<compile_context>
chip_gen: v6e
topology: v6e:2x2x1
jax: 0.10.0
libtpu: 0.0.40
codegen_flags: <defaults>
</compile_context>

<pallas_src>
import math
import functools

import jax
import jax.numpy as jnp
from jax import lax
from jax.experimental import pallas as pl
from jax.experimental.pallas import tpu as pltpu

_GELU_C = math.sqrt(2.0 / math.pi)


# ----------------------------- Pallas kernel ---------------------------------

def _ln(x, g, b):
    mu = jnp.mean(x, axis=-1, keepdims=True)
    xc = x - mu
    var = jnp.mean(xc * xc, axis=-1, keepdims=True)
    return xc * lax.rsqrt(var + 1e-5) * g + b


def _gpt2_stack_kernel(x_ref, wpe_ref, mask_ref, ln1g_ref, ln1b_ref, wqkv_ref,
                       bqkv_ref, wo_ref, bo_ref, ln2g_ref, ln2b_ref, wfc_ref,
                       bfc_ref, wproj_ref, bproj_ref, lnfg_ref, lnfb_ref,
                       o_ref, h_ref, *, n_head):
    """One grid step == one transformer block; hidden state resident in VMEM."""
    layer = pl.program_id(0)
    last_layer = pl.num_programs(0) - 1
    n, t, d = x_ref.shape
    dh = d // n_head
    bf16 = jnp.bfloat16

    @pl.when(layer == 0)
    def _():
        h_ref[...] = x_ref[...] + wpe_ref[...]        # wpe broadcasts over batch

    h2 = h_ref[...].reshape(n * t, d)                 # (rows, D) f32

    # ---- attention sub-block (all heads batched along the leading axis) ------
    a = _ln(h2, ln1g_ref[0], ln1b_ref[0])
    qkv = (jnp.dot(a.astype(bf16), wqkv_ref[0],
                   preferred_element_type=jnp.float32) + bqkv_ref[0])
    qkv3 = qkv.astype(bf16).reshape(n, t, 3 * d)

    # static, lane-aligned 128-wide head slices; concat along the cheap major axis
    q = jnp.concatenate([qkv3[:, :, hh * dh:(hh + 1) * dh]
                         for hh in range(n_head)], axis=0)             # (H*N,T,dh)
    k = jnp.concatenate([qkv3[:, :, d + hh * dh:d + (hh + 1) * dh]
                         for hh in range(n_head)], axis=0)
    v = jnp.concatenate([qkv3[:, :, 2 * d + hh * dh:2 * d + (hh + 1) * dh]
                         for hh in range(n_head)], axis=0)

    s = jnp.einsum('bqd,bkd->bqk', q, k,
                   preferred_element_type=jnp.float32) * (1.0 / math.sqrt(dh))
    s = s + mask_ref[...][None, :, :]                 # hoisted additive causal mask
    s = s - jnp.max(s, axis=-1, keepdims=True)        # ONE softmax for all heads
    p = jnp.exp(s)                                    # kept in f32 (v5e-safe)
    p = p * pl.reciprocal(jnp.sum(p, axis=-1, keepdims=True), approx=True)
    ctx = jnp.einsum('bqk,bkd->bqd', p.astype(bf16), v,
                     preferred_element_type=jnp.float32)               # (H*N,T,dh)
    attn = jnp.concatenate([ctx[hh * n:(hh + 1) * n]
                            for hh in range(n_head)], axis=-1)         # (N,T,D)
    attn = (jnp.dot(attn.reshape(n * t, d).astype(bf16), wo_ref[0],
                    preferred_element_type=jnp.float32) + bo_ref[0])
    h2 = h2 + attn

    # ---- MLP sub-block (gelu_new, f32 elementwise) ---------------------------
    m = _ln(h2, ln2g_ref[0], ln2b_ref[0])
    hmid = (jnp.dot(m.astype(bf16), wfc_ref[0],
                    preferred_element_type=jnp.float32) + bfc_ref[0])
    hmid = 0.5 * hmid * (1.0 + jnp.tanh(_GELU_C * (hmid + 0.044715 * hmid * hmid * hmid)))
    h2 = h2 + (jnp.dot(hmid.astype(bf16), wproj_ref[0],
                       preferred_element_type=jnp.float32) + bproj_ref[0])

    @pl.when(layer < last_layer)                      # last-layer h_ref write is dead
    def _():
        h_ref[...] = h2.reshape(n, t, d)

    @pl.when(layer == last_layer)                     # the ONLY o_ref write
    def _():
        o_ref[...] = _ln(h2, lnfg_ref[...], lnfb_ref[...]).reshape(n, t, d)


def gpt2_forward(g, inputs_embeds, n_head):
    n, t, d = inputs_embeds.shape
    n_layer = g['w_qkv'].shape[0]
    dff = g['w_fc'].shape[2]
    wpe_t = g['wpe'][:t]

    # additive causal mask, computed once outside the grid body
    row = jnp.arange(t)[:, None]
    col = jnp.arange(t)[None, :]
    mask = jnp.where(col <= row, 0.0, -1e9).astype(jnp.float32)

    per_layer = lambda l: (l, 0, 0)
    const3 = lambda l: (0, 0, 0)
    const2 = lambda l: (0, 0)

    kernel = functools.partial(_gpt2_stack_kernel, n_head=n_head)
    # NOTE: at d_model=384 the double-buffered per-layer weights are ~7 MB —
    # well inside the default scoped-VMEM limit on all generations.  If the
    # model is scaled to GPT-2-small sizes, set vmem_limit_bytes explicitly and
    # consider pl.Buffered(3) on w_fc/w_proj (exposed weight DMA).
    return pl.pallas_call(
        kernel,
        out_shape=jax.ShapeDtypeStruct((n, t, d), jnp.float32),
        grid=(n_layer,),
        in_specs=[
            pl.BlockSpec((n, t, d), const3),            # inputs_embeds
            pl.BlockSpec((t, d), const2),               # wpe[:t]
            pl.BlockSpec((t, t), const2),               # additive causal mask
            pl.BlockSpec((1, 1, d), per_layer),         # ln1_g
            pl.BlockSpec((1, 1, d), per_layer),         # ln1_b
            pl.BlockSpec((1, d, 3 * d), per_layer),     # w_qkv (bf16)
            pl.BlockSpec((1, 1, 3 * d), per_layer),     # b_qkv
            pl.BlockSpec((1, d, d), per_layer),         # w_o (bf16)
            pl.BlockSpec((1, 1, d), per_layer),         # b_o
            pl.BlockSpec((1, 1, d), per_layer),         # ln2_g
            pl.BlockSpec((1, 1, d), per_layer),         # ln2_b
            pl.BlockSpec((1, d, dff), per_layer),       # w_fc (bf16)
            pl.BlockSpec((1, 1, dff), per_layer),       # b_fc
            pl.BlockSpec((1, dff, d), per_layer),       # w_proj (bf16)
            pl.BlockSpec((1, 1, d), per_layer),         # b_proj
            pl.BlockSpec((1, d), const2),               # lnf_g
            pl.BlockSpec((1, d), const2),               # lnf_b
        ],
        out_specs=pl.BlockSpec((n, t, d), const3),
        scratch_shapes=[pltpu.VMEM((n, t, d), jnp.float32)],
        compiler_params=pltpu.CompilerParams(dimension_semantics=("arbitrary",)),
    )(inputs_embeds.astype(jnp.float32), wpe_t, mask,
      g['ln1_g'], g['ln1_b'], g['w_qkv'], g['b_qkv'], g['w_o'], g['b_o'],
      g['ln2_g'], g['ln2_b'], g['w_fc'], g['b_fc'], g['w_proj'], g['b_proj'],
      g['lnf_g'], g['lnf_b'])


# ------------------------------- JAX glue ------------------------------------

def stl_decompose(x, trend_len, seasonal_len):
    """x: (N, L). Faithful JAX re-implementation of the pandas decomposition:
    centered rolling-mean trend with bfill/ffill edges, modulo-group seasonal,
    residual = x - trend - seasonal."""
    # TODO(synk): original uses pandas rolling/groupby on CPU; reimplemented in JAX glue.
    n, l = x.shape
    w = trend_len
    off = (w - 1) // 2
    idx = jnp.arange(l)
    first_valid = w - 1 - off
    last_valid = l - 1 - off
    ic = jnp.clip(idx, first_valid, last_valid)        # bfill/ffill of NaN edges
    cs = jnp.concatenate([jnp.zeros((n, 1), x.dtype), jnp.cumsum(x, axis=1)], axis=1)
    end = ic + 1 + off
    start = end - w
    trend = (cs[:, end] - cs[:, start]) / w
    detr = x - trend
    s = seasonal_len
    g = idx % s
    onehot = (g[None, :] == jnp.arange(s)[:, None]).astype(x.dtype)   # (S, L)
    counts = jnp.sum(onehot, axis=1)
    gmean = (detr @ onehot.T) / counts[None, :]
    seasonal = gmean[:, g]
    resid = x - trend - seasonal
    return trend, seasonal, resid


def patchify(x, patch_size, stride):
    """x: (N, L) -> (N, patch_num, patch_size). ReplicationPad1d((0, stride)) + unfold."""
    xp = jnp.concatenate([x, jnp.tile(x[:, -1:], (1, stride))], axis=1)
    lpad = xp.shape[1]
    num = (lpad - patch_size) // stride + 1
    gather_idx = jnp.arange(num)[:, None] * stride + jnp.arange(patch_size)[None, :]
    return xp[:, gather_idx]


def l2_normalize(x, axis, eps=1e-12):
    sq = jnp.sum(x * x, axis=axis, keepdims=True)
    return x * lax.rsqrt(jnp.maximum(sq, eps))


def prada_forward(params, cfg, x_enc, x_mark_enc=None, x_dec=None, x_mark_dec=None, mask=None):
    b, l, m = x_enc.shape
    d = cfg['d_model']
    pred_len = cfg['pred_len']
    top_k = cfg['prompt_length']

    # 1. instance normalization over time (tiny -> plain XLA, fused by compiler)
    x_enc = x_enc.astype(jnp.float32)
    means = jnp.mean(x_enc, axis=1, keepdims=True)
    xc = x_enc - means
    stdev = jnp.sqrt(jnp.mean(xc * xc, axis=1, keepdims=True) + 1e-5)
    x = (xc / stdev).transpose(0, 2, 1).reshape(b * m, l)          # 'b l m -> (b m) l'

    # 2. trend / seasonal / residual decomposition
    trend, seasonal, resid = stl_decompose(x, cfg['trend_length'], cfg['seasonal_length'])

    # 3. padding + unfold into patches.  The 3-way patch embedding and the
    #    prompt-key similarity are <1 MFLOP each: left to plain XLA (launching
    #    a pallas_call here is pure overhead).
    x_t = patchify(trend, cfg['patch_size'], cfg['stride'])
    x_s = patchify(seasonal, cfg['patch_size'], cfg['stride'])
    x_r = patchify(resid, cfg['patch_size'], cfg['stride'])
    n = b * m
    pn = x_t.shape[1]
    x3 = jnp.stack([x_t, x_s, x_r], axis=0).reshape(3, n * pn, cfg['patch_size'])
    emb3 = (jnp.einsum('cnp,cpd->cnd', x3, params['in_w'])
            + params['in_b']).reshape(3, n, pn, d)

    # prompt pool (length=1, embedding_key='mean')
    xnorm3 = l2_normalize(jnp.mean(emb3, axis=2), axis=-1)          # (3, N, D)
    keynorm3 = l2_normalize(params['prompt_key'], axis=-1)          # (3, pool, D)
    sims = jnp.einsum('cnd,cpd->cnp', xnorm3, keynorm3)             # (3, N, pool)

    prompted_sum = None
    sim_loss = 0.0
    batched_prompts = []
    for c in range(3):
        _, idx = lax.top_k(sims[c], top_k)                          # (N, top_k)
        bp = params['prompt'][c][idx].reshape(n, top_k, d)          # length == 1
        bk = keynorm3[c][idx]                                       # (N, top_k, D)
        sim_loss = sim_loss + jnp.sum(bk * xnorm3[c][:, None, :]) / n
        prompted = jnp.concatenate([bp, emb3[c]], axis=1)           # (N, top_k+pn, D)
        prompted_sum = prompted if prompted_sum is None else prompted_sum + prompted
        batched_prompts.append(bp)

    # 4. GPT-2-style backbone: ONE fused Pallas kernel over all layers
    last = gpt2_forward(params['gpt2'], prompted_sum, cfg['n_head'])   # (N, T, D)
    t_total = last.shape[1]

    # 5. output projection + recombination (contiguous reshape matches PyTorch).
    #    ~0.2 MFLOP -> plain XLA, fused with the denorm / sum-over-components.
    flat = last.reshape(b * m * 3, t_total * d // 3)
    out = flat @ params['out_w'] + params['out_b']                     # (B*M*3, pred)
    out = out.reshape(b, m, 3, pred_len).sum(axis=2)                   # sum over c
    out = out.transpose(0, 2, 1)                                       # 'b m l -> b l m'
    out = out * stdev[:, :, :m] + means[:, :, :m]

    def ortho(x1, x2, x3_):
        f = lambda z: z.reshape(z.shape[0], -1)
        x1, x2, x3_ = f(x1), f(x2), f(x3_)
        ip12 = jnp.sum(x1 * x2, axis=1)
        ip13 = jnp.sum(x1 * x3_, axis=1)
        ip23 = jnp.sum(x2 * x3_, axis=1)
        return jnp.mean(ip12 ** 2 + ip13 ** 2 + ip23 ** 2)

    res = {'simlarity_loss': sim_loss,
           'orthogonal_loss': ortho(*batched_prompts)}
    return out[:, -pred_len:, :], res


# ------------------------------ parameters -----------------------------------

def init_params(key, cfg):
    d = cfg['d_model']
    p = cfg['patch_size']
    n_layer = cfg['n_layer']
    dff = 4 * d
    keys = iter(jax.random.split(key, 64))
    nrm = lambda shape, s=0.02: s * jax.random.normal(next(keys), shape, jnp.float32)
    uni = lambda shape: jax.random.uniform(next(keys), shape, jnp.float32, -1.0, 1.0)
    bf16 = jnp.bfloat16

    params = {}
    params['in_w'] = nrm((3, p, d))                          # tiny, XLA side: f32
    params['in_b'] = jnp.zeros((3, 1, d), jnp.float32)
    params['prompt'] = uni((3, cfg['pool_size'], 1, d))      # prompt_init='uniform'
    params['prompt_key'] = uni((3, cfg['pool_size'], d))     # prompt_key_init

    patch_num = (cfg['seq_len'] - p) // cfg['stride'] + 2
    out_in = d // 3 * (patch_num + cfg['prompt_length'])
    params['out_w'] = nrm((out_in, cfg['pred_len']))
    params['out_b'] = jnp.zeros((cfg['pred_len'],), jnp.float32)

    g = dict(
        wpe=nrm((cfg['n_positions'], d)),
        ln1_g=jnp.ones((n_layer, 1, d), jnp.float32),
        ln1_b=jnp.zeros((n_layer, 1, d), jnp.float32),
        w_qkv=nrm((n_layer, d, 3 * d)).astype(bf16),
        b_qkv=jnp.zeros((n_layer, 1, 3 * d), jnp.float32),
        w_o=nrm((n_layer, d, d)).astype(bf16),
        b_o=jnp.zeros((n_layer, 1, d), jnp.float32),
        ln2_g=jnp.ones((n_layer, 1, d), jnp.float32),
        ln2_b=jnp.zeros((n_layer, 1, d), jnp.float32),
        w_fc=nrm((n_layer, d, dff)).astype(bf16),
        b_fc=jnp.zeros((n_layer, 1, dff), jnp.float32),
        w_proj=nrm((n_layer, dff, d)).astype(bf16),
        b_proj=jnp.zeros((n_layer, 1, d), jnp.float32),
        lnf_g=jnp.ones((1, d), jnp.float32),
        lnf_b=jnp.zeros((1, d), jnp.float32))
    params['gpt2'] = g
    return params


if __name__ == "__main__":
    # d_model=384 (=3*128) keeps lane dims 128-aligned and divisible by 3;
    # n_head=3 gives dh=128 (lane-aligned head slices).
    cfg = dict(seq_len=32, pred_len=8, patch_size=8, stride=8,
               d_model=384, n_head=3, n_layer=2, n_positions=64,
               pool_size=8, prompt_length=3,
               trend_length=5, seasonal_length=4)

    key = jax.random.PRNGKey(0)
    kx, kme, kd, kmd = jax.random.split(key, 4)
    B, M = 2, 4
    x_enc = jax.random.normal(kx, (B, cfg['seq_len'], M), jnp.float32)
    x_mark_enc = jax.random.normal(kme, (B, cfg['seq_len'], 4), jnp.float32)   # unused
    x_dec = jax.random.normal(kd, (B, cfg['pred_len'], M), jnp.float32)        # unused
    x_mark_dec = jax.random.normal(kmd, (B, cfg['pred_len'], 4), jnp.float32)  # unused

    params = init_params(jax.random.PRNGKey(42), cfg)

    fwd = jax.jit(lambda p, xe, xme, xd, xmd: prada_forward(p, cfg, xe, xme, xd, xmd))
    dec_out, res = fwd(params, x_enc, x_mark_enc, x_dec, x_mark_dec)
    jax.block_until_ready(dec_out)
    jax.block_until_ready(res['simlarity_loss'])
    jax.block_until_ready(res['orthogonal_loss'])

    assert dec_out.shape == (B, cfg['pred_len'], M), dec_out.shape
    assert jnp.all(jnp.isfinite(dec_out))
    print("KERNEL_OK")
</pallas_src>

<mosaic_0001>
module attributes {stable_mosaic.version = 11 : i64} {
  func.func @_gpt2_stack_kernel(%arg0: i32, %arg1: memref<8x8x384xf32, #tpu.memory_space<vmem>>, %arg2: memref<8x384xf32, #tpu.memory_space<vmem>>, %arg3: memref<8x8xf32, #tpu.memory_space<vmem>>, %arg4: memref<1x1x384xf32, #tpu.memory_space<vmem>>, %arg5: memref<1x1x384xf32, #tpu.memory_space<vmem>>, %arg6: memref<1x384x1152xbf16, #tpu.memory_space<vmem>>, %arg7: memref<1x1x1152xf32, #tpu.memory_space<vmem>>, %arg8: memref<1x384x384xbf16, #tpu.memory_space<vmem>>, %arg9: memref<1x1x384xf32, #tpu.memory_space<vmem>>, %arg10: memref<1x1x384xf32, #tpu.memory_space<vmem>>, %arg11: memref<1x1x384xf32, #tpu.memory_space<vmem>>, %arg12: memref<1x384x1536xbf16, #tpu.memory_space<vmem>>, %arg13: memref<1x1x1536xf32, #tpu.memory_space<vmem>>, %arg14: memref<1x1536x384xbf16, #tpu.memory_space<vmem>>, %arg15: memref<1x1x384xf32, #tpu.memory_space<vmem>>, %arg16: memref<1x384xf32, #tpu.memory_space<vmem>>, %arg17: memref<1x384xf32, #tpu.memory_space<vmem>>, %arg18: memref<8x8x384xf32, #tpu.memory_space<vmem>>, %arg19: memref<8x8x384xf32, #tpu.memory_space<vmem>>) attributes {dimension_semantics = [#tpu.dimension_semantics<arbitrary>], iteration_bounds = array<i64: 2>, scalar_prefetch = 0 : i64, scratch_operands = 1 : i64, tpu.core_type = #tpu.core_type<tc>, window_params = [{pipeline_mode = #tpu.pipeline_mode<synchronous>, transform_indices = @transform_0, window_bounds = array<i64: 8, 8, 384>}, {pipeline_mode = #tpu.pipeline_mode<synchronous>, transform_indices = @transform_1, window_bounds = array<i64: 8, 384>}, {pipeline_mode = #tpu.pipeline_mode<synchronous>, transform_indices = @transform_2, window_bounds = array<i64: 8, 8>}, {transform_indices = @transform_3, window_bounds = array<i64: 1, 1, 384>}, {transform_indices = @transform_4, window_bounds = array<i64: 1, 1, 384>}, {transform_indices = @transform_5, window_bounds = array<i64: 1, 384, 1152>}, {transform_indices = @transform_6, window_bounds = array<i64: 1, 1, 1152>}, {transform_indices = @transform_7, window_bounds = array<i64: 1, 384, 384>}, {transform_indices = @transform_8, window_bounds = array<i64: 1, 1, 384>}, {transform_indices = @transform_9, window_bounds = array<i64: 1, 1, 384>}, {transform_indices = @transform_10, window_bounds = array<i64: 1, 1, 384>}, {transform_indices = @transform_11, window_bounds = array<i64: 1, 384, 1536>}, {transform_indices = @transform_12, window_bounds = array<i64: 1, 1, 1536>}, {transform_indices = @transform_13, window_bounds = array<i64: 1, 1536, 384>}, {transform_indices = @transform_14, window_bounds = array<i64: 1, 1, 384>}, {pipeline_mode = #tpu.pipeline_mode<synchronous>, transform_indices = @transform_15, window_bounds = array<i64: 1, 384>}, {pipeline_mode = #tpu.pipeline_mode<synchronous>, transform_indices = @transform_16, window_bounds = array<i64: 1, 384>}, {pipeline_mode = #tpu.pipeline_mode<synchronous>, transform_indices = @transform_17, window_bounds = array<i64: 8, 8, 384>}]} {
    %c0_i32 = arith.constant 0 : i32
    %0 = arith.cmpi eq, %arg0, %c0_i32 : i32
    %1 = arith.extui %0 : i1 to i32
    %c0_i32_0 = arith.constant 0 : i32
    %2 = arith.cmpi ne, %1, %c0_i32_0 : i32
    scf.if %2 {
      %c0_66 = arith.constant 0 : index
      %c0_67 = arith.constant 0 : index
      %c0_68 = arith.constant 0 : index
      %144 = vector.load %arg1[%c0_66, %c0_67, %c0_68] : memref<8x8x384xf32, #tpu.memory_space<vmem>>, vector<8x8x384xf32>
      %c0_69 = arith.constant 0 : index
      %c0_70 = arith.constant 0 : index
      %145 = vector.load %arg2[%c0_69, %c0_70] : memref<8x384xf32, #tpu.memory_space<vmem>>, vector<8x384xf32>
      %146 = vector.shape_cast %145 : vector<8x384xf32> to vector<1x8x384xf32>
      %147 = vector.broadcast %146 : vector<1x8x384xf32> to vector<8x8x384xf32>
      %148 = arith.addf %144, %147 : vector<8x8x384xf32>
      %c0_71 = arith.constant 0 : index
      %c0_72 = arith.constant 0 : index
      %c0_73 = arith.constant 0 : index
      %149 = vector.load %arg19[%c0_71, %c0_72, %c0_73] : memref<8x8x384xf32, #tpu.memory_space<vmem>>, vector<8x8x384xf32>
      tpu.vector_store %arg19[%c0_71, %c0_72, %c0_73], %148 {strides = array<i32>} : memref<8x8x384xf32, #tpu.memory_space<vmem>>, vector<8x8x384xf32>,
    } else {
    }
    %c0 = arith.constant 0 : index
    %c0_1 = arith.constant 0 : index
    %c0_2 = arith.constant 0 : index
    %3 = vector.load %arg19[%c0, %c0_1, %c0_2] : memref<8x8x384xf32, #tpu.memory_space<vmem>>, vector<8x8x384xf32>
    %4 = vector.shape_cast %3 : vector<8x8x384xf32> to vector<64x384xf32>
    %c0_3 = arith.constant 0 : index
    %c0_4 = arith.constant 0 : index
    %c0_5 = arith.constant 0 : index
    %5 = vector.load %arg4[%c0_3, %c0_4, %c0_5] : memref<1x1x384xf32, #tpu.memory_space<vmem>>, vector<1x1x384xf32>
    %6 = vector.shape_cast %5 : vector<1x1x384xf32> to vector<1x384xf32>
    %c0_6 = arith.constant 0 : index
    %c0_7 = arith.constant 0 : index
    %c0_8 = arith.constant 0 : index
    %7 = vector.load %arg5[%c0_6, %c0_7, %c0_8] : memref<1x1x384xf32, #tpu.memory_space<vmem>>, vector<1x1x384xf32>
    %8 = vector.shape_cast %7 : vector<1x1x384xf32> to vector<1x384xf32>
    %cst = arith.constant dense<0.000000e+00> : vector<64xf32>
    %9 = vector.multi_reduction <add>, %4, %cst [1] : vector<64x384xf32> to vector<64xf32>
    %10 = vector.shape_cast %9 : vector<64xf32> to vector<64x1xf32>
    %cst_9 = arith.constant 3.840000e+02 : f32
    %11 = vector.broadcast %cst_9 : f32 to vector<64x1xf32>
    %12 = arith.divf %10, %11 : vector<64x1xf32>
    %13 = vector.broadcast %12 : vector<64x1xf32> to vector<64x384xf32>
    %14 = arith.subf %4, %13 : vector<64x384xf32>
    %15 = arith.mulf %14, %14 : vector<64x384xf32>
    %cst_10 = arith.constant dense<0.000000e+00> : vector<64xf32>
    %16 = vector.multi_reduction <add>, %15, %cst_10 [1] : vector<64x384xf32> to vector<64xf32>
    %17 = vector.shape_cast %16 : vector<64xf32> to vector<64x1xf32>
    %cst_11 = arith.constant 3.840000e+02 : f32
    %18 = vector.broadcast %cst_11 : f32 to vector<64x1xf32>
    %19 = arith.divf %17, %18 : vector<64x1xf32>
    %cst_12 = arith.constant 9.99999974E-6 : f32
    %20 = vector.broadcast %cst_12 : f32 to vector<64x1xf32>
    %21 = arith.addf %19, %20 : vector<64x1xf32>
    %22 = math.rsqrt %21 : vector<64x1xf32>
    %23 = vector.broadcast %22 : vector<64x1xf32> to vector<64x384xf32>
    %24 = arith.mulf %14, %23 : vector<64x384xf32>
    %25 = vector.broadcast %6 : vector<1x384xf32> to vector<64x384xf32>
    %26 = arith.mulf %24, %25 : vector<64x384xf32>
    %27 = vector.broadcast %8 : vector<1x384xf32> to vector<64x384xf32>
    %28 = arith.addf %26, %27 : vector<64x384xf32>
    %29 = arith.truncf %28 : vector<64x384xf32> to vector<64x384xbf16>
    %c0_13 = arith.constant 0 : index
    %c0_14 = arith.constant 0 : index
    %c0_15 = arith.constant 0 : index
    %30 = vector.load %arg6[%c0_13, %c0_14, %c0_15] : memref<1x384x1152xbf16, #tpu.memory_space<vmem>>, vector<1x384x1152xbf16>
    %31 = vector.shape_cast %30 : vector<1x384x1152xbf16> to vector<384x1152xbf16>
    %cst_16 = arith.constant dense<0.000000e+00> : vector<64x1152xf32>
    %32 = tpu.matmul %29, %31, %cst_16 {dimension_numbers = #tpu.dot_dimension_numbers<[1], [0], [0], [1], [0, 0, 1, 1], [], []>} : vector<64x384xbf16>, vector<384x1152xbf16>, vector<64x1152xf32> -> vector<64x1152xf32>
    %c0_17 = arith.constant 0 : index
    %c0_18 = arith.constant 0 : index
    %c0_19 = arith.constant 0 : index
    %33 = vector.load %arg7[%c0_17, %c0_18, %c0_19] : memref<1x1x1152xf32, #tpu.memory_space<vmem>>, vector<1x1x1152xf32>
    %34 = vector.shape_cast %33 : vector<1x1x1152xf32> to vector<1x1152xf32>
    %35 = vector.broadcast %34 : vector<1x1152xf32> to vector<64x1152xf32>
    %36 = arith.addf %32, %35 : vector<64x1152xf32>
    %37 = arith.truncf %36 : vector<64x1152xf32> to vector<64x1152xbf16>
    %38 = vector.shape_cast %37 : vector<64x1152xbf16> to vector<8x8x1152xbf16>
    %39 = vector.extract_strided_slice %38 {offsets = [0, 0, 0], sizes = [8, 8, 128], strides = [1, 1, 1]} : vector<8x8x1152xbf16> to vector<8x8x128xbf16>
    %40 = vector.extract_strided_slice %38 {offsets = [0, 0, 128], sizes = [8, 8, 128], strides = [1, 1, 1]} : vector<8x8x1152xbf16> to vector<8x8x128xbf16>
    %41 = vector.extract_strided_slice %38 {offsets = [0, 0, 256], sizes = [8, 8, 128], strides = [1, 1, 1]} : vector<8x8x1152xbf16> to vector<8x8x128xbf16>
    %42 = tpu.concatenate %39, %40, %41 in 0 : vector<8x8x128xbf16>, vector<8x8x128xbf16>, vector<8x8x128xbf16> -> vector<24x8x128xbf16>
    %43 = vector.extract_strided_slice %38 {offsets = [0, 0, 384], sizes = [8, 8, 128], strides = [1, 1, 1]} : vector<8x8x1152xbf16> to vector<8x8x128xbf16>
    %44 = vector.extract_strided_slice %38 {offsets = [0, 0, 512], sizes = [8, 8, 128], strides = [1, 1, 1]} : vector<8x8x1152xbf16> to vector<8x8x128xbf16>
    %45 = vector.extract_strided_slice %38 {offsets = [0, 0, 640], sizes = [8, 8, 128], strides = [1, 1, 1]} : vector<8x8x1152xbf16> to vector<8x8x128xbf16>
    %46 = tpu.concatenate %43, %44, %45 in 0 : vector<8x8x128xbf16>, vector<8x8x128xbf16>, vector<8x8x128xbf16> -> vector<24x8x128xbf16>
    %47 = vector.extract_strided_slice %38 {offsets = [0, 0, 768], sizes = [8, 8, 128], strides = [1, 1, 1]} : vector<8x8x1152xbf16> to vector<8x8x128xbf16>
    %48 = vector.extract_strided_slice %38 {offsets = [0, 0, 896], sizes = [8, 8, 128], strides = [1, 1, 1]} : vector<8x8x1152xbf16> to vector<8x8x128xbf16>
    %49 = vector.extract_strided_slice %38 {offsets = [0, 0, 1024], sizes = [8, 8, 128], strides = [1, 1, 1]} : vector<8x8x1152xbf16> to vector<8x8x128xbf16>
    %50 = tpu.concatenate %47, %48, %49 in 0 : vector<8x8x128xbf16>, vector<8x8x128xbf16>, vector<8x8x128xbf16> -> vector<24x8x128xbf16>
    "tpu.trace_start"() <{level = 10 : i32, message = "bqd,bkd->bqk"}> : () -> ()
    %cst_20 = arith.constant dense<0.000000e+00> : vector<24x8x8xf32>
    %51 = tpu.matmul %42, %46, %cst_20 {dimension_numbers = #tpu.dot_dimension_numbers<[2], [2], [1], [1], [0, 0, 0, 1, 1, 1], [0], [0]>} : vector<24x8x128xbf16>, vector<24x8x128xbf16>, vector<24x8x8xf32> -> vector<24x8x8xf32>
    "tpu.trace_stop"() : () -> ()
    %cst_21 = arith.constant 0.0883883461 : f32
    %52 = vector.broadcast %cst_21 : f32 to vector<24x8x8xf32>
    %53 = arith.mulf %51, %52 : vector<24x8x8xf32>
    %c0_22 = arith.constant 0 : index
    %c0_23 = arith.constant 0 : index
    %54 = vector.load %arg3[%c0_22, %c0_23] : memref<8x8xf32, #tpu.memory_space<vmem>>, vector<8x8xf32>
    %55 = vector.shape_cast %54 : vector<8x8xf32> to vector<1x8x8xf32>
    %56 = vector.broadcast %55 : vector<1x8x8xf32> to vector<24x8x8xf32>
    %57 = arith.addf %53, %56 : vector<24x8x8xf32>
    %cst_24 = arith.constant dense<0xFF800000> : vector<24x8xf32>
    %58 = vector.multi_reduction <maximumf>, %57, %cst_24 [2] : vector<24x8x8xf32> to vector<24x8xf32>
    %59 = vector.shape_cast %58 : vector<24x8xf32> to vector<24x8x1xf32>
    %60 = vector.broadcast %59 : vector<24x8x1xf32> to vector<24x8x8xf32>
    %61 = arith.subf %57, %60 : vector<24x8x8xf32>
    %62 = math.exp %61 : vector<24x8x8xf32>
    %cst_25 = arith.constant dense<0.000000e+00> : vector<24x8xf32>
    %63 = vector.multi_reduction <add>, %62, %cst_25 [2] : vector<24x8x8xf32> to vector<24x8xf32>
    %64 = vector.shape_cast %63 : vector<24x8xf32> to vector<24x8x1xf32>
    %65 = tpu.reciprocal %64 {approx = true} : vector<24x8x1xf32> -> vector<24x8x1xf32>
    %66 = vector.broadcast %65 : vector<24x8x1xf32> to vector<24x8x8xf32>
    %67 = arith.mulf %62, %66 : vector<24x8x8xf32>
    %68 = arith.truncf %67 : vector<24x8x8xf32> to vector<24x8x8xbf16>
    "tpu.trace_start"() <{level = 10 : i32, message = "bqk,bkd->bqd"}> : () -> ()
    %cst_26 = arith.constant dense<0.000000e+00> : vector<24x8x128xf32>
    %69 = tpu.matmul %68, %50, %cst_26 {dimension_numbers = #tpu.dot_dimension_numbers<[2], [1], [1], [2], [0, 0, 0, 1, 1, 2], [0], [0]>} : vector<24x8x8xbf16>, vector<24x8x128xbf16>, vector<24x8x128xf32> -> vector<24x8x128xf32>
    "tpu.trace_stop"() : () -> ()
    %70 = vector.extract_strided_slice %69 {offsets = [0, 0, 0], sizes = [8, 8, 128], strides = [1, 1, 1]} : vector<24x8x128xf32> to vector<8x8x128xf32>
    %71 = vector.extract_strided_slice %69 {offsets = [8, 0, 0], sizes = [8, 8, 128], strides = [1, 1, 1]} : vector<24x8x128xf32> to vector<8x8x128xf32>
    %72 = vector.extract_strided_slice %69 {offsets = [16, 0, 0], sizes = [8, 8, 128], strides = [1, 1, 1]} : vector<24x8x128xf32> to vector<8x8x128xf32>
    %73 = tpu.concatenate %70, %71, %72 in 2 : vector<8x8x128xf32>, vector<8x8x128xf32>, vector<8x8x128xf32> -> vector<8x8x384xf32>
    %74 = vector.shape_cast %73 : vector<8x8x384xf32> to vector<64x384xf32>
    %75 = arith.truncf %74 : vector<64x384xf32> to vector<64x384xbf16>
    %c0_27 = arith.constant 0 : index
    %c0_28 = arith.constant 0 : index
    %c0_29 = arith.constant 0 : index
    %76 = vector.load %arg8[%c0_27, %c0_28, %c0_29] : memref<1x384x384xbf16, #tpu.memory_space<vmem>>, vector<1x384x384xbf16>
    %77 = vector.shape_cast %76 : vector<1x384x384xbf16> to vector<384x384xbf16>
    %cst_30 = arith.constant dense<0.000000e+00> : vector<64x384xf32>
    %78 = tpu.matmul %75, %77, %cst_30 {dimension_numbers = #tpu.dot_dimension_numbers<[1], [0], [0], [1], [0, 0, 1, 1], [], []>} : vector<64x384xbf16>, vector<384x384xbf16>, vector<64x384xf32> -> vector<64x384xf32>
    %c0_31 = arith.constant 0 : index
    %c0_32 = arith.constant 0 : index
    %c0_33 = arith.constant 0 : index
    %79 = vector.load %arg9[%c0_31, %c0_32, %c0_33] : memref<1x1x384xf32, #tpu.memory_space<vmem>>, vector<1x1x384xf32>
    %80 = vector.shape_cast %79 : vector<1x1x384xf32> to vector<1x384xf32>
    %81 = vector.broadcast %80 : vector<1x384xf32> to vector<64x384xf32>
    %82 = arith.addf %78, %81 : vector<64x384xf32>
    %83 = arith.addf %4, %82 : vector<64x384xf32>
    %c0_34 = arith.constant 0 : index
    %c0_35 = arith.constant 0 : index
    %c0_36 = arith.constant 0 : index
    %84 = vector.load %arg10[%c0_34, %c0_35, %c0_36] : memref<1x1x384xf32, #tpu.memory_space<vmem>>, vector<1x1x384xf32>
    %85 = vector.shape_cast %84 : vector<1x1x384xf32> to vector<1x384xf32>
    %c0_37 = arith.constant 0 : index
    %c0_38 = arith.constant 0 : index
    %c0_39 = arith.constant 0 : index
    %86 = vector.load %arg11[%c0_37, %c0_38, %c0_39] : memref<1x1x384xf32, #tpu.memory_space<vmem>>, vector<1x1x384xf32>
    %87 = vector.shape_cast %86 : vector<1x1x384xf32> to vector<1x384xf32>
    %cst_40 = arith.constant dense<0.000000e+00> : vector<64xf32>
    %88 = vector.multi_reduction <add>, %83, %cst_40 [1] : vector<64x384xf32> to vector<64xf32>
    %89 = vector.shape_cast %88 : vector<64xf32> to vector<64x1xf32>
    %cst_41 = arith.constant 3.840000e+02 : f32
    %90 = vector.broadcast %cst_41 : f32 to vector<64x1xf32>
    %91 = arith.divf %89, %90 : vector<64x1xf32>
    %92 = vector.broadcast %91 : vector<64x1xf32> to vector<64x384xf32>
    %93 = arith.subf %83, %92 : vector<64x384xf32>
    %94 = arith.mulf %93, %93 : vector<64x384xf32>
    %cst_42 = arith.constant dense<0.000000e+00> : vector<64xf32>
    %95 = vector.multi_reduction <add>, %94, %cst_42 [1] : vector<64x384xf32> to vector<64xf32>
    %96 = vector.shape_cast %95 : vector<64xf32> to vector<64x1xf32>
    %cst_43 = arith.constant 3.840000e+02 : f32
    %97 = vector.broadcast %cst_43 : f32 to vector<64x1xf32>
    %98 = arith.divf %96, %97 : vector<64x1xf32>
    %cst_44 = arith.constant 9.99999974E-6 : f32
    %99 = vector.broadcast %cst_44 : f32 to vector<64x1xf32>
    %100 = arith.addf %98, %99 : vector<64x1xf32>
    %101 = math.rsqrt %100 : vector<64x1xf32>
    %102 = vector.broadcast %101 : vector<64x1xf32> to vector<64x384xf32>
    %103 = arith.mulf %93, %102 : vector<64x384xf32>
    %104 = vector.broadcast %85 : vector<1x384xf32> to vector<64x384xf32>
    %105 = arith.mulf %103, %104 : vector<64x384xf32>
    %106 = vector.broadcast %87 : vector<1x384xf32> to vector<64x384xf32>
    %107 = arith.addf %105, %106 : vector<64x384xf32>
    %108 = arith.truncf %107 : vector<64x384xf32> to vector<64x384xbf16>
    %c0_45 = arith.constant 0 : index
    %c0_46 = arith.constant 0 : index
    %c0_47 = arith.constant 0 : index
    %109 = vector.load %arg12[%c0_45, %c0_46, %c0_47] : memref<1x384x1536xbf16, #tpu.memory_space<vmem>>, vector<1x384x1536xbf16>
    %110 = vector.shape_cast %109 : vector<1x384x1536xbf16> to vector<384x1536xbf16>
    %cst_48 = arith.constant dense<0.000000e+00> : vector<64x1536xf32>
    %111 = tpu.matmul %108, %110, %cst_48 {dimension_numbers = #tpu.dot_dimension_numbers<[1], [0], [0], [1], [0, 0, 1, 1], [], []>} : vector<64x384xbf16>, vector<384x1536xbf16>, vector<64x1536xf32> -> vector<64x1536xf32>
    %c0_49 = arith.constant 0 : index
    %c0_50 = arith.constant 0 : index
    %c0_51 = arith.constant 0 : index
    %112 = vector.load %arg13[%c0_49, %c0_50, %c0_51] : memref<1x1x1536xf32, #tpu.memory_space<vmem>>, vector<1x1x1536xf32>
    %113 = vector.shape_cast %112 : vector<1x1x1536xf32> to vector<1x1536xf32>
    %114 = vector.broadcast %113 : vector<1x1536xf32> to vector<64x1536xf32>
    %115 = arith.addf %111, %114 : vector<64x1536xf32>
    %cst_52 = arith.constant 5.000000e-01 : f32
    %116 = vector.broadcast %cst_52 : f32 to vector<64x1536xf32>
    %117 = arith.mulf %116, %115 : vector<64x1536xf32>
    %cst_53 = arith.constant 4.471500e-02 : f32
    %118 = vector.broadcast %cst_53 : f32 to vector<64x1536xf32>
    %119 = arith.mulf %118, %115 : vector<64x1536xf32>
    %120 = arith.mulf %119, %115 : vector<64x1536xf32>
    %121 = arith.mulf %120, %115 : vector<64x1536xf32>
    %122 = arith.addf %115, %121 : vector<64x1536xf32>
    %cst_54 = arith.constant 0.797884583 : f32
    %123 = vector.broadcast %cst_54 : f32 to vector<64x1536xf32>
    %124 = arith.mulf %123, %122 : vector<64x1536xf32>
    %125 = math.tanh %124 : vector<64x1536xf32>
    %cst_55 = arith.constant 1.000000e+00 : f32
    %126 = vector.broadcast %cst_55 : f32 to vector<64x1536xf32>
    %127 = arith.addf %126, %125 : vector<64x1536xf32>
    %128 = arith.mulf %117, %127 : vector<64x1536xf32>
    %129 = arith.truncf %128 : vector<64x1536xf32> to vector<64x1536xbf16>
    %c0_56 = arith.constant 0 : index
    %c0_57 = arith.constant 0 : index
    %c0_58 = arith.constant 0 : index
    %130 = vector.load %arg14[%c0_56, %c0_57, %c0_58] : memref<1x1536x384xbf16, #tpu.memory_space<vmem>>, vector<1x1536x384xbf16>
    %131 = vector.shape_cast %130 : vector<1x1536x384xbf16> to vector<1536x384xbf16>
    %cst_59 = arith.constant dense<0.000000e+00> : vector<64x384xf32>
    %132 = tpu.matmul %129, %131, %cst_59 {dimension_numbers = #tpu.dot_dimension_numbers<[1], [0], [0], [1], [0, 0, 1, 1], [], []>} : vector<64x1536xbf16>, vector<1536x384xbf16>, vector<64x384xf32> -> vector<64x384xf32>
    %c0_60 = arith.constant 0 : index
    %c0_61 = arith.constant 0 : index
    %c0_62 = arith.constant 0 : index
    %133 = vector.load %arg15[%c0_60, %c0_61, %c0_62] : memref<1x1x384xf32, #tpu.memory_space<vmem>>, vector<1x1x384xf32>
    %134 = vector.shape_cast %133 : vector<1x1x384xf32> to vector<1x384xf32>
    %135 = vector.broadcast %134 : vector<1x384xf32> to vector<64x384xf32>
    %136 = arith.addf %132, %135 : vector<64x384xf32>
    %137 = arith.addf %83, %136 : vector<64x384xf32>
    %c1_i32 = arith.constant 1 : i32
    %138 = arith.cmpi slt, %arg0, %c1_i32 : i32
    %139 = arith.extui %138 : i1 to i32
    %c0_i32_63 = arith.constant 0 : i32
    %140 = arith.cmpi ne, %139, %c0_i32_63 : i32
    scf.if %140 {
      %144 = vector.shape_cast %137 : vector<64x384xf32> to vector<8x8x384xf32>
      %c0_66 = arith.constant 0 : index
      %c0_67 = arith.constant 0 : index
      %c0_68 = arith.constant 0 : index
      %145 = vector.load %arg19[%c0_66, %c0_67, %c0_68] : memref<8x8x384xf32, #tpu.memory_space<vmem>>, vector<8x8x384xf32>
      tpu.vector_store %arg19[%c0_66, %c0_67, %c0_68], %144 {strides = array<i32>} : memref<8x8x384xf32, #tpu.memory_space<vmem>>, vector<8x8x384xf32>,
    } else {
    }
    %c1_i32_64 = arith.constant 1 : i32
    %141 = arith.cmpi eq, %arg0, %c1_i32_64 : i32
    %142 = arith.extui %141 : i1 to i32
    %c0_i32_65 = arith.constant 0 : i32
    %143 = arith.cmpi ne, %142, %c0_i32_65 : i32
    scf.if %143 {
      %c0_66 = arith.constant 0 : index
      %c0_67 = arith.constant 0 : index
      %144 = vector.load %arg16[%c0_66, %c0_67] : memref<1x384xf32, #tpu.memory_space<vmem>>, vector<1x384xf32>
      %c0_68 = arith.constant 0 : index
      %c0_69 = arith.constant 0 : index
      %145 = vector.load %arg17[%c0_68, %c0_69] : memref<1x384xf32, #tpu.memory_space<vmem>>, vector<1x384xf32>
      %cst_70 = arith.constant dense<0.000000e+00> : vector<64xf32>
      %146 = vector.multi_reduction <add>, %137, %cst_70 [1] : vector<64x384xf32> to vector<64xf32>
      %147 = vector.shape_cast %146 : vector<64xf32> to vector<64x1xf32>
      %cst_71 = arith.constant 3.840000e+02 : f32
      %148 = vector.broadcast %cst_71 : f32 to vector<64x1xf32>
      %149 = arith.divf %147, %148 : vector<64x1xf32>
      %150 = vector.broadcast %149 : vector<64x1xf32> to vector<64x384xf32>
      %151 = arith.subf %137, %150 : vector<64x384xf32>
      %152 = arith.mulf %151, %151 : vector<64x384xf32>
      %cst_72 = arith.constant dense<0.000000e+00> : vector<64xf32>
      %153 = vector.multi_reduction <add>, %152, %cst_72 [1] : vector<64x384xf32> to vector<64xf32>
      %154 = vector.shape_cast %153 : vector<64xf32> to vector<64x1xf32>
      %cst_73 = arith.constant 3.840000e+02 : f32
      %155 = vector.broadcast %cst_73 : f32 to vector<64x1xf32>
      %156 = arith.divf %154, %155 : vector<64x1xf32>
      %cst_74 = arith.constant 9.99999974E-6 : f32
      %157 = vector.broadcast %cst_74 : f32 to vector<64x1xf32>
      %158 = arith.addf %156, %157 : vector<64x1xf32>
      %159 = math.rsqrt %158 : vector<64x1xf32>
      %160 = vector.broadcast %159 : vector<64x1xf32> to vector<64x384xf32>
      %161 = arith.mulf %151, %160 : vector<64x384xf32>
      %162 = vector.broadcast %144 : vector<1x384xf32> to vector<64x384xf32>
      %163 = arith.mulf %161, %162 : vector<64x384xf32>
      %164 = vector.broadcast %145 : vector<1x384xf32> to vector<64x384xf32>
      %165 = arith.addf %163, %164 : vector<64x384xf32>
      %166 = vector.shape_cast %165 : vector<64x384xf32> to vector<8x8x384xf32>
      %c0_75 = arith.constant 0 : index
      %c0_76 = arith.constant 0 : index
      %c0_77 = arith.constant 0 : index
      %167 = vector.load %arg18[%c0_75, %c0_76, %c0_77] : memref<8x8x384xf32, #tpu.memory_space<vmem>>, vector<8x8x384xf32>
      tpu.vector_store %arg18[%c0_75, %c0_76, %c0_77], %166 {strides = array<i32>} : memref<8x8x384xf32, #tpu.memory_space<vmem>>, vector<8x8x384xf32>,
    } else {
    }
    return
  }
  func.func @transform_0(%arg0: i32) -> (i32, i32, i32) {
    %c0_i32 = arith.constant 0 : i32
    %c0_i32_0 = arith.constant 0 : i32
    %c0_i32_1 = arith.constant 0 : i32
    %c0_i32_2 = arith.constant 0 : i32
    return %c0_i32, %c0_i32_0, %c0_i32_1 : i32, i32, i32
  }
  func.func @transform_1(%arg0: i32) -> (i32, i32) {
    %c0_i32 = arith.constant 0 : i32
    %c0_i32_0 = arith.constant 0 : i32
    %c0_i32_1 = arith.constant 0 : i32
    return %c0_i32, %c0_i32_0 : i32, i32
  }
  func.func @transform_2(%arg0: i32) -> (i32, i32) {
    %c0_i32 = arith.constant 0 : i32
    %c0_i32_0 = arith.constant 0 : i32
    %c0_i32_1 = arith.constant 0 : i32
    return %c0_i32, %c0_i32_0 : i32, i32
  }
  func.func @transform_3(%arg0: i32) -> (i32, i32, i32) {
    %c0_i32 = arith.constant 0 : i32
    %c0_i32_0 = arith.constant 0 : i32
    %c0_i32_1 = arith.constant 0 : i32
    return %arg0, %c0_i32, %c0_i32_0 : i32, i32, i32
  }
  func.func @transform_4(%arg0: i32) -> (i32, i32, i32) {
    %c0_i32 = arith.constant 0 : i32
    %c0_i32_0 = arith.constant 0 : i32
    %c0_i32_1 = arith.constant 0 : i32
    return %arg0, %c0_i32, %c0_i32_0 : i32, i32, i32
  }
  func.func @transform_5(%arg0: i32) -> (i32, i32, i32) {
    %c0_i32 = arith.constant 0 : i32
    %c0_i32_0 = arith.constant 0 : i32
    %c0_i32_1 = arith.constant 0 : i32
    return %arg0, %c0_i32, %c0_i32_0 : i32, i32, i32
  }
  func.func @transform_6(%arg0: i32) -> (i32, i32, i32) {
    %c0_i32 = arith.constant 0 : i32
    %c0_i32_0 = arith.constant 0 : i32
    %c0_i32_1 = arith.constant 0 : i32
    return %arg0, %c0_i32, %c0_i32_0 : i32, i32, i32
  }
  func.func @transform_7(%arg0: i32) -> (i32, i32, i32) {
    %c0_i32 = arith.constant 0 : i32
    %c0_i32_0 = arith.constant 0 : i32
    %c0_i32_1 = arith.constant 0 : i32
    return %arg0, %c0_i32, %c0_i32_0 : i32, i32, i32
  }
  func.func @transform_8(%arg0: i32) -> (i32, i32, i32) {
    %c0_i32 = arith.constant 0 : i32
    %c0_i32_0 = arith.constant 0 : i32
    %c0_i32_1 = arith.constant 0 : i32
    return %arg0, %c0_i32, %c0_i32_0 : i32, i32, i32
  }
  func.func @transform_9(%arg0: i32) -> (i32, i32, i32) {
    %c0_i32 = arith.constant 0 : i32
    %c0_i32_0 = arith.constant 0 : i32
    %c0_i32_1 = arith.constant 0 : i32
    return %arg0, %c0_i32, %c0_i32_0 : i32, i32, i32
  }
  func.func @transform_10(%arg0: i32) -> (i32, i32, i32) {
    %c0_i32 = arith.constant 0 : i32
    %c0_i32_0 = arith.constant 0 : i32
    %c0_i32_1 = arith.constant 0 : i32
    return %arg0, %c0_i32, %c0_i32_0 : i32, i32, i32
  }
  func.func @transform_11(%arg0: i32) -> (i32, i32, i32) {
    %c0_i32 = arith.constant 0 : i32
    %c0_i32_0 = arith.constant 0 : i32
    %c0_i32_1 = arith.constant 0 : i32
    return %arg0, %c0_i32, %c0_i32_0 : i32, i32, i32
  }
  func.func @transform_12(%arg0: i32) -> (i32, i32, i32) {
    %c0_i32 = arith.constant 0 : i32
    %c0_i32_0 = arith.constant 0 : i32
    %c0_i32_1 = arith.constant 0 : i32
    return %arg0, %c0_i32, %c0_i32_0 : i32, i32, i32
  }
  func.func @transform_13(%arg0: i32) -> (i32, i32, i32) {
    %c0_i32 = arith.constant 0 : i32
    %c0_i32_0 = arith.constant 0 : i32
    %c0_i32_1 = arith.constant 0 : i32
    return %arg0, %c0_i32, %c0_i32_0 : i32, i32, i32
  }
  func.func @transform_14(%arg0: i32) -> (i32, i32, i32) {
    %c0_i32 = arith.constant 0 : i32
    %c0_i32_0 = arith.constant 0 : i32
    %c0_i32_1 = arith.constant 0 : i32
    return %arg0, %c0_i32, %c0_i32_0 : i32, i32, i32
  }
  func.func @transform_15(%arg0: i32) -> (i32, i32) {
    %c0_i32 = arith.constant 0 : i32
    %c0_i32_0 = arith.constant 0 : i32
    %c0_i32_1 = arith.constant 0 : i32
    return %c0_i32, %c0_i32_0 : i32, i32
  }
  func.func @transform_16(%arg0: i32) -> (i32, i32) {
    %c0_i32 = arith.constant 0 : i32
    %c0_i32_0 = arith.constant 0 : i32
    %c0_i32_1 = arith.constant 0 : i32
    return %c0_i32, %c0_i32_0 : i32, i32
  }
  func.func @transform_17(%arg0: i32) -> (i32, i32, i32) {
    %c0_i32 = arith.constant 0 : i32
    %c0_i32_0 = arith.constant 0 : i32
    %c0_i32_1 = arith.constant 0 : i32
    %c0_i32_2 = arith.constant 0 : i32
    return %c0_i32, %c0_i32_0, %c0_i32_1 : i32, i32, i32
  }
}

</mosaic_0001>

<bundles_post_ra>
// kernel: squeeze.19
= control target key start
LH: loop header
LB: loop body
LE: loop exit
PB: predicated region body
PF: predicated region fallthrough
CT: control target
= control target key end

     0   :  { %s314_s0 = inlined_call_operand.vmem [shape: f32[1,40,384], index: 0, kind: input, shape index: {}]   ;;  %s315_s1 = inlined_call_operand.vmem [shape: f32[8,5,384], index: 1, kind: output, shape index: {}]  }
   0x1   :  { %v2_v0 = vld [vmem:[%s314_s0] sm:$0xff]   ;;  %v103_v1 = vld [vmem:[%s314_s0 + $0x8] sm:$0xff]   ;;  %v106_v2 = vld [vmem:[%s314_s0 + $0x10] sm:$0xff]  }
   0x2   :  { %3 = vst [vmem:[%s315_s1] sm:$0x1f] %v2_v0   ;;  %102 = vst [vmem:[%s315_s1 + $0x13] sm:$0xe0] %v2_v0   ;;  %v109_v3 = vld [vmem:[%s314_s0 + $0x18] sm:$0xff]   ;;  %v113_v4 = vld [vmem:[%s314_s0 + $0x20] sm:$0xff]  }
   0x3   :  { %104 = vst [vmem:[%s315_s1 + $0x8] sm:$0x1f] %v103_v1   ;;  %105 = vst [vmem:[%s315_s1 + $0x1b] sm:$0xe0] %v103_v1   ;;  %v117_v5 = vld [vmem:[%s314_s0 + $0x28] sm:$0xff]   ;;  %v121_v6 = vld [vmem:[%s314_s0 + $0x30] sm:$0xff]  }
   0x4   :  { %107 = vst [vmem:[%s315_s1 + $0x10] sm:$0x1f] %v106_v2   ;;  %108 = vst [vmem:[%s315_s1 + $0x23] sm:$0xe0] %v106_v2   ;;  %v124_v7 = vld [vmem:[%s314_s0 + $0x38] sm:$0xff]   ;;  %v127_v8 = vld [vmem:[%s314_s0 + $0x40] sm:$0xff]  }
   0x5   :  { %110 = vst [vmem:[%s315_s1 + $0x1b] sm:$0x3] %v109_v3   ;;  %111 = vst [vmem:[%s315_s1 + $0x2e] sm:$0x7c] %v109_v3   ;;  %v130_v9 = vld [vmem:[%s314_s0 + $0x48] sm:$0xff]   ;;  %v134_v10 = vld [vmem:[%s314_s0 + $0x50] sm:$0xff]  }
   0x6   :  { %112 = vst [vmem:[%s315_s1 + $0x41] sm:$0x80] %v109_v3   ;;  %114 = vst [vmem:[%s315_s1 + $0x23] sm:$0x3] %v113_v4   ;;  %v138_v11 = vld [vmem:[%s314_s0 + $0x58] sm:$0xff]   ;;  %v142_v12 = vld [vmem:[%s314_s0 + $0x60] sm:$0xff]  }
   0x7   :  { %115 = vst [vmem:[%s315_s1 + $0x36] sm:$0x7c] %v113_v4   ;;  %116 = vst [vmem:[%s315_s1 + $0x49] sm:$0x80] %v113_v4   ;;  %v145_v13 = vld [vmem:[%s314_s0 + $0x68] sm:$0xff]   ;;  %v148_v14 = vld [vmem:[%s314_s0 + $0x70] sm:$0xff]  }
   0x8   :  { %118 = vst [vmem:[%s315_s1 + $0x2b] sm:$0x3] %v117_v5   ;;  %119 = vst [vmem:[%s315_s1 + $0x3e] sm:$0x7c] %v117_v5  }
   0x9   :  { %120 = vst [vmem:[%s315_s1 + $0x51] sm:$0x80] %v117_v5   ;;  %122 = vst [vmem:[%s315_s1 + $0x49] sm:$0xf] %v121_v6  }
   0xa   :  { %123 = vst [vmem:[%s315_s1 + $0x5c] sm:$0xf0] %v121_v6   ;;  %125 = vst [vmem:[%s315_s1 + $0x51] sm:$0xf] %v124_v7  }
   0xb   :  { %126 = vst [vmem:[%s315_s1 + $0x64] sm:$0xf0] %v124_v7   ;;  %128 = vst [vmem:[%s315_s1 + $0x59] sm:$0xf] %v127_v8  }
   0xc   :  { %129 = vst [vmem:[%s315_s1 + $0x6c] sm:$0xf0] %v127_v8   ;;  %131 = vst [vmem:[%s315_s1 + $0x64] ss:$20 sm:$0x3] %v130_v9  }
   0xd   :  { %132 = vst [vmem:[%s315_s1 + $0x77] sm:$0x3c] %v130_v9   ;;  %133 = vst [vmem:[%s315_s1 + $0x8a] sm:$0xc0] %v130_v9  }
   0xe   :  { %135 = vst [vmem:[%s315_s1 + $0x6c] ss:$20 sm:$0x3] %v134_v10   ;;  %136 = vst [vmem:[%s315_s1 + $0x7f] sm:$0x3c] %v134_v10  }
   0xf   :  { %137 = vst [vmem:[%s315_s1 + $0x92] sm:$0xc0] %v134_v10   ;;  %139 = vst [vmem:[%s315_s1 + $0x74] ss:$20 sm:$0x3] %v138_v11  }
  0x10   :  { %140 = vst [vmem:[%s315_s1 + $0x87] sm:$0x3c] %v138_v11   ;;  %141 = vst [vmem:[%s315_s1 + $0x9a] sm:$0xc0] %v138_v11  }
  0x11   :  { %143 = vst [vmem:[%s315_s1 + $0x92] sm:$0x7] %v142_v12   ;;  %144 = vst [vmem:[%s315_s1 + $0xa5] sm:$0xf8] %v142_v12  }
  0x12   :  { %146 = vst [vmem:[%s315_s1 + $0x9a] sm:$0x7] %v145_v13   ;;  %147 = vst [vmem:[%s315_s1 + $0xad] sm:$0xf8] %v145_v13  }
  0x13   :  { %149 = vst [vmem:[%s315_s1 + $0xa2] sm:$0x7] %v148_v14   ;;  %150 = vst [vmem:[%s315_s1 + $0xb5] sm:$0xf8] %v148_v14  }

// kernel: _lambda_.1
= control target key start
LH: loop header
LB: loop body
LE: loop exit
PB: predicated region body
PF: predicated region fallthrough
CT: control target
= control target key end

     0   :  { %s23103_s0 = inlined_call_operand.vmem [shape: f32[8,8,384], index: 0, kind: input, shape index: {}]   ;;  %s23104_s1 = inlined_call_operand.vmem [shape: f32[8,384], index: 1, kind: input, shape index: {}]   ;;  %s23105_s2 = inlined_call_operand.vmem [shape: f32[8,8], index: 2, kind: input, shape index: {}]   ;;  %s23106_s3 = inlined_call_operand.hbm [shape: f32[2,1,384], index: 3, kind: input, shape index: {}]   ;;  %s23107_s4 = inlined_call_operand.hbm [shape: f32[2,1,384], index: 4, kind: input, shape index: {}]   ;;  %s23108_s5 = inlined_call_operand.vmem [shape: bf16[2,384,1152], index: 5, kind: input, shape index: {}]   ;;  %s23109_s6 = inlined_call_operand.vmem [shape: f32[2,1,1152], index: 6, kind: input, shape index: {}]   ;;  %s23110_s7 = inlined_call_operand.vmem [shape: bf16[2,384,384], index: 7, kind: input, shape index: {}]   ;;  %s23111_s8 = inlined_call_operand.hbm [shape: f32[2,1,384], index: 8, kind: input, shape index: {}]   ;;  %s23112_s9 = inlined_call_operand.hbm [shape: f32[2,1,384], index: 9, kind: input, shape index: {}]   ;;  %s23113_s10 = inlined_call_operand.hbm [shape: f32[2,1,384], index: 10, kind: input, shape index: {}]   ;;  %s23114_s11 = inlined_call_operand.vmem [shape: bf16[2,384,1536], index: 11, kind: input, shape index: {}]   ;;  %s23115_s12 = inlined_call_operand.hbm [shape: f32[2,1,1536], index: 12, kind: input, shape index: {}]   ;;  %s23116_s13 = inlined_call_operand.vmem [shape: bf16[2,1536,384], index: 13, kind: input, shape index: {}]   ;;  %s23117_s14 = inlined_call_operand.hbm [shape: f32[2,1,384], index: 14, kind: input, shape index: {}]   ;;  %s23118_s15 = inlined_call_operand.vmem [shape: f32[1,384], index: 15, kind: input, shape index: {}]   ;;  %s23119_s16 = inlined_call_operand.hbm [shape: f32[1,384], index: 16, kind: input, shape index: {}]   ;;  %s23120_s17 = inlined_call_operand.vmem [shape: f32[8,8,384], index: 17, kind: output, shape index: {}]  }
   0x1   :  { %23215 = sst [smem:[#allocation75_spill]] %s23103_s0 }
   0x2   :  { %23216 = sst [smem:[#allocation76_spill]] %s23104_s1 }
   0x3   :  { %23217 = sst [smem:[#allocation77_spill]] %s23105_s2 }
   0x4   :  { %23218 = sst [smem:[#allocation78_spill]] %s23107_s4 }
   0x5   :  { %23219 = sst [smem:[#allocation79_spill]] %s23110_s7 }
   0x6   :  { %23220 = sst [smem:[#allocation80_spill]] %s23112_s9 }
   0x7   :  { %23221 = sst [smem:[#allocation81_spill]] %s23114_s11 }
   0x8   :  { %23222 = sst [smem:[#allocation82_spill]] %s23115_s12 }
   0x9   :  { %23223 = sst [smem:[#allocation83_spill]] %s23116_s13 }
   0xa   :  { %23224 = sst [smem:[#allocation84_spill]] %s23118_s15 }
   0xb   :  { %23225 = sst [smem:[#allocation85_spill]] %s23120_s17 }
   0xc   :  { %22 = vsyncpa [#allocation4], 0 }
   0xd   :  { %24 = vsyncpa [#allocation4 + $0x1], 0 }
   0xe   :  { %25 = vsyncpa [#allocation6], 0 }
   0xf   :  { %27 = vsyncpa [#allocation6 + $0x1], 0 }
  0x10   :  { %28 = vsyncpa [#allocation9], 0 }
  0x11   :  { %30 = vsyncpa [#allocation9 + $0x1], 0 }
  0x12   :  { %31 = vsyncpa [#allocation12], 0 }
  0x13   :  { %33 = vsyncpa [#allocation12 + $0x1], 0 }
  0x14   :  { %34 = vsyncpa [#allocation15], 0  ;;  %s17864_s24 = smov 0   ;;  %s17866_s25 = smov 0  }
  0x15   :  { %s17868_s26 = smov 0   ;;  %s17870_s27 = smov 0  }
  0x16 LB: > { %23226 = sst [smem:[#allocation21_spill]] %s17757_s26  ;;  %s17885_s28 = sadd.s32 1, %s17761_s27   ;;  %s17761_s27 = sphi %s17870_s27, %s23437_s27   ;;  %s17757_s26 = sphi %s17868_s26, %s23439_s26   ;;  %s17753_s25 = sphi %s17866_s25, %s23441_s25   ;;  %s17749_s24 = sphi %s17864_s24, %s23440_s24  }
  0x17   : > { %23227 = sst [smem:[#allocation22_spill]] %s17885_s28  ;;  %s110_s29 = sadd.s32 1, %s17757_s26 }
  0x18   : > { %s107_s0 = ssub.s32 %s17761_s27, %s17885_s28  ;;  %p117_p0 = scmp.ne.s32.totalorder %s17757_s26, %s17753_s25 }
  0x19   : > { %p108_p1 = scmp.eq.s32.totalorder %s107_s0, 0  ;;  %p118_p2 = scmp.eq.s32.totalorder %s17761_s27, 0 }
  0x1a   : > { %p15854_p3 = scmp.lt.s32.totalorder %s17761_s27, 2  ;;  %s17898_s18 = sand.u32 1, %s17757_s26  }
  0x1b   : > { %s17895_s30 = scalar_select %p108_p1, %s17757_s26, %s110_s29  }
  0x1c   : > { %p119_p4 = por %p118_p2, %p117_p0  ;;  %s17901_s19 = smul.u32 3, %s17898_s18 }
  0x1d   : > { %23228 = sst [smem:[#allocation23_spill]] %s17895_s30  ;;  %s17904_s1 = sand.u32 1, %s17761_s27  }
  0x1e   : > { %s17907_s20 = smul.u32 48, %s17761_s27  ;;  %p17909_p5 = pnand %p15854_p3, %p119_p4 }
  0x1f   : > { %s23230_s4 = sld [smem:[#allocation78_spill]]  ;;  %s542_s0 = scalar_lea.vmem [#allocation5], %s17901_s19 }
  0x20   : > { %s550_s30 = sshll.u32 %s542_s0, 4  ;;  %p17925_p7 = pneg %p17909_p5  ;;  %s551_s30 = int_to_ptr.vmem [resolvable:$true] %s550_s30 }
  0x25   : > { %s17917_s29 = scalar_lea.hbm %s23230_s4, %s17907_s20  ;;  %s17494_s15 = scalar_lea.hbm %s23230_s4, 96 }
  0x26   : > { %s17489_s28 = scalar_lea.hbm %s17917_s29, 48  ;;  %p17495_p10 = scmp.lt.s32.totalorder %s17917_s29, %s23230_s4 }
  0x27   : > { %p17490_p6 = scmp.ne.s32.totalorder %s17917_s29, %s17489_s28  ;;  %p17496_p11 = scmp.lt.s32.totalorder %s17494_s15, %s17489_s28 }
  0x29   : > { %p17492_p8 = pnand %p17925_p7, %p17490_p6  ;;  %p17497_p12 = por %p17496_p11, %p17495_p10 }
  0x2b   : > { %p17493_p9 = pneg %p17492_p8 }
  0x2d   : > { %p17498_p13 = pnand %p17497_p12, %p17493_p9 }
  0x2f   : > { %17501 = shalt.err (!%p17498_p13)
}
  0x30   : > { %s17502_s0 = scalar_lea.vmem %s551_s30, 48  ;;  %s17763_s26 = smov [#allocation5]  }
  0x31   : > { %p17503_p0 = scmp.ne.s32.totalorder %s551_s30, %s17502_s0  ;;  %s17507_s11 = sshll.u32 %s17763_s26, 4  ;;  %s17508_s11 = int_to_ptr.vmem [resolvable:$false] %s17507_s11 }
  0x32   : > { %s17509_s7 = scalar_lea.vmem %s17508_s11, 96  ;;  %p17510_p3 = scmp.lt.s32.totalorder %s551_s30, %s17508_s11 }
  0x33   : > { %p17505_p1 = pnand %p17503_p0, %p17925_p7  ;;  %p17511_p4 = scmp.lt.s32.totalorder %s17509_s7, %s17502_s0 }
  0x35   : > { %p17506_p2 = pneg %p17505_p1  ;;  %p17512_p6 = por %p17511_p4, %p17510_p3 }
  0x37   : > { %p17513_p8 = pnand %p17512_p6, %p17506_p2 }
  0x39   : > { %17516 = shalt.err (!%p17513_p8)
}
  0x3a   : > { %s23232_s2 = scalar_lea.sflag [#allocation6], %s17904_s1  ;;  %s23233_s9 = sld [smem:[#allocation80_spill]] }
  0x3b   : > { %15837 = dma.hbm_to_vmem [thread:$0]  (!%p17909_p5), %s17917_s29, 48, %s551_s30, %s23232_s2  }
  0x3c   : > { %s603_s7 = scalar_lea.vmem [#allocation8], %s17901_s19 }
  0x3d   : > { %s611_s11 = sshll.u32 %s603_s7, 4  ;;  %s612_s11 = int_to_ptr.vmem [resolvable:$true] %s611_s11 }
  0x40   : > { %s17949_s26 = scalar_lea.hbm %s23233_s9, %s17907_s20  ;;  %s17522_s30 = scalar_lea.hbm %s23233_s9, 96 }
  0x41   : > { %s17517_s22 = scalar_lea.hbm %s17949_s26, 48  ;;  %p17523_p12 = scmp.lt.s32.totalorder %s17949_s26, %s23233_s9 }
  0x42   : > { %p17518_p9 = scmp.ne.s32.totalorder %s17949_s26, %s17517_s22  ;;  %p17524_p13 = scmp.lt.s32.totalorder %s17522_s30, %s17517_s22 }
  0x44   : > { %p17520_p10 = pnand %p17518_p9, %p17925_p7  ;;  %p17525_p0 = por %p17524_p13, %p17523_p12 }
  0x46   : > { %p17521_p11 = pneg %p17520_p10 }
  0x48   : > { %p17526_p1 = pnand %p17525_p0, %p17521_p11 }
  0x4a   : > { %17529 = shalt.err (!%p17526_p1)
}
  0x4b   : > { %s17530_s13 = scalar_lea.vmem %s612_s11, 48  ;;  %s17764_s15 = smov [#allocation8]  }
  0x4c   : > { %p17531_p2 = scmp.ne.s32.totalorder %s612_s11, %s17530_s13  ;;  %s17535_s7 = sshll.u32 %s17764_s15, 4  ;;  %s17536_s7 = int_to_ptr.vmem [resolvable:$false] %s17535_s7 }
  0x4d   : > { %s17537_s28 = scalar_lea.vmem %s17536_s7, 96  ;;  %p17538_p6 = scmp.lt.s32.totalorder %s612_s11, %s17536_s7 }
  0x4e   : > { %p17533_p3 = pnand %p17531_p2, %p17925_p7  ;;  %p17539_p8 = scmp.lt.s32.totalorder %s17537_s28, %s17530_s13 }
  0x50   : > { %p17534_p4 = pneg %p17533_p3  ;;  %p17540_p9 = por %p17539_p8, %p17538_p6 }
  0x52   : > { %p17541_p10 = pnand %p17540_p9, %p17534_p4 }
  0x54   : > { %17544 = shalt.err (!%p17541_p10)
}
  0x55   : > { %s23234_s22 = scalar_lea.sflag [#allocation9], %s17904_s1  ;;  %s15799_s23 = smul.u32 12, %s17898_s18 }
  0x56   : > { %15843 = dma.hbm_to_vmem [thread:$0]  (!%p17909_p5), %s17949_s26, 48, %s612_s11, %s23234_s22  }
  0x57   : > { %s15800_s0 = smul.u32 192, %s17761_s27  ;;  %s17974_s30 = sadd.s32 4294967295, %s17761_s27  }
  0x58   : > { %s23235_s12 = sld [smem:[#allocation82_spill]]  ;;  %s649_s13 = scalar_lea.vmem [#allocation11], %s15799_s23 }
  0x59   : > { %s657_s15 = sshll.u32 %s649_s13, 4  ;;  %s658_s15 = int_to_ptr.vmem [resolvable:$true] %s657_s15 }
  0x5e   : > { %s17979_s2 = scalar_lea.hbm %s23235_s12, %s15800_s0  ;;  %s17550_s22 = scalar_lea.hbm %s23235_s12, 384 }
  0x5f   : > { %s17545_s4 = scalar_lea.hbm %s17979_s2, 192  ;;  %p17551_p1 = scmp.lt.s32.totalorder %s17979_s2, %s23235_s12 }
  0x60   : > { %p17546_p12 = scmp.ne.s32.totalorder %s17979_s2, %s17545_s4  ;;  %p17552_p2 = scmp.lt.s32.totalorder %s17550_s22, %s17545_s4 }
  0x62   : > { %p17548_p13 = pnand %p17546_p12, %p17925_p7  ;;  %p17553_p3 = por %p17552_p2, %p17551_p1 }
  0x64   : > { %p17549_p0 = pneg %p17548_p13 }
  0x66   : > { %p17554_p4 = pnand %p17553_p3, %p17549_p0 }
  0x68   : > { %17557 = shalt.err (!%p17554_p4)
}
  0x69   : > { %s17558_s23 = scalar_lea.vmem %s658_s15, 192  ;;  %s17765_s29 = smov [#allocation11]  }
  0x6a   : > { %p17559_p6 = scmp.ne.s32.totalorder %s658_s15, %s17558_s23  ;;  %s17563_s13 = sshll.u32 %s17765_s29, 4  ;;  %s17564_s13 = int_to_ptr.vmem [resolvable:$false] %s17563_s13 }
  0x6b   : > { %s17565_s7 = scalar_lea.vmem %s17564_s13, 384  ;;  %p17566_p10 = scmp.lt.s32.totalorder %s658_s15, %s17564_s13 }
  0x6c   : > { %p17561_p8 = pnand %p17559_p6, %p17925_p7  ;;  %p17567_p12 = scmp.lt.s32.totalorder %s17565_s7, %s17558_s23 }
  0x6e   : > { %p17562_p9 = pneg %p17561_p8  ;;  %p17568_p13 = por %p17567_p12, %p17566_p10 }
  0x70   : > { %p17569_p11 = pnand %p17568_p13, %p17562_p9 }
  0x72   : > { %17572 = shalt.err (!%p17569_p11)
}
  0x73   : > { %s23236_s4 = scalar_lea.sflag [#allocation12], %s17904_s1  ;;  %p23127_p0 = scmp.eq.s32.totalorder %s17974_s30, 0 }
  0x74   : > { %15849 = dma.hbm_to_vmem [thread:$0]  (!%p17909_p5), %s17979_s2, 192, %s658_s15, %s23236_s4  }
  0x75   : > { %p14007_p1 = scmp.ge.s32.totalorder %s17761_s27, 1  ;;  %p483_p11 = scmp.lt.s32.totalorder %s17761_s27, 3 }
  0x76   : > { %p23237_p3 = scmp.ne.s32.totalorder %s17753_s25, %s17749_s24  ;;  %s17766_s11 = smov [#allocation14]  }
  0x77   : > { %p18015_p6 = pnand %p14007_p1, %p483_p11  ;;  %s508_s22 = sshll.u32 %s17766_s11, 4  ;;  %s18019_s22 = int_to_ptr.vmem [resolvable:$true] %s508_s22 }
  0x78   : > { %p18011_p4 = por %p23127_p0, %p23237_p3  ;;  %s18027_s24 = scalar_lea.hbm %s23106_s3, %s17907_s20 }
  0x79   : > { %s23239_s26 = scalar_select %p18015_p6, 1, 0 }
  0x7a   : > { %s23238_s7 = scalar_select %p18011_p4, 1, 0 }
  0x7b   : > { %p15827_p8 = pneg %p18015_p6  ;;  %s523_s15 = scalar_lea.vmem [#allocation3], %s17901_s19 }
  0x7c   : > { %s531_s28 = sshll.u32 %s523_s15, 4  ;;  %s520_s23 = scalar_lea.sflag [#allocation4], %s17898_s18  ;;  %s532_s28 = int_to_ptr.vmem [resolvable:$true] %s531_s28 }
  0x7d   : > { %p18032_p9 = pnand %p15827_p8, %p23127_p0  ;;  %s17573_s29 = scalar_lea.hbm %s18027_s24, 48 }
  0x7e   : > { %p17574_p10 = scmp.ne.s32.totalorder %s18027_s24, %s17573_s29  ;;  %s17578_s11 = scalar_lea.hbm %s23106_s3, 96 }
  0x7f   : > { %s23240_s0 = scalar_select %p18032_p9, 1, 0 }
  0x80   : > { %p17576_p12 = pnand %p17574_p10, %p17925_p7  ;;  %p17579_p1 = scmp.lt.s32.totalorder %s18027_s24, %s23106_s3 }
  0x81   : > { %p17580_p11 = scmp.lt.s32.totalorder %s17578_s11, %s17573_s29 }
  0x82   : > { %p17577_p13 = pneg %p17576_p12 }
  0x83   : > { %p17581_p3 = por %p17580_p11, %p17579_p1 }
  0x85   : > { %p17582_p8 = pnand %p17581_p3, %p17577_p13 }
  0x87   : > { %17585 = shalt.err (!%p17582_p8)
}
  0x88   : > { %s17586_s15 = scalar_lea.vmem %s532_s28, 48  ;;  %s17767_s18 = smov [#allocation3]  }
  0x89   : > { %p17587_p2 = scmp.ne.s32.totalorder %s532_s28, %s17586_s15  ;;  %s17591_s9 = sshll.u32 %s17767_s18, 4  ;;  %s17592_s9 = int_to_ptr.vmem [resolvable:$false] %s17591_s9 }
  0x8a   : > { %s17593_s12 = scalar_lea.vmem %s17592_s9, 96  ;;  %p17594_p10 = scmp.lt.s32.totalorder %s532_s28, %s17592_s9 }
  0x8b   : > { %p17589_p0 = pnand %p17587_p2, %p17925_p7  ;;  %p17595_p12 = scmp.lt.s32.totalorder %s17593_s12, %s17586_s15 }
  0x8d   : > { %p17590_p4 = pneg %p17589_p0  ;;  %p17596_p6 = por %p17595_p12, %p17594_p10 }
  0x8f   : > { %p17597_p9 = pnand %p17596_p6, %p17590_p4 }
  0x91   : > { %17600 = shalt.err (!%p17597_p9)
}
  0x92   : > { %15834 = dma.hbm_to_vmem [thread:$0]  (!%p17909_p5), %s18027_s24, 48, %s532_s28, %s520_s23  }
  0x93   : > { %p23241_p2 = scmp.ne.s32.totalorder %s23240_s0, 0  ;;  %s17612_s29 = scalar_lea.vmem %s18019_s22, 48 }
  0x94   : > { %p17613_p13 = scmp.ne.s32.totalorder %s18019_s22, %s17612_s29  ;;  %s17619_s9 = scalar_lea.vmem %s18019_s22, 64 }
  0x95   : > { %p17603_p0 = pneg %p23241_p2  ;;  %p17620_p3 = scmp.lt.s32.totalorder %s18019_s22, %s18019_s22 }
  0x96   : > { %p17621_p4 = scmp.lt.s32.totalorder %s17619_s9, %s17612_s29 }
  0x97   : > { %p17615_p1 = pnand %p17613_p13, %p17603_p0 }
  0x98   : > { %p17622_p6 = por %p17621_p4, %p17620_p3 }
  0x99   : > { %p17616_p11 = pneg %p17615_p1 }
  0x9b   : > { %p17623_p9 = pnand %p17622_p6, %p17616_p11 }
  0x9d   : > { %17626 = shalt.err (!%p17623_p9)
}
  0x9e   : > { %15830 = dma.hbm_to_vmem [thread:$0]  (!%p23241_p2), %s23119_s16, 48, %s18019_s22, [#allocation15]  }
  0x9f   : > { %s590_s23 = scalar_lea.hbm %s23111_s8, %s17907_s20  ;;  %s584_s4 = scalar_lea.vmem [#allocation7], %s17901_s19 }
  0xa0   : > { %s592_s11 = sshll.u32 %s584_s4, 4  ;;  %s17627_s27 = scalar_lea.hbm %s590_s23, 48  ;;  %s593_s11 = int_to_ptr.vmem [resolvable:$true] %s592_s11 }
  0xa1   : > { %p17628_p8 = scmp.ne.s32.totalorder %s590_s23, %s17627_s27  ;;  %s17632_s15 = scalar_lea.hbm %s23111_s8, 96 }
  0xa2   : > { %p17633_p2 = scmp.lt.s32.totalorder %s590_s23, %s23111_s8  ;;  %p17634_p0 = scmp.lt.s32.totalorder %s17632_s15, %s17627_s27 }
  0xa3   : > { %p17630_p10 = pnand %p17628_p8, %p17925_p7 }
  0xa4   : > { %p17635_p13 = por %p17634_p0, %p17633_p2 }
  0xa5   : > { %p17631_p12 = pneg %p17630_p10 }
  0xa7   : > { %p17636_p1 = pnand %p17635_p13, %p17631_p12 }
  0xa9   : > { %17639 = shalt.err (!%p17636_p1)
}
  0xaa   : > { %s17640_s22 = scalar_lea.vmem %s593_s11, 48  ;;  %s17768_s9 = smov [#allocation7]  }
  0xab   : > { %p17641_p11 = scmp.ne.s32.totalorder %s593_s11, %s17640_s22  ;;  %s17645_s12 = sshll.u32 %s17768_s9, 4  ;;  %s17646_s12 = int_to_ptr.vmem [resolvable:$false] %s17645_s12 }
  0xac   : > { %s17647_s13 = scalar_lea.vmem %s17646_s12, 96  ;;  %p17648_p6 = scmp.lt.s32.totalorder %s593_s11, %s17646_s12 }
  0xad   : > { %p17643_p3 = pnand %p17641_p11, %p17925_p7  ;;  %p17649_p9 = scmp.lt.s32.totalorder %s17647_s13, %s17640_s22 }
  0xaf   : > { %p17644_p4 = pneg %p17643_p3  ;;  %p17650_p8 = por %p17649_p9, %p17648_p6 }
  0xb1   : > { %p17651_p10 = pnand %p17650_p8, %p17644_p4 }
  0xb3   : > { %17654 = shalt.err (!%p17651_p10)
}
  0xb4   : > { %s23242_s24 = scalar_lea.sflag [#allocation6], %s17904_s1  ;;  %s628_s27 = scalar_lea.hbm %s23113_s10, %s17907_s20 }
  0xb5   : > { %15840 = dma.hbm_to_vmem [thread:$0]  (!%p17909_p5), %s590_s23, 48, %s593_s11, %s23242_s24  }
  0xb6   : > { %s622_s0 = scalar_lea.vmem [#allocation10], %s17901_s19  ;;  %s17655_s15 = scalar_lea.hbm %s628_s27, 48 }
  0xb7   : > { %s630_s2 = sshll.u32 %s622_s0, 4  ;;  %p17656_p12 = scmp.ne.s32.totalorder %s628_s27, %s17655_s15  ;;  %s631_s2 = int_to_ptr.vmem [resolvable:$true] %s630_s2 }
  0xb8   : > { %s17660_s22 = scalar_lea.hbm %s23113_s10, 96  ;;  %p17661_p13 = scmp.lt.s32.totalorder %s628_s27, %s23113_s10 }
  0xb9   : > { %p17658_p2 = pnand %p17656_p12, %p17925_p7  ;;  %p17662_p1 = scmp.lt.s32.totalorder %s17660_s22, %s17655_s15 }
  0xbb   : > { %p17659_p0 = pneg %p17658_p2  ;;  %p17663_p11 = por %p17662_p1, %p17661_p13 }
  0xbd   : > { %p17664_p3 = pnand %p17663_p11, %p17659_p0 }
  0xbf   : > { %17667 = shalt.err (!%p17664_p3)
}
  0xc0   : > { %s17668_s23 = scalar_lea.vmem %s631_s2, 48  ;;  %s17769_s11 = smov [#allocation10]  }
  0xc1   : > { %p17669_p4 = scmp.ne.s32.totalorder %s631_s2, %s17668_s23  ;;  %s17673_s13 = sshll.u32 %s17769_s11, 4  ;;  %s17674_s13 = int_to_ptr.vmem [resolvable:$false] %s17673_s13 }
  0xc2   : > { %s17675_s24 = scalar_lea.vmem %s17674_s13, 96  ;;  %p17676_p8 = scmp.lt.s32.totalorder %s631_s2, %s17674_s13 }
  0xc3   : > { %p17671_p6 = pnand %p17669_p4, %p17925_p7  ;;  %p17677_p10 = scmp.lt.s32.totalorder %s17675_s24, %s17668_s23 }
  0xc5   : > { %p17672_p9 = pneg %p17671_p6  ;;  %p17678_p12 = por %p17677_p10, %p17676_p8 }
  0xc7   : > { %p17679_p2 = pnand %p17678_p12, %p17672_p9 }
  0xc9   : > { %17682 = shalt.err (!%p17679_p2)
}
  0xca   : > { %s23243_s28 = scalar_lea.sflag [#allocation9], %s17904_s1  ;;  %s682_s15 = scalar_lea.hbm %s23117_s14, %s17907_s20 }
  0xcb   : > { %15846 = dma.hbm_to_vmem [thread:$0]  (!%p17909_p5), %s628_s27, 48, %s631_s2, %s23243_s28  }
  0xcc   : > { %s676_s18 = scalar_lea.vmem [#allocation13], %s17901_s19  ;;  %s17683_s22 = scalar_lea.hbm %s682_s15, 48 }
  0xcd   : > { %s684_s29 = sshll.u32 %s676_s18, 4  ;;  %p17684_p0 = scmp.ne.s32.totalorder %s682_s15, %s17683_s22  ;;  %s685_s29 = int_to_ptr.vmem [resolvable:$true] %s684_s29 }
  0xce   : > { %s17688_s23 = scalar_lea.hbm %s23117_s14, 96  ;;  %p17689_p11 = scmp.lt.s32.totalorder %s682_s15, %s23117_s14 }
  0xcf   : > { %p17686_p13 = pnand %p17684_p0, %p17925_p7  ;;  %p17690_p3 = scmp.lt.s32.totalorder %s17688_s23, %s17683_s22 }
  0xd1   : > { %p17687_p1 = pneg %p17686_p13  ;;  %p17691_p4 = por %p17690_p3, %p17689_p11 }
  0xd3   : > { %p17692_p6 = pnand %p17691_p4, %p17687_p1 }
  0xd5   : > { %17695 = shalt.err (!%p17692_p6)
}
  0xd6   : > { %s17696_s19 = scalar_lea.vmem %s685_s29, 48  ;;  %s17770_s20 = smov [#allocation13]  }
  0xd7   : > { %p17697_p9 = scmp.ne.s32.totalorder %s685_s29, %s17696_s19  ;;  %s17701_s27 = sshll.u32 %s17770_s20, 4  ;;  %s17702_s27 = int_to_ptr.vmem [resolvable:$false] %s17701_s27 }
  0xd8   : > { %s17703_s2 = scalar_lea.vmem %s17702_s27, 96  ;;  %p17704_p12 = scmp.lt.s32.totalorder %s685_s29, %s17702_s27 }
  0xd9   : > { %p17699_p8 = pnand %p17697_p9, %p17925_p7  ;;  %p17705_p2 = scmp.lt.s32.totalorder %s17703_s2, %s17696_s19 }
  0xdb   : > { %p17700_p10 = pneg %p17699_p8  ;;  %p17706_p0 = por %p17705_p2, %p17704_p12 }
  0xdd   : > { %p17707_p13 = pnand %p17706_p0, %p17700_p10 }
  0xdf   : > { %17710 = shalt.err (!%p17707_p13)
}
  0xe0   : > { %s23244_s24 = scalar_lea.sflag [#allocation12], %s17904_s1  ;;  %p23245_p1 = scmp.ne.s32.totalorder %s23239_s26, 0 }
  0xe1   : > { %15852 = dma.hbm_to_vmem [thread:$0]  (!%p17909_p5), %s682_s15, 48, %s685_s29, %s23244_s24  }
  0xe2   : > { %693 = sbr.rel (%p23245_p1) target bundleno = 3364 (0xd24), region = 88 }
  0xe7   : > { %s695_s17 = sand.u32 1, %s17753_s25   ;;  %p23246_p7 = scmp.ne.s32.totalorder %s23238_s7, 0 }
  0xe8   : > { %s18126_s28 = smul.u32 3, %s695_s17  ;;  %s696_s4 = scalar_lea.sflag [#allocation4], %s695_s17 }
  0xe9   : > { %17728 = dma.done.wait (%p23246_p7), %s696_s4, 48  }
  0xea   : > { %17730 = vsyncadd (%p23246_p7), %s696_s4, 4294967248  ;;  %s704_s1 = sand.u32 1, %s17974_s30  }
  0xeb   : > { %s705_s21 = scalar_lea.sflag [#allocation6], %s704_s1 }
  0xec   : > { %17732 = dma.done.wait (%p23246_p7), %s705_s21, 96  }
  0xed   : > { %17734 = vsyncadd (%p23246_p7), %s705_s21, 4294967200  ;;  %s723_s18 = scalar_lea.sflag [#allocation9], %s704_s1 }
  0xee   : > { %17736 = dma.done.wait (%p23246_p7), %s723_s18, 96  }
  0xef   : > { %17738 = vsyncadd (%p23246_p7), %s723_s18, 4294967200  ;;  %s15804_s22 = smul.u32 12, %s695_s17  ;;  %s741_s12 = scalar_lea.sflag [#allocation12], %s704_s1 }
  0xf1   : > { %s18146_s23 = scalar_lea.vmem [#allocation11], %s15804_s22 }
  0xf2   : > { %17740 = dma.done.wait (%p23246_p7), %s741_s12, 240  }
  0xf3   : > { %17742 = vsyncadd (%p23246_p7), %s741_s12, 4294967056  ;;  %p23247_p5 = scmp.eq.s32.totalorder %s17974_s30, 0 }
  0xf5   : > { %17744 = dma.done.wait (%p23247_p5), [#allocation15], 48   ;;  %p23248_p11 = pmov %p23247_p5 }
  0xf6   : > { %p857_p3 = scmp.lt.s32.totalorder %s17974_s30, 1  ;;  %s23249_s12 = sld [smem:[#allocation79_spill]] }
  0xf7   : > { %17746 = vsyncadd (%p23248_p11), [#allocation15], 4294967248  ;;  %s23250_s15 = sld [smem:[#allocation81_spill]]  ;;  %p23252_p4 = scmp.ne.s32.totalorder %s17974_s30, 0 }
  0xf8   : > { %s858_s13 = scalar_select %p857_p3, %s17974_s30, 1 }
  0xf9   : > { %s23251_s2 = sld [smem:[#allocation83_spill]] }
  0xfa   : > { %s15805_s19 = smul.u32 1728, %s858_s13  ;;  %s23253_s17 = sld [smem:[#allocation75_spill]] (!%p23252_p4) }
  0xfb   : > { %s15806_s20 = smul.u32 9, %s858_s13  ;;  %s23254_s18 = sld [smem:[#allocation76_spill]] (!%p23252_p4) }
  0xfc   : > { %s18162_s24 = scalar_lea.vmem %s23108_s5, %s15805_s19  ;;  %s15807_s7 = smul.u32 576, %s858_s13 }
  0xfd   : > { %s18167_s1 = scalar_lea.vmem %s23109_s6, %s15806_s20  ;;  %s15808_s21 = smul.u32 2304, %s858_s13 }
  0xfe   : > { %s18172_s11 = scalar_lea.vmem %s23249_s12, %s15807_s7  ;;  %885 = sbr.rel (%p23252_p4) target bundleno = 275 (0x113), region = 124 }
  0xff   : > { %s18177_s26 = scalar_lea.vmem %s23250_s15, %s15808_s21  ;;  %s18182_s0 = scalar_lea.vmem %s23251_s2, %s15808_s21 }
 0x103   : > { %v886_v0 = vld [vmem:[%s23253_s17] sm:$0xff]  ;;  %v887_v2 = vld [vmem:[%s23253_s17 + $0x8] sm:$0xff]  ;;  %v888_v5 = vld [vmem:[%s23253_s17 + $0x10] sm:$0xff] }
 0x104   : > { %v18192_v1 = vld [vmem:[%s23254_s18] sm:$0xff]  ;;  %v18201_v4 = vld [vmem:[%s23254_s18 + $0x8] sm:$0xff]  ;;  %v912_v6 = vld [vmem:[%s23254_s18 + $0x10] sm:$0xff] }
 0x105   : > { %v913_v3 = vadd.f32 %v18192_v1, %v886_v0  ;;  %v914_v7 = vadd.f32 %v18201_v4, %v887_v2  ;;  %v915_v8 = vadd.f32 %v912_v6, %v888_v5  ;;  %v889_v9 = vld [vmem:[%s23253_s17 + $0x18] sm:$0xff]  ;;  %v890_v10 = vld [vmem:[%s23253_s17 + $0x20] sm:$0xff]  ;;  %v891_v11 = vld [vmem:[%s23253_s17 + $0x28] sm:$0xff] }
 0x106   : > { %v916_v12 = vadd.f32 %v18192_v1, %v889_v9  ;;  %v917_v13 = vadd.f32 %v18201_v4, %v890_v10  ;;  %v918_v14 = vadd.f32 %v912_v6, %v891_v11  ;;  %v892_v15 = vld [vmem:[%s23253_s17 + $0x30] sm:$0xff]  ;;  %v893_v16 = vld [vmem:[%s23253_s17 + $0x38] sm:$0xff]  ;;  %v894_v17 = vld [vmem:[%s23253_s17 + $0x40] sm:$0xff] }
 0x107   : > { %937 = vst [vmem:[#allocation2 + $0xb0] sm:$0xff] %v913_v3  ;;  %938 = vst [vmem:[#allocation2] sm:$0xff] %v914_v7  ;;  %v919_v18 = vadd.f32 %v18192_v1, %v892_v15  ;;  %v920_v19 = vadd.f32 %v18201_v4, %v893_v16  ;;  %v921_v20 = vadd.f32 %v912_v6, %v894_v17  ;;  %v895_v21 = vld [vmem:[%s23253_s17 + $0x48] sm:$0xff]  ;;  %v896_v22 = vld [vmem:[%s23253_s17 + $0x50] sm:$0xff] }
 0x108   : > { %939 = vst [vmem:[#allocation2 + $0x10] sm:$0xff] %v915_v8  ;;  %v897_v23 = vld [vmem:[%s23253_s17 + $0x58] sm:$0xff]  ;;  %940 = vst [vmem:[#allocation2 + $0x48] sm:$0xff] %v916_v12  ;;  %v922_v24 = vadd.f32 %v18192_v1, %v895_v21  ;;  %v923_v25 = vadd.f32 %v18201_v4, %v896_v22  ;;  %v898_v27 = vld [vmem:[%s23253_s17 + $0x60] sm:$0xff] }
 0x109   : > { %941 = vst [vmem:[#allocation2 + $0x60] sm:$0xff] %v917_v13  ;;  %942 = vst [vmem:[#allocation2 + $0x28] sm:$0xff] %v918_v14  ;;  %v924_v26 = vadd.f32 %v912_v6, %v897_v23  ;;  %v899_v28 = vld [vmem:[%s23253_s17 + $0x68] sm:$0xff]  ;;  %v900_v29 = vld [vmem:[%s23253_s17 + $0x70] sm:$0xff]  ;;  %v925_v30 = vadd.f32 %v18192_v1, %v898_v27 }
 0x10a   : > { %943 = vst [vmem:[#allocation2 + $0x40] sm:$0xff] %v919_v18  ;;  %944 = vst [vmem:[#allocation2 + $0x78] sm:$0xff] %v920_v19  ;;  %v926_v31 = vadd.f32 %v18201_v4, %v899_v28  ;;  %v927_v32 = vadd.f32 %v912_v6, %v900_v29  ;;  %v901_v33 = vld [vmem:[%s23253_s17 + $0x78] sm:$0xff]  ;;  %v902_v34 = vld [vmem:[%s23253_s17 + $0x80] sm:$0xff] }
 0x10b   : > { %945 = vst [vmem:[#allocation2 + $0x88] sm:$0xff] %v921_v20  ;;  %v903_v35 = vld [vmem:[%s23253_s17 + $0x88] sm:$0xff]  ;;  %946 = vst [vmem:[#allocation2 + $0x90] sm:$0xff] %v922_v24  ;;  %v928_v36 = vadd.f32 %v18192_v1, %v901_v33  ;;  %v929_v37 = vadd.f32 %v18201_v4, %v902_v34  ;;  %v904_v39 = vld [vmem:[%s23253_s17 + $0x90] sm:$0xff] }
 0x10c   : > { %947 = vst [vmem:[#allocation2 + $0x18] sm:$0xff] %v923_v25  ;;  %948 = vst [vmem:[#allocation2 + $0x98] sm:$0xff] %v924_v26  ;;  %v930_v38 = vadd.f32 %v912_v6, %v903_v35  ;;  %v905_v40 = vld [vmem:[%s23253_s17 + $0x98] sm:$0xff]  ;;  %v906_v41 = vld [vmem:[%s23253_s17 + $0xa0] sm:$0xff]  ;;  %v931_v42 = vadd.f32 %v18192_v1, %v904_v39 }
 0x10d   : > { %949 = vst [vmem:[#allocation2 + $0x38] sm:$0xff] %v925_v30  ;;  %950 = vst [vmem:[#allocation2 + $0x50] sm:$0xff] %v926_v31  ;;  %v932_v43 = vadd.f32 %v18201_v4, %v905_v40  ;;  %v933_v44 = vadd.f32 %v912_v6, %v906_v41  ;;  %v907_v45 = vld [vmem:[%s23253_s17 + $0xa8] sm:$0xff]  ;;  %v908_v46 = vld [vmem:[%s23253_s17 + $0xb0] sm:$0xff] }
 0x10e   : > { %951 = vst [vmem:[#allocation2 + $0x70] sm:$0xff] %v927_v32  ;;  %v909_v47 = vld [vmem:[%s23253_s17 + $0xb8] sm:$0xff]  ;;  %952 = vst [vmem:[#allocation2 + $0xa0] sm:$0xff] %v928_v36  ;;  %v934_v48 = vadd.f32 %v18192_v1, %v907_v45  ;;  %v935_v49 = vadd.f32 %v18201_v4, %v908_v46 }
 0x10f   : > { %953 = vst [vmem:[#allocation2 + $0xa8] sm:$0xff] %v929_v37  ;;  %954 = vst [vmem:[#allocation2 + $0x68] sm:$0xff] %v930_v38  ;;  %v936_v50 = vadd.f32 %v912_v6, %v909_v47 }
 0x110   : > { %955 = vst [vmem:[#allocation2 + $0x30] sm:$0xff] %v931_v42  ;;  %956 = vst [vmem:[#allocation2 + $0x58] sm:$0xff] %v932_v43 }
 0x111   : > { %957 = vst [vmem:[#allocation2 + $0x80] sm:$0xff] %v933_v44  ;;  %958 = vst [vmem:[#allocation2 + $0xb8] sm:$0xff] %v934_v48 }
 0x112   : > { %959 = vst [vmem:[#allocation2 + $0x20] sm:$0xff] %v935_v49  ;;  %960 = vst [vmem:[#allocation2 + $0x8] sm:$0xff] %v936_v50 }
 0x113 PF: > { %v18287_v51 = vld [vmem:[#allocation2 + $0xb0] sm:$0xff]  ;;  %v18289_v52 = vld [vmem:[#allocation2] sm:$0xff]  ;;  %v18297_v56 = vld [vmem:[#allocation2 + $0x78] sm:$0xff]  ;;  %s23255_s4 = scalar_lea.vmem [#allocation3], %s18126_s28  ;;  %s23259_s7 = scalar_lea.vmem [#allocation5], %s18126_s28  ;;  %vm17773_vm0 = vmmov 0  }
 0x114   : > { %v18291_v53 = vld [vmem:[#allocation2 + $0x10] sm:$0xff]  ;;  %v987_v54 = vadd.f32 %v18289_v52, %v18287_v51  ;;  %v18295_v55 = vld [vmem:[#allocation2 + $0x40] sm:$0xff]  ;;  %v18299_v57 = vld [vmem:[#allocation2 + $0x88] sm:$0xff]  ;;  %vm4920_vm1 = vcmask 1043456   ;;  %s23262_s29 = sld [smem:[#allocation77_spill]]  ;;  %vm4628_vm2 = vcmask 64512  }
 0x115   : > { %v995_v58 = vadd.f32 %v18297_v56, %v18295_v55  ;;  %v18303_v59 = vld [vmem:[#allocation2 + $0x48] sm:$0xff]  ;;  %v18305_v60 = vld [vmem:[#allocation2 + $0x60] sm:$0xff]  ;;  %v18312_v0 = vld [vmem:[#allocation2 + $0x90] sm:$0xff]  ;;  %s23292_s15 = scalar_lea.vmem [#allocation8], %s18126_s28  ;;  %s23293_s9 = scalar_lea.vmem [#allocation10], %s18126_s28 }
 0x116   : > { %v18307_v61 = vld [vmem:[#allocation2 + $0x28] sm:$0xff]  ;;  %v988_v62 = vadd.f32 %v987_v54, %v18291_v53  ;;  %v991_v63 = vadd.f32 %v18305_v60, %v18303_v59  ;;  %v18314_v1 = vld [vmem:[#allocation2 + $0x18] sm:$0xff]  ;;  %v974_v6 = vld [vmem:[#allocation2 + $0x50] sm:$0xff]  ;;  %p14953_p6 = scmp.ge.s32.totalorder %s17974_s30, 1 }
 0x117   : > { %v18316_v2 = vld [vmem:[#allocation2 + $0x98] sm:$0xff]  ;;  %v996_v3 = vadd.f32 %v995_v58, %v18299_v57  ;;  %v999_v4 = vadd.f32 %v18314_v1, %v18312_v0  ;;  %v976_v9 = vld [vmem:[#allocation2 + $0xa0] sm:$0xff]  ;;  %v977_v10 = vld [vmem:[#allocation2 + $0xa8] sm:$0xff] }
 0x118   : > { %v973_v5 = vld [vmem:[#allocation2 + $0x38] sm:$0xff]  ;;  %989 = vadd.xlane.f32.xlu0 %v988_v62  ;;  %v992_v7 = vadd.f32 %v991_v63, %v18307_v61  ;;  %v975_v12 = vld [vmem:[#allocation2 + $0x70] sm:$0xff]  ;;  %v1007_v13 = vadd.f32 %v977_v10, %v976_v9  ;;  %v978_v16 = vld [vmem:[#allocation2 + $0x68] sm:$0xff] }
 0x119   : > { %v1003_v8 = vadd.f32 %v974_v6, %v973_v5  ;;  %997 = vadd.xlane.f32.xlu1 %v996_v3  ;;  %v1000_v11 = vadd.f32 %v999_v4, %v18316_v2  ;;  %v979_v14 = vld [vmem:[#allocation2 + $0x30] sm:$0xff]  ;;  %v980_v15 = vld [vmem:[#allocation2 + $0x58] sm:$0xff]  ;;  %v983_v18 = vld [vmem:[#allocation2 + $0x20] sm:$0xff] }
 0x11a   : > { %v982_v17 = vld [vmem:[#allocation2 + $0xb8] sm:$0xff]  ;;  %v981_v19 = vld [vmem:[#allocation2 + $0x80] sm:$0xff]  ;;  %v1011_v21 = vadd.f32 %v980_v15, %v979_v14  ;;  %v984_v22 = vld [vmem:[#allocation2 + $0x8] sm:$0xff]  ;;  %v1008_v23 = vadd.f32 %v1007_v13, %v978_v16 }
 0x11b   : > { %v1004_v20 = vadd.f32 %v1003_v8, %v975_v12  ;;  %v1015_v24 = vadd.f32 %v983_v18, %v982_v17  ;;  %v15892_v27 = vld [vmem:[%s18162_s24 + $0x1fc] ss:$36 sps:$4 sm:$0xff]   ;;  %v15895_v29 = vld [vmem:[%s18162_s24 + $0x1b4] ss:$36 sps:$4 sm:$0xff]   ;;  %v15898_v31 = vld [vmem:[%s18162_s24 + $0x16c] ss:$36 sps:$4 sm:$0xff]  }
 0x11c   : > { %993 = vadd.xlane.f32.xlu0 %v992_v7  ;;  %v1012_v25 = vadd.f32 %v1011_v21, %v981_v19  ;;  %v15894_v28 = vld [vmem:[%s18162_s24 + $0x1f8] ss:$36 sps:$4 sm:$0xff]   ;;  %2641 = vmatprep.subr.bf16.mxu0 %v15892_v27  ;;  %v15897_v30 = vld [vmem:[%s18162_s24 + $0x1b0] ss:$36 sps:$4 sm:$0xff]   ;;  %v15900_v32 = vld [vmem:[%s18162_s24 + $0x168] ss:$36 sps:$4 sm:$0xff]  }
 0x11d   : > { %1001 = vadd.xlane.f32.xlu1 %v1000_v11  ;;  %v1016_v26 = vadd.f32 %v1015_v24, %v984_v22  ;;  %2642 = vmatpush1.bf16.msra.mxu0 %v15894_v28  ;;  %v15916_v33 = vld [vmem:[%s18162_s24 + $0x67c] ss:$36 sps:$4 sm:$0xff]   ;;  %v15901_v34 = vld [vmem:[%s18162_s24 + $0x124] ss:$36 sps:$4 sm:$0xff]   ;;  %v15907_v39 = vld [vmem:[%s18162_s24 + $0x94] ss:$36 sps:$4 sm:$0xff]  }
 0x11e   : > { %2643 = vmatprep.subr.bf16.mxu0 %v15895_v29  ;;  %v15920_v35 = vld [vmem:[%s18162_s24 + $0x678] ss:$36 sps:$4 sm:$0xff]   ;;  %2714 = vmatprep.subr.bf16.mxu1 %v15916_v33  ;;  %v15903_v36 = vld [vmem:[%s18162_s24 + $0x120] ss:$36 sps:$4 sm:$0xff]   ;;  %v15909_v40 = vld [vmem:[%s18162_s24 + $0x90] ss:$36 sps:$4 sm:$0xff]  }
 0x11f   : > { %2715 = vmatpush1.bf16.msra.mxu1 %v15920_v35  ;;  %v15904_v37 = vld [vmem:[%s18162_s24 + $0xdc] ss:$36 sps:$4 sm:$0xff]   ;;  %v15910_v41 = vld [vmem:[%s18162_s24 + $0x4c] ss:$36 sps:$4 sm:$0xff]   ;;  %v15913_v43 = vld [vmem:[%s18162_s24 + $0x4] ss:$36 sps:$4 sm:$0xff]  }
 0x120   : > { %1005 = vadd.xlane.f32.xlu0 %v1004_v20  ;;  %v15906_v38 = vld [vmem:[%s18162_s24 + $0xd8] ss:$36 sps:$4 sm:$0xff]   ;;  %v15912_v42 = vld [vmem:[%s18162_s24 + $0x48] ss:$36 sps:$4 sm:$0xff]   ;;  %v15915_v44 = vld [vmem:[%s18162_s24] ss:$36 sps:$4 sm:$0xff]  }
 0x121   : > { %1009 = vadd.xlane.f32.xlu1 %v1008_v23  ;;  %2644 = vmatpush1.bf16.msra.mxu0 %v15897_v30  ;;  %v15918_v45 = vld [vmem:[%s18162_s24 + $0x43c] ss:$36 sps:$4 sm:$0xff]   ;;  %v17437_v23 = vld [vmem:[#allocation2 + $0x50] sm:$0xff]  ;;  %v17440_v30 = vld [vmem:[#allocation2 + $0xa8] sm:$0xff] }
 0x122   : > { %2645 = vmatprep.subr.bf16.mxu0 %v15898_v31  ;;  %v15921_v46 = vld [vmem:[%s18162_s24 + $0x438] ss:$36 sps:$4 sm:$0xff]   ;;  %v17439_v28 = vld [vmem:[#allocation2 + $0xa0] sm:$0xff] }
 0x123   : > { %v17436_v21 = vld [vmem:[#allocation2 + $0x38] sm:$0xff] }
 0x124   : > { %1013 = vadd.xlane.f32.xlu0 %v1012_v25  ;;  %v17438_v25 = vld [vmem:[#allocation2 + $0x70] sm:$0xff] }
 0x125   : > { %1017 = vadd.xlane.f32.xlu1 %v1016_v26  ;;  %2646 = vmatpush1.bf16.msra.mxu0 %v15900_v32  ;;  %v17441_v32 = vld [vmem:[#allocation2 + $0x68] sm:$0xff] }
 0x126   : > { %2647 = vmatprep.subr.bf16.mxu0 %v15901_v34 }
 0x129   : > { %2648 = vmatpush1.bf16.msra.mxu0 %v15903_v36 }
 0x12a   : > { %2649 = vmatprep.subr.bf16.mxu0 %v15904_v37 }
 0x12d   : > { %2650 = vmatpush1.bf16.msra.mxu0 %v15906_v38 }
 0x12e   : > { %2651 = vmatprep.subr.bf16.mxu0 %v15907_v39 }
 0x131   : > { %2652 = vmatpush1.bf16.msra.mxu0 %v15909_v40 }
 0x132   : > { %2653 = vmatprep.subr.bf16.mxu0 %v15910_v41 }
 0x135   : > { %2654 = vmatpush1.bf16.msra.mxu0 %v15912_v42 }
 0x136   : > { %2655 = vmatprep.subr.bf16.mxu0 %v15913_v43 }
 0x139   : > { %2656 = vmatpush1.bf16.msra.mxu0 %v15915_v44 }
 0x13a   : > { %2657 = vmatprep.subr.bf16.mxu0 %v15918_v45  ;;  %v17442_v45 = vld [vmem:[#allocation2 + $0x30] sm:$0xff] }
 0x13d   : > { %2658 = vmatpush2.bf16.msra.mxu0 %v15921_v46 }
 0x1a1   : > { %v990_v47 = vpop.xlane.xlu0 %989 }
 0x1a2   : > { %v1020_v48 = vmul.f32 0.0026041667, %v990_v47  ;;  %v998_v49 = vpop.xlane.xlu1 %997  ;;  %v17443_v47 = vld [vmem:[#allocation2 + $0x58] sm:$0xff] }
 0x1a3   : > { %v1022_v50 = vmul.f32 0.0026041667, %v998_v49  ;;  %v17444_v49 = vld [vmem:[#allocation2 + $0x80] sm:$0xff] }
 0x1a4   : > { %v18344_v54 = vsub.f32 %v18287_v51, %v1020_v48  ;;  %v18347_v58 = vsub.f32 %v18289_v52, %v1020_v48  ;;  %v18350_v62 = vsub.f32 %v18291_v53, %v1020_v48 }
 0x1a5   : > { %v18353_v63 = vsub.f32 %v18295_v55, %v1022_v50  ;;  %v18356_v3 = vsub.f32 %v18297_v56, %v1022_v50  ;;  %v18359_v4 = vsub.f32 %v18299_v57, %v1022_v50  ;;  %v994_v5 = vpop.xlane.xlu0 %993 }
 0x1a6   : > { %v1021_v6 = vmul.f32 0.0026041667, %v994_v5  ;;  %v1002_v7 = vpop.xlane.xlu1 %1001  ;;  %v1052_v51 = vmul.f32 %v18344_v54, %v18344_v54  ;;  %v1053_v52 = vmul.f32 %v18347_v58, %v18347_v58  ;;  %v1054_v53 = vmul.f32 %v18350_v62, %v18350_v62  ;;  %v17445_v5 = vld [vmem:[#allocation2 + $0xb8] sm:$0xff] }
 0x1a7   : > { %v1023_v55 = vmul.f32 0.0026041667, %v1002_v7  ;;  %v1058_v56 = vmul.f32 %v18353_v63, %v18353_v63  ;;  %v1059_v57 = vmul.f32 %v18356_v3, %v18356_v3  ;;  %v1060_v8 = vmul.f32 %v18359_v4, %v18359_v4  ;;  %v17446_v7 = vld [vmem:[#allocation2 + $0x20] sm:$0xff] }
 0x1a8   : > { %v18374_v9 = vsub.f32 %v18303_v59, %v1021_v6  ;;  %v18377_v10 = vsub.f32 %v18305_v60, %v1021_v6  ;;  %v18380_v11 = vsub.f32 %v18307_v61, %v1021_v6  ;;  %v1076_v12 = vadd.f32 %v1053_v52, %v1052_v51  ;;  %v17447_v52 = vld [vmem:[#allocation2 + $0x8] sm:$0xff] }
 0x1a9   : > { %v18383_v13 = vsub.f32 %v18312_v0, %v1023_v55  ;;  %v18386_v14 = vsub.f32 %v18314_v1, %v1023_v55  ;;  %v18389_v15 = vsub.f32 %v18316_v2, %v1023_v55  ;;  %v1006_v16 = vpop.xlane.xlu0 %1005  ;;  %v1084_v17 = vadd.f32 %v1059_v57, %v1058_v56 }
 0x1aa   : > { %v1024_v59 = vmul.f32 0.0026041667, %v1006_v16  ;;  %v1077_v18 = vadd.f32 %v1076_v12, %v1054_v53  ;;  %v1010_v19 = vpop.xlane.xlu1 %1009  ;;  %v1055_v60 = vmul.f32 %v18374_v9, %v18374_v9  ;;  %v1056_v61 = vmul.f32 %v18377_v10, %v18377_v10 }
 0x1ab   : > { %v1025_v20 = vmul.f32 0.0026041667, %v1010_v19  ;;  %v1085_v0 = vadd.f32 %v1084_v17, %v1060_v8  ;;  %v1057_v1 = vmul.f32 %v18380_v11, %v18380_v11  ;;  %v1061_v2 = vmul.f32 %v18383_v13, %v18383_v13 }
 0x1ac   : > { %v18399_v22 = vsub.f32 %v17436_v21, %v1024_v59  ;;  %v18401_v24 = vsub.f32 %v17437_v23, %v1024_v59  ;;  %v18403_v26 = vsub.f32 %v17438_v25, %v1024_v59  ;;  %1078 = vadd.xlane.f32.xlu0 %v1077_v18  ;;  %v1080_v27 = vadd.f32 %v1056_v61, %v1055_v60  ;;  %v15922_v23 = vld [vmem:[%s18162_s24 + $0x634] ss:$36 sps:$4 sm:$0xff]  }
 0x1ad   : > { %v18405_v29 = vsub.f32 %v17439_v28, %v1025_v20  ;;  %v18407_v31 = vsub.f32 %v17440_v30, %v1025_v20  ;;  %v18409_v33 = vsub.f32 %v17441_v32, %v1025_v20  ;;  %v1014_v34 = vpop.xlane.xlu0 %1013  ;;  %v1062_v35 = vmul.f32 %v18386_v14, %v18386_v14  ;;  %v15926_v28 = vld [vmem:[%s18162_s24 + $0x630] ss:$36 sps:$4 sm:$0xff]   ;;  %2716 = vmatprep.subr.bf16.mxu1 %v15922_v23 }
 0x1ae   : > { %v1026_v36 = vmul.f32 0.0026041667, %v1014_v34  ;;  %v1081_v37 = vadd.f32 %v1080_v27, %v1057_v1  ;;  %v1018_v38 = vpop.xlane.xlu1 %1017  ;;  %v1063_v39 = vmul.f32 %v18389_v15, %v18389_v15  ;;  %v1064_v40 = vmul.f32 %v18399_v22, %v18399_v22  ;;  %v15924_v27 = vld [vmem:[%s18162_s24 + $0x3f4] ss:$36 sps:$4 sm:$0xff]   ;;  %2717 = vmatpush1.bf16.msra.mxu1 %v15926_v28  ;;  %v15928_v32 = vld [vmem:[%s18162_s24 + $0x5ec] ss:$36 sps:$4 sm:$0xff]  }
 0x1af   : > { %v1027_v41 = vmul.f32 0.0026041667, %v1018_v38  ;;  %v1088_v42 = vadd.f32 %v1062_v35, %v1061_v2  ;;  %v1065_v43 = vmul.f32 %v18401_v24, %v18401_v24  ;;  %v1066_v44 = vmul.f32 %v18403_v26, %v18403_v26  ;;  %v15927_v30 = vld [vmem:[%s18162_s24 + $0x3f0] ss:$36 sps:$4 sm:$0xff]   ;;  %2659 = vmatprep.subr.bf16.mxu0 %v15924_v27  ;;  %v15932_v35 = vld [vmem:[%s18162_s24 + $0x5e8] ss:$36 sps:$4 sm:$0xff]   ;;  %2718 = vmatprep.subr.bf16.mxu1 %v15928_v32 }
 0x1b0   : > { %v18421_v46 = vsub.f32 %v17442_v45, %v1026_v36  ;;  %v18423_v48 = vsub.f32 %v17443_v47, %v1026_v36  ;;  %v18425_v50 = vsub.f32 %v17444_v49, %v1026_v36  ;;  %1086 = vadd.xlane.f32.xlu0 %v1085_v0  ;;  %1082 = vadd.xlane.f32.xlu1 %v1081_v37  ;;  %v15930_v34 = vld [vmem:[%s18162_s24 + $0x3ac] ss:$36 sps:$4 sm:$0xff]   ;;  %v15934_v37 = vld [vmem:[%s18162_s24 + $0x5a4] ss:$36 sps:$4 sm:$0xff]   ;;  %v15946_v45 = vld [vmem:[%s18162_s24 + $0x514] ss:$36 sps:$4 sm:$0xff]  }
 0x1b1   : > { %v18427_v6 = vsub.f32 %v17445_v5, %v1027_v41  ;;  %v18429_v51 = vsub.f32 %v17446_v7, %v1027_v41  ;;  %v18431_v53 = vsub.f32 %v17447_v52, %v1027_v41  ;;  %v1089_v55 = vadd.f32 %v1088_v42, %v1063_v39  ;;  %2660 = vmatpush2.bf16.msra.mxu0 %v15927_v30  ;;  %v15933_v36 = vld [vmem:[%s18162_s24 + $0x3a8] ss:$36 sps:$4 sm:$0xff]   ;;  %v15938_v39 = vld [vmem:[%s18162_s24 + $0x5a0] ss:$36 sps:$4 sm:$0xff]   ;;  %v15948_v47 = vld [vmem:[%s18162_s24 + $0x2d4] ss:$36 sps:$4 sm:$0xff]  }
 0x1b2   : > { %v1092_v56 = vadd.f32 %v1065_v43, %v1064_v40  ;;  %v1067_v57 = vmul.f32 %v18405_v29, %v18405_v29  ;;  %v1068_v8 = vmul.f32 %v18407_v31, %v18407_v31  ;;  %v1069_v12 = vmul.f32 %v18409_v33, %v18409_v33  ;;  %2661 = vmatprep.subr.bf16.mxu0 %v15930_v34  ;;  %v15936_v38 = vld [vmem:[%s18162_s24 + $0x364] ss:$36 sps:$4 sm:$0xff]   ;;  %v15940_v41 = vld [vmem:[%s18162_s24 + $0x55c] ss:$36 sps:$4 sm:$0xff]   ;;  %v15950_v49 = vld [vmem:[%s18162_s24 + $0x510] ss:$36 sps:$4 sm:$0xff]  }
 0x1b3   : > { %v1070_v16 = vmul.f32 %v18421_v46, %v18421_v46  ;;  %v1071_v17 = vmul.f32 %v18423_v48, %v18423_v48  ;;  %v1072_v59 = vmul.f32 %v18425_v50, %v18425_v50  ;;  %v1073_v18 = vmul.f32 %v18427_v6, %v18427_v6  ;;  %2719 = vmatpush1.bf16.msra.mxu1 %v15932_v35  ;;  %v15939_v40 = vld [vmem:[%s18162_s24 + $0x360] ss:$36 sps:$4 sm:$0xff]   ;;  %v15944_v43 = vld [vmem:[%s18162_s24 + $0x558] ss:$36 sps:$4 sm:$0xff]   ;;  %v15951_v5 = vld [vmem:[%s18162_s24 + $0x2d0] ss:$36 sps:$4 sm:$0xff]  }
 0x1b4   : > { %1090 = vadd.xlane.f32.xlu1 %v1089_v55  ;;  %v1093_v19 = vadd.f32 %v1092_v56, %v1066_v44  ;;  %v1096_v60 = vadd.f32 %v1068_v8, %v1067_v57  ;;  %v1074_v61 = vmul.f32 %v18429_v51, %v18429_v51  ;;  %v1075_v20 = vmul.f32 %v18431_v53, %v18431_v53  ;;  %v15942_v42 = vld [vmem:[%s18162_s24 + $0x31c] ss:$36 sps:$4 sm:$0xff]   ;;  %v15952_v7 = vld [vmem:[%s18162_s24 + $0x4cc] ss:$36 sps:$4 sm:$0xff]   ;;  %v15958_v57 = vld [vmem:[%s18162_s24 + $0x484] ss:$36 sps:$4 sm:$0xff]  }
 0x1b5   : > { %v1100_v0 = vadd.f32 %v1071_v17, %v1070_v16  ;;  %2662 = vmatpush2.bf16.msra.mxu0 %v15933_v36  ;;  %2720 = vmatprep.subr.bf16.mxu1 %v15934_v37  ;;  %v15945_v44 = vld [vmem:[%s18162_s24 + $0x318] ss:$36 sps:$4 sm:$0xff]   ;;  %v15954_v52 = vld [vmem:[%s18162_s24 + $0x28c] ss:$36 sps:$4 sm:$0xff]   ;;  %v15960_v8 = vld [vmem:[%s18162_s24 + $0x244] ss:$36 sps:$4 sm:$0xff]  }
 0x1b6   : > { %1094 = vadd.xlane.f32.xlu0 %v1093_v19  ;;  %v1097_v1 = vadd.f32 %v1096_v60, %v1069_v12  ;;  %v1104_v2 = vadd.f32 %v1074_v61, %v1073_v18  ;;  %2663 = vmatprep.subr.bf16.mxu0 %v15936_v38  ;;  %v15956_v55 = vld [vmem:[%s18162_s24 + $0x4c8] ss:$36 sps:$4 sm:$0xff]   ;;  %v15962_v12 = vld [vmem:[%s18162_s24 + $0x480] ss:$36 sps:$4 sm:$0xff]   ;;  %v23131_v17 = vmov 0  }
 0x1b7   : > { %v1101_v21 = vadd.f32 %v1100_v0, %v1072_v59  ;;  %2721 = vmatpush1.bf16.msra.mxu1 %v15938_v39  ;;  %v15957_v56 = vld [vmem:[%s18162_s24 + $0x288] ss:$36 sps:$4 sm:$0xff]   ;;  %v15963_v16 = vld [vmem:[%s18162_s24 + $0x240] ss:$36 sps:$4 sm:$0xff]   ;;  %2746 = vmatprep.mubr.bf16.mxu1 %v23131_v17 }
 0x1b8   : > { %1098 = vadd.xlane.f32.xlu1 %v1097_v1  ;;  %v1105_v25 = vadd.f32 %v1104_v2, %v1075_v20  ;;  %2722 = vmatprep.subr.bf16.mxu1 %v15940_v41  ;;  %v15966_v59 = vld [vmem:[%s18162_s24 + $0x204] ss:$36 sps:$4 sm:$0xff]   ;;  %v1157_v1 = vlaneseq }
 0x1b9   : > { %2664 = vmatpush2.bf16.msra.mxu0 %v15939_v40  ;;  %v15969_v18 = vld [vmem:[%s18162_s24 + $0x684] ss:$36 sps:$4 sm:$0xff]  }
 0x1ba   : > { %1102 = vadd.xlane.f32.xlu0 %v1101_v21  ;;  %2665 = vmatprep.subr.bf16.mxu0 %v15942_v42  ;;  %v18482_v28 = vshrl.u32 %v1157_v1, 7  ;;  %v985_v37 = vld [vmem:[%s23255_s4] sm:$0x7] }
 0x1bb   : > { %2723 = vmatpush1.bf16.msra.mxu1 %v15944_v43 }
 0x1bc   : > { %1106 = vadd.xlane.f32.xlu1 %v1105_v25  ;;  %2724 = vmatprep.subr.bf16.mxu1 %v15946_v45  ;;  %v18487_v38 = vsub.s32 1, %v18482_v28  ;;  %v18490_v42 = vsub.s32 2, %v18482_v28 }
 0x1bd   : > { %2666 = vmatpush2.bf16.msra.mxu0 %v15945_v44 }
 0x1be   : > { %2667 = vmatprep.subr.bf16.mxu0 %v15948_v47  ;;  %23256 = vst [vmem:[#allocation24_spill] sm:$0xff] %v18487_v38  ;;  %23257 = vst [vmem:[#allocation25_spill] sm:$0xff] %v18490_v42  ;;  %v18493_v47 = vsub.s32 0, %v18482_v28 }
 0x1bf   : > { %2725 = vmatpush1.bf16.msra.mxu1 %v15950_v49 }
 0x1c0   : > { %2726 = vmatprep.subr.bf16.mxu1 %v15952_v7  ;;  %23258 = vst [vmem:[#allocation26_spill] sm:$0xff] %v18493_v47  ;;  %v18496_v7 = vrot.slane %v985_v37, %v18487_v38 }
 0x1c1   : > { %2668 = vmatpush2.bf16.msra.mxu0 %v15951_v5 }
 0x1c2   : > { %2669 = vmatprep.subr.bf16.mxu0 %v15954_v52 }
 0x1c3   : > { %2727 = vmatpush1.bf16.msra.mxu1 %v15956_v55  ;;  %v986_v55 = vld [vmem:[%s23259_s7] sm:$0x7] }
 0x1c4   : > { %2728 = vmatprep.subr.bf16.mxu1 %v15958_v57 }
 0x1c5   : > { %2670 = vmatpush2.bf16.msra.mxu0 %v15957_v56  ;;  %v18501_v56 = vrot.slane %v985_v37, %v18490_v42 }
 0x1c6   : > { %2671 = vmatprep.subr.bf16.mxu0 %v15960_v8 }
 0x1c7   : > { %2729 = vmatpush1.bf16.msra.mxu1 %v15962_v12 }
 0x1c8   : > { %2787 = vmatprep.subr.bf16.mxu1 %v15966_v59  ;;  %v18507_v59 = vrot.slane %v985_v37, %v18493_v47 }
 0x1c9   : > { %2672 = vmatpush2.bf16.msra.mxu0 %v15963_v16 }
 0x1ca   : > { %2860 = vmatprep.subr.bf16.mxu0 %v15969_v18 }
 0x235   : > { %v1079_v19 = vpop.xlane.xlu0 %1078 }
 0x236   : > { %v1108_v60 = vmul.f32 0.0026041667, %v1079_v19  ;;  %v18511_v19 = vrot.slane %v986_v55, %v18487_v38 }
 0x238   : > { %v1116_v61 = vadd.f32 1e-05, %v1108_v60 }
 0x239   : > { %v1083_v20 = vpop.xlane.xlu1 %1082  ;;  %v1087_v0 = vpop.xlane.xlu0 %1086 }
 0x23a   : > { %17116 = vrsqrt.f32 %v1116_v61  ;;  %v1109_v2 = vmul.f32 0.0026041667, %v1083_v20  ;;  %v1110_v21 = vmul.f32 0.0026041667, %v1087_v0  ;;  %v18515_v20 = vrot.slane %v986_v55, %v18490_v42 }
 0x23c   : > { %v1117_v23 = vadd.f32 1e-05, %v1109_v2  ;;  %v1118_v25 = vadd.f32 1e-05, %v1110_v21  ;;  %v18522_v2 = vrot.slane %v986_v55, %v18493_v47 }
 0x23d   : > { %v1091_v27 = vpop.xlane.xlu1 %1090 }
 0x23e   : > { %17118 = vrsqrt.f32 %v1117_v23  ;;  %v1111_v30 = vmul.f32 0.0026041667, %v1091_v27 }
 0x23f   : > { %17120 = vrsqrt.f32 %v1118_v25  ;;  %v1095_v32 = vpop.xlane.xlu0 %1094 }
 0x240   : > { %v1119_v34 = vadd.f32 1e-05, %v1111_v30  ;;  %v1112_v35 = vmul.f32 0.0026041667, %v1095_v32 }
 0x241   : > { %v1099_v36 = vpop.xlane.xlu1 %1098 }
 0x242   : > { %17122 = vrsqrt.f32 %v1119_v34  ;;  %v1120_v39 = vadd.f32 1e-05, %v1112_v35  ;;  %v1113_v40 = vmul.f32 0.0026041667, %v1099_v36 }
 0x243   : > { %v1103_v41 = vpop.xlane.xlu0 %1102 }
 0x244   : > { %17124 = vrsqrt.f32 %v1120_v39  ;;  %v1121_v43 = vadd.f32 1e-05, %v1113_v40  ;;  %v1114_v44 = vmul.f32 0.0026041667, %v1103_v41  ;;  %v15964_v39 = vld [vmem:[%s18162_s24 + $0x200] ss:$36 sps:$4 sm:$0xff]  }
 0x245   : > { %v1107_v45 = vpop.xlane.xlu1 %1106  ;;  %v15967_v40 = vld [vmem:[%s18162_s24 + $0x680] ss:$36 sps:$4 sm:$0xff]  }
 0x246   : > { %17126 = vrsqrt.f32 %v1121_v43  ;;  %v1122_v49 = vadd.f32 1e-05, %v1114_v44  ;;  %v1115_v5 = vmul.f32 0.0026041667, %v1107_v45 }
 0x247   : > { %v17117_v52 = vpop.eup %17116 }
 0x248   : > { %v1123_v57 = vadd.f32 1e-05, %v1115_v5  ;;  %v1133_v8 = vmul.f32 %v17117_v52, %v18347_v58  ;;  %v1134_v12 = vmul.f32 %v17117_v52, %v18350_v62  ;;  %17128 = vrsqrt.f32 %v1122_v49  ;;  %v15972_v5 = vld [vmem:[%s18162_s24 + $0x1bc] ss:$36 sps:$4 sm:$0xff]  }
 0x249   : > { %v1132_v16 = vmul.f32 %v17117_v52, %v18344_v54 }
 0x24a   : > { %17130 = vrsqrt.f32 %v1123_v57  ;;  %v1173_v18 = vmul.f32 %v18496_v7, %v1133_v8  ;;  %v1174_v61 = vmul.f32 %v18501_v56, %v1134_v12 }
 0x24b   : > { %v17119_v60 = vpop.eup %17118  ;;  %v1172_v1 = vmul.f32 %v18507_v59, %v1132_v16 }
 0x24c   : > { %v17121_v58 = vpop.eup %17120  ;;  %v1136_v62 = vmul.f32 %v17119_v60, %v18377_v10  ;;  %v1137_v54 = vmul.f32 %v17119_v60, %v18380_v11  ;;  %v1135_v0 = vmul.f32 %v17119_v60, %v18374_v9  ;;  %v1213_v25 = vadd.f32 %v18511_v19, %v1173_v18  ;;  %v15970_v60 = vld [vmem:[%s18162_s24 + $0x1b8] ss:$36 sps:$4 sm:$0xff]  }
 0x24d   : > { %v1139_v21 = vmul.f32 %v17121_v58, %v18356_v3  ;;  %v1214_v11 = vadd.f32 %v18515_v20, %v1174_v61  ;;  %v1140_v32 = vmul.f32 %v17121_v58, %v18359_v4  ;;  %v1212_v41 = vadd.f32 %v18522_v2, %v1172_v1  ;;  %v15973_v61 = vld [vmem:[%s18162_s24 + $0x638] ss:$36 sps:$4 sm:$0xff]  }
 0x24e   : > { %v1176_v23 = vmul.f32 %v18496_v7, %v1136_v62  ;;  %v1177_v27 = vmul.f32 %v18501_v56, %v1137_v54  ;;  %v1175_v9 = vmul.f32 %v18507_v59, %v1135_v0  ;;  %v1138_v44 = vmul.f32 %v17121_v58, %v18353_v63  ;;  %v15978_v0 = vld [vmem:[%s18162_s24 + $0x174] ss:$36 sps:$4 sm:$0xff]  }
 0x24f   : > { %v17123_v10 = vpop.eup %17122  ;;  %v1179_v30 = vmul.f32 %v18496_v7, %v1139_v21  ;;  %v1180_v8 = vmul.f32 %v18501_v56, %v1140_v32  ;;  %v15981_v1 = vld [vmem:[%s18162_s24 + $0x5f4] ss:$36 sps:$4 sm:$0xff]  }
 0x250   : > { %v1216_v34 = vadd.f32 %v18511_v19, %v1176_v23  ;;  %v1217_v3 = vadd.f32 %v18515_v20, %v1177_v27  ;;  %v1142_v35 = vmul.f32 %v17123_v10, %v18386_v14  ;;  %v1143_v36 = vmul.f32 %v17123_v10, %v18389_v15  ;;  %v15975_v15 = vld [vmem:[%s18162_s24 + $0x63c] ss:$36 sps:$4 sm:$0xff]   ;;  %v15976_v32 = vld [vmem:[%s18162_s24 + $0x170] ss:$36 sps:$4 sm:$0xff]  }
 0x251   : > { %v17125_v37 = vpop.eup %17124  ;;  %v1215_v43 = vadd.f32 %v18522_v2, %v1175_v9  ;;  %v1141_v4 = vmul.f32 %v17123_v10, %v18383_v13  ;;  %v1219_v12 = vadd.f32 %v18511_v19, %v1179_v30 }
 0x252   : > { %v18542_v45 = vpack.c.bf16 %v1216_v34, %v1213_v25  ;;  %v18544_v49 = vpack.c.bf16 %v1217_v3, %v1214_v11  ;;  %v1182_v14 = vmul.f32 %v18496_v7, %v1142_v35  ;;  %v1183_v52 = vmul.f32 %v18501_v56, %v1143_v36  ;;  %v15979_v3 = vld [vmem:[%s18162_s24 + $0x5f0] ss:$36 sps:$4 sm:$0xff]  }
 0x253   : > { %v17127_v55 = vpop.eup %17126  ;;  %v18550_v57 = vpack.c.bf16 %v1215_v43, %v1212_v41  ;;  %v1181_v63 = vmul.f32 %v18507_v59, %v1141_v4  ;;  %v1145_v13 = vmul.f32 %v17125_v37, %v18401_v24  ;;  %v1178_v24 = vmul.f32 %v18507_v59, %v1138_v44  ;;  %v15982_v4 = vld [vmem:[%s18162_s24 + $0x128] ss:$36 sps:$4 sm:$0xff]  }
 0x254   : > { %2673 = vmatprep.mubr.bf16.mxu0 %v18542_v45  ;;  %2747 = vmatmul.mubr.bf16.vlgmr.msra.gmra.mxu1 %v18544_v49  ;;  %v1222_v16 = vadd.f32 %v18511_v19, %v1182_v14  ;;  %v1148_v18 = vmul.f32 %v17127_v55, %v18407_v31  ;;  %v1223_v58 = vadd.f32 %v18515_v20, %v1183_v52  ;;  %v15990_v14 = vld [vmem:[%s18162_s24 + $0xe4] ss:$36 sps:$4 sm:$0xff]  }
 0x255   : > { %2788 = vmatpush1.bf16.msra.mxu1 %v15964_v39  ;;  %2674 = vmatmul.mubr.bf16.vlgmr.msra.gmra.mxu0 %v18550_v57  ;;  %v18565_v62 = vpop.eup %17128  ;;  %v1185_v31 = vmul.f32 %v18496_v7, %v1145_v13  ;;  %v1220_v25 = vadd.f32 %v18515_v20, %v1180_v8  ;;  %v1221_v27 = vadd.f32 %v18522_v2, %v1181_v63  ;;  %v15993_v52 = vld [vmem:[%s18162_s24 + $0x564] ss:$36 sps:$4 sm:$0xff]  }
 0x256   : > { %2861 = vmatpush1.bf16.msra.mxu0 %v15967_v40  ;;  %2789 = vmatprep.subr.bf16.mxu1 %v15972_v5  ;;  %v18567_v54 = vpack.c.bf16 %v1222_v16, %v1219_v12  ;;  %v1188_v21 = vmul.f32 %v18496_v7, %v1148_v18  ;;  %v1146_v11 = vmul.f32 %v17125_v37, %v18403_v26  ;;  %v15987_v40 = vld [vmem:[%s18162_s24 + $0x5ac] ss:$36 sps:$4 sm:$0xff]  }
 0x257   : > { %v17131_v23 = vpop.eup %17130  ;;  %2862 = vmatprep.subr.bf16.mxu0 %v15975_v15  ;;  %2756 = vmatprep.mubr.bf16.mxu1 %v23131_v17  ;;  %v1149_v9 = vmul.f32 %v17127_v55, %v18409_v33  ;;  %v1147_v30 = vmul.f32 %v17127_v55, %v18405_v29  ;;  %v18582_v34 = vpack.c.bf16 %v1223_v58, %v1220_v25  ;;  %v15984_v33 = vld [vmem:[%s18162_s24 + $0x12c] ss:$36 sps:$4 sm:$0xff]   ;;  %v16002_v25 = vld [vmem:[%s18162_s24 + $0x54] ss:$36 sps:$4 sm:$0xff]  }
 0x258   : > { %2683 = vmatprep.mubr.bf16.mxu0 %v18567_v54  ;;  %v1228_v10 = vadd.f32 %v18511_v19, %v1188_v21  ;;  %v1218_v35 = vadd.f32 %v18522_v2, %v1178_v24  ;;  %v1144_v36 = vmul.f32 %v17125_v37, %v18399_v22  ;;  %v1154_v39 = vmul.f32 %v17131_v23, %v18429_v51  ;;  %v15985_v5 = vld [vmem:[%s18162_s24 + $0x5a8] ss:$36 sps:$4 sm:$0xff]   ;;  %v15997_v21 = vld [vmem:[%s18162_s24 + $0x518] ss:$36 sps:$4 sm:$0xff]  }
 0x259   : > { %2790 = vmatpush1.bf16.msra.mxu1 %v15970_v60  ;;  %v1225_v26 = vadd.f32 %v18511_v19, %v1185_v31  ;;  %v1189_v29 = vmul.f32 %v18501_v56, %v1149_v9  ;;  %v1151_v41 = vmul.f32 %v18565_v62, %v18423_v48  ;;  %v1187_v22 = vmul.f32 %v18507_v59, %v1147_v30  ;;  %v16003_v9 = vld [vmem:[%s18162_s24 + $0x4d0] ss:$36 sps:$4 sm:$0xff]  }
 0x25a   : > { %2863 = vmatpush1.bf16.msra.mxu0 %v15973_v61  ;;  %2791 = vmatprep.subr.bf16.mxu1 %v15978_v0  ;;  %v18594_v43 = vpack.c.bf16 %v1221_v27, %v1218_v35  ;;  %v1186_v37 = vmul.f32 %v18501_v56, %v1146_v11  ;;  %v1194_v44 = vmul.f32 %v18496_v7, %v1154_v39  ;;  %v15996_v0 = vld [vmem:[%s18162_s24 + $0x9c] ss:$36 sps:$4 sm:$0xff]   ;;  %v16011_v35 = vld [vmem:[%s18162_s24 + $0x48c] ss:$36 sps:$4 sm:$0xff]   ;;  %v16014_v39 = vld [vmem:[%s18162_s24 + $0x444] ss:$36 sps:$4 sm:$0xff]  }
 0x25b   : > { %2864 = vmatprep.subr.bf16.mxu0 %v15981_v1  ;;  %v18598_v51 = vpack.c.bf16 %v1228_v10, %v1225_v26  ;;  %v1184_v48 = vmul.f32 %v18507_v59, %v1144_v36  ;;  %v1229_v15 = vadd.f32 %v18515_v20, %v1189_v29  ;;  %v1191_v55 = vmul.f32 %v18496_v7, %v1151_v41  ;;  %v15988_v7 = vld [vmem:[%s18162_s24 + $0xe0] ss:$36 sps:$4 sm:$0xff]   ;;  %v16005_v10 = vld [vmem:[%s18162_s24 + $0x4d4] ss:$36 sps:$4 sm:$0xff]   ;;  %v16017_v26 = vld [vmem:[%s18162_s24 + $0x20c] ss:$36 sps:$4 sm:$0xff]  }
 0x25c   : > { %2757 = vmatmul.mubr.bf16.gmra.mxu1 %v18582_v34  ;;  %v1155_v8 = vmul.f32 %v17131_v23, %v18431_v53  ;;  %v1227_v63 = vadd.f32 %v18522_v2, %v1187_v22  ;;  %v1226_v13 = vadd.f32 %v18515_v20, %v1186_v37  ;;  %v1234_v12 = vadd.f32 %v18511_v19, %v1194_v44  ;;  %v15991_v53 = vld [vmem:[%s18162_s24 + $0x560] ss:$36 sps:$4 sm:$0xff]   ;;  %v16018_v22 = vld [vmem:[%s18162_s24 + $0x3f8] ss:$36 sps:$4 sm:$0xff]  }
 0x25d   : > { %2792 = vmatpush1.bf16.msra.mxu1 %v15976_v32  ;;  %2684 = vmatmul.mubr.bf16.gmra.mxu0 %v18594_v43  ;;  %v1152_v16 = vmul.f32 %v18565_v62, %v18425_v50  ;;  %v1153_v18 = vmul.f32 %v17131_v23, %v18427_v6  ;;  %v1224_v60 = vadd.f32 %v18522_v2, %v1184_v48  ;;  %v15999_v50 = vld [vmem:[%s18162_s24 + $0x51c] ss:$36 sps:$4 sm:$0xff]   ;;  %v16023_v41 = vld [vmem:[%s18162_s24 + $0x1c4] ss:$36 sps:$4 sm:$0xff]   ;;  %v16026_v44 = vld [vmem:[%s18162_s24 + $0x3b4] ss:$36 sps:$4 sm:$0xff]  }
 0x25e   : > { %2865 = vmatpush1.bf16.msra.mxu0 %v15979_v3  ;;  %2693 = vmatprep.mubr.bf16.mxu0 %v18598_v51  ;;  %v1150_v61 = vmul.f32 %v18565_v62, %v18421_v46  ;;  %v18624_v58 = vpack.c.bf16 %v1229_v15, %v1226_v13  ;;  %v1231_v24 = vadd.f32 %v18511_v19, %v1191_v55  ;;  %v15994_v19 = vld [vmem:[%s18162_s24 + $0x98] ss:$36 sps:$4 sm:$0xff]   ;;  %v16008_v3 = vld [vmem:[%s18162_s24 + $0xc] ss:$36 sps:$4 sm:$0xff]   ;;  %v16021_v37 = vld [vmem:[%s18162_s24 + $0x1c0] ss:$36 sps:$4 sm:$0xff]  }
 0x25f   : > { %2793 = vmatprep.subr.bf16.mxu1 %v15984_v33  ;;  %2866 = vmatprep.subr.bf16.mxu0 %v15987_v40  ;;  %v1195_v6 = vmul.f32 %v18501_v56, %v1155_v8  ;;  %v18630_v1 = vpack.c.bf16 %v1227_v63, %v1224_v60  ;;  %v1193_v31 = vmul.f32 %v18507_v59, %v1153_v18  ;;  %v16012_v33 = vld [vmem:[%s18162_s24 + $0x440] ss:$36 sps:$4 sm:$0xff]   ;;  %v16015_v40 = vld [vmem:[%s18162_s24 + $0x208] ss:$36 sps:$4 sm:$0xff]   ;;  %v16027_v48 = vld [vmem:[%s18162_s24 + $0x178] ss:$36 sps:$4 sm:$0xff]  }
 0x260   : > { %2766 = vmatprep.mubr.bf16.mxu1 %v23131_v17  ;;  %v18634_v46 = vpack.c.bf16 %v1234_v12, %v1231_v24  ;;  %v1192_v62 = vmul.f32 %v18501_v56, %v1152_v16  ;;  %v1190_v23 = vmul.f32 %v18507_v59, %v1150_v61  ;;  %v16000_v59 = vld [vmem:[%s18162_s24 + $0x50] ss:$36 sps:$4 sm:$0xff]   ;;  %v16020_v29 = vld [vmem:[%s18162_s24 + $0x3fc] ss:$36 sps:$4 sm:$0xff]   ;;  %v16038_v8 = vld [vmem:[%s18162_s24 + $0x324] ss:$36 sps:$4 sm:$0xff]  }
 0x261   : > { %2794 = vmatpush1.bf16.msra.mxu1 %v15982_v4  ;;  %v1235_v27 = vadd.f32 %v18515_v20, %v1195_v6  ;;  %v1233_v56 = vadd.f32 %v18522_v2, %v1193_v31  ;;  %v16029_v4 = vld [vmem:[%s18162_s24 + $0x17c] ss:$36 sps:$4 sm:$0xff]   ;;  %v16035_v15 = vld [vmem:[%s18162_s24 + $0x134] ss:$36 sps:$4 sm:$0xff]   ;;  %v16041_v63 = vld [vmem:[%s18162_s24 + $0xec] ss:$36 sps:$4 sm:$0xff]  }
 0x262   : > { %2867 = vmatpush1.bf16.msra.mxu0 %v15985_v5  ;;  %2795 = vmatprep.subr.bf16.mxu1 %v15990_v14  ;;  %v1232_v11 = vadd.f32 %v18515_v20, %v1192_v62  ;;  %v1230_v30 = vadd.f32 %v18522_v2, %v1190_v23  ;;  %v16006_v20 = vld [vmem:[%s18162_s24 + $0x8] ss:$36 sps:$4 sm:$0xff]   ;;  %v16024_v5 = vld [vmem:[%s18162_s24 + $0x3b0] ss:$36 sps:$4 sm:$0xff]   ;;  %v16036_v13 = vld [vmem:[%s18162_s24 + $0x320] ss:$36 sps:$4 sm:$0xff]  }
 0x263   : > { %2868 = vmatprep.subr.bf16.mxu0 %v15993_v52  ;;  %v16009_v2 = vld [vmem:[%s18162_s24 + $0x488] ss:$36 sps:$4 sm:$0xff]   ;;  %v16033_v55 = vld [vmem:[%s18162_s24 + $0x130] ss:$36 sps:$4 sm:$0xff]   ;;  %v16044_v16 = vld [vmem:[%s18162_s24 + $0x2dc] ss:$36 sps:$4 sm:$0xff]  }
 0x264   : > { %2767 = vmatmul.mubr.bf16.gmra.mxu1 %v18624_v58  ;;  %v18651_v32 = vpack.c.bf16 %v1235_v27, %v1232_v11  ;;  %v18655_v36 = vpack.c.bf16 %v1233_v56, %v1230_v30  ;;  %v16032_v14 = vld [vmem:[%s18162_s24 + $0x36c] ss:$36 sps:$4 sm:$0xff]   ;;  %v16047_v18 = vld [vmem:[%s18162_s24 + $0xa4] ss:$36 sps:$4 sm:$0xff]   ;;  %v16050_v60 = vld [vmem:[%s18162_s24 + $0x294] ss:$36 sps:$4 sm:$0xff]  }
 0x265   : > { %2796 = vmatpush1.bf16.msra.mxu1 %v15988_v7  ;;  %2694 = vmatmul.mubr.bf16.gmra.mxu0 %v18630_v1  ;;  %v16030_v52 = vld [vmem:[%s18162_s24 + $0x368] ss:$36 sps:$4 sm:$0xff]   ;;  %v16042_v7 = vld [vmem:[%s18162_s24 + $0x2d8] ss:$36 sps:$4 sm:$0xff]   ;;  %v16048_v24 = vld [vmem:[%s18162_s24 + $0x290] ss:$36 sps:$4 sm:$0xff]  }
 0x266   : > { %2869 = vmatpush1.bf16.msra.mxu0 %v15991_v53  ;;  %2703 = vmatprep.mubr.bf16.mxu0 %v18634_v46  ;;  %v16039_v12 = vld [vmem:[%s18162_s24 + $0xe8] ss:$36 sps:$4 sm:$0xff]   ;;  %v16045_v53 = vld [vmem:[%s18162_s24 + $0xa0] ss:$36 sps:$4 sm:$0xff]   ;;  %v16059_v6 = vld [vmem:[%s18162_s24 + $0x14] ss:$36 sps:$4 sm:$0xff]  }
 0x267   : > { %2797 = vmatprep.subr.bf16.mxu1 %v15996_v0  ;;  %2870 = vmatprep.subr.bf16.mxu0 %v15999_v50  ;;  %v16053_v61 = vld [vmem:[%s18162_s24 + $0x5c] ss:$36 sps:$4 sm:$0xff]   ;;  %v16056_v50 = vld [vmem:[%s18162_s24 + $0x24c] ss:$36 sps:$4 sm:$0xff]   ;;  %v16068_v27 = vld [vmem:[%s18162_s24 + $0x644] ss:$36 sps:$4 sm:$0xff]  }
 0x268   : > { %2776 = vmatprep.mubr.bf16.mxu1 %v23131_v17  ;;  %v16051_v0 = vld [vmem:[%s18162_s24 + $0x58] ss:$36 sps:$4 sm:$0xff]   ;;  %v16054_v31 = vld [vmem:[%s18162_s24 + $0x248] ss:$36 sps:$4 sm:$0xff]   ;;  %v16057_v62 = vld [vmem:[%s18162_s24 + $0x10] ss:$36 sps:$4 sm:$0xff]  }
 0x269   : > { %2798 = vmatpush1.bf16.msra.mxu1 %v15994_v19  ;;  %v16062_v19 = vld [vmem:[%s18162_s24 + $0x68c] ss:$36 sps:$4 sm:$0xff]   ;;  %v16066_v56 = vld [vmem:[%s18162_s24 + $0x640] ss:$36 sps:$4 sm:$0xff]   ;;  %v16072_v30 = vld [vmem:[%s18162_s24 + $0x5f8] ss:$36 sps:$4 sm:$0xff]  }
 0x26a   : > { %2871 = vmatpush1.bf16.msra.mxu0 %v15997_v21  ;;  %2799 = vmatprep.subr.bf16.mxu1 %v16002_v25  ;;  %v16065_v21 = vld [vmem:[%s18162_s24 + $0x44c] ss:$36 sps:$4 sm:$0xff]   ;;  %v16069_v11 = vld [vmem:[%s18162_s24 + $0x400] ss:$36 sps:$4 sm:$0xff]  }
 0x26b   : > { %2872 = vmatprep.subr.bf16.mxu0 %v16005_v10  ;;  %v16060_v23 = vld [vmem:[%s18162_s24 + $0x688] ss:$36 sps:$4 sm:$0xff]  }
 0x26c   : > { %2777 = vmatmul.mubr.bf16.gmra.mxu1 %v18651_v32  ;;  %v16063_v25 = vld [vmem:[%s18162_s24 + $0x448] ss:$36 sps:$4 sm:$0xff]  }
 0x26d   : > { %2800 = vmatpush1.bf16.msra.mxu1 %v16000_v59  ;;  %2704 = vmatmul.mubr.bf16.gmra.mxu0 %v18655_v36  ;;  %v16071_v10 = vld [vmem:[%s18162_s24 + $0x404] ss:$36 sps:$4 sm:$0xff]   ;;  %v16074_v59 = vld [vmem:[%s18162_s24 + $0x5fc] ss:$36 sps:$4 sm:$0xff]  }
 0x26e   : > { %2819 = vmatprep.mubr.bf16.mxu1 %v18542_v45  ;;  %2873 = vmatpush1.bf16.msra.mxu0 %v16003_v9  ;;  %v16077_v9 = vld [vmem:[%s18162_s24 + $0x3bc] ss:$36 sps:$4 sm:$0xff]  }
 0x26f   : > { %2801 = vmatprep.subr.bf16.mxu1 %v16008_v3  ;;  %2874 = vmatprep.subr.bf16.mxu0 %v16011_v35  ;;  %v16075_v3 = vld [vmem:[%s18162_s24 + $0x3b8] ss:$36 sps:$4 sm:$0xff]  }
 0x270   : > { %2892 = vmatprep.mubr.bf16.mxu0 %v23131_v17  ;;  %v16080_v35 = vld [vmem:[%s18162_s24 + $0x5b4] ss:$36 sps:$4 sm:$0xff]  }
 0x271   : > { %2802 = vmatpush1.bf16.msra.mxu1 %v16006_v20  ;;  %v16083_v20 = vld [vmem:[%s18162_s24 + $0x374] ss:$36 sps:$4 sm:$0xff]  }
 0x272   : > { %2875 = vmatpush1.bf16.msra.mxu0 %v16009_v2  ;;  %2803 = vmatprep.subr.bf16.mxu1 %v16014_v39  ;;  %v16078_v2 = vld [vmem:[%s18162_s24 + $0x5b0] ss:$36 sps:$4 sm:$0xff]  }
 0x273   : > { %2933 = vmatprep.subr.bf16.mxu0 %v16017_v26  ;;  %v16081_v39 = vld [vmem:[%s18162_s24 + $0x370] ss:$36 sps:$4 sm:$0xff]  }
 0x274   : > { %v16086_v26 = vld [vmem:[%s18162_s24 + $0x56c] ss:$36 sps:$4 sm:$0xff]  }
 0x275   : > { %2804 = vmatpush2.bf16.msra.mxu1 %v16012_v33  ;;  %2893 = vmatmul.mubr.bf16.vlgmr.msra.gmra.mxu0 %v18544_v49  ;;  %v16089_v33 = vld [vmem:[%s18162_s24 + $0x32c] ss:$36 sps:$4 sm:$0xff]  }
 0x276   : > { %2934 = vmatpush1.bf16.msra.mxu0 %v16015_v40  ;;  %2805 = vmatprep.subr.bf16.mxu1 %v16020_v29  ;;  %v16084_v40 = vld [vmem:[%s18162_s24 + $0x568] ss:$36 sps:$4 sm:$0xff]  }
 0x277   : > { %2935 = vmatprep.subr.bf16.mxu0 %v16023_v41  ;;  %2902 = vmatprep.mubr.bf16.mxu0 %v23131_v17  ;;  %v16087_v29 = vld [vmem:[%s18162_s24 + $0x328] ss:$36 sps:$4 sm:$0xff]  }
 0x278   : > { %v16092_v41 = vld [vmem:[%s18162_s24 + $0x524] ss:$36 sps:$4 sm:$0xff]  }
 0x279   : > { %2806 = vmatpush2.bf16.msra.mxu1 %v16018_v22  ;;  %v16095_v22 = vld [vmem:[%s18162_s24 + $0x2e4] ss:$36 sps:$4 sm:$0xff]  }
 0x27a   : > { %2936 = vmatpush1.bf16.msra.mxu0 %v16021_v37  ;;  %2807 = vmatprep.subr.bf16.mxu1 %v16026_v44  ;;  %v16090_v37 = vld [vmem:[%s18162_s24 + $0x520] ss:$36 sps:$4 sm:$0xff]  }
 0x27b   : > { %2937 = vmatprep.subr.bf16.mxu0 %v16029_v4  ;;  %v16093_v44 = vld [vmem:[%s18162_s24 + $0x2e0] ss:$36 sps:$4 sm:$0xff]  }
 0x27c   : > { %v16098_v4 = vld [vmem:[%s18162_s24 + $0x4dc] ss:$36 sps:$4 sm:$0xff]  }
 0x27d   : > { %2808 = vmatpush2.bf16.msra.mxu1 %v16024_v5  ;;  %2903 = vmatmul.mubr.bf16.gmra.mxu0 %v18582_v34  ;;  %v16101_v5 = vld [vmem:[%s18162_s24 + $0x29c] ss:$36 sps:$4 sm:$0xff]  }
 0x27e   : > { %2938 = vmatpush1.bf16.msra.mxu0 %v16027_v48  ;;  %2809 = vmatprep.subr.bf16.mxu1 %v16032_v14  ;;  %v16096_v48 = vld [vmem:[%s18162_s24 + $0x4d8] ss:$36 sps:$4 sm:$0xff]  }
 0x27f   : > { %2939 = vmatprep.subr.bf16.mxu0 %v16035_v15  ;;  %2912 = vmatprep.mubr.bf16.mxu0 %v23131_v17  ;;  %v16099_v14 = vld [vmem:[%s18162_s24 + $0x298] ss:$36 sps:$4 sm:$0xff]  }
 0x280   : > { %v16104_v15 = vld [vmem:[%s18162_s24 + $0x494] ss:$36 sps:$4 sm:$0xff]  }
 0x281   : > { %2810 = vmatpush2.bf16.msra.mxu1 %v16030_v52  ;;  %v16107_v52 = vld [vmem:[%s18162_s24 + $0x254] ss:$36 sps:$4 sm:$0xff]  }
 0x282   : > { %2940 = vmatpush1.bf16.msra.mxu0 %v16033_v55  ;;  %2811 = vmatprep.subr.bf16.mxu1 %v16038_v8  ;;  %v16102_v55 = vld [vmem:[%s18162_s24 + $0x490] ss:$36 sps:$4 sm:$0xff]  }
 0x283   : > { %2941 = vmatprep.subr.bf16.mxu0 %v16041_v63  ;;  %v16105_v8 = vld [vmem:[%s18162_s24 + $0x250] ss:$36 sps:$4 sm:$0xff]  }
 0x284   : > { %v16110_v63 = vld [vmem:[%s18162_s24 + $0x214] ss:$36 sps:$4 sm:$0xff]  }
 0x285   : > { %2812 = vmatpush2.bf16.msra.mxu1 %v16036_v13  ;;  %2913 = vmatmul.mubr.bf16.gmra.mxu0 %v18624_v58  ;;  %v16113_v13 = vld [vmem:[%s18162_s24 + $0x694] ss:$36 sps:$4 sm:$0xff]  }
 0x286   : > { %2942 = vmatpush1.bf16.msra.mxu0 %v16039_v12  ;;  %2813 = vmatprep.subr.bf16.mxu1 %v16044_v16  ;;  %v16108_v12 = vld [vmem:[%s18162_s24 + $0x210] ss:$36 sps:$4 sm:$0xff]  }
 0x287   : > { %2943 = vmatprep.subr.bf16.mxu0 %v16047_v18  ;;  %2922 = vmatprep.mubr.bf16.mxu0 %v23131_v17  ;;  %v16111_v16 = vld [vmem:[%s18162_s24 + $0x690] ss:$36 sps:$4 sm:$0xff]  }
 0x288   : > { %v16116_v18 = vld [vmem:[%s18162_s24 + $0x1cc] ss:$36 sps:$4 sm:$0xff]  }
 0x289   : > { %2814 = vmatpush2.bf16.msra.mxu1 %v16042_v7  ;;  %v16119_v7 = vld [vmem:[%s18162_s24 + $0x64c] ss:$36 sps:$4 sm:$0xff]  }
 0x28a   : > { %2944 = vmatpush1.bf16.msra.mxu0 %v16045_v53  ;;  %2815 = vmatprep.subr.bf16.mxu1 %v16050_v60  ;;  %v16114_v53 = vld [vmem:[%s18162_s24 + $0x1c8] ss:$36 sps:$4 sm:$0xff]  }
 0x28b   : > { %2945 = vmatprep.subr.bf16.mxu0 %v16053_v61  ;;  %v16117_v60 = vld [vmem:[%s18162_s24 + $0x648] ss:$36 sps:$4 sm:$0xff]  }
 0x28c   : > { %v16122_v61 = vld [vmem:[%s18162_s24 + $0x184] ss:$36 sps:$4 sm:$0xff]  }
 0x28d   : > { %2816 = vmatpush2.bf16.msra.mxu1 %v16048_v24  ;;  %2923 = vmatmul.mubr.bf16.gmra.mxu0 %v18651_v32  ;;  %v16125_v24 = vld [vmem:[%s18162_s24 + $0x604] ss:$36 sps:$4 sm:$0xff]  }
 0x28e   : > { %2946 = vmatpush1.bf16.msra.mxu0 %v16051_v0  ;;  %2965 = vmatprep.mubr.bf16.mxu0 %v18542_v45  ;;  %v16120_v0 = vld [vmem:[%s18162_s24 + $0x180] ss:$36 sps:$4 sm:$0xff]  }
 0x28f   : > { %2817 = vmatprep.subr.bf16.mxu1 %v16056_v50  ;;  %2947 = vmatprep.subr.bf16.mxu0 %v16059_v6  ;;  %v16123_v50 = vld [vmem:[%s18162_s24 + $0x600] ss:$36 sps:$4 sm:$0xff]  }
 0x290   : > { %v16128_v6 = vld [vmem:[%s18162_s24 + $0x13c] ss:$36 sps:$4 sm:$0xff]  }
 0x291   : > { %2818 = vmatpush2.bf16.msra.mxu1 %v16054_v31  ;;  %v16131_v31 = vld [vmem:[%s18162_s24 + $0x5bc] ss:$36 sps:$4 sm:$0xff]  }
 0x292   : > { %2948 = vmatpush1.bf16.msra.mxu0 %v16057_v62  ;;  %3006 = vmatprep.subr.bf16.mxu1 %v16062_v19  ;;  %v16126_v62 = vld [vmem:[%s18162_s24 + $0x138] ss:$36 sps:$4 sm:$0xff]  }
 0x293   : > { %2949 = vmatprep.subr.bf16.mxu0 %v16065_v21  ;;  %v16129_v19 = vld [vmem:[%s18162_s24 + $0x5b8] ss:$36 sps:$4 sm:$0xff]  }
 0x294   : > { %2820 = vmatmul.mubr.bf16.vlgmr.msra.gmra.mxu1 %v18550_v57  ;;  %v16134_v21 = vld [vmem:[%s18162_s24 + $0xf4] ss:$36 sps:$4 sm:$0xff]  }
 0x295   : > { %2829 = vmatprep.mubr.bf16.mxu1 %v18567_v54  ;;  %3007 = vmatpush1.bf16.msra.mxu1 %v16060_v23  ;;  %v16137_v23 = vld [vmem:[%s18162_s24 + $0x574] ss:$36 sps:$4 sm:$0xff]  }
 0x296   : > { %2950 = vmatpush2.bf16.msra.mxu0 %v16063_v25  ;;  %3008 = vmatprep.subr.bf16.mxu1 %v16068_v27  ;;  %v16132_v25 = vld [vmem:[%s18162_s24 + $0xf0] ss:$36 sps:$4 sm:$0xff]  }
 0x297   : > { %2951 = vmatprep.subr.bf16.mxu0 %v16071_v10  ;;  %v16135_v27 = vld [vmem:[%s18162_s24 + $0x570] ss:$36 sps:$4 sm:$0xff]  }
 0x298   : > { %v16140_v10 = vld [vmem:[%s18162_s24 + $0xac] ss:$36 sps:$4 sm:$0xff]  }
 0x299   : > { %3009 = vmatpush1.bf16.msra.mxu1 %v16066_v56  ;;  %v16143_v56 = vld [vmem:[%s18162_s24 + $0x52c] ss:$36 sps:$4 sm:$0xff]  }
 0x29a   : > { %2952 = vmatpush2.bf16.msra.mxu0 %v16069_v11  ;;  %3010 = vmatprep.subr.bf16.mxu1 %v16074_v59  ;;  %v16138_v11 = vld [vmem:[%s18162_s24 + $0xa8] ss:$36 sps:$4 sm:$0xff]  }
 0x29b   : > { %2953 = vmatprep.subr.bf16.mxu0 %v16077_v9  ;;  %v16141_v59 = vld [vmem:[%s18162_s24 + $0x528] ss:$36 sps:$4 sm:$0xff]  }
 0x29c   : > { %2830 = vmatmul.mubr.bf16.gmra.mxu1 %v18594_v43  ;;  %v16146_v9 = vld [vmem:[%s18162_s24 + $0x64] ss:$36 sps:$4 sm:$0xff]  }
 0x29d   : > { %2839 = vmatprep.mubr.bf16.mxu1 %v18598_v51  ;;  %3011 = vmatpush1.bf16.msra.mxu1 %v16072_v30  ;;  %v16149_v30 = vld [vmem:[%s18162_s24 + $0x4e4] ss:$36 sps:$4 sm:$0xff]  }
 0x29e   : > { %2954 = vmatpush2.bf16.msra.mxu0 %v16075_v3  ;;  %3012 = vmatprep.subr.bf16.mxu1 %v16080_v35  ;;  %v16144_v3 = vld [vmem:[%s18162_s24 + $0x60] ss:$36 sps:$4 sm:$0xff]  }
 0x29f   : > { %2955 = vmatprep.subr.bf16.mxu0 %v16083_v20  ;;  %v16147_v35 = vld [vmem:[%s18162_s24 + $0x4e0] ss:$36 sps:$4 sm:$0xff]  }
 0x2a0   : > { %v16152_v20 = vld [vmem:[%s18162_s24 + $0x1c] ss:$36 sps:$4 sm:$0xff]  }
 0x2a1   : > { %3013 = vmatpush1.bf16.msra.mxu1 %v16078_v2  ;;  %v16155_v2 = vld [vmem:[%s18162_s24 + $0x49c] ss:$36 sps:$4 sm:$0xff]  }
 0x2a2   : > { %2956 = vmatpush2.bf16.msra.mxu0 %v16081_v39  ;;  %3014 = vmatprep.subr.bf16.mxu1 %v16086_v26  ;;  %v16150_v39 = vld [vmem:[%s18162_s24 + $0x18] ss:$36 sps:$4 sm:$0xff]  }
 0x2a3   : > { %2957 = vmatprep.subr.bf16.mxu0 %v16089_v33  ;;  %v16153_v26 = vld [vmem:[%s18162_s24 + $0x498] ss:$36 sps:$4 sm:$0xff]  }
 0x2a4   : > { %2840 = vmatmul.mubr.bf16.gmra.mxu1 %v18630_v1  ;;  %v16158_v33 = vld [vmem:[%s18162_s24 + $0x454] ss:$36 sps:$4 sm:$0xff]  }
 0x2a5   : > { %2849 = vmatprep.mubr.bf16.mxu1 %v18634_v46  ;;  %3015 = vmatpush1.bf16.msra.mxu1 %v16084_v40  ;;  %v16159_v40 = vld [vmem:[%s18162_s24 + $0x458] ss:$36 sps:$4 sm:$0xff]  }
 0x2a6   : > { %2958 = vmatpush2.bf16.msra.mxu0 %v16087_v29  ;;  %3016 = vmatprep.subr.bf16.mxu1 %v16092_v41  ;;  %v16156_v29 = vld [vmem:[%s18162_s24 + $0x450] ss:$36 sps:$4 sm:$0xff]   ;;  %v16160_v41 = vld [vmem:[%s18162_s24 + $0x218] ss:$36 sps:$4 sm:$0xff]  }
 0x2a7   : > { %2959 = vmatprep.subr.bf16.mxu0 %v16095_v22  ;;  %v16163_v22 = vld [vmem:[%s18162_s24 + $0x40c] ss:$36 sps:$4 sm:$0xff]  }
 0x2a9   : > { %3017 = vmatpush1.bf16.msra.mxu1 %v16090_v37  ;;  %v16164_v37 = vld [vmem:[%s18162_s24 + $0x410] ss:$36 sps:$4 sm:$0xff]  }
 0x2aa   : > { %2960 = vmatpush2.bf16.msra.mxu0 %v16093_v44  ;;  %3018 = vmatprep.subr.bf16.mxu1 %v16098_v4  ;;  %v16161_v44 = vld [vmem:[%s18162_s24 + $0x408] ss:$36 sps:$4 sm:$0xff]   ;;  %v16165_v4 = vld [vmem:[%s18162_s24 + $0x1d0] ss:$36 sps:$4 sm:$0xff]  }
 0x2ab   : > { %2961 = vmatprep.subr.bf16.mxu0 %v16101_v5  ;;  %v16168_v5 = vld [vmem:[%s18162_s24 + $0x3c4] ss:$36 sps:$4 sm:$0xff]  }
 0x2ac   : > { %2850 = vmatmul.mubr.bf16.gmra.mxu1 %v18655_v36 }
 0x2ad   : > { %3019 = vmatpush1.bf16.msra.mxu1 %v16096_v48  ;;  %3038 = vmatprep.mubr.bf16.mxu1 %v23131_v17  ;;  %v16169_v48 = vld [vmem:[%s18162_s24 + $0x3c8] ss:$36 sps:$4 sm:$0xff]  }
 0x2ae   : > { %2962 = vmatpush2.bf16.msra.mxu0 %v16099_v14  ;;  %3020 = vmatprep.subr.bf16.mxu1 %v16104_v15  ;;  %v16166_v14 = vld [vmem:[%s18162_s24 + $0x3c0] ss:$36 sps:$4 sm:$0xff]   ;;  %v16170_v15 = vld [vmem:[%s18162_s24 + $0x188] ss:$36 sps:$4 sm:$0xff]  }
 0x2af   : > { %2963 = vmatprep.subr.bf16.mxu0 %v16107_v52  ;;  %v16173_v52 = vld [vmem:[%s18162_s24 + $0x37c] ss:$36 sps:$4 sm:$0xff]  }
 0x2b1   : > { %3021 = vmatpush1.bf16.msra.mxu1 %v16102_v55  ;;  %v16174_v55 = vld [vmem:[%s18162_s24 + $0x380] ss:$36 sps:$4 sm:$0xff]  }
 0x2b2   : > { %2964 = vmatpush2.bf16.msra.mxu0 %v16105_v8  ;;  %3079 = vmatprep.subr.bf16.mxu1 %v16110_v63  ;;  %v16171_v8 = vld [vmem:[%s18162_s24 + $0x378] ss:$36 sps:$4 sm:$0xff]   ;;  %v16175_v63 = vld [vmem:[%s18162_s24 + $0x140] ss:$36 sps:$4 sm:$0xff]  }
 0x2b3   : > { %3152 = vmatprep.subr.bf16.mxu0 %v16113_v13  ;;  %v16178_v13 = vld [vmem:[%s18162_s24 + $0x334] ss:$36 sps:$4 sm:$0xff]  }
 0x2b4   : > { %3039 = vmatmul.mubr.bf16.vlgmr.msra.gmra.mxu1 %v18544_v49 }
 0x2b5   : > { %2966 = vmatmul.mubr.bf16.vlgmr.msra.gmra.mxu0 %v18550_v57  ;;  %3080 = vmatpush1.bf16.msra.mxu1 %v16108_v12  ;;  %v16179_v12 = vld [vmem:[%s18162_s24 + $0x338] ss:$36 sps:$4 sm:$0xff]  }
 0x2b6   : > { %2975 = vmatprep.mubr.bf16.mxu0 %v18567_v54  ;;  %3153 = vmatpush1.bf16.msra.mxu0 %v16111_v16  ;;  %v16176_v16 = vld [vmem:[%s18162_s24 + $0x330] ss:$36 sps:$4 sm:$0xff]  }
 0x2b7   : > { %3081 = vmatprep.subr.bf16.mxu1 %v16116_v18  ;;  %3154 = vmatprep.subr.bf16.mxu0 %v16119_v7  ;;  %v16180_v18 = vld [vmem:[%s18162_s24 + $0xf8] ss:$36 sps:$4 sm:$0xff]   ;;  %v16183_v7 = vld [vmem:[%s18162_s24 + $0x2ec] ss:$36 sps:$4 sm:$0xff]  }
 0x2b8   : > { %3048 = vmatprep.mubr.bf16.mxu1 %v23131_v17 }
 0x2b9   : > { %3082 = vmatpush1.bf16.msra.mxu1 %v16114_v53  ;;  %v16184_v53 = vld [vmem:[%s18162_s24 + $0x2f0] ss:$36 sps:$4 sm:$0xff]  }
 0x2ba   : > { %3155 = vmatpush1.bf16.msra.mxu0 %v16117_v60  ;;  %3083 = vmatprep.subr.bf16.mxu1 %v16122_v61  ;;  %v16181_v60 = vld [vmem:[%s18162_s24 + $0x2e8] ss:$36 sps:$4 sm:$0xff]   ;;  %v16185_v61 = vld [vmem:[%s18162_s24 + $0xb0] ss:$36 sps:$4 sm:$0xff]  }
 0x2bb   : > { %3156 = vmatprep.subr.bf16.mxu0 %v16125_v24  ;;  %v16188_v24 = vld [vmem:[%s18162_s24 + $0x2a4] ss:$36 sps:$4 sm:$0xff]  }
 0x2bc   : > { %3049 = vmatmul.mubr.bf16.gmra.mxu1 %v18582_v34 }
 0x2bd   : > { %2976 = vmatmul.mubr.bf16.gmra.mxu0 %v18594_v43  ;;  %3084 = vmatpush1.bf16.msra.mxu1 %v16120_v0  ;;  %v16189_v0 = vld [vmem:[%s18162_s24 + $0x2a8] ss:$36 sps:$4 sm:$0xff]  }
 0x2be   : > { %2985 = vmatprep.mubr.bf16.mxu0 %v18598_v51  ;;  %3157 = vmatpush1.bf16.msra.mxu0 %v16123_v50  ;;  %v16186_v50 = vld [vmem:[%s18162_s24 + $0x2a0] ss:$36 sps:$4 sm:$0xff]  }
 0x2bf   : > { %3085 = vmatprep.subr.bf16.mxu1 %v16128_v6  ;;  %3158 = vmatprep.subr.bf16.mxu0 %v16131_v31  ;;  %v16190_v6 = vld [vmem:[%s18162_s24 + $0x68] ss:$36 sps:$4 sm:$0xff]   ;;  %v16193_v31 = vld [vmem:[%s18162_s24 + $0x25c] ss:$36 sps:$4 sm:$0xff]  }
 0x2c0   : > { %3058 = vmatprep.mubr.bf16.mxu1 %v23131_v17 }
 0x2c1   : > { %3086 = vmatpush1.bf16.msra.mxu1 %v16126_v62  ;;  %v16194_v62 = vld [vmem:[%s18162_s24 + $0x260] ss:$36 sps:$4 sm:$0xff]  }
 0x2c2   : > { %3159 = vmatpush1.bf16.msra.mxu0 %v16129_v19  ;;  %3087 = vmatprep.subr.bf16.mxu1 %v16134_v21  ;;  %v16191_v19 = vld [vmem:[%s18162_s24 + $0x258] ss:$36 sps:$4 sm:$0xff]   ;;  %v16195_v21 = vld [vmem:[%s18162_s24 + $0x20] ss:$36 sps:$4 sm:$0xff]  }
 0x2c3   : > { %3160 = vmatprep.subr.bf16.mxu0 %v16137_v23  ;;  %v16196_v23 = vld [vmem:[%s18162_s24 + $0x698] ss:$36 sps:$4 sm:$0xff]  }
 0x2c4   : > { %3059 = vmatmul.mubr.bf16.gmra.mxu1 %v18624_v58 }
 0x2c5   : > { %2986 = vmatmul.mubr.bf16.gmra.mxu0 %v18630_v1  ;;  %3088 = vmatpush1.bf16.msra.mxu1 %v16132_v25  ;;  %v16197_v25 = vld [vmem:[%s18162_s24 + $0x650] ss:$36 sps:$4 sm:$0xff]  }
 0x2c6   : > { %2995 = vmatprep.mubr.bf16.mxu0 %v18634_v46  ;;  %3161 = vmatpush1.bf16.msra.mxu0 %v16135_v27  ;;  %v23133_v27 = vmov 0.0  }
 0x2c7   : > { %3089 = vmatprep.subr.bf16.mxu1 %v16140_v10  ;;  %3162 = vmatprep.subr.bf16.mxu0 %v16143_v56  ;;  %v16199_v10 = vld [vmem:[%s18162_s24 + $0x5c0] ss:$36 sps:$4 sm:$0xff]  }
 0x2c8   : > { %3068 = vmatprep.mubr.bf16.mxu1 %v23131_v17  ;;  %v16203_v56 = vld [vmem:[%s18162_s24 + $0x4a0] ss:$36 sps:$4 sm:$0xff]  }
 0x2c9   : > { %3090 = vmatpush1.bf16.msra.mxu1 %v16138_v11 }
 0x2ca   : > { %3163 = vmatpush1.bf16.msra.mxu0 %v16141_v59  ;;  %3091 = vmatprep.subr.bf16.mxu1 %v16146_v9 }
 0x2cb   : > { %3164 = vmatprep.subr.bf16.mxu0 %v16149_v30 }
 0x2cc   : > { %3069 = vmatmul.mubr.bf16.gmra.mxu1 %v18651_v32 }
 0x2cd   : > { %2996 = vmatmul.mubr.bf16.gmra.mxu0 %v18655_v36  ;;  %3092 = vmatpush1.bf16.msra.mxu1 %v16144_v3 }
 0x2ce   : > { %3111 = vmatprep.mubr.bf16.mxu1 %v18542_v45  ;;  %3165 = vmatpush1.bf16.msra.mxu0 %v16147_v35 }
 0x2cf   : > { %3093 = vmatprep.subr.bf16.mxu1 %v16152_v20  ;;  %3166 = vmatprep.subr.bf16.mxu0 %v16155_v2 }
 0x2d0   : > { %3184 = vmatprep.mubr.bf16.mxu0 %v23131_v17 }
 0x2d1   : > { %3094 = vmatpush1.bf16.msra.mxu1 %v16150_v39 }
 0x2d2   : > { %3167 = vmatpush1.bf16.msra.mxu0 %v16153_v26  ;;  %3095 = vmatprep.subr.bf16.mxu1 %v16158_v33 }
 0x2d3   : > { %14997 = vmatprep.subr.bf16.mxu0 %v16159_v40 }
 0x2d5   : > { %3096 = vmatpush2.bf16.msra.mxu1 %v16156_v29  ;;  %3185 = vmatmul.mubr.bf16.vlgmr.msra.gmra.mxu0 %v18544_v49 }
 0x2d6   : > { %14998 = vmatpush3.bf16.msra.mxu0 %v16160_v41  ;;  %3097 = vmatprep.subr.bf16.mxu1 %v16163_v22 }
 0x2d7   : > { %14999 = vmatprep.subr.bf16.mxu0 %v16164_v37  ;;  %3194 = vmatprep.mubr.bf16.mxu0 %v23131_v17 }
 0x2d9   : > { %3098 = vmatpush2.bf16.msra.mxu1 %v16161_v44 }
 0x2da   : > { %15000 = vmatpush3.bf16.msra.mxu0 %v16165_v4  ;;  %3099 = vmatprep.subr.bf16.mxu1 %v16168_v5 }
 0x2db   : > { %15001 = vmatprep.subr.bf16.mxu0 %v16169_v48 }
 0x2dd   : > { %3100 = vmatpush2.bf16.msra.mxu1 %v16166_v14  ;;  %3195 = vmatmul.mubr.bf16.gmra.mxu0 %v18582_v34 }
 0x2de   : > { %15002 = vmatpush3.bf16.msra.mxu0 %v16170_v15  ;;  %3101 = vmatprep.subr.bf16.mxu1 %v16173_v52 }
 0x2df   : > { %15003 = vmatprep.subr.bf16.mxu0 %v16174_v55  ;;  %3204 = vmatprep.mubr.bf16.mxu0 %v23131_v17 }
 0x2e1   : > { %3102 = vmatpush2.bf16.msra.mxu1 %v16171_v8 }
 0x2e2   : > { %15004 = vmatpush3.bf16.msra.mxu0 %v16175_v63  ;;  %3103 = vmatprep.subr.bf16.mxu1 %v16178_v13 }
 0x2e3   : > { %15005 = vmatprep.subr.bf16.mxu0 %v16179_v12 }
 0x2e5   : > { %3104 = vmatpush2.bf16.msra.mxu1 %v16176_v16  ;;  %3205 = vmatmul.mubr.bf16.gmra.mxu0 %v18624_v58 }
 0x2e6   : > { %15006 = vmatpush3.bf16.msra.mxu0 %v16180_v18  ;;  %3105 = vmatprep.subr.bf16.mxu1 %v16183_v7  ;;  %v18924_v7 = vsub.s32 3, %v18482_v28 }
 0x2e7   : > { %15007 = vmatprep.subr.bf16.mxu0 %v16184_v53  ;;  %3214 = vmatprep.mubr.bf16.mxu0 %v23131_v17  ;;  %v18927_v53 = vld [vmem:[%s18167_s1] sm:$0xff] }
 0x2e8   : > { %23260 = vst [vmem:[#allocation27_spill] sm:$0xff] %v18924_v7 }
 0x2e9   : > { %3106 = vmatpush2.bf16.msra.mxu1 %v16181_v60  ;;  %v18931_v60 = vrot.slane %v18927_v53, %v18490_v42 }
 0x2ea   : > { %15008 = vmatpush3.bf16.msra.mxu0 %v16185_v61  ;;  %3107 = vmatprep.subr.bf16.mxu1 %v16188_v24 }
 0x2eb   : > { %15009 = vmatprep.subr.bf16.mxu0 %v16189_v0  ;;  %v18937_v0 = vrot.slane %v18927_v53, %v18924_v7 }
 0x2ed   : > { %3108 = vmatpush2.bf16.msra.mxu1 %v16186_v50  ;;  %3215 = vmatmul.mubr.bf16.gmra.mxu0 %v18651_v32 }
 0x2ee   : > { %15010 = vmatpush3.bf16.msra.mxu0 %v16190_v6  ;;  %3257 = vmatprep.mubr.bf16.mxu0 %v18542_v45  ;;  %v16198_v45 = vld [vmem:[%s18162_s24 + $0x608] ss:$36 sps:$4 sm:$0xff]  }
 0x2ef   : > { %3109 = vmatprep.subr.bf16.mxu1 %v16193_v31  ;;  %15011 = vmatprep.subr.bf16.mxu0 %v16194_v62 }
 0x2f1   : > { %3110 = vmatpush2.bf16.msra.mxu1 %v16191_v19 }
 0x2f2   : > { %15012 = vmatpush3.bf16.msra.mxu0 %v16195_v21  ;;  %15437 = vmatprep.subr.bf16.mxu1 %v16196_v23  ;;  %v18943_v21 = vrot.slane %v18927_v53, %v18487_v38 }
 0x2f3   : > { %15473 = vmatprep.subr.bf16.mxu0 %v23133_v27 }
 0x2f4   : > { %3112 = vmatmul.mubr.bf16.vlgmr.msra.gmra.mxu1 %v18550_v57 }
 0x2f5   : > { %3121 = vmatprep.mubr.bf16.mxu1 %v18567_v54  ;;  %3258 = vmatmul.mubr.bf16.vlgmr.msra.gmra.mxu0 %v18550_v57  ;;  %v16200_v57 = vld [vmem:[%s18162_s24 + $0x578] ss:$36 sps:$4 sm:$0xff]  }
 0x2f6   : > { %15438 = vmatpush3.bf16.msra.mxu1 %v16196_v23  ;;  %3265 = vmatprep.mubr.bf16.mxu0 %v18567_v54  ;;  %v16201_v54 = vld [vmem:[%s18162_s24 + $0x530] ss:$36 sps:$4 sm:$0xff]  }
 0x2f7   : > { %15439 = vmatprep.subr.bf16.mxu1 %v16197_v25 }
 0x2fa   : > { %15440 = vmatpush3.bf16.msra.mxu1 %v16197_v25 }
 0x2fb   : > { %15441 = vmatprep.subr.bf16.mxu1 %v16198_v45 }
 0x2fc   : > { %3122 = vmatmul.mubr.bf16.gmra.mxu1 %v18594_v43 }
 0x2fd   : > { %3131 = vmatprep.mubr.bf16.mxu1 %v18598_v51  ;;  %3266 = vmatmul.mubr.bf16.gmra.mxu0 %v18594_v43  ;;  %v16202_v43 = vld [vmem:[%s18162_s24 + $0x4e8] ss:$36 sps:$4 sm:$0xff]  }
 0x2fe   : > { %15442 = vmatpush3.bf16.msra.mxu1 %v16198_v45  ;;  %3273 = vmatprep.mubr.bf16.mxu0 %v18598_v51 }
 0x2ff   : > { %15443 = vmatprep.subr.bf16.mxu1 %v16199_v10 }
 0x302   : > { %15444 = vmatpush3.bf16.msra.mxu1 %v16199_v10  ;;  %v18947_v10 = vrot.slane %v18927_v53, %v18493_v47 }
 0x303   : > { %15445 = vmatprep.subr.bf16.mxu1 %v16200_v57 }
 0x304   : > { %3132 = vmatmul.mubr.bf16.gmra.mxu1 %v18630_v1 }
 0x305   : > { %3141 = vmatprep.mubr.bf16.mxu1 %v18634_v46  ;;  %3274 = vmatmul.mubr.bf16.gmra.mxu0 %v18630_v1 }
 0x306   : > { %15446 = vmatpush3.bf16.msra.mxu1 %v16200_v57  ;;  %3281 = vmatprep.mubr.bf16.mxu0 %v18634_v46 }
 0x307   : > { %15447 = vmatprep.subr.bf16.mxu1 %v16201_v54 }
 0x30a   : > { %15448 = vmatpush3.bf16.msra.mxu1 %v16201_v54 }
 0x30b   : > { %15449 = vmatprep.subr.bf16.mxu1 %v16202_v43 }
 0x30c   : > { %3142 = vmatmul.mubr.bf16.gmra.mxu1 %v18655_v36 }
 0x30d   : > { %3282 = vmatmul.mubr.bf16.gmra.mxu0 %v18655_v36  ;;  %15453 = vmatprep.mubr.bf16.mxu1 %v18544_v49 }
 0x30e   : > { %15450 = vmatpush3.bf16.msra.mxu1 %v16202_v43  ;;  %15475 = vmatprep.mubr.msk.bf16.mxu0 %vm17773_vm0, %v23133_v27 }
 0x30f   : > { %15451 = vmatprep.subr.bf16.mxu1 %v16203_v56 }
 0x312   : > { %15452 = vmatpush3.bf16.msra.mxu1 %v16203_v56 }
 0x313   : > { %15461 = vmatprep.subr.bf16.mxu1 %v23133_v27 }
 0x314   : > { %v18861_v1 = vpop.f32.mrf.mxu1 }
 0x315   : > { %15454 = vmatmul.mubr.bf16.vlgmr.msra.gmra.mxu1 %v18582_v34  ;;  %v18859_v51 = vpop.f32.mrf.mxu0 }
 0x316   : > { %15457 = vmatprep.mubr.bf16.mxu1 %v18624_v58  ;;  %v18866_v49 = vpop.f32.mrf.mxu1 }
 0x317   : > { %v2677_v46 = vpop.f32.mrf.mxu0 }
 0x318   : > { %v18873_v9 = vpop.f32.mrf.mxu1 }
 0x319   : > { %v18864_v36 = vpop.f32.mrf.mxu0 }
 0x31a   : > { %v18881_v58 = vpop.f32.mrf.mxu1 }
 0x31b   : > { %v18868_v11 = vpop.f32.mrf.mxu0 }
 0x31c   : > { %v18887_v20 = vpop.f32.mrf.mxu1 }
 0x31d   : > { %15458 = vmatmul.mubr.bf16.gmra.mxu1 %v18651_v32  ;;  %v18871_v59 = vpop.f32.mrf.mxu0 }
 0x31e   : > { %15463 = vmatprep.mubr.msk.bf16.mxu1 %vm17773_vm0, %v23133_v27  ;;  %v18893_v39 = vpop.f32.mrf.mxu1 }
 0x31f   : > { %v18877_v34 = vpop.f32.mrf.mxu0 }
 0x320   : > { %v18899_v40 = vpop.f32.mrf.mxu1 }
 0x321   : > { %v18879_v30 = vpop.f32.mrf.mxu0 }
 0x322   : > { %v18905_v22 = vpop.f32.mrf.mxu1 }
 0x323   : > { %v18883_v3 = vpop.f32.mrf.mxu0 }
 0x324   : > { %v18909_v44 = vpop.f32.mrf.mxu1 }
 0x325   : > { %v18885_v35 = vpop.f32.mrf.mxu0 }
 0x326   : > { %v18911_v5 = vpop.f32.mrf.mxu1 }
 0x327   : > { %v18889_v32 = vpop.f32.mrf.mxu0 }
 0x328   : > { %v18913_v14 = vpop.f32.mrf.mxu1 }
 0x329   : > { %v18891_v2 = vpop.f32.mrf.mxu0 }
 0x32a   : > { %v18915_v52 = vpop.f32.mrf.mxu1 }
 0x32b   : > { %v18895_v26 = vpop.f32.mrf.mxu0 }
 0x32c   : > { %v18917_v8 = vpop.f32.mrf.mxu1 }
 0x32d   : > { %v18897_v33 = vpop.f32.mrf.mxu0 }
 0x32e   : > { %v18919_v13 = vpop.f32.mrf.mxu1 }
 0x32f   : > { %v18901_v29 = vpop.f32.mrf.mxu0 }
 0x330   : > { %v18921_v16 = vpop.f32.mrf.mxu1 }
 0x331   : > { %v18903_v41 = vpop.f32.mrf.mxu0 }
 0x332   : > { %v18933_v61 = vpop.f32.mrf.mxu1 }
 0x333   : > { %v18907_v37 = vpop.f32.mrf.mxu0 }
 0x335   : > { %v2894_v4 = vpop.f32.mrf.mxu0 }
 0x337   : > { %v2896_v48 = vpop.f32.mrf.mxu0 }
 0x339   : > { %v2898_v15 = vpop.f32.mrf.mxu0 }
 0x33b   : > { %v2900_v55 = vpop.f32.mrf.mxu0 }
 0x33d   : > { %v2904_v63 = vpop.f32.mrf.mxu0 }
 0x33f   : > { %v2906_v12 = vpop.f32.mrf.mxu0 }
 0x341   : > { %v2908_v18 = vpop.f32.mrf.mxu0 }
 0x343   : > { %v2910_v24 = vpop.f32.mrf.mxu0 }
 0x345   : > { %v2914_v62 = vpop.f32.mrf.mxu0 }
 0x347   : > { %v2916_v54 = vpop.f32.mrf.mxu0 }
 0x354   : > { %v2821_v50 = vpop.f32.mrf.mxu1 }
 0x355   : > { %v2822_v6 = vadd.f32 %v2821_v50, %v18931_v60 }
 0x356   : > { %v2823_v31 = vpop.f32.mrf.mxu1 }
 0x357   : > { %v2824_v19 = vadd.f32 %v2823_v31, %v18937_v0  ;;  %v2895_v25 = vadd.f32 %v2894_v4, %v2822_v6  ;;  %v2678_v31 = vadd.f32 %v2677_v46, %v18943_v21  ;;  %v23261_v46 = vmov 0.0  }
 0x358   : > { %v2825_v23 = vpop.f32.mrf.mxu1 }
 0x359   : > { %v2897_v45 = vadd.f32 %v2896_v48, %v2824_v19  ;;  %v2826_v56 = vadd.f32 %v2825_v23, %v18931_v60  ;;  %v2676_v48 = vadd.f32 %v18859_v51, %v18947_v10  ;;  %v18958_v19 = vpop.f32.mrf.mxu0  ;;  %v2751_v23 = vadd.f32 %v18866_v49, %v2678_v31 }
 0x35a   : > { %v2827_v57 = vpop.f32.mrf.mxu1  ;;  %v2682_v49 = vadd.f32 %v18868_v11, %v18943_v21 }
 0x35b   : > { %v18949_v43 = vpack.c.bf16 %v2897_v45, %v2895_v25  ;;  %v2828_v50 = vadd.f32 %v2827_v57, %v18937_v0  ;;  %v2899_v25 = vadd.f32 %v2898_v15, %v2826_v56  ;;  %v2920_v51 = vpop.f32.mrf.mxu0 }
 0x35c   : > { %v2831_v17 = vpop.f32.mrf.mxu1 }
 0x35d   : > { %v3579_v27 = vrot.slane %v18949_v43, 4  ;;  %v2901_v7 = vadd.f32 %v2900_v55, %v2828_v50  ;;  %v2832_v4 = vadd.f32 %v2831_v17, %v18931_v60  ;;  %v2749_v17 = vadd.f32 %v18861_v1, %v2676_v48  ;;  %v2924_v11 = vpop.f32.mrf.mxu0 }
 0x35e   : > { %v2833_v6 = vpop.f32.mrf.mxu1  ;;  %v2680_v48 = vadd.f32 %v18864_v36, %v18947_v10 }
 0x35f   : > { %v2834_v45 = vadd.f32 %v2833_v6, %v18937_v0  ;;  %15462 = vmatpush3.bf16.xpose.msra.mxu1 %v3579_v27  ;;  %v18963_v42 = vpack.c.bf16 %v2901_v7, %v2899_v25  ;;  %v2905_v55 = vadd.f32 %v2904_v63, %v2832_v4  ;;  %v18970_v27 = vpack.c.bf16 %v2751_v23, %v2749_v17 }
 0x360   : > { %v2835_v57 = vpop.f32.mrf.mxu1  ;;  %15467 = vmatprep.subr.bf16.mxu1 %v23261_v46  ;;  %v2688_v7 = vadd.f32 %v18877_v34, %v18943_v21 }
 0x361   : > { %v2907_v50 = vadd.f32 %v2906_v12, %v2834_v45  ;;  %v2836_v15 = vadd.f32 %v2835_v57, %v18931_v60  ;;  %v3580_v4 = vrot.slane %v18963_v42, 4 }
 0x362   : > { %v2837_v47 = vpop.f32.mrf.mxu1  ;;  %v2761_v45 = vadd.f32 %v18893_v39, %v2688_v7 }
 0x363   : > { %v18966_v38 = vpack.c.bf16 %v2907_v50, %v2905_v55  ;;  %v2838_v56 = vadd.f32 %v2837_v47, %v18937_v0  ;;  %v2686_v47 = vadd.f32 %v18871_v59, %v18947_v10  ;;  %v2909_v25 = vadd.f32 %v2908_v18, %v2836_v15 }
 0x364   : > { %v2841_v63 = vpop.f32.mrf.mxu1  ;;  %v2753_v18 = vadd.f32 %v18873_v9, %v2680_v48  ;;  %v2698_v9 = vadd.f32 %v18889_v32, %v18943_v21 }
 0x365   : > { %v3581_v12 = vrot.slane %v18966_v38, 4  ;;  %v2911_v1 = vadd.f32 %v2910_v24, %v2838_v56  ;;  %v2842_v31 = vadd.f32 %v2841_v63, %v18931_v60  ;;  %v2755_v24 = vadd.f32 %v18881_v58, %v2682_v49  ;;  %v2926_v58 = vpop.f32.mrf.mxu0 }
 0x366   : > { %v2843_v6 = vpop.f32.mrf.mxu1  ;;  %15464 = vmatmul.mubr.bf16.vlgmr.msra.gmra.mxu1 %v18970_v27  ;;  %v2759_v55 = vadd.f32 %v18887_v20, %v2686_v47  ;;  %v23148_v47 = vsub.s32 5, %v18482_v28 }
 0x367   : > { %v2844_v34 = vadd.f32 %v2843_v6, %v18937_v0  ;;  %15468 = vmatpush3.bf16.xpose.msra.mxu1 %v3580_v4  ;;  %15474 = vmatpush3.bf16.xpose.msra.mxu0 %v3581_v12  ;;  %v18990_v36 = vpack.c.bf16 %v2911_v1, %v2909_v25  ;;  %v2915_v59 = vadd.f32 %v2914_v62, %v2842_v31  ;;  %v2928_v32 = vpop.f32.mrf.mxu0 }
 0x368   : > { %v2845_v23 = vpop.f32.mrf.mxu1  ;;  %15469 = vmatprep.mubr.msk.bf16.mxu1 %vm17773_vm0, %v23261_v46  ;;  %15479 = vmatprep.subr.bf16.mxu1 %v23261_v46  ;;  %v18999_v56 = vpack.c.bf16 %v2755_v24, %v2753_v18  ;;  %v19001_v49 = vpack.c.bf16 %v2761_v45, %v2759_v55  ;;  %v2692_v62 = vadd.f32 %v18883_v3, %v18943_v21  ;;  %v23149_v3 = vsub.s32 4, %v18482_v28 }
 0x369   : > { %v2917_v57 = vadd.f32 %v2916_v54, %v2844_v34  ;;  %15485 = vmatprep.subr.bf16.mxu0 %v23261_v46  ;;  %v2846_v39 = vadd.f32 %v2845_v23, %v18931_v60  ;;  %v3582_v12 = vrot.slane %v18990_v36, 4  ;;  %v2690_v1 = vadd.f32 %v18879_v30, %v18947_v10  ;;  %v2930_v23 = vpop.f32.mrf.mxu0 }
 0x36a   : > { %v2847_v50 = vpop.f32.mrf.mxu1  ;;  %v2696_v31 = vadd.f32 %v18885_v35, %v18947_v10  ;;  %v2765_v30 = vadd.f32 %v18905_v22, %v2692_v62  ;;  %v2771_v35 = vadd.f32 %v18911_v5, %v2698_v9  ;;  %v19035_v45 = vrot.slane %v18927_v53, %v23149_v3 }
 0x36b   : > { %v18995_v17 = vpack.c.bf16 %v2917_v57, %v2915_v59  ;;  %v2848_v15 = vadd.f32 %v2847_v50, %v18937_v0  ;;  %v2763_v24 = vadd.f32 %v18899_v40, %v2690_v1  ;;  %v19044_v18 = vrot.slane %v18927_v53, %v23148_v47 }
 0x36c   : > { %v2851_v54 = vpop.f32.mrf.mxu1  ;;  %v2769_v22 = vadd.f32 %v18909_v44, %v2696_v31  ;;  %v2702_v55 = vadd.f32 %v18895_v26, %v18943_v21  ;;  %v2708_v50 = vadd.f32 %v18901_v29, %v18943_v21  ;;  %v2700_v62 = vadd.f32 %v18891_v2, %v18947_v10 }
 0x36d   : > { %v3583_v20 = vrot.slane %v18995_v17, 4  ;;  %v2921_v7 = vadd.f32 %v2920_v51, %v2848_v15  ;;  %v2852_v63 = vadd.f32 %v2851_v54, %v18931_v60  ;;  %v2919_v51 = vadd.f32 %v18958_v19, %v2846_v39 }
 0x36e   : > { %v2853_v4 = vpop.f32.mrf.mxu1  ;;  %15470 = vmatmul.mubr.bf16.vlgmr.msra.gmra.mxu1 %v18999_v56  ;;  %15476 = vmatmul.mubr.bf16.vlgmr.msra.gmra.mxu0 %v19001_v49  ;;  %v19046_v40 = vpack.c.bf16 %v2765_v30, %v2763_v24  ;;  %v19048_v44 = vpack.c.bf16 %v2771_v35, %v2769_v22  ;;  %v2706_v9 = vadd.f32 %v18897_v33, %v18947_v10 }
 0x36f   : > { %v2854_v48 = vadd.f32 %v2853_v4, %v18937_v0  ;;  %15480 = vmatpush3.bf16.xpose.msra.mxu1 %v3582_v12  ;;  %15486 = vmatpush3.bf16.xpose.msra.mxu0 %v3583_v20  ;;  %v19026_v25 = vpack.c.bf16 %v2921_v7, %v2919_v51  ;;  %v2925_v19 = vadd.f32 %v2924_v11, %v2852_v63 }
 0x370   : > { %v2855_v6 = vpop.f32.mrf.mxu1  ;;  %15481 = vmatprep.mubr.msk.bf16.mxu1 %vm17773_vm0, %v23261_v46  ;;  %15487 = vmatprep.mubr.msk.bf16.mxu0 %vm17773_vm0, %v23261_v46  ;;  %v2775_v7 = vadd.f32 %v18915_v52, %v2702_v55  ;;  %v2781_v63 = vadd.f32 %v18919_v13, %v2708_v50  ;;  %v2773_v52 = vadd.f32 %v18913_v14, %v2700_v62 }
 0x371   : > { %v2927_v34 = vadd.f32 %v2926_v58, %v2854_v48  ;;  %15491 = vmatprep.subr.bf16.mxu1 %v23261_v46  ;;  %15497 = vmatprep.subr.bf16.mxu0 %v23261_v46  ;;  %v2856_v11 = vadd.f32 %v2855_v6, %v18931_v60  ;;  %v3584_v15 = vrot.slane %v19026_v25, 4  ;;  %v2779_v13 = vadd.f32 %v18917_v8, %v2706_v9 }
 0x372   : > { %v2857_v5 = vpop.f32.mrf.mxu1  ;;  %v19076_v48 = vpack.c.bf16 %v2775_v7, %v2773_v52  ;;  %v2712_v35 = vadd.f32 %v18907_v37, %v18943_v21  ;;  %v2710_v8 = vadd.f32 %v18903_v41, %v18947_v10 }
 0x373   : > { %v19037_v59 = vpack.c.bf16 %v2927_v34, %v2925_v19  ;;  %v2858_v57 = vadd.f32 %v2857_v5, %v18937_v0  ;;  %v2929_v26 = vadd.f32 %v2928_v32, %v2856_v11  ;;  %v19078_v30 = vpack.c.bf16 %v2781_v63, %v2779_v13 }
 0x374   : > { %v3040_v58 = vpop.f32.mrf.mxu1  ;;  %v2783_v55 = vadd.f32 %v18921_v16, %v2710_v8 }
 0x375   : > { %v3585_v60 = vrot.slane %v19037_v59, 4  ;;  %v2931_v39 = vadd.f32 %v2930_v23, %v2858_v57  ;;  %v2967_v0 = vpop.f32.mrf.mxu0  ;;  %v2785_v23 = vadd.f32 %v18933_v61, %v2712_v35 }
 0x376   : > { %v2968_v54 = vadd.f32 %v2967_v0, %v19035_v45  ;;  %v3042_v20 = vpop.f32.mrf.mxu1  ;;  %15482 = vmatmul.mubr.bf16.vlgmr.msra.gmra.mxu1 %v19046_v40  ;;  %15488 = vmatmul.mubr.bf16.vlgmr.msra.gmra.mxu0 %v19048_v44  ;;  %v3563_v0 = vrot.slane %v18970_v27, 4 }
 0x377   : > { %v2969_v29 = vpop.f32.mrf.mxu0  ;;  %15492 = vmatpush3.bf16.xpose.msra.mxu1 %v3584_v15  ;;  %15498 = vmatpush3.bf16.xpose.msra.mxu0 %v3585_v60  ;;  %v19070_v33 = vpack.c.bf16 %v2931_v39, %v2929_v26  ;;  %v19103_v15 = vpack.c.bf16 %v2785_v23, %v2783_v55  ;;  %v3567_v55 = vrot.slane %v19048_v44, 4 }
 0x378   : > { %v2970_v2 = vadd.f32 %v2969_v29, %v19044_v18  ;;  %v3044_v12 = vpop.f32.mrf.mxu1  ;;  %15493 = vmatprep.mubr.msk.bf16.mxu1 %vm17773_vm0, %v23261_v46  ;;  %15499 = vmatprep.mubr.msk.bf16.mxu0 %vm17773_vm0, %v23261_v46  ;;  %v3041_v31 = vadd.f32 %v3040_v58, %v2968_v54 }
 0x379   : > { %v2971_v1 = vpop.f32.mrf.mxu0  ;;  %15503 = vmatprep.subr.bf16.mxu1 %v23261_v46  ;;  %15509 = vmatprep.subr.bf16.mxu0 %v23261_v46  ;;  %v3586_v14 = vrot.slane %v19070_v33, 4 }
 0x37a   : > { %v3043_v4 = vadd.f32 %v3042_v20, %v2970_v2  ;;  %v3046_v32 = vpop.f32.mrf.mxu1  ;;  %v2972_v37 = vadd.f32 %v2971_v1, %v19035_v45 }
 0x37b   : > { %v2973_v51 = vpop.f32.mrf.mxu0 }
 0x37c   : > { %v19082_v6 = vpack.c.bf16 %v3043_v4, %v3041_v31  ;;  %v3050_v19 = vpop.f32.mrf.mxu1  ;;  %v2974_v34 = vadd.f32 %v2973_v51, %v19044_v18  ;;  %v3045_v60 = vadd.f32 %v3044_v12, %v2972_v37  ;;  %v3565_v51 = vrot.slane %v19001_v49, 4 }
 0x37d   : > { %v2977_v24 = vpop.f32.mrf.mxu0 }
 0x37e   : > { %v2978_v22 = vadd.f32 %v2977_v24, %v19035_v45  ;;  %v3052_v5 = vpop.f32.mrf.mxu1  ;;  %15494 = vmatmul.mubr.bf16.vlgmr.msra.gmra.mxu1 %v19076_v48  ;;  %15500 = vmatmul.mubr.bf16.vlgmr.msra.gmra.mxu0 %v19078_v30  ;;  %v3047_v41 = vadd.f32 %v3046_v32, %v2974_v34  ;;  %v3564_v34 = vrot.slane %v18999_v56, 4 }
 0x37f   : > { %v2979_v21 = vpop.f32.mrf.mxu0  ;;  %15504 = vmatpush3.bf16.xpose.msra.mxu1 %v3586_v14  ;;  %15510 = vmatpush3.bf16.xpose.msra.mxu0 %v19082_v6 }
 0x380   : > { %v2980_v11 = vadd.f32 %v2979_v21, %v19044_v18  ;;  %v3054_v57 = vpop.f32.mrf.mxu1  ;;  %15505 = vmatprep.mubr.msk.bf16.mxu1 %vm17773_vm0, %v23261_v46  ;;  %15511 = vmatprep.mubr.msk.bf16.mxu0 %vm17773_vm0, %v23261_v46  ;;  %v3051_v50 = vadd.f32 %v3050_v19, %v2978_v22  ;;  %v19107_v54 = vpack.c.bf16 %v3047_v41, %v3045_v60 }
 0x381   : > { %v2981_v10 = vpop.f32.mrf.mxu0  ;;  %15515 = vmatprep.subr.bf16.mxu1 %v23261_v46  ;;  %15521 = vmatprep.subr.bf16.mxu0 %v23261_v46 }
 0x382   : > { %v3053_v58 = vadd.f32 %v3052_v5, %v2980_v11  ;;  %v3056_v61 = vpop.f32.mrf.mxu1  ;;  %v2982_v7 = vadd.f32 %v2981_v10, %v19035_v45 }
 0x383   : > { %v2983_v39 = vpop.f32.mrf.mxu0 }
 0x384   : > { %v19105_v62 = vpack.c.bf16 %v3053_v58, %v3051_v50  ;;  %v3060_v9 = vpop.f32.mrf.mxu1  ;;  %v2984_v20 = vadd.f32 %v2983_v39, %v19044_v18  ;;  %v3055_v4 = vadd.f32 %v3054_v57, %v2982_v7  ;;  %v3595_v7 = vrot.slane %v19082_v6, 4 }
 0x385   : > { %v2987_v26 = vpop.f32.mrf.mxu0  ;;  %v3570_v6 = vrot.slane %v19103_v15, 4 }
 0x386   : > { %v2988_v29 = vadd.f32 %v2987_v26, %v19035_v45  ;;  %v3062_v16 = vpop.f32.mrf.mxu1  ;;  %15506 = vmatmul.mubr.bf16.vlgmr.msra.gmra.mxu1 %v19103_v15  ;;  %15512 = vmatmul.mubr.bf16.vlgmr.msra.gmra.mxu0 %v3563_v0  ;;  %v3057_v12 = vadd.f32 %v3056_v61, %v2984_v20  ;;  %v3566_v61 = vrot.slane %v19046_v40, 4 }
 0x387   : > { %v2989_v63 = vpop.f32.mrf.mxu0  ;;  %15516 = vmatpush3.bf16.xpose.msra.mxu1 %v19107_v54  ;;  %15522 = vmatpush3.bf16.xpose.msra.mxu0 %v19105_v62 }
 0x388   : > { %v2990_v27 = vadd.f32 %v2989_v63, %v19044_v18  ;;  %v3064_v2 = vpop.f32.mrf.mxu1  ;;  %15517 = vmatprep.mubr.msk.bf16.mxu1 %vm17773_vm0, %v23261_v46  ;;  %15523 = vmatprep.mubr.msk.bf16.mxu0 %vm17773_vm0, %v23261_v46  ;;  %v3061_v52 = vadd.f32 %v3060_v9, %v2988_v29  ;;  %v19126_v24 = vpack.c.bf16 %v3057_v12, %v3055_v4  ;;  %v3569_v29 = vrot.slane %v19078_v30, 4 }
 0x389   : > { %v2991_v1 = vpop.f32.mrf.mxu0  ;;  %15527 = vmatprep.subr.bf16.mxu1 %v23261_v46  ;;  %15533 = vmatprep.subr.bf16.mxu0 %v23261_v46  ;;  %v3597_v12 = vrot.slane %v19105_v62, 4  ;;  %v23147_v4 = vsub.s32 6, %v18482_v28 }
 0x38a   : > { %v3063_v13 = vadd.f32 %v3062_v16, %v2990_v27  ;;  %v3066_v31 = vpop.f32.mrf.mxu1  ;;  %v2992_v5 = vadd.f32 %v2991_v1, %v19035_v45  ;;  %v3568_v16 = vrot.slane %v19076_v48, 4 }
 0x38b   : > { %v2993_v32 = vpop.f32.mrf.mxu0 }
 0x38c   : > { %v19123_v35 = vpack.c.bf16 %v3063_v13, %v3061_v52  ;;  %v3070_v19 = vpop.f32.mrf.mxu1  ;;  %v2994_v14 = vadd.f32 %v2993_v32, %v19044_v18  ;;  %v3065_v41 = vadd.f32 %v3064_v2, %v2992_v5  ;;  %v3596_v52 = vrot.slane %v19107_v54, 4 }
 0x38d   : > { %v2997_v8 = vpop.f32.mrf.mxu0 }
 0x38e   : > { %v2998_v22 = vadd.f32 %v2997_v8, %v19035_v45  ;;  %15518 = vmatmul.mubr.bf16.vlgmr.msra.gmra.mxu1 %v3564_v34  ;;  %15524 = vmatmul.mubr.bf16.vlgmr.msra.gmra.mxu0 %v3565_v51  ;;  %v3072_v49 = vpop.f32.mrf.mxu1  ;;  %v3067_v56 = vadd.f32 %v3066_v31, %v2994_v14  ;;  %v3598_v31 = vrot.slane %v19126_v24, 4  ;;  %v23146_v51 = vsub.s32 7, %v18482_v28 }
 0x38f   : > { %v2999_v37 = vpop.f32.mrf.mxu0  ;;  %15528 = vmatpush3.bf16.xpose.msra.mxu1 %v19126_v24  ;;  %15534 = vmatpush3.bf16.xpose.msra.mxu0 %v19123_v35 }
 0x390   : > { %v3000_v21 = vadd.f32 %v2999_v37, %v19044_v18  ;;  %15529 = vmatprep.mubr.msk.bf16.mxu1 %vm17773_vm0, %v23261_v46  ;;  %15535 = vmatprep.mubr.msk.bf16.mxu0 %vm17773_vm0, %v23261_v46  ;;  %v3071_v11 = vadd.f32 %v3070_v19, %v2998_v22  ;;  %v3074_v58 = vpop.f32.mrf.mxu1  ;;  %v19144_v60 = vpack.c.bf16 %v3067_v56, %v3065_v41 }
 0x391   : > { %v3001_v23 = vpop.f32.mrf.mxu0  ;;  %15539 = vmatprep.subr.bf16.mxu1 %v23261_v46  ;;  %15545 = vmatprep.subr.bf16.mxu0 %v23261_v46  ;;  %v19230_v19 = vrot.slane %v18927_v53, %v23146_v51 }
 0x392   : > { %v3073_v57 = vadd.f32 %v3072_v49, %v3000_v21  ;;  %v3002_v9 = vadd.f32 %v3001_v23, %v19035_v45  ;;  %v3076_v44 = vpop.f32.mrf.mxu1  ;;  %v3600_v22 = vrot.slane %v19144_v60, 4 }
 0x393   : > { %v3003_v10 = vpop.f32.mrf.mxu0 }
 0x394   : > { %v19141_v50 = vpack.c.bf16 %v3073_v57, %v3071_v11  ;;  %v3004_v39 = vadd.f32 %v3003_v10, %v19044_v18  ;;  %v3075_v45 = vadd.f32 %v3074_v58, %v3002_v9 }
 0x395   : > { %v19147_v0 = vpop.f32.mrf.mxu0 }
 0x396   : > { %15530 = vmatmul.mubr.bf16.vlgmr.msra.gmra.mxu1 %v3566_v61  ;;  %15536 = vmatmul.mubr.bf16.vlgmr.msra.gmra.mxu0 %v3567_v55  ;;  %v3077_v18 = vadd.f32 %v3076_v44, %v3004_v39  ;;  %v3601_v24 = vrot.slane %v19141_v50, 4 }
 0x397   : > { %v19150_v20 = vpop.f32.mrf.mxu0  ;;  %15540 = vmatpush3.bf16.xpose.msra.mxu1 %v19144_v60  ;;  %15546 = vmatpush3.bf16.xpose.msra.mxu0 %v19141_v50 }
 0x398   : > { %15541 = vmatprep.mubr.msk.bf16.mxu1 %vm17773_vm0, %v23261_v46  ;;  %15547 = vmatprep.mubr.msk.bf16.mxu0 %vm17773_vm0, %v23261_v46  ;;  %v19167_v63 = vpack.c.bf16 %v3077_v18, %v3075_v45 }
 0x399   : > { %v19158_v40 = vpop.f32.mrf.mxu0  ;;  %15551 = vmatprep.subr.bf16.mxu1 %v23261_v46  ;;  %15557 = vmatprep.subr.bf16.mxu0 %v23261_v46 }
 0x39a   : > { %v3602_v58 = vrot.slane %v19167_v63, 4 }
 0x39b   : > { %v19162_v26 = vpop.f32.mrf.mxu0 }
 0x39d   : > { %v19169_v27 = vpop.f32.mrf.mxu0 }
 0x39e   : > { %15542 = vmatmul.mubr.bf16.vlgmr.msra.gmra.mxu1 %v3568_v16  ;;  %15548 = vmatmul.mubr.bf16.vlgmr.msra.gmra.mxu0 %v3569_v29 }
 0x39f   : > { %v19171_v2 = vpop.f32.mrf.mxu0  ;;  %15552 = vmatpush3.bf16.xpose.msra.mxu1 %v19167_v63  ;;  %15558 = vmatpush3.bf16.xpose.msra.mxu0 %v3595_v7 }
 0x3a0   : > { %15553 = vmatprep.mubr.msk.bf16.mxu1 %vm17773_vm0, %v23261_v46  ;;  %15559 = vmatprep.mubr.msk.bf16.mxu0 %vm17773_vm0, %v23261_v46 }
 0x3a1   : > { %v19178_v48 = vpop.f32.mrf.mxu0  ;;  %15563 = vmatprep.subr.bf16.mxu1 %v23261_v46  ;;  %15569 = vmatprep.subr.bf16.mxu0 %v23261_v46 }
 0x3a3   : > { %v19182_v30 = vpop.f32.mrf.mxu0 }
 0x3a5   : > { %v19186_v1 = vpop.f32.mrf.mxu0 }
 0x3a6   : > { %15554 = vmatmul.mubr.bf16.vlgmr.msra.gmra.mxu1 %v3570_v6  ;;  %15560 = vmatmul.mubr.bf16.vlgmr.msra.gmra.mxu0 %v18949_v43  ;;  %v3599_v43 = vrot.slane %v19123_v35, 4 }
 0x3a7   : > { %v19190_v13 = vpop.f32.mrf.mxu0  ;;  %15564 = vmatpush3.bf16.xpose.msra.mxu1 %v3596_v52  ;;  %15570 = vmatpush3.bf16.xpose.msra.mxu0 %v3597_v12 }
 0x3a8   : > { %15565 = vmatprep.mubr.msk.bf16.mxu1 %vm17773_vm0, %v23261_v46  ;;  %15571 = vmatprep.mubr.msk.bf16.mxu0 %vm17773_vm0, %v23261_v46 }
 0x3a9   : > { %v19196_v15 = vpop.f32.mrf.mxu0  ;;  %15575 = vmatprep.subr.bf16.mxu1 %v23261_v46  ;;  %15581 = vmatprep.subr.bf16.mxu0 %v23261_v46 }
 0x3ab   : > { %v19200_v62 = vpop.f32.mrf.mxu0 }
 0x3ad   : > { %v19203_v54 = vpop.f32.mrf.mxu0 }
 0x3ae   : > { %15566 = vmatmul.mubr.bf16.vlgmr.msra.gmra.mxu1 %v18963_v42  ;;  %15572 = vmatmul.mubr.bf16.vlgmr.msra.gmra.mxu0 %v18966_v38  ;;  %v19221_v42 = vrot.slane %v18927_v53, %v23147_v4 }
 0x3af   : > { %v19209_v32 = vpop.f32.mrf.mxu0  ;;  %15576 = vmatpush3.bf16.xpose.msra.mxu1 %v3598_v31  ;;  %15582 = vmatpush3.bf16.xpose.msra.mxu0 %v3599_v43 }
 0x3b0   : > { %15577 = vmatprep.mubr.msk.bf16.mxu1 %vm17773_vm0, %v23261_v46  ;;  %15583 = vmatprep.mubr.msk.bf16.mxu0 %vm17773_vm0, %v23261_v46 }
 0x3b1   : > { %v19216_v35 = vpop.f32.mrf.mxu0  ;;  %15587 = vmatprep.subr.bf16.mxu1 %v23261_v46  ;;  %15593 = vmatprep.subr.bf16.mxu0 %v23261_v46 }
 0x3b3   : > { %v19225_v38 = vpop.f32.mrf.mxu0 }
 0x3b4   : > { %v3113_v34 = vpop.f32.mrf.mxu1 }
 0x3b5   : > { %v3114_v14 = vadd.f32 %v3113_v34, %v19221_v42  ;;  %v15013_v8 = vpop.f32.mrf.mxu0 }
 0x3b6   : > { %v3115_v5 = vpop.f32.mrf.mxu1  ;;  %15578 = vmatmul.mubr.bf16.vlgmr.msra.gmra.mxu1 %v18990_v36  ;;  %15584 = vmatmul.mubr.bf16.vlgmr.msra.gmra.mxu0 %v18995_v17 }
 0x3b7   : > { %v3116_v37 = vadd.f32 %v3115_v5, %v19230_v19  ;;  %v15014_v49 = vpop.f32.mrf.mxu0  ;;  %15588 = vmatpush3.bf16.xpose.msra.mxu1 %v3600_v22  ;;  %15594 = vmatpush3.bf16.xpose.msra.mxu0 %v3601_v24  ;;  %v3187_v56 = vadd.f32 %v19147_v0, %v3114_v14 }
 0x3b8   : > { %v19238_v53 = vadd.f32 %v15014_v49, %v15013_v8  ;;  %v3117_v21 = vpop.f32.mrf.mxu1  ;;  %15589 = vmatprep.mubr.msk.bf16.mxu1 %vm17773_vm0, %v23261_v46  ;;  %15595 = vmatprep.mubr.msk.bf16.mxu0 %vm17773_vm0, %v23261_v46 }
 0x3b9   : > { %v3189_v36 = vadd.f32 %v19150_v20, %v3116_v37  ;;  %v3118_v17 = vadd.f32 %v3117_v21, %v19221_v42  ;;  %v19247_v23 = vpop.f32.mrf.mxu0  ;;  %15599 = vmatprep.subr.bf16.mxu1 %v23261_v46  ;;  %15605 = vmatprep.subr.bf16.mxu0 %v23261_v46 }
 0x3ba   : > { %v3119_v11 = vpop.f32.mrf.mxu1 }
 0x3bb   : > { %v14960_v57 = vpack.c.bf16 %v3189_v36, %v3187_v56  ;;  %v3120_v41 = vadd.f32 %v3119_v11, %v19230_v19  ;;  %v19252_v10 = vpop.f32.mrf.mxu0  ;;  %v3191_v55 = vadd.f32 %v19158_v40, %v3118_v17 }
 0x3bc   : > { %v3123_v50 = vpop.f32.mrf.mxu1 }
 0x3bd   : > { %v3193_v61 = vadd.f32 %v19162_v26, %v3120_v41  ;;  %v3124_v60 = vadd.f32 %v3123_v50, %v19221_v42  ;;  %v15019_v39 = vpop.f32.mrf.mxu0  ;;  %v4922_v0 = vsel %vm4920_vm1, %v14960_v57, 0  ;;  %v3611_v9 = vrot.slane %v14960_v57, 4 }
 0x3be   : > { %v3125_v20 = vpop.f32.mrf.mxu1  ;;  %15590 = vmatmul.mubr.bf16.vlgmr.msra.gmra.mxu1 %v19026_v25  ;;  %15596 = vmatmul.mubr.bf16.vlgmr.msra.gmra.mxu0 %v19037_v59 }
 0x3bf   : > { %v3197_v44 = vadd.f32 %v19169_v27, %v3124_v60  ;;  %v3126_v18 = vadd.f32 %v3125_v20, %v19230_v19  ;;  %v15020_v40 = vpop.f32.mrf.mxu0  ;;  %15600 = vmatpush3.bf16.xpose.msra.mxu1 %v3602_v58  ;;  %15606 = vmatpush3.bf16.msra.mxu0 %v4922_v0  ;;  %v14965_v45 = vpack.c.bf16 %v3193_v61, %v3191_v55  ;;  %v19264_v26 = vsel %vm4920_vm1, %v3611_v9, 0 }
 0x3c0   : > { %v19266_v29 = vadd.f32 %v15020_v40, %v15019_v39  ;;  %v3127_v16 = vpop.f32.mrf.mxu1  ;;  %15601 = vmatprep.mubr.msk.bf16.mxu1 %vm17773_vm0, %v23261_v46  ;;  %15611 = vmatprep.subr.bf16.mxu1 %v23261_v46 }
 0x3c1   : > { %v3199_v25 = vadd.f32 %v19171_v2, %v3126_v18  ;;  %v3128_v59 = vadd.f32 %v3127_v16, %v19221_v42  ;;  %v19273_v7 = vpop.f32.mrf.mxu0  ;;  %15607 = vmatprep.mubr.msk.bf16.mxu0 %vm17773_vm0, %v23261_v46  ;;  %15617 = vmatprep.subr.bf16.mxu0 %v23261_v46  ;;  %v3612_v63 = vrot.slane %v14965_v45, 4 }
 0x3c2   : > { %v3129_v27 = vpop.f32.mrf.mxu1 }
 0x3c3   : > { %v14970_v6 = vpack.c.bf16 %v3199_v25, %v3197_v44  ;;  %v3201_v12 = vadd.f32 %v19178_v48, %v3128_v59  ;;  %v3130_v52 = vadd.f32 %v3129_v27, %v19230_v19  ;;  %v15023_v43 = vpop.f32.mrf.mxu0  ;;  %v19281_v31 = vsel %vm4920_vm1, %v3612_v63, 0 }
 0x3c4   : > { %v3133_v2 = vpop.f32.mrf.mxu1  ;;  %v4968_v48 = vsel %vm4920_vm1, %v14965_v45, 0 }
 0x3c5   : > { %v3203_v34 = vadd.f32 %v19182_v30, %v3130_v52  ;;  %v3134_v24 = vadd.f32 %v3133_v2, %v19221_v42  ;;  %v15025_v14 = vpop.f32.mrf.mxu0  ;;  %v19286_v8 = vsel %vm4920_vm1, %v14970_v6, 0  ;;  %v3613_v22 = vrot.slane %v14970_v6, 4 }
 0x3c6   : > { %v3135_v5 = vpop.f32.mrf.mxu1  ;;  %15602 = vmatmul.mubr.bf16.vlgmr.msra.gmra.mxu1 %v19070_v33 }
 0x3c7   : > { %v3207_v37 = vadd.f32 %v19186_v1, %v3134_v24  ;;  %v3136_v49 = vadd.f32 %v3135_v5, %v19230_v19  ;;  %v15026_v21 = vpop.f32.mrf.mxu0  ;;  %15612 = vmatpush3.bf16.msra.mxu1 %v4968_v48  ;;  %15613 = vmatprep.mubr.msk.bf16.mxu1 %vm17773_vm0, %v23261_v46  ;;  %v14975_v30 = vpack.c.bf16 %v3203_v34, %v3201_v12  ;;  %v19295_v56 = vsel %vm4920_vm1, %v3613_v22, 0 }
 0x3c8   : > { %v19297_v36 = vadd.f32 %v15026_v21, %v15025_v14  ;;  %v3137_v17 = vpop.f32.mrf.mxu1  ;;  %15623 = vmatprep.subr.bf16.mxu1 %v23261_v46  ;;  %v14024_v14 = vld [vmem:[%s18167_s1 + $0x8] ss:$0 sm:$0xff]  ;;  %v15024_v5 = vadd.f32 %v15023_v43, %v19273_v7 }
 0x3c9   : > { %v3209_v33 = vadd.f32 %v19190_v13, %v3136_v49  ;;  %v3138_v1 = vadd.f32 %v3137_v17, %v19221_v42  ;;  %v19302_v11 = vpop.f32.mrf.mxu0  ;;  %v19305_v57 = vsel %vm4920_vm1, %v14975_v30, 0  ;;  %v3614_v41 = vrot.slane %v14975_v30, 4 }
 0x3ca   : > { %v3139_v55 = vpop.f32.mrf.mxu1  ;;  %v3260_v30 = vadd.f32 %v19238_v53, %v14024_v14 }
 0x3cb   : > { %v14980_v50 = vpack.c.bf16 %v3209_v33, %v3207_v37  ;;  %v3211_v58 = vadd.f32 %v19196_v15, %v3138_v1  ;;  %v3140_v61 = vadd.f32 %v3139_v55, %v19230_v19  ;;  %v15029_v60 = vpop.f32.mrf.mxu0  ;;  %v19310_v39 = vsel %vm4920_vm1, %v3614_v41, 0 }
 0x3cc   : > { %v3143_v0 = vpop.f32.mrf.mxu1  ;;  %v3271_v1 = vadd.f32 %v15024_v5, %v14024_v14 }
 0x3cd   : > { %v3213_v13 = vadd.f32 %v19200_v62, %v3140_v61  ;;  %v3144_v9 = vadd.f32 %v3143_v0, %v19221_v42  ;;  %v15031_v20 = vpop.f32.mrf.mxu0  ;;  %v19315_v44 = vsel %vm4920_vm1, %v14980_v50, 0  ;;  %v3615_v18 = vrot.slane %v14980_v50, 4 }
 0x3ce   : > { %v3145_v40 = vpop.f32.mrf.mxu1 }
 0x3cf   : > { %v3217_v15 = vadd.f32 %v19203_v54, %v3144_v9  ;;  %v3146_v45 = vadd.f32 %v3145_v40, %v19230_v19  ;;  %v15032_v16 = vpop.f32.mrf.mxu0  ;;  %v14985_v25 = vpack.c.bf16 %v3213_v13, %v3211_v58  ;;  %v19320_v59 = vsel %vm4920_vm1, %v3615_v18, 0 }
 0x3d0   : > { %v15033_v63 = vadd.f32 %v15032_v16, %v15031_v20  ;;  %v3147_v62 = vpop.f32.mrf.mxu1  ;;  %v15030_v16 = vadd.f32 %v15029_v60, %v19302_v11 }
 0x3d1   : > { %v3219_v27 = vadd.f32 %v19209_v32, %v3146_v45  ;;  %v3148_v6 = vadd.f32 %v3147_v62, %v19221_v42  ;;  %v19325_v12 = vsel %vm4920_vm1, %v14985_v25, 0  ;;  %v3616_v52 = vrot.slane %v14985_v25, 4  ;;  %v15034_v48 = vpop.f32.mrf.mxu0 }
 0x3d2   : > { %v3149_v2 = vpop.f32.mrf.mxu1  ;;  %v3268_v32 = vadd.f32 %v19266_v29, %v14024_v14  ;;  %v3284_v0 = vadd.f32 %v15033_v63, %v14024_v14  ;;  %v3276_v45 = vadd.f32 %v19297_v36, %v14024_v14 }
 0x3d3   : > { %v14990_v34 = vpack.c.bf16 %v3219_v27, %v3217_v15  ;;  %v3221_v54 = vadd.f32 %v19216_v35, %v3148_v6  ;;  %v3150_v24 = vadd.f32 %v3149_v2, %v19230_v19  ;;  %v19331_v22 = vsel %vm4920_vm1, %v3616_v52, 0 }
 0x3d4   : > { %v15018_v35 = vadd.f32 %v19252_v10, %v19247_v23 }
 0x3d5   : > { %v3223_v42 = vadd.f32 %v19225_v38, %v3150_v24  ;;  %v15455_v37 = vpop.f32.mrf.mxu1  ;;  %v19337_v49 = vsel %vm4920_vm1, %v14990_v34, 0  ;;  %v3617_v21 = vrot.slane %v14990_v34, 4  ;;  %v15035_v38 = vpop.f32.mrf.mxu0 }
 0x3d6   : > { %v3333_v19 = vadd.f32 %v15455_v37, %v3268_v32  ;;  %v3263_v53 = vadd.f32 %v15018_v35, %v14024_v14  ;;  %v15036_v9 = vadd.f32 %v15035_v38, %v15034_v48  ;;  %v3279_v32 = vadd.f32 %v15030_v16, %v14024_v14 }
 0x3d7   : > { %v3324_v17 = vpop.f32.mrf.mxu1  ;;  %v14995_v33 = vpack.c.bf16 %v3223_v42, %v3221_v54  ;;  %v19343_v7 = vsel %vm4920_vm1, %v3617_v21, 0 }
 0x3d8   : > { %v14971_v29 = vpack.c.bf16 %v3333_v19, %v3333_v19  ;;  %v3325_v43 = vadd.f32 %v3324_v17, %v3260_v30  ;;  %v3287_v2 = vadd.f32 %v15036_v9, %v14024_v14  ;;  %v19380_v30 = vld [vmem:[%s23262_s29] sm:$0xff] }
 0x3d9   : > { %v15456_v41 = vpop.f32.mrf.mxu1  ;;  %v19346_v55 = vsel %vm4920_vm1, %v14995_v33, 0  ;;  %v3618_v50 = vrot.slane %v14995_v33, 4 }
 0x3da   : > { %v19349_v58 = vsel %vm4920_vm1, %v14971_v29, 0  ;;  %v14961_v23 = vpack.c.bf16 %v3325_v43, %v3325_v43  ;;  %v3336_v10 = vadd.f32 %v15456_v41, %v3271_v1 }
 0x3db   : > { %v3327_v61 = vpop.f32.mrf.mxu1  ;;  %v19352_v13 = vsel %vm4920_vm1, %v3618_v50, 0 }
 0x3dc   : > { %v19355_v20 = vsel %vm4920_vm1, %v14961_v23, 0  ;;  %v14976_v18 = vpack.c.bf16 %v3336_v10, %v3336_v10  ;;  %v3328_v40 = vadd.f32 %v3327_v61, %v3263_v53 }
 0x3dd   : > { %v15459_v15 = vpop.f32.mrf.mxu1 }
 0x3de   : > { %v19360_v25 = vsel %vm4920_vm1, %v14976_v18, 0  ;;  %v14966_v62 = vpack.c.bf16 %v3328_v40, %v3328_v40  ;;  %v3349_v27 = vadd.f32 %v15459_v15, %v3284_v0 }
 0x3df   : > { %v3340_v63 = vpop.f32.mrf.mxu1 }
 0x3e0   : > { %v14991_v6 = vpack.c.bf16 %v3349_v27, %v3349_v27  ;;  %v3341_v52 = vadd.f32 %v3340_v63, %v3276_v45  ;;  %v19363_v34 = vsel %vm4920_vm1, %v14966_v62, 0 }
 0x3e1   : > { %v15460_v54 = vpop.f32.mrf.mxu1 }
 0x3e2   : > { %v19366_v24 = vsel %vm4920_vm1, %v14991_v6, 0  ;;  %v14981_v5 = vpack.c.bf16 %v3341_v52, %v3341_v52  ;;  %v3352_v36 = vadd.f32 %v15460_v54, %v3287_v2 }
 0x3e3   : > { %v3343_v11 = vpop.f32.mrf.mxu1 }
 0x3e4   : > { %v19369_v60 = vsel %vm4920_vm1, %v14981_v5, 0  ;;  %v14996_v48 = vpack.c.bf16 %v3352_v36, %v3352_v36  ;;  %v3344_v42 = vadd.f32 %v3343_v11, %v3279_v32 }
 0x3e6   : > { %v19372_v37 = vsel %vm4920_vm1, %v14996_v48, 0  ;;  %v14986_v21 = vpack.c.bf16 %v3344_v42, %v3344_v42 }
 0x3e8   : > { %v19375_v35 = vsel %vm4920_vm1, %v14986_v21, 0 }
 0x426   : > { %v3653_v19 = vpop.f32.mrf.mxu1 }
 0x427   : > { %v4579_v14 = vmul.f32 0.088388346, %v3653_v19 }
 0x428   : > { %v15465_v17 = vpop.f32.mrf.mxu1 }
 0x429   : > { %v19383_v33 = vadd.f32 %v19380_v30, %v4579_v14 }
 0x42a   : > { %v3656_v29 = vpop.f32.mrf.mxu1 }
 0x42b   : > { %v4629_v43 = vsel %vm4628_vm2, %v19383_v33, -inf }
 0x42c   : > { %4630 = vmax.xlane.f32.xlu0 %v4629_v43  ;;  %v15466_v1 = vpop.f32.mrf.mxu1 }
 0x42e   : > { %v3693_v38 = vpop.f32.mrf.mxu1  ;;  %v3733_v41 = vpop.f32.mrf.mxu0 }
 0x42f   : > { %v4580_v50 = vmul.f32 0.088388346, %v3693_v38  ;;  %v4581_v23 = vmul.f32 0.088388346, %v3733_v41 }
 0x430   : > { %v15471_v10 = vpop.f32.mrf.mxu1  ;;  %v15477_v53 = vpop.f32.mrf.mxu0 }
 0x431   : > { %v19388_v61 = vadd.f32 %v19380_v30, %v4581_v23  ;;  %v19391_v0 = vadd.f32 %v19380_v30, %v4580_v50 }
 0x432   : > { %v3696_v9 = vpop.f32.mrf.mxu1  ;;  %v3736_v18 = vpop.f32.mrf.mxu0 }
 0x433   : > { %v4635_v40 = vsel %vm4628_vm2, %v19388_v61, -inf  ;;  %v4632_v15 = vsel %vm4628_vm2, %v19391_v0, -inf }
 0x434   : > { %v15478_v45 = vpop.f32.mrf.mxu0  ;;  %4636 = vmax.xlane.f32.xlu0 %v4635_v40  ;;  %4633 = vmax.xlane.f32.xlu1 %v4632_v15  ;;  %v15472_v16 = vpop.f32.mrf.mxu1 }
 0x436   : > { %v3773_v62 = vpop.f32.mrf.mxu1  ;;  %v3813_v27 = vpop.f32.mrf.mxu0 }
 0x437   : > { %v4582_v63 = vmul.f32 0.088388346, %v3773_v62  ;;  %v4583_v6 = vmul.f32 0.088388346, %v3813_v27 }
 0x438   : > { %v15483_v52 = vpop.f32.mrf.mxu1  ;;  %v15489_v2 = vpop.f32.mrf.mxu0 }
 0x439   : > { %v19398_v54 = vadd.f32 %v19380_v30, %v4583_v6  ;;  %v19401_v5 = vadd.f32 %v19380_v30, %v4582_v63 }
 0x43a   : > { %v3776_v36 = vpop.f32.mrf.mxu1  ;;  %v3816_v32 = vpop.f32.mrf.mxu0 }
 0x43b   : > { %v4641_v11 = vsel %vm4628_vm2, %v19398_v54, -inf  ;;  %v4638_v48 = vsel %vm4628_vm2, %v19401_v5, -inf }
 0x43c   : > { %v15490_v42 = vpop.f32.mrf.mxu0  ;;  %4642 = vmax.xlane.f32.xlu0 %v4641_v11  ;;  %4639 = vmax.xlane.f32.xlu1 %v4638_v48  ;;  %v15484_v21 = vpop.f32.mrf.mxu1 }
 0x43e   : > { %v3853_v19 = vpop.f32.mrf.mxu1  ;;  %v3893_v14 = vpop.f32.mrf.mxu0 }
 0x43f   : > { %v4584_v17 = vmul.f32 0.088388346, %v3853_v19  ;;  %v4585_v29 = vmul.f32 0.088388346, %v3893_v14 }
 0x440   : > { %v15495_v43 = vpop.f32.mrf.mxu1  ;;  %v15501_v1 = vpop.f32.mrf.mxu0 }
 0x441   : > { %v19408_v38 = vadd.f32 %v19380_v30, %v4584_v17  ;;  %v19411_v41 = vadd.f32 %v19380_v30, %v4585_v29 }
 0x442   : > { %v3856_v50 = vpop.f32.mrf.mxu1  ;;  %v3896_v23 = vpop.f32.mrf.mxu0 }
 0x443   : > { %v4644_v10 = vsel %vm4628_vm2, %v19408_v38, -inf  ;;  %v4647_v53 = vsel %vm4628_vm2, %v19411_v41, -inf }
 0x444   : > { %4645 = vmax.xlane.f32.xlu1 %v4644_v10  ;;  %v15496_v9 = vpop.f32.mrf.mxu1  ;;  %4648 = vmax.xlane.f32.xlu0 %v4647_v53  ;;  %v15502_v18 = vpop.f32.mrf.mxu0 }
 0x446   : > { %v3933_v40 = vpop.f32.mrf.mxu1  ;;  %v3973_v15 = vpop.f32.mrf.mxu0 }
 0x447   : > { %v4586_v45 = vmul.f32 0.088388346, %v3933_v40  ;;  %v4587_v16 = vmul.f32 0.088388346, %v3973_v15 }
 0x448   : > { %v15507_v62 = vpop.f32.mrf.mxu1  ;;  %v15513_v27 = vpop.f32.mrf.mxu0 }
 0x449   : > { %v19418_v63 = vadd.f32 %v19380_v30, %v4586_v45  ;;  %v19421_v6 = vadd.f32 %v19380_v30, %v4587_v16 }
 0x44a   : > { %v3936_v52 = vpop.f32.mrf.mxu1  ;;  %v3976_v2 = vpop.f32.mrf.mxu0 }
 0x44b   : > { %v4650_v36 = vsel %vm4628_vm2, %v19418_v63, -inf  ;;  %v4653_v32 = vsel %vm4628_vm2, %v19421_v6, -inf }
 0x44c   : > { %4651 = vmax.xlane.f32.xlu1 %v4650_v36  ;;  %v15508_v11 = vpop.f32.mrf.mxu1  ;;  %4654 = vmax.xlane.f32.xlu0 %v4653_v32  ;;  %v15514_v48 = vpop.f32.mrf.mxu0 }
 0x44e   : > { %v4013_v42 = vpop.f32.mrf.mxu1  ;;  %v4053_v21 = vpop.f32.mrf.mxu0 }
 0x44f   : > { %v4588_v19 = vmul.f32 0.088388346, %v4013_v42  ;;  %v4589_v14 = vmul.f32 0.088388346, %v4053_v21 }
 0x450   : > { %v15519_v17 = vpop.f32.mrf.mxu1  ;;  %v15525_v29 = vpop.f32.mrf.mxu0 }
 0x451   : > { %v19428_v43 = vadd.f32 %v19380_v30, %v4588_v19  ;;  %v19431_v1 = vadd.f32 %v19380_v30, %v4589_v14 }
 0x452   : > { %v4016_v50 = vpop.f32.mrf.mxu1  ;;  %v4056_v23 = vpop.f32.mrf.mxu0 }
 0x453   : > { %v4656_v10 = vsel %vm4628_vm2, %v19428_v43, -inf  ;;  %v4659_v53 = vsel %vm4628_vm2, %v19431_v1, -inf }
 0x454   : > { %4657 = vmax.xlane.f32.xlu1 %v4656_v10  ;;  %v15520_v9 = vpop.f32.mrf.mxu1  ;;  %4660 = vmax.xlane.f32.xlu0 %v4659_v53  ;;  %v15526_v18 = vpop.f32.mrf.mxu0 }
 0x456   : > { %v4093_v40 = vpop.f32.mrf.mxu1  ;;  %v4133_v15 = vpop.f32.mrf.mxu0 }
 0x457   : > { %v4590_v45 = vmul.f32 0.088388346, %v4093_v40  ;;  %v4591_v16 = vmul.f32 0.088388346, %v4133_v15 }
 0x458   : > { %v15531_v62 = vpop.f32.mrf.mxu1  ;;  %v15537_v27 = vpop.f32.mrf.mxu0 }
 0x459   : > { %v19438_v52 = vadd.f32 %v19380_v30, %v4590_v45  ;;  %v19441_v2 = vadd.f32 %v19380_v30, %v4591_v16 }
 0x45a   : > { %v4096_v36 = vpop.f32.mrf.mxu1  ;;  %v4136_v32 = vpop.f32.mrf.mxu0 }
 0x45b   : > { %v4662_v11 = vsel %vm4628_vm2, %v19438_v52, -inf  ;;  %v4665_v48 = vsel %vm4628_vm2, %v19441_v2, -inf }
 0x45c   : > { %4663 = vmax.xlane.f32.xlu1 %v4662_v11  ;;  %v15532_v42 = vpop.f32.mrf.mxu1  ;;  %4666 = vmax.xlane.f32.xlu0 %v4665_v48  ;;  %v15538_v21 = vpop.f32.mrf.mxu0 }
 0x45e   : > { %v4173_v19 = vpop.f32.mrf.mxu1  ;;  %v4213_v14 = vpop.f32.mrf.mxu0 }
 0x45f   : > { %v4592_v17 = vmul.f32 0.088388346, %v4173_v19  ;;  %v4593_v29 = vmul.f32 0.088388346, %v4213_v14 }
 0x460   : > { %v15543_v50 = vpop.f32.mrf.mxu1  ;;  %v15549_v23 = vpop.f32.mrf.mxu0 }
 0x461   : > { %v19448_v10 = vadd.f32 %v19380_v30, %v4592_v17  ;;  %v19451_v53 = vadd.f32 %v19380_v30, %v4593_v29 }
 0x462   : > { %v4176_v9 = vpop.f32.mrf.mxu1  ;;  %v4216_v18 = vpop.f32.mrf.mxu0 }
 0x463   : > { %v4668_v40 = vsel %vm4628_vm2, %v19448_v10, -inf  ;;  %v4671_v15 = vsel %vm4628_vm2, %v19451_v53, -inf }
 0x464   : > { %4669 = vmax.xlane.f32.xlu1 %v4668_v40  ;;  %v15544_v45 = vpop.f32.mrf.mxu1  ;;  %4672 = vmax.xlane.f32.xlu0 %v4671_v15  ;;  %v15550_v16 = vpop.f32.mrf.mxu0 }
 0x466   : > { %v4253_v62 = vpop.f32.mrf.mxu1  ;;  %v4293_v27 = vpop.f32.mrf.mxu0 }
 0x467   : > { %v4594_v36 = vmul.f32 0.088388346, %v4253_v62  ;;  %v4595_v32 = vmul.f32 0.088388346, %v4293_v27 }
 0x468   : > { %v15555_v11 = vpop.f32.mrf.mxu1  ;;  %v15561_v48 = vpop.f32.mrf.mxu0 }
 0x469   : > { %v19458_v42 = vadd.f32 %v19380_v30, %v4594_v36  ;;  %v19461_v21 = vadd.f32 %v19380_v30, %v4595_v32 }
 0x46a   : > { %v4256_v19 = vpop.f32.mrf.mxu1  ;;  %v4296_v14 = vpop.f32.mrf.mxu0 }
 0x46b   : > { %v4674_v17 = vsel %vm4628_vm2, %v19458_v42, -inf  ;;  %v4677_v29 = vsel %vm4628_vm2, %v19461_v21, -inf }
 0x46c   : > { %4675 = vmax.xlane.f32.xlu1 %v4674_v17  ;;  %v15556_v50 = vpop.f32.mrf.mxu1  ;;  %4678 = vmax.xlane.f32.xlu0 %v4677_v29  ;;  %v15562_v23 = vpop.f32.mrf.mxu0 }
 0x46e   : > { %v4333_v9 = vpop.f32.mrf.mxu1  ;;  %v4373_v18 = vpop.f32.mrf.mxu0 }
 0x46f   : > { %v4596_v40 = vmul.f32 0.088388346, %v4333_v9  ;;  %v4597_v15 = vmul.f32 0.088388346, %v4373_v18 }
 0x470   : > { %v15567_v45 = vpop.f32.mrf.mxu1  ;;  %v15573_v16 = vpop.f32.mrf.mxu0 }
 0x471   : > { %v19468_v62 = vadd.f32 %v19380_v30, %v4596_v40  ;;  %v19471_v27 = vadd.f32 %v19380_v30, %v4597_v15 }
 0x472   : > { %v4336_v36 = vpop.f32.mrf.mxu1  ;;  %v4376_v32 = vpop.f32.mrf.mxu0 }
 0x473   : > { %v4680_v11 = vsel %vm4628_vm2, %v19468_v62, -inf  ;;  %v4683_v48 = vsel %vm4628_vm2, %v19471_v27, -inf }
 0x474   : > { %4681 = vmax.xlane.f32.xlu1 %v4680_v11  ;;  %v15568_v19 = vpop.f32.mrf.mxu1  ;;  %4684 = vmax.xlane.f32.xlu0 %v4683_v48  ;;  %v15574_v14 = vpop.f32.mrf.mxu0 }
 0x476   : > { %v4413_v17 = vpop.f32.mrf.mxu1  ;;  %v4453_v29 = vpop.f32.mrf.mxu0 }
 0x477   : > { %v4598_v50 = vmul.f32 0.088388346, %v4413_v17  ;;  %v4599_v23 = vmul.f32 0.088388346, %v4453_v29 }
 0x478   : > { %v15579_v9 = vpop.f32.mrf.mxu1  ;;  %v15585_v18 = vpop.f32.mrf.mxu0 }
 0x479   : > { %v19478_v40 = vadd.f32 %v19380_v30, %v4598_v50  ;;  %v19481_v15 = vadd.f32 %v19380_v30, %v4599_v23 }
 0x47a   : > { %v4416_v45 = vpop.f32.mrf.mxu1  ;;  %v4456_v16 = vpop.f32.mrf.mxu0 }
 0x47b   : > { %v4686_v36 = vsel %vm4628_vm2, %v19478_v40, -inf  ;;  %v4689_v32 = vsel %vm4628_vm2, %v19481_v15, -inf }
 0x47c   : > { %4687 = vmax.xlane.f32.xlu1 %v4686_v36  ;;  %v15580_v11 = vpop.f32.mrf.mxu1  ;;  %4690 = vmax.xlane.f32.xlu0 %v4689_v32  ;;  %v15586_v48 = vpop.f32.mrf.mxu0 }
 0x47e   : > { %v4493_v19 = vpop.f32.mrf.mxu1  ;;  %v4533_v14 = vpop.f32.mrf.mxu0 }
 0x47f   : > { %v4600_v17 = vmul.f32 0.088388346, %v4493_v19  ;;  %v4601_v29 = vmul.f32 0.088388346, %v4533_v14 }
 0x480   : > { %v15591_v50 = vpop.f32.mrf.mxu1  ;;  %v15597_v9 = vpop.f32.mrf.mxu0 }
 0x481   : > { %v19488_v23 = vadd.f32 %v19380_v30, %v4600_v17  ;;  %v19491_v18 = vadd.f32 %v19380_v30, %v4601_v29 }
 0x482   : > { %v4496_v45 = vpop.f32.mrf.mxu1  ;;  %v4536_v16 = vpop.f32.mrf.mxu0 }
 0x483   : > { %v4692_v36 = vsel %vm4628_vm2, %v19488_v23, -inf  ;;  %v4695_v32 = vsel %vm4628_vm2, %v19491_v18, -inf }
 0x484   : > { %4693 = vmax.xlane.f32.xlu1 %v4692_v36  ;;  %v15592_v11 = vpop.f32.mrf.mxu1  ;;  %4696 = vmax.xlane.f32.xlu0 %v4695_v32  ;;  %v15598_v48 = vpop.f32.mrf.mxu0 }
 0x486   : > { %v4573_v19 = vpop.f32.mrf.mxu1 }
 0x487   : > { %v4602_v14 = vmul.f32 0.088388346, %v4573_v19 }
 0x488   : > { %v15603_v50 = vpop.f32.mrf.mxu1 }
 0x489   : > { %v19498_v17 = vadd.f32 %v19380_v30, %v4602_v14 }
 0x48a   : > { %v4576_v29 = vpop.f32.mrf.mxu1 }
 0x48b   : > { %v4698_v9 = vsel %vm4628_vm2, %v19498_v17, -inf }
 0x48c   : > { %4699 = vmax.xlane.f32.xlu1 %v4698_v9  ;;  %v15604_v45 = vpop.f32.mrf.mxu1 }
 0x4b5   : > { %v4631_v16 = vpop.xlane.xlu0 %4630 }
 0x4b6   : > { %v4701_v51 = vsub.f32 %v19383_v33, %v4631_v16 }
 0x4b8   : > { %v4725_v4 = vmul.f32 1.442695, %v4701_v51 }
 0x4ba   : > { %17132 = vpow2.f32 %v4725_v4 }
 0x4bd   : > { %v4637_v36 = vpop.xlane.xlu0 %4636  ;;  %v4634_v32 = vpop.xlane.xlu1 %4633 }
 0x4be   : > { %v4703_v11 = vsub.f32 %v19388_v61, %v4637_v36  ;;  %v4702_v48 = vsub.f32 %v19391_v0, %v4634_v32 }
 0x4c0   : > { %v4729_v19 = vmul.f32 1.442695, %v4703_v11  ;;  %v4727_v30 = vmul.f32 1.442695, %v4702_v48 }
 0x4c2   : > { %17134 = vpow2.f32 %v4729_v19 }
 0x4c3   : > { %17136 = vpow2.f32 %v4727_v30 }
 0x4c5   : > { %v4643_v14 = vpop.xlane.xlu0 %4642  ;;  %v4640_v50 = vpop.xlane.xlu1 %4639 }
 0x4c6   : > { %v4705_v29 = vsub.f32 %v19398_v54, %v4643_v14  ;;  %v4704_v9 = vsub.f32 %v19401_v5, %v4640_v50 }
 0x4c7   : > { %v19507_v45 = vpop.eup %17132 }
 0x4c8   : > { %v4733_v51 = vmul.f32 1.442695, %v4705_v29  ;;  %v4731_v4 = vmul.f32 1.442695, %v4704_v9  ;;  %v4773_v33 = vsel %vm4628_vm2, %v19507_v45, 0.0 }
 0x4c9   : > { %4774 = vadd.xlane.f32.xlu0 %v4773_v33 }
 0x4ca   : > { %17138 = vpow2.f32 %v4733_v51 }
 0x4cb   : > { %17140 = vpow2.f32 %v4731_v4 }
 0x4cd   : > { %v4646_v61 = vpop.xlane.xlu1 %4645  ;;  %v4649_v0 = vpop.xlane.xlu0 %4648 }
 0x4ce   : > { %v4706_v16 = vsub.f32 %v19408_v38, %v4646_v61  ;;  %v4707_v36 = vsub.f32 %v19411_v41, %v4649_v0 }
 0x4cf   : > { %v19513_v32 = vpop.eup %17134 }
 0x4d0   : > { %v19515_v54 = vpop.eup %17136  ;;  %v4735_v5 = vmul.f32 1.442695, %v4706_v16  ;;  %v4737_v11 = vmul.f32 1.442695, %v4707_v36  ;;  %v4779_v48 = vsel %vm4628_vm2, %v19513_v32, 0.0 }
 0x4d1   : > { %v4776_v19 = vsel %vm4628_vm2, %v19515_v54, 0.0  ;;  %4780 = vadd.xlane.f32.xlu0 %v4779_v48 }
 0x4d2   : > { %17142 = vpow2.f32 %v4735_v5  ;;  %4777 = vadd.xlane.f32.xlu1 %v4776_v19 }
 0x4d3   : > { %17144 = vpow2.f32 %v4737_v11 }
 0x4d5   : > { %v4652_v30 = vpop.xlane.xlu1 %4651  ;;  %v4655_v38 = vpop.xlane.xlu0 %4654 }
 0x4d6   : > { %v4708_v41 = vsub.f32 %v19418_v63, %v4652_v30  ;;  %v4709_v14 = vsub.f32 %v19421_v6, %v4655_v38 }
 0x4d7   : > { %v19523_v50 = vpop.eup %17138 }
 0x4d8   : > { %v19525_v29 = vpop.eup %17140  ;;  %v4739_v9 = vmul.f32 1.442695, %v4708_v41  ;;  %v4741_v51 = vmul.f32 1.442695, %v4709_v14  ;;  %v4785_v4 = vsel %vm4628_vm2, %v19523_v50, 0.0 }
 0x4d9   : > { %v4782_v33 = vsel %vm4628_vm2, %v19525_v29, 0.0  ;;  %4786 = vadd.xlane.f32.xlu0 %v4785_v4 }
 0x4da   : > { %17146 = vpow2.f32 %v4739_v9  ;;  %4783 = vadd.xlane.f32.xlu1 %v4782_v33 }
 0x4db   : > { %17148 = vpow2.f32 %v4741_v51 }
 0x4dd   : > { %v4658_v61 = vpop.xlane.xlu1 %4657  ;;  %v4661_v63 = vpop.xlane.xlu0 %4660 }
 0x4de   : > { %v4710_v6 = vsub.f32 %v19428_v43, %v4658_v61  ;;  %v4711_v0 = vsub.f32 %v19431_v1, %v4661_v63 }
 0x4df   : > { %v19533_v16 = vpop.eup %17142 }
 0x4e0   : > { %v19535_v36 = vpop.eup %17144  ;;  %v4743_v5 = vmul.f32 1.442695, %v4710_v6  ;;  %v4745_v11 = vmul.f32 1.442695, %v4711_v0  ;;  %v4788_v48 = vsel %vm4628_vm2, %v19533_v16, 0.0 }
 0x4e1   : > { %4789 = vadd.xlane.f32.xlu1 %v4788_v48  ;;  %v4791_v19 = vsel %vm4628_vm2, %v19535_v36, 0.0 }
 0x4e2   : > { %17150 = vpow2.f32 %v4743_v5  ;;  %4792 = vadd.xlane.f32.xlu0 %v4791_v19 }
 0x4e3   : > { %17152 = vpow2.f32 %v4745_v11 }
 0x4e5   : > { %v4664_v30 = vpop.xlane.xlu1 %4663  ;;  %v4667_v43 = vpop.xlane.xlu0 %4666 }
 0x4e6   : > { %v4712_v1 = vsub.f32 %v19438_v52, %v4664_v30  ;;  %v4713_v38 = vsub.f32 %v19441_v2, %v4667_v43 }
 0x4e7   : > { %v19543_v41 = vpop.eup %17146 }
 0x4e8   : > { %v19545_v14 = vpop.eup %17148  ;;  %v4747_v9 = vmul.f32 1.442695, %v4712_v1  ;;  %v4749_v51 = vmul.f32 1.442695, %v4713_v38  ;;  %v4794_v4 = vsel %vm4628_vm2, %v19543_v41, 0.0 }
 0x4e9   : > { %4795 = vadd.xlane.f32.xlu1 %v4794_v4  ;;  %v4797_v33 = vsel %vm4628_vm2, %v19545_v14, 0.0 }
 0x4ea   : > { %17154 = vpow2.f32 %v4747_v9  ;;  %4798 = vadd.xlane.f32.xlu0 %v4797_v33 }
 0x4eb   : > { %17156 = vpow2.f32 %v4749_v51 }
 0x4ed   : > { %v4670_v61 = vpop.xlane.xlu1 %4669  ;;  %v4673_v52 = vpop.xlane.xlu0 %4672 }
 0x4ee   : > { %v4714_v2 = vsub.f32 %v19448_v10, %v4670_v61  ;;  %v4715_v63 = vsub.f32 %v19451_v53, %v4673_v52 }
 0x4ef   : > { %v19553_v6 = vpop.eup %17150 }
 0x4f0   : > { %v19555_v0 = vpop.eup %17152  ;;  %v4751_v5 = vmul.f32 1.442695, %v4714_v2  ;;  %v4753_v11 = vmul.f32 1.442695, %v4715_v63  ;;  %v4800_v48 = vsel %vm4628_vm2, %v19553_v6, 0.0 }
 0x4f1   : > { %4801 = vadd.xlane.f32.xlu1 %v4800_v48  ;;  %v4803_v19 = vsel %vm4628_vm2, %v19555_v0, 0.0 }
 0x4f2   : > { %17158 = vpow2.f32 %v4751_v5  ;;  %4804 = vadd.xlane.f32.xlu0 %v4803_v19 }
 0x4f3   : > { %17160 = vpow2.f32 %v4753_v11 }
 0x4f5   : > { %v4676_v30 = vpop.xlane.xlu1 %4675  ;;  %v4679_v10 = vpop.xlane.xlu0 %4678 }
 0x4f6   : > { %v4716_v53 = vsub.f32 %v19458_v42, %v4676_v30  ;;  %v4717_v43 = vsub.f32 %v19461_v21, %v4679_v10 }
 0x4f7   : > { %v19563_v1 = vpop.eup %17154 }
 0x4f8   : > { %v19565_v38 = vpop.eup %17156  ;;  %v4755_v9 = vmul.f32 1.442695, %v4716_v53  ;;  %v4757_v51 = vmul.f32 1.442695, %v4717_v43  ;;  %v4806_v4 = vsel %vm4628_vm2, %v19563_v1, 0.0 }
 0x4f9   : > { %4807 = vadd.xlane.f32.xlu1 %v4806_v4  ;;  %v4809_v33 = vsel %vm4628_vm2, %v19565_v38, 0.0 }
 0x4fa   : > { %17162 = vpow2.f32 %v4755_v9  ;;  %4810 = vadd.xlane.f32.xlu0 %v4809_v33 }
 0x4fb   : > { %17164 = vpow2.f32 %v4757_v51 }
 0x4fd   : > { %v4682_v61 = vpop.xlane.xlu1 %4681  ;;  %v4685_v42 = vpop.xlane.xlu0 %4684 }
 0x4fe   : > { %v4718_v21 = vsub.f32 %v19468_v62, %v4682_v61  ;;  %v4719_v52 = vsub.f32 %v19471_v27, %v4685_v42 }
 0x4ff   : > { %v19573_v2 = vpop.eup %17158 }
 0x500   : > { %v19575_v63 = vpop.eup %17160  ;;  %v4759_v5 = vmul.f32 1.442695, %v4718_v21  ;;  %v4761_v11 = vmul.f32 1.442695, %v4719_v52  ;;  %v4812_v48 = vsel %vm4628_vm2, %v19573_v2, 0.0 }
 0x501   : > { %4813 = vadd.xlane.f32.xlu1 %v4812_v48  ;;  %v4815_v19 = vsel %vm4628_vm2, %v19575_v63, 0.0 }
 0x502   : > { %17166 = vpow2.f32 %v4759_v5  ;;  %4816 = vadd.xlane.f32.xlu0 %v4815_v19 }
 0x503   : > { %17168 = vpow2.f32 %v4761_v11 }
 0x505   : > { %v4688_v30 = vpop.xlane.xlu1 %4687  ;;  %v4691_v62 = vpop.xlane.xlu0 %4690 }
 0x506   : > { %v4720_v27 = vsub.f32 %v19478_v40, %v4688_v30  ;;  %v4721_v10 = vsub.f32 %v19481_v15, %v4691_v62 }
 0x507   : > { %v19583_v53 = vpop.eup %17162 }
 0x508   : > { %v19585_v43 = vpop.eup %17164  ;;  %v4763_v9 = vmul.f32 1.442695, %v4720_v27  ;;  %v4765_v51 = vmul.f32 1.442695, %v4721_v10  ;;  %v4818_v4 = vsel %vm4628_vm2, %v19583_v53, 0.0 }
 0x509   : > { %4819 = vadd.xlane.f32.xlu1 %v4818_v4  ;;  %v4821_v33 = vsel %vm4628_vm2, %v19585_v43, 0.0 }
 0x50a   : > { %17170 = vpow2.f32 %v4763_v9  ;;  %4822 = vadd.xlane.f32.xlu0 %v4821_v33 }
 0x50b   : > { %17172 = vpow2.f32 %v4765_v51 }
 0x50d   : > { %v4694_v61 = vpop.xlane.xlu1 %4693  ;;  %v4697_v40 = vpop.xlane.xlu0 %4696 }
 0x50e   : > { %v4722_v15 = vsub.f32 %v19488_v23, %v4694_v61  ;;  %v4723_v42 = vsub.f32 %v19491_v18, %v4697_v40 }
 0x50f   : > { %v19593_v21 = vpop.eup %17166 }
 0x510   : > { %v19595_v52 = vpop.eup %17168  ;;  %v4767_v5 = vmul.f32 1.442695, %v4722_v15  ;;  %v4769_v11 = vmul.f32 1.442695, %v4723_v42  ;;  %v4824_v48 = vsel %vm4628_vm2, %v19593_v21, 0.0 }
 0x511   : > { %4825 = vadd.xlane.f32.xlu1 %v4824_v48  ;;  %v4827_v19 = vsel %vm4628_vm2, %v19595_v52, 0.0 }
 0x512   : > { %17174 = vpow2.f32 %v4767_v5  ;;  %4828 = vadd.xlane.f32.xlu0 %v4827_v19 }
 0x513   : > { %17176 = vpow2.f32 %v4769_v11 }
 0x515   : > { %v4700_v30 = vpop.xlane.xlu1 %4699 }
 0x516   : > { %v4724_v23 = vsub.f32 %v19498_v17, %v4700_v30 }
 0x517   : > { %v19602_v18 = vpop.eup %17170 }
 0x518   : > { %v19604_v62 = vpop.eup %17172  ;;  %v4771_v27 = vmul.f32 1.442695, %v4724_v23  ;;  %v4830_v10 = vsel %vm4628_vm2, %v19602_v18, 0.0 }
 0x519   : > { %4831 = vadd.xlane.f32.xlu1 %v4830_v10  ;;  %v4833_v9 = vsel %vm4628_vm2, %v19604_v62, 0.0 }
 0x51a   : > { %17178 = vpow2.f32 %v4771_v27  ;;  %4834 = vadd.xlane.f32.xlu0 %v4833_v9 }
 0x51f   : > { %v19610_v51 = vpop.eup %17174 }
 0x520   : > { %v19612_v4 = vpop.eup %17176  ;;  %v4836_v17 = vsel %vm4628_vm2, %v19610_v51, 0.0 }
 0x521   : > { %4837 = vadd.xlane.f32.xlu1 %v4836_v17  ;;  %v4839_v33 = vsel %vm4628_vm2, %v19612_v4, 0.0 }
 0x522   : > { %4840 = vadd.xlane.f32.xlu0 %v4839_v33 }
 0x527   : > { %v19618_v61 = vpop.eup %17178 }
 0x528   : > { %v4842_v40 = vsel %vm4628_vm2, %v19618_v61, 0.0 }
 0x529   : > { %4843 = vadd.xlane.f32.xlu1 %v4842_v40 }
 0x552   : > { %v4775_v15 = vpop.xlane.xlu0 %4774 }
 0x553   : > { %17180 = vrcp.f32 %v4775_v15 }
 0x55a   : > { %v4781_v42 = vpop.xlane.xlu0 %4780 }
 0x55b   : > { %v4778_v5 = vpop.xlane.xlu1 %4777  ;;  %17182 = vrcp.f32 %v4781_v42 }
 0x55c   : > { %17184 = vrcp.f32 %v4778_v5 }
 0x560   : > { %v17181_v11 = vpop.eup %17180 }
 0x561   : > { %v4869_v48 = vmul.f32 %v17181_v11, %v19507_v45 }
 0x562   : > { %v4787_v19 = vpop.xlane.xlu0 %4786 }
 0x563   : > { %v4893_v30 = vpack.c.bf16 %v4869_v48, %v4869_v48  ;;  %v4784_v23 = vpop.xlane.xlu1 %4783  ;;  %17186 = vrcp.f32 %v4787_v19 }
 0x564   : > { %17188 = vrcp.f32 %v4784_v23 }
 0x565   : > { %15608 = vmatmul.mubr.msk.bf16.vlgmr.msra.gmra.mxu0 %vm4628_vm2, %v4893_v30 }
 0x566   : > { %15618 = vmatpush3.bf16.msra.mxu0 %v19286_v8  ;;  %15619 = vmatprep.mubr.msk.bf16.mxu0 %vm17773_vm0, %v23261_v46 }
 0x567   : > { %15629 = vmatprep.subr.bf16.mxu0 %v23261_v46 }
 0x568   : > { %v17183_v27 = vpop.eup %17182 }
 0x569   : > { %v17185_v10 = vpop.eup %17184  ;;  %v4871_v9 = vmul.f32 %v17183_v27, %v19513_v32 }
 0x56a   : > { %v4870_v45 = vmul.f32 %v17185_v10, %v19515_v54  ;;  %v4790_v17 = vpop.xlane.xlu1 %4789 }
 0x56b   : > { %v4895_v33 = vpack.c.bf16 %v4871_v9, %v4871_v9  ;;  %17190 = vrcp.f32 %v4790_v17  ;;  %v4793_v40 = vpop.xlane.xlu0 %4792 }
 0x56c   : > { %v4894_v15 = vpack.c.bf16 %v4870_v45, %v4870_v45  ;;  %17192 = vrcp.f32 %v4793_v40 }
 0x56d   : > { %15620 = vmatmul.mubr.msk.bf16.vlgmr.msra.gmra.mxu0 %vm4628_vm2, %v4895_v33 }
 0x56e   : > { %15614 = vmatmul.mubr.msk.bf16.vlgmr.msra.gmra.mxu1 %vm4628_vm2, %v4894_v15  ;;  %15630 = vmatpush3.bf16.msra.mxu0 %v19315_v44 }
 0x56f   : > { %15624 = vmatpush3.bf16.msra.mxu1 %v19305_v57  ;;  %15625 = vmatprep.mubr.msk.bf16.mxu1 %vm17773_vm0, %v23261_v46 }
 0x570   : > { %v17187_v8 = vpop.eup %17186  ;;  %15631 = vmatprep.mubr.msk.bf16.mxu0 %vm17773_vm0, %v23261_v46  ;;  %15635 = vmatprep.subr.bf16.mxu1 %v23261_v46 }
 0x571   : > { %v17189_v32 = vpop.eup %17188  ;;  %v4873_v54 = vmul.f32 %v17187_v8, %v19523_v50  ;;  %15641 = vmatprep.subr.bf16.mxu0 %v23261_v46 }
 0x572   : > { %v4872_v42 = vmul.f32 %v17189_v32, %v19525_v29  ;;  %v4796_v5 = vpop.xlane.xlu1 %4795 }
 0x573   : > { %v4897_v44 = vpack.c.bf16 %v4873_v54, %v4873_v54  ;;  %17194 = vrcp.f32 %v4796_v5  ;;  %v4799_v57 = vpop.xlane.xlu0 %4798 }
 0x574   : > { %v4896_v11 = vpack.c.bf16 %v4872_v42, %v4872_v42  ;;  %17196 = vrcp.f32 %v4799_v57 }
 0x575   : > { %15632 = vmatmul.mubr.msk.bf16.vlgmr.msra.gmra.mxu0 %vm4628_vm2, %v4897_v44 }
 0x576   : > { %15626 = vmatmul.mubr.msk.bf16.vlgmr.msra.gmra.mxu1 %vm4628_vm2, %v4896_v11  ;;  %15642 = vmatpush3.bf16.msra.mxu0 %v19337_v49 }
 0x577   : > { %15636 = vmatpush3.bf16.msra.mxu1 %v19325_v12  ;;  %15637 = vmatprep.mubr.msk.bf16.mxu1 %vm17773_vm0, %v23261_v46 }
 0x578   : > { %v17191_v50 = vpop.eup %17190  ;;  %15643 = vmatprep.mubr.msk.bf16.mxu0 %vm17773_vm0, %v23261_v46  ;;  %15647 = vmatprep.subr.bf16.mxu1 %v23261_v46 }
 0x579   : > { %v17193_v29 = vpop.eup %17192  ;;  %v4874_v48 = vmul.f32 %v17191_v50, %v19533_v16  ;;  %15653 = vmatprep.subr.bf16.mxu0 %v23261_v46 }
 0x57a   : > { %v4875_v19 = vmul.f32 %v17193_v29, %v19535_v36  ;;  %v4802_v30 = vpop.xlane.xlu1 %4801 }
 0x57b   : > { %v4898_v49 = vpack.c.bf16 %v4874_v48, %v4874_v48  ;;  %17198 = vrcp.f32 %v4802_v30  ;;  %v4805_v12 = vpop.xlane.xlu0 %4804 }
 0x57c   : > { %v4899_v23 = vpack.c.bf16 %v4875_v19, %v4875_v19  ;;  %17200 = vrcp.f32 %v4805_v12 }
 0x57e   : > { %15638 = vmatmul.mubr.msk.bf16.vlgmr.msra.gmra.mxu1 %vm4628_vm2, %v4898_v49  ;;  %15644 = vmatmul.mubr.msk.bf16.vlgmr.msra.gmra.mxu0 %vm4628_vm2, %v4899_v23 }
 0x57f   : > { %15648 = vmatpush3.bf16.msra.mxu1 %v19346_v55  ;;  %15654 = vmatpush3.bf16.msra.mxu0 %v19264_v26 }
 0x580   : > { %v17195_v27 = vpop.eup %17194  ;;  %15649 = vmatprep.mubr.msk.bf16.mxu1 %vm17773_vm0, %v23261_v46  ;;  %15655 = vmatprep.mubr.msk.bf16.mxu0 %vm17773_vm0, %v23261_v46 }
 0x581   : > { %v17197_v16 = vpop.eup %17196  ;;  %v4876_v36 = vmul.f32 %v17195_v27, %v19543_v41  ;;  %15659 = vmatprep.subr.bf16.mxu1 %v23261_v46  ;;  %15665 = vmatprep.subr.bf16.mxu0 %v23261_v46 }
 0x582   : > { %v4877_v10 = vmul.f32 %v17197_v16, %v19545_v14  ;;  %v4808_v9 = vpop.xlane.xlu1 %4807 }
 0x583   : > { %v4900_v55 = vpack.c.bf16 %v4876_v36, %v4876_v36  ;;  %17202 = vrcp.f32 %v4808_v9  ;;  %v4811_v26 = vpop.xlane.xlu0 %4810 }
 0x584   : > { %v4901_v45 = vpack.c.bf16 %v4877_v10, %v4877_v10  ;;  %17204 = vrcp.f32 %v4811_v26  ;;  %v16206_v10 = vld [vmem:[%s18172_s11 + $0xac] ss:$12 sps:$4 sm:$0xff]   ;;  %v16204_v26 = vld [vmem:[%s18172_s11 + $0xa8] ss:$12 sps:$4 sm:$0xff]  }
 0x586   : > { %15650 = vmatmul.mubr.msk.bf16.vlgmr.msra.gmra.mxu1 %vm4628_vm2, %v4900_v55  ;;  %15656 = vmatmul.mubr.msk.bf16.vlgmr.msra.gmra.mxu0 %vm4628_vm2, %v4901_v45  ;;  %v16209_v45 = vld [vmem:[%s18172_s11 + $0x94] ss:$12 sps:$4 sm:$0xff]  }
 0x587   : > { %15660 = vmatpush3.bf16.msra.mxu1 %v19281_v31  ;;  %15666 = vmatpush3.bf16.msra.mxu0 %v19295_v56 }
 0x588   : > { %v17199_v41 = vpop.eup %17198  ;;  %15661 = vmatprep.mubr.msk.bf16.mxu1 %vm17773_vm0, %v23261_v46  ;;  %15667 = vmatprep.mubr.msk.bf16.mxu0 %vm17773_vm0, %v23261_v46 }
 0x589   : > { %v17201_v14 = vpop.eup %17200  ;;  %v4878_v17 = vmul.f32 %v17199_v41, %v19553_v6  ;;  %15671 = vmatprep.subr.bf16.mxu1 %v23261_v46  ;;  %15677 = vmatprep.subr.bf16.mxu0 %v23261_v46 }
 0x58a   : > { %v4879_v33 = vmul.f32 %v17201_v14, %v19555_v0  ;;  %v4814_v40 = vpop.xlane.xlu1 %4813  ;;  %v16212_v14 = vld [vmem:[%s18172_s11 + $0x7c] ss:$12 sps:$4 sm:$0xff]  }
 0x58b   : > { %v4902_v31 = vpack.c.bf16 %v4878_v17, %v4878_v17  ;;  %17206 = vrcp.f32 %v4814_v40  ;;  %v4817_v56 = vpop.xlane.xlu0 %4816  ;;  %v16213_v40 = vld [vmem:[%s18172_s11 + $0x60] ss:$12 sps:$4 sm:$0xff]  }
 0x58c   : > { %v4903_v15 = vpack.c.bf16 %v4879_v33, %v4879_v33  ;;  %17208 = vrcp.f32 %v4817_v56  ;;  %v16210_v33 = vld [vmem:[%s18172_s11 + $0x78] ss:$12 sps:$4 sm:$0xff]   ;;  %v16221_v56 = vld [vmem:[%s18172_s11 + $0x34] ss:$12 sps:$4 sm:$0xff]  }
 0x58e   : > { %15662 = vmatmul.mubr.msk.bf16.vlgmr.msra.gmra.mxu1 %vm4628_vm2, %v4902_v31  ;;  %15668 = vmatmul.mubr.msk.bf16.vlgmr.msra.gmra.mxu0 %vm4628_vm2, %v4903_v15  ;;  %v16216_v31 = vld [vmem:[%s18172_s11 + $0x48] ss:$12 sps:$4 sm:$0xff]   ;;  %v16219_v15 = vld [vmem:[%s18172_s11 + $0x30] ss:$12 sps:$4 sm:$0xff]  }
 0x58f   : > { %15672 = vmatpush3.bf16.msra.mxu1 %v19310_v39  ;;  %15678 = vmatpush3.bf16.msra.mxu0 %v19320_v59 }
 0x590   : > { %v17203_v6 = vpop.eup %17202  ;;  %15673 = vmatprep.mubr.msk.bf16.mxu1 %vm17773_vm0, %v23261_v46  ;;  %15679 = vmatprep.mubr.msk.bf16.mxu0 %vm17773_vm0, %v23261_v46 }
 0x591   : > { %v17205_v0 = vpop.eup %17204  ;;  %v4880_v8 = vmul.f32 %v17203_v6, %v19563_v1  ;;  %15683 = vmatprep.subr.bf16.mxu1 %v23261_v46  ;;  %15689 = vmatprep.subr.bf16.mxu0 %v23261_v46  ;;  %v16224_v6 = vld [vmem:[%s18172_s11 + $0x1c] ss:$12 sps:$4 sm:$0xff]  }
 0x592   : > { %v4881_v32 = vmul.f32 %v17205_v0, %v19565_v38  ;;  %v4820_v54 = vpop.xlane.xlu1 %4819  ;;  %v16252_v0 = vld [vmem:[%s18172_s11 + $0x228] ss:$12 sps:$4 sm:$0xff]  }
 0x593   : > { %v4904_v39 = vpack.c.bf16 %v4880_v8, %v4880_v8  ;;  %17210 = vrcp.f32 %v4820_v54  ;;  %v4823_v59 = vpop.xlane.xlu0 %4822  ;;  %v16254_v8 = vld [vmem:[%s18172_s11 + $0x22c] ss:$12 sps:$4 sm:$0xff]   ;;  %v16255_v54 = vld [vmem:[%s18172_s11 + $0x210] ss:$12 sps:$4 sm:$0xff]  }
 0x594   : > { %v4905_v42 = vpack.c.bf16 %v4881_v32, %v4881_v32  ;;  %17212 = vrcp.f32 %v4823_v59  ;;  %v16222_v32 = vld [vmem:[%s18172_s11 + $0x18] ss:$12 sps:$4 sm:$0xff]  }
 0x595   : > { %v16227_v59 = vld [vmem:[%s18172_s11 + $0x4] ss:$12 sps:$4 sm:$0xff]  }
 0x596   : > { %15674 = vmatmul.mubr.msk.bf16.vlgmr.msra.gmra.mxu1 %vm4628_vm2, %v4904_v39  ;;  %15680 = vmatmul.mubr.msk.bf16.vlgmr.msra.gmra.mxu0 %vm4628_vm2, %v4905_v42  ;;  %v16257_v39 = vld [vmem:[%s18172_s11 + $0x214] ss:$12 sps:$4 sm:$0xff]  }
 0x597   : > { %15684 = vmatpush3.bf16.msra.mxu1 %v19331_v22  ;;  %15690 = vmatpush3.bf16.msra.mxu0 %v19343_v7  ;;  %v16225_v42 = vld [vmem:[%s18172_s11] ss:$12 sps:$4 sm:$0xff]  }
 0x598   : > { %v17207_v1 = vpop.eup %17206  ;;  %15685 = vmatprep.mubr.msk.bf16.mxu1 %vm17773_vm0, %v23261_v46  ;;  %15691 = vmatprep.mubr.msk.bf16.mxu0 %vm17773_vm0, %v23261_v46 }
 0x599   : > { %v17209_v38 = vpop.eup %17208  ;;  %v4882_v5 = vmul.f32 %v17207_v1, %v19573_v2  ;;  %15695 = vmatprep.subr.bf16.mxu1 %v23261_v46  ;;  %15701 = vmatprep.subr.bf16.mxu0 %v23261_v46  ;;  %v16230_v1 = vld [vmem:[%s18172_s11 + $0x16c] ss:$12 sps:$4 sm:$0xff]  }
 0x59a   : > { %v4883_v44 = vmul.f32 %v17209_v38, %v19575_v63  ;;  %v4826_v57 = vpop.xlane.xlu1 %4825  ;;  %v16258_v38 = vld [vmem:[%s18172_s11 + $0x1f8] ss:$12 sps:$4 sm:$0xff]  }
 0x59b   : > { %v4906_v22 = vpack.c.bf16 %v4882_v5, %v4882_v5  ;;  %17214 = vrcp.f32 %v4826_v57  ;;  %v4829_v7 = vpop.xlane.xlu0 %4828  ;;  %v16260_v5 = vld [vmem:[%s18172_s11 + $0x1fc] ss:$12 sps:$4 sm:$0xff]   ;;  %v16262_v57 = vld [vmem:[%s18172_s11 + $0x1e0] ss:$12 sps:$4 sm:$0xff]  }
 0x59c   : > { %v4907_v11 = vpack.c.bf16 %v4883_v44, %v4883_v44  ;;  %17216 = vrcp.f32 %v4829_v7  ;;  %v16228_v44 = vld [vmem:[%s18172_s11 + $0x168] ss:$12 sps:$4 sm:$0xff]  }
 0x59d   : > { %v16233_v7 = vld [vmem:[%s18172_s11 + $0x154] ss:$12 sps:$4 sm:$0xff]  }
 0x59e   : > { %15686 = vmatmul.mubr.msk.bf16.vlgmr.msra.gmra.mxu1 %vm4628_vm2, %v4906_v22  ;;  %15692 = vmatmul.mubr.msk.bf16.vlgmr.msra.gmra.mxu0 %vm4628_vm2, %v4907_v11  ;;  %v16264_v22 = vld [vmem:[%s18172_s11 + $0x1e4] ss:$12 sps:$4 sm:$0xff]  }
 0x59f   : > { %15696 = vmatpush3.bf16.msra.mxu1 %v19352_v13  ;;  %15702 = vmatpush3.bf16.msra.mxu0 %v19355_v20  ;;  %v16231_v11 = vld [vmem:[%s18172_s11 + $0x150] ss:$12 sps:$4 sm:$0xff]  }
 0x5a0   : > { %v17211_v2 = vpop.eup %17210  ;;  %15697 = vmatprep.mubr.msk.bf16.mxu1 %vm17773_vm0, %v23261_v46  ;;  %15703 = vmatprep.mubr.msk.bf16.mxu0 %vm17773_vm0, %v23261_v46 }
 0x5a1   : > { %v17213_v63 = vpop.eup %17212  ;;  %v4884_v50 = vmul.f32 %v17211_v2, %v19583_v53  ;;  %15707 = vmatprep.subr.bf16.mxu1 %v23261_v46  ;;  %15713 = vmatprep.subr.bf16.mxu0 %v23261_v46  ;;  %v16236_v2 = vld [vmem:[%s18172_s11 + $0x13c] ss:$12 sps:$4 sm:$0xff]  }
 0x5a2   : > { %v4885_v29 = vmul.f32 %v17213_v63, %v19585_v43  ;;  %v4832_v48 = vpop.xlane.xlu1 %4831  ;;  %v16266_v63 = vld [vmem:[%s18172_s11 + $0x1c8] ss:$12 sps:$4 sm:$0xff]  }
 0x5a3   : > { %v4908_v13 = vpack.c.bf16 %v4884_v50, %v4884_v50  ;;  %17218 = vrcp.f32 %v4832_v48  ;;  %v4835_v20 = vpop.xlane.xlu0 %4834  ;;  %v16268_v50 = vld [vmem:[%s18172_s11 + $0x1cc] ss:$12 sps:$4 sm:$0xff]   ;;  %v16270_v48 = vld [vmem:[%s18172_s11 + $0x1b0] ss:$12 sps:$4 sm:$0xff]  }
 0x5a4   : > { %v4909_v19 = vpack.c.bf16 %v4885_v29, %v4885_v29  ;;  %17220 = vrcp.f32 %v4835_v20  ;;  %v16234_v29 = vld [vmem:[%s18172_s11 + $0x138] ss:$12 sps:$4 sm:$0xff]  }
 0x5a5   : > { %v16239_v20 = vld [vmem:[%s18172_s11 + $0x124] ss:$12 sps:$4 sm:$0xff]  }
 0x5a6   : > { %15698 = vmatmul.mubr.msk.bf16.vlgmr.msra.gmra.mxu1 %vm4628_vm2, %v4908_v13  ;;  %15704 = vmatmul.mubr.msk.bf16.vlgmr.msra.gmra.mxu0 %vm4628_vm2, %v4909_v19  ;;  %v16272_v13 = vld [vmem:[%s18172_s11 + $0x1b4] ss:$12 sps:$4 sm:$0xff]  }
 0x5a7   : > { %15708 = vmatpush3.bf16.msra.mxu1 %v19363_v34  ;;  %15714 = vmatpush3.bf16.msra.mxu0 %v19349_v58  ;;  %v16237_v19 = vld [vmem:[%s18172_s11 + $0x120] ss:$12 sps:$4 sm:$0xff]  }
 0x5a8   : > { %v17215_v53 = vpop.eup %17214  ;;  %15709 = vmatprep.mubr.msk.bf16.mxu1 %vm17773_vm0, %v23261_v46  ;;  %15715 = vmatprep.mubr.msk.bf16.mxu0 %vm17773_vm0, %v23261_v46 }
 0x5a9   : > { %v17217_v43 = vpop.eup %17216  ;;  %v4886_v30 = vmul.f32 %v17215_v53, %v19593_v21  ;;  %15719 = vmatprep.subr.bf16.mxu1 %v23261_v46  ;;  %15725 = vmatprep.subr.bf16.mxu0 %v23261_v46  ;;  %v16242_v53 = vld [vmem:[%s18172_s11 + $0x10c] ss:$12 sps:$4 sm:$0xff]  }
 0x5aa   : > { %v4887_v49 = vmul.f32 %v17217_v43, %v19595_v52  ;;  %v4838_v12 = vpop.xlane.xlu1 %4837  ;;  %v16274_v43 = vld [vmem:[%s18172_s11 + $0x198] ss:$12 sps:$4 sm:$0xff]  }
 0x5ab   : > { %v4910_v34 = vpack.c.bf16 %v4886_v30, %v4886_v30  ;;  %17222 = vrcp.f32 %v4838_v12  ;;  %v4841_v58 = vpop.xlane.xlu0 %4840  ;;  %v16276_v30 = vld [vmem:[%s18172_s11 + $0x19c] ss:$12 sps:$4 sm:$0xff]   ;;  %v16278_v12 = vld [vmem:[%s18172_s11 + $0x180] ss:$12 sps:$4 sm:$0xff]  }
 0x5ac   : > { %v4911_v23 = vpack.c.bf16 %v4887_v49, %v4887_v49  ;;  %17224 = vrcp.f32 %v4841_v58  ;;  %v16240_v49 = vld [vmem:[%s18172_s11 + $0x108] ss:$12 sps:$4 sm:$0xff]  }
 0x5ad   : > { %v16245_v58 = vld [vmem:[%s18172_s11 + $0xf4] ss:$12 sps:$4 sm:$0xff]  }
 0x5ae   : > { %15710 = vmatmul.mubr.msk.bf16.vlgmr.msra.gmra.mxu1 %vm4628_vm2, %v4910_v34  ;;  %15716 = vmatmul.mubr.msk.bf16.vlgmr.msra.gmra.mxu0 %vm4628_vm2, %v4911_v23  ;;  %v16280_v34 = vld [vmem:[%s18172_s11 + $0x184] ss:$12 sps:$4 sm:$0xff]  }
 0x5af   : > { %15720 = vmatpush3.bf16.msra.mxu1 %v19360_v25  ;;  %15726 = vmatpush3.bf16.msra.mxu0 %v19369_v60  ;;  %v16243_v23 = vld [vmem:[%s18172_s11 + $0xf0] ss:$12 sps:$4 sm:$0xff]  }
 0x5b0   : > { %v17219_v21 = vpop.eup %17218  ;;  %15721 = vmatprep.mubr.msk.bf16.mxu1 %vm17773_vm0, %v23261_v46  ;;  %15727 = vmatprep.mubr.msk.bf16.mxu0 %vm17773_vm0, %v23261_v46 }
 0x5b1   : > { %v17221_v52 = vpop.eup %17220  ;;  %v4888_v27 = vmul.f32 %v17219_v21, %v19602_v18  ;;  %15731 = vmatprep.subr.bf16.mxu1 %v23261_v46  ;;  %15737 = vmatprep.subr.bf16.mxu0 %v23261_v46  ;;  %v16248_v21 = vld [vmem:[%s18172_s11 + $0xdc] ss:$12 sps:$4 sm:$0xff]  }
 0x5b2   : > { %v4889_v16 = vmul.f32 %v17221_v52, %v19604_v62  ;;  %v4844_v36 = vpop.xlane.xlu1 %4843  ;;  %v16282_v52 = vld [vmem:[%s18172_s11 + $0x170] ss:$12 sps:$4 sm:$0xff]  }
 0x5b3   : > { %v4912_v25 = vpack.c.bf16 %v4888_v27, %v4888_v27  ;;  %17226 = vrcp.f32 %v4844_v36  ;;  %v16246_v27 = vld [vmem:[%s18172_s11 + $0xd8] ss:$12 sps:$4 sm:$0xff]   ;;  %v16249_v36 = vld [vmem:[%s18172_s11 + $0xc0] ss:$12 sps:$4 sm:$0xff]  }
 0x5b4   : > { %v4913_v60 = vpack.c.bf16 %v4889_v16, %v4889_v16  ;;  %v16251_v16 = vld [vmem:[%s18172_s11 + $0xc4] ss:$12 sps:$4 sm:$0xff]  }
 0x5b6   : > { %15722 = vmatmul.mubr.msk.bf16.vlgmr.msra.gmra.mxu1 %vm4628_vm2, %v4912_v25  ;;  %15728 = vmatmul.mubr.msk.bf16.vlgmr.msra.gmra.mxu0 %vm4628_vm2, %v4913_v60  ;;  %v16261_v25 = vld [vmem:[%s18172_s11 + $0x230] ss:$12 sps:$4 sm:$0xff]  }
 0x5b7   : > { %15732 = vmatpush3.bf16.msra.mxu1 %v19375_v35  ;;  %15738 = vmatpush3.bf16.msra.mxu0 %v19366_v24 }
 0x5b8   : > { %v17223_v18 = vpop.eup %17222  ;;  %15733 = vmatprep.mubr.msk.bf16.mxu1 %vm17773_vm0, %v23261_v46  ;;  %15739 = vmatprep.mubr.msk.bf16.mxu0 %vm17773_vm0, %v23261_v46 }
 0x5b9   : > { %v17225_v62 = vpop.eup %17224  ;;  %v4890_v9 = vmul.f32 %v17223_v18, %v19610_v51  ;;  %15743 = vmatprep.subr.bf16.mxu1 %v23261_v46  ;;  %6531 = vmatprep.subr.bf16.mxu0 %v16206_v10 }
 0x5ba   : > { %v4891_v55 = vmul.f32 %v17225_v62, %v19612_v4  ;;  %v16207_v4 = vld [vmem:[%s18172_s11 + $0x90] ss:$12 sps:$4 sm:$0xff]  }
 0x5bb   : > { %v4914_v35 = vpack.c.bf16 %v4890_v9, %v4890_v9 }
 0x5bc   : > { %v4915_v24 = vpack.c.bf16 %v4891_v55, %v4891_v55 }
 0x5be   : > { %15734 = vmatmul.mubr.msk.bf16.vlgmr.msra.gmra.mxu1 %vm4628_vm2, %v4914_v35  ;;  %15740 = vmatmul.mubr.msk.bf16.vlgmr.msra.gmra.mxu0 %vm4628_vm2, %v4915_v24 }
 0x5bf   : > { %15744 = vmatpush3.bf16.msra.mxu1 %v19372_v37  ;;  %15745 = vmatprep.mubr.msk.bf16.mxu1 %vm17773_vm0, %v23261_v46  ;;  %v16215_v37 = vld [vmem:[%s18172_s11 + $0x64] ss:$12 sps:$4 sm:$0xff]   ;;  %v23263_v46 = vmov 0  }
 0x5c0   : > { %v17227_v51 = vpop.eup %17226  ;;  %6532 = vmatpush1.bf16.msra.mxu0 %v16204_v26  ;;  %6604 = vmatprep.subr.bf16.mxu1 %v16254_v8 }
 0x5c1   : > { %v4892_v41 = vmul.f32 %v17227_v51, %v19618_v61  ;;  %6533 = vmatprep.subr.bf16.mxu0 %v16209_v45  ;;  %v16218_v61 = vld [vmem:[%s18172_s11 + $0x4c] ss:$12 sps:$4 sm:$0xff]  }
 0x5c3   : > { %v4916_v17 = vpack.c.bf16 %v4892_v41, %v4892_v41 }
 0x5c4   : > { %6534 = vmatpush1.bf16.msra.mxu0 %v16207_v4 }
 0x5c5   : > { %6535 = vmatprep.subr.bf16.mxu0 %v16212_v14 }
 0x5c6   : > { %15746 = vmatmul.mubr.msk.bf16.vlgmr.msra.gmra.mxu1 %vm4628_vm2, %v4916_v17 }
 0x5c7   : > { %6636 = vmatprep.mubr.bf16.mxu1 %v23263_v46  ;;  %6605 = vmatpush1.bf16.msra.mxu1 %v16252_v0 }
 0x5c8   : > { %6536 = vmatpush1.bf16.msra.mxu0 %v16210_v33  ;;  %6606 = vmatprep.subr.bf16.mxu1 %v16257_v39 }
 0x5c9   : > { %6537 = vmatprep.subr.bf16.mxu0 %v16215_v37 }
 0x5cb   : > { %6607 = vmatpush1.bf16.msra.mxu1 %v16255_v54 }
 0x5cc   : > { %6538 = vmatpush1.bf16.msra.mxu0 %v16213_v40  ;;  %6608 = vmatprep.subr.bf16.mxu1 %v16260_v5 }
 0x5cd   : > { %6539 = vmatprep.subr.bf16.mxu0 %v16218_v61 }
 0x5cf   : > { %6609 = vmatpush1.bf16.msra.mxu1 %v16258_v38 }
 0x5d0   : > { %6540 = vmatpush1.bf16.msra.mxu0 %v16216_v31  ;;  %6610 = vmatprep.subr.bf16.mxu1 %v16264_v22 }
 0x5d1   : > { %6541 = vmatprep.subr.bf16.mxu0 %v16221_v56 }
 0x5d3   : > { %6611 = vmatpush1.bf16.msra.mxu1 %v16262_v57 }
 0x5d4   : > { %6542 = vmatpush1.bf16.msra.mxu0 %v16219_v15  ;;  %6612 = vmatprep.subr.bf16.mxu1 %v16268_v50 }
 0x5d5   : > { %6543 = vmatprep.subr.bf16.mxu0 %v16224_v6 }
 0x5d7   : > { %6613 = vmatpush1.bf16.msra.mxu1 %v16266_v63 }
 0x5d8   : > { %6544 = vmatpush1.bf16.msra.mxu0 %v16222_v32  ;;  %6614 = vmatprep.subr.bf16.mxu1 %v16272_v13 }
 0x5d9   : > { %6545 = vmatprep.subr.bf16.mxu0 %v16227_v59 }
 0x5db   : > { %6615 = vmatpush1.bf16.msra.mxu1 %v16270_v48  ;;  %v16265_v48 = vld [vmem:[%s18172_s11 + $0x218] ss:$12 sps:$4 sm:$0xff]  }
 0x5dc   : > { %6546 = vmatpush1.bf16.msra.mxu0 %v16225_v42  ;;  %6616 = vmatprep.subr.bf16.mxu1 %v16276_v30 }
 0x5dd   : > { %6547 = vmatprep.subr.bf16.mxu0 %v16230_v1 }
 0x5df   : > { %6617 = vmatpush1.bf16.msra.mxu1 %v16274_v43  ;;  %v16269_v43 = vld [vmem:[%s18172_s11 + $0x200] ss:$12 sps:$4 sm:$0xff]  }
 0x5e0   : > { %6548 = vmatpush2.bf16.msra.mxu0 %v16228_v44  ;;  %6618 = vmatprep.subr.bf16.mxu1 %v16280_v34 }
 0x5e1   : > { %6549 = vmatprep.subr.bf16.mxu0 %v16233_v7 }
 0x5e3   : > { %6619 = vmatpush1.bf16.msra.mxu1 %v16278_v12 }
 0x5e4   : > { %6550 = vmatpush2.bf16.msra.mxu0 %v16231_v11  ;;  %15145 = vmatprep.subr.bf16.mxu1 %v16282_v52 }
 0x5e5   : > { %6551 = vmatprep.subr.bf16.mxu0 %v16236_v2 }
 0x5e8   : > { %6552 = vmatpush2.bf16.msra.mxu0 %v16234_v29 }
 0x5e9   : > { %6553 = vmatprep.subr.bf16.mxu0 %v16239_v20 }
 0x5ec   : > { %6554 = vmatpush2.bf16.msra.mxu0 %v16237_v19 }
 0x5ed   : > { %6555 = vmatprep.subr.bf16.mxu0 %v16242_v53 }
 0x5f0   : > { %6556 = vmatpush2.bf16.msra.mxu0 %v16240_v49 }
 0x5f1   : > { %6557 = vmatprep.subr.bf16.mxu0 %v16245_v58 }
 0x5f4   : > { %6558 = vmatpush2.bf16.msra.mxu0 %v16243_v23 }
 0x5f5   : > { %6559 = vmatprep.subr.bf16.mxu0 %v16248_v21  ;;  %v16273_v21 = vld [vmem:[%s18172_s11 + $0x1e8] ss:$12 sps:$4 sm:$0xff]  }
 0x5f8   : > { %6560 = vmatpush2.bf16.msra.mxu0 %v16246_v27 }
 0x5f9   : > { %6561 = vmatprep.subr.bf16.mxu0 %v16251_v16 }
 0x5fc   : > { %6562 = vmatpush2.bf16.msra.mxu0 %v16249_v36 }
 0x5fd   : > { %15749 = vmatprep.subr.bf16.mxu0 %v16261_v25 }
 0x625   : > { %v4958_v60 = vpop.f32.mrf.mxu0 }
 0x627   : > { %v15609_v10 = vpop.f32.mrf.mxu0 }
 0x629   : > { %v4961_v18 = vpop.f32.mrf.mxu0 }
 0x62b   : > { %v15610_v62 = vpop.f32.mrf.mxu0 }
 0x62d   : > { %v5050_v9 = vpop.f32.mrf.mxu0 }
 0x62e   : > { %v5004_v55 = vpop.f32.mrf.mxu1 }
 0x62f   : > { %v15621_v35 = vpop.f32.mrf.mxu0  ;;  %v19813_v63 = vpack.c.bf16 %v5004_v55, %v4958_v60 }
 0x630   : > { %v15615_v24 = vpop.f32.mrf.mxu1  ;;  %v16281_v35 = vld [vmem:[%s18172_s11 + $0x1b8] ss:$12 sps:$4 sm:$0xff]  }
 0x631   : > { %v5053_v26 = vpop.f32.mrf.mxu0 }
 0x632   : > { %v5007_v45 = vpop.f32.mrf.mxu1 }
 0x633   : > { %v15622_v51 = vpop.f32.mrf.mxu0 }
 0x634   : > { %v15616_v4 = vpop.f32.mrf.mxu1 }
 0x635   : > { %v5142_v41 = vpop.f32.mrf.mxu0  ;;  %v16283_v4 = vld [vmem:[%s18172_s11 + $0x1a0] ss:$12 sps:$4 sm:$0xff]  }
 0x636   : > { %v5096_v14 = vpop.f32.mrf.mxu1 }
 0x637   : > { %v15633_v17 = vpop.f32.mrf.mxu0  ;;  %v19821_v34 = vpack.c.bf16 %v5096_v14, %v5050_v9 }
 0x638   : > { %v15627_v33 = vpop.f32.mrf.mxu1 }
 0x639   : > { %v5145_v37 = vpop.f32.mrf.mxu0 }
 0x63a   : > { %v5099_v40 = vpop.f32.mrf.mxu1 }
 0x63b   : > { %v15634_v61 = vpop.f32.mrf.mxu0 }
 0x63c   : > { %v15628_v31 = vpop.f32.mrf.mxu1  ;;  %v16286_v61 = vld [vmem:[%s18172_s11 + $0x188] ss:$12 sps:$4 sm:$0xff]  }
 0x63e   : > { %v5188_v56 = vpop.f32.mrf.mxu1  ;;  %v19807_v15 = vpop.f32.mrf.mxu0 }
 0x63f   : > { %v19829_v62 = vpack.c.bf16 %v5188_v56, %v5142_v41 }
 0x640   : > { %v15639_v6 = vpop.f32.mrf.mxu1  ;;  %v15645_v0 = vpop.f32.mrf.mxu0 }
 0x642   : > { %v5191_v8 = vpop.f32.mrf.mxu1  ;;  %v5237_v32 = vpop.f32.mrf.mxu0 }
 0x643   : > { %v16284_v32 = vld [vmem:[%s18172_s11 + $0xb0] ss:$12 sps:$4 sm:$0xff]  }
 0x644   : > { %v15640_v54 = vpop.f32.mrf.mxu1  ;;  %v15646_v39 = vpop.f32.mrf.mxu0 }
 0x645   : > { %v16285_v39 = vld [vmem:[%s18172_s11 + $0x158] ss:$12 sps:$4 sm:$0xff]  }
 0x646   : > { %v19809_v59 = vpop.f32.mrf.mxu1  ;;  %v5326_v42 = vpop.f32.mrf.mxu0 }
 0x647   : > { %v19839_v33 = vpack.c.bf16 %v19809_v59, %v19807_v15 }
 0x648   : > { %v15651_v1 = vpop.f32.mrf.mxu1  ;;  %v15657_v38 = vpop.f32.mrf.mxu0 }
 0x64a   : > { %v5283_v5 = vpop.f32.mrf.mxu1  ;;  %v5329_v44 = vpop.f32.mrf.mxu0 }
 0x64b   : > { %v16287_v5 = vld [vmem:[%s18172_s11 + $0x98] ss:$12 sps:$4 sm:$0xff]   ;;  %v16288_v44 = vld [vmem:[%s18172_s11 + $0x140] ss:$12 sps:$4 sm:$0xff]  }
 0x64c   : > { %v15652_v57 = vpop.f32.mrf.mxu1  ;;  %v15658_v22 = vpop.f32.mrf.mxu0 }
 0x64e   : > { %v5372_v7 = vpop.f32.mrf.mxu1  ;;  %v5418_v11 = vpop.f32.mrf.mxu0 }
 0x64f   : > { %v19811_v2 = vpack.c.bf16 %v5372_v7, %v5326_v42 }
 0x650   : > { %v15663_v50 = vpop.f32.mrf.mxu1  ;;  %v15669_v29 = vpop.f32.mrf.mxu0 }
 0x651   : > { %6563 = vmatprep.mubr.bf16.mxu0 %v19811_v2  ;;  %v16289_v50 = vld [vmem:[%s18172_s11 + $0x80] ss:$12 sps:$4 sm:$0xff]  }
 0x652   : > { %v5375_v13 = vpop.f32.mrf.mxu1  ;;  %v5421_v20 = vpop.f32.mrf.mxu0  ;;  %6564 = vmatmul.mubr.bf16.vlgmr.msra.gmra.mxu0 %v19813_v63 }
 0x653   : > { %15750 = vmatpush3.bf16.msra.mxu0 %v16261_v25  ;;  %v16277_v25 = vld [vmem:[%s18172_s11 + $0x1d0] ss:$12 sps:$4 sm:$0xff]  }
 0x654   : > { %v15664_v19 = vpop.f32.mrf.mxu1  ;;  %v15670_v53 = vpop.f32.mrf.mxu0  ;;  %15751 = vmatprep.subr.bf16.mxu0 %v16265_v48 }
 0x656   : > { %v5464_v30 = vpop.f32.mrf.mxu1  ;;  %v5510_v49 = vpop.f32.mrf.mxu0 }
 0x657   : > { %v19819_v12 = vpack.c.bf16 %v5464_v30, %v5418_v11  ;;  %15752 = vmatpush3.bf16.msra.mxu0 %v16265_v48  ;;  %v16290_v48 = vld [vmem:[%s18172_s11 + $0x128] ss:$12 sps:$4 sm:$0xff]   ;;  %v16292_v30 = vld [vmem:[%s18172_s11 + $0x110] ss:$12 sps:$4 sm:$0xff]  }
 0x658   : > { %v15675_v58 = vpop.f32.mrf.mxu1  ;;  %v15681_v23 = vpop.f32.mrf.mxu0  ;;  %15753 = vmatprep.subr.bf16.mxu0 %v16269_v43 }
 0x659   : > { %6573 = vmatprep.mubr.bf16.mxu0 %v19819_v12 }
 0x65a   : > { %v5467_v52 = vpop.f32.mrf.mxu1  ;;  %v5513_v27 = vpop.f32.mrf.mxu0  ;;  %6574 = vmatmul.mubr.bf16.gmra.mxu0 %v19821_v34 }
 0x65b   : > { %15754 = vmatpush3.bf16.msra.mxu0 %v16269_v43  ;;  %v16291_v43 = vld [vmem:[%s18172_s11 + $0x68] ss:$12 sps:$4 sm:$0xff]   ;;  %v16293_v52 = vld [vmem:[%s18172_s11 + $0x50] ss:$12 sps:$4 sm:$0xff]  }
 0x65c   : > { %v15676_v16 = vpop.f32.mrf.mxu1  ;;  %v15682_v36 = vpop.f32.mrf.mxu0  ;;  %15755 = vmatprep.subr.bf16.mxu0 %v16273_v21 }
 0x65d   : > { %v16294_v16 = vld [vmem:[%s18172_s11 + $0xf8] ss:$12 sps:$4 sm:$0xff]  }
 0x65e   : > { %v5556_v60 = vpop.f32.mrf.mxu1  ;;  %v5602_v10 = vpop.f32.mrf.mxu0 }
 0x65f   : > { %v19827_v18 = vpack.c.bf16 %v5556_v60, %v5510_v49  ;;  %15756 = vmatpush3.bf16.msra.mxu0 %v16273_v21 }
 0x660   : > { %v15687_v9 = vpop.f32.mrf.mxu1  ;;  %v15693_v55 = vpop.f32.mrf.mxu0  ;;  %15757 = vmatprep.subr.bf16.mxu0 %v16277_v25 }
 0x661   : > { %6583 = vmatprep.mubr.bf16.mxu0 %v19827_v18  ;;  %v16295_v9 = vld [vmem:[%s18172_s11 + $0x38] ss:$12 sps:$4 sm:$0xff]   ;;  %v16296_v55 = vld [vmem:[%s18172_s11 + $0xe0] ss:$12 sps:$4 sm:$0xff]  }
 0x662   : > { %v5559_v24 = vpop.f32.mrf.mxu1  ;;  %v5605_v26 = vpop.f32.mrf.mxu0  ;;  %6584 = vmatmul.mubr.bf16.gmra.mxu0 %v19829_v62 }
 0x663   : > { %15758 = vmatpush3.bf16.msra.mxu0 %v16277_v25 }
 0x664   : > { %v15688_v45 = vpop.f32.mrf.mxu1  ;;  %v15694_v51 = vpop.f32.mrf.mxu0  ;;  %15759 = vmatprep.subr.bf16.mxu0 %v16281_v35 }
 0x665   : > { %v16297_v45 = vld [vmem:[%s18172_s11 + $0x20] ss:$12 sps:$4 sm:$0xff]  }
 0x666   : > { %v5648_v14 = vpop.f32.mrf.mxu1  ;;  %v5694_v17 = vpop.f32.mrf.mxu0 }
 0x667   : > { %v19835_v41 = vpack.c.bf16 %v5648_v14, %v5602_v10  ;;  %15760 = vmatpush3.bf16.msra.mxu0 %v16281_v35 }
 0x668   : > { %v15699_v37 = vpop.f32.mrf.mxu1  ;;  %v15705_v40 = vpop.f32.mrf.mxu0  ;;  %15761 = vmatprep.subr.bf16.mxu0 %v16283_v4 }
 0x669   : > { %6593 = vmatprep.mubr.bf16.mxu0 %v19835_v41  ;;  %v16299_v37 = vld [vmem:[%s18172_s11 + $0x8] ss:$12 sps:$4 sm:$0xff]  }
 0x66a   : > { %v5651_v31 = vpop.f32.mrf.mxu1  ;;  %v5697_v56 = vpop.f32.mrf.mxu0  ;;  %6594 = vmatmul.mubr.bf16.gmra.mxu0 %v19839_v33 }
 0x66b   : > { %15762 = vmatpush3.bf16.msra.mxu0 %v16283_v4  ;;  %v16298_v4 = vld [vmem:[%s18172_s11 + $0xc8] ss:$12 sps:$4 sm:$0xff]   ;;  %s23264_s11 = scalar_lea.vmem [#allocation7], %s18126_s28 }
 0x66c   : > { %v15700_v6 = vpop.f32.mrf.mxu1  ;;  %v15706_v0 = vpop.f32.mrf.mxu0  ;;  %15763 = vmatprep.subr.bf16.mxu0 %v16286_v61 }
 0x66e   : > { %v5740_v8 = vpop.f32.mrf.mxu1  ;;  %v5786_v15 = vpop.f32.mrf.mxu0 }
 0x66f   : > { %v6024_v54 = vpack.c.bf16 %v5740_v8, %v5694_v17  ;;  %15764 = vmatpush3.bf16.msra.mxu0 %v16286_v61 }
 0x670   : > { %v15711_v59 = vpop.f32.mrf.mxu1  ;;  %v15717_v42 = vpop.f32.mrf.mxu0 }
 0x671   : > { %6637 = vmatmul.mubr.bf16.vlgmr.msra.gmra.mxu1 %v6024_v54  ;;  %15765 = vmatprep.mubr.bf16.mxu0 %v6024_v54 }
 0x672   : > { %v5743_v1 = vpop.f32.mrf.mxu1  ;;  %v5789_v38 = vpop.f32.mrf.mxu0  ;;  %15146 = vmatpush3.bf16.msra.mxu1 %v16284_v32  ;;  %6646 = vmatprep.mubr.bf16.mxu1 %v23263_v46 }
 0x673   : > { %15147 = vmatprep.subr.bf16.mxu1 %v16285_v39 }
 0x674   : > { %v15712_v57 = vpop.f32.mrf.mxu1  ;;  %v15718_v22 = vpop.f32.mrf.mxu0 }
 0x676   : > { %v5832_v7 = vpop.f32.mrf.mxu1  ;;  %v5878_v11 = vpop.f32.mrf.mxu0  ;;  %15148 = vmatpush3.bf16.msra.mxu1 %v16287_v5 }
 0x677   : > { %v6027_v29 = vpack.c.bf16 %v5832_v7, %v5786_v15  ;;  %15149 = vmatprep.subr.bf16.mxu1 %v16288_v44 }
 0x678   : > { %v15723_v13 = vpop.f32.mrf.mxu1  ;;  %v15729_v20 = vpop.f32.mrf.mxu0 }
 0x679   : > { %6647 = vmatmul.mubr.bf16.gmra.mxu1 %v6027_v29  ;;  %15766 = vmatmul.mubr.bf16.vlgmr.msra.gmra.mxu0 %v6027_v29 }
 0x67a   : > { %v5835_v19 = vpop.f32.mrf.mxu1  ;;  %v5881_v53 = vpop.f32.mrf.mxu0  ;;  %15150 = vmatpush3.bf16.msra.mxu1 %v16289_v50  ;;  %6656 = vmatprep.mubr.bf16.mxu1 %v23263_v46  ;;  %v6130_v50 = vld [vmem:[%s23264_s11] sm:$0x7] }
 0x67b   : > { %15151 = vmatprep.subr.bf16.mxu1 %v16290_v48  ;;  %v23265_v48 = vld [vmem:[#allocation24_spill] sm:$0xff]  ;;  %v23266_v53 = vld [vmem:[#allocation26_spill] sm:$0xff] }
 0x67c   : > { %v15724_v49 = vpop.f32.mrf.mxu1  ;;  %v15730_v58 = vpop.f32.mrf.mxu0  ;;  %v19906_v13 = vrot.slane %v6130_v50, %v23265_v48 }
 0x67e   : > { %v5924_v23 = vpop.f32.mrf.mxu1  ;;  %v5970_v21 = vpop.f32.mrf.mxu0  ;;  %15152 = vmatpush3.bf16.msra.mxu1 %v16291_v43  ;;  %v19913_v43 = vrot.slane %v6130_v50, %v23266_v53 }
 0x67f   : > { %v6030_v27 = vpack.c.bf16 %v5924_v23, %v5878_v11  ;;  %15153 = vmatprep.subr.bf16.mxu1 %v16292_v30 }
 0x680   : > { %v15735_v36 = vpop.f32.mrf.mxu1  ;;  %v15741_v25 = vpop.f32.mrf.mxu0 }
 0x681   : > { %6657 = vmatmul.mubr.bf16.gmra.mxu1 %v6030_v27  ;;  %15769 = vmatprep.mubr.bf16.mxu0 %v6030_v27  ;;  %v23267_v27 = vld [vmem:[#allocation25_spill] sm:$0xff] }
 0x682   : > { %v5927_v60 = vpop.f32.mrf.mxu1  ;;  %v5973_v10 = vpop.f32.mrf.mxu0  ;;  %15154 = vmatpush3.bf16.msra.mxu1 %v16293_v52  ;;  %6666 = vmatprep.mubr.bf16.mxu1 %v23263_v46 }
 0x683   : > { %15155 = vmatprep.subr.bf16.mxu1 %v16294_v16  ;;  %v19920_v16 = vrot.slane %v6130_v50, %v23267_v27  ;;  %v17450_v50 = vld [vmem:[#allocation2 + $0x60] sm:$0xff] }
 0x684   : > { %v15736_v35 = vpop.f32.mrf.mxu1  ;;  %v15742_v24 = vpop.f32.mrf.mxu0 }
 0x685   : > { %v17448_v24 = vld [vmem:[#allocation2] sm:$0xff] }
 0x686   : > { %v6016_v26 = vpop.f32.mrf.mxu1  ;;  %15156 = vmatpush3.bf16.msra.mxu1 %v16295_v9 }
 0x687   : > { %v6033_v51 = vpack.c.bf16 %v6016_v26, %v5970_v21  ;;  %15157 = vmatprep.subr.bf16.mxu1 %v16296_v55 }
 0x688   : > { %v15747_v14 = vpop.f32.mrf.mxu1 }
 0x689   : > { %6667 = vmatmul.mubr.bf16.gmra.mxu1 %v6033_v51  ;;  %15770 = vmatmul.mubr.bf16.gmra.mxu0 %v6033_v51 }
 0x68a   : > { %v6019_v17 = vpop.f32.mrf.mxu1  ;;  %15158 = vmatpush3.bf16.msra.mxu1 %v16297_v45  ;;  %6709 = vmatprep.mubr.bf16.mxu1 %v19811_v2 }
 0x68b   : > { %15159 = vmatprep.subr.bf16.mxu1 %v16298_v4  ;;  %8990 = vmatprep.mubr.bf16.mxu0 %v23263_v46 }
 0x68c   : > { %v15748_v40 = vpop.f32.mrf.mxu1 }
 0x68e   : > { %15160 = vmatpush3.bf16.msra.mxu1 %v16299_v37  ;;  %v17449_v37 = vld [vmem:[#allocation2 + $0xb0] sm:$0xff] }
 0x691   : > { %6710 = vmatmul.mubr.bf16.vlgmr.msra.gmra.mxu1 %v19813_v63 }
 0x692   : > { %6717 = vmatprep.mubr.bf16.mxu1 %v19819_v12 }
 0x699   : > { %6718 = vmatmul.mubr.bf16.gmra.mxu1 %v19821_v34 }
 0x69a   : > { %6725 = vmatprep.mubr.bf16.mxu1 %v19827_v18 }
 0x6a1   : > { %6726 = vmatmul.mubr.bf16.gmra.mxu1 %v19829_v62 }
 0x6a2   : > { %6733 = vmatprep.mubr.bf16.mxu1 %v19835_v41 }
 0x6a9   : > { %6734 = vmatmul.mubr.bf16.gmra.mxu1 %v19839_v33 }
 0x712   : > { %v6565_v2 = vpop.f32.mrf.mxu0 }
 0x713   : > { %v6566_v21 = vadd.f32 %v6565_v2, %v19913_v43 }
 0x714   : > { %v6567_v61 = vpop.f32.mrf.mxu0 }
 0x715   : > { %v6568_v58 = vadd.f32 %v6567_v61, %v19906_v13 }
 0x716   : > { %v6569_v31 = vpop.f32.mrf.mxu0 }
 0x717   : > { %v6570_v35 = vadd.f32 %v6569_v31, %v19913_v43 }
 0x718   : > { %v6571_v56 = vpop.f32.mrf.mxu0 }
 0x719   : > { %v6572_v60 = vadd.f32 %v6571_v56, %v19906_v13 }
 0x71a   : > { %v6575_v6 = vpop.f32.mrf.mxu0 }
 0x71c   : > { %v6577_v0 = vpop.f32.mrf.mxu0 }
 0x71d   : > { %v6578_v4 = vadd.f32 %v6577_v0, %v19906_v13 }
 0x71e   : > { %v19871_v8 = vpop.f32.mrf.mxu0 }
 0x720   : > { %v6581_v63 = vpop.f32.mrf.mxu0 }
 0x722   : > { %v19873_v12 = vpop.f32.mrf.mxu0 }
 0x724   : > { %v19875_v18 = vpop.f32.mrf.mxu0 }
 0x726   : > { %v19877_v32 = vpop.f32.mrf.mxu0 }
 0x728   : > { %v19879_v39 = vpop.f32.mrf.mxu0 }
 0x72a   : > { %v19885_v1 = vpop.f32.mrf.mxu0 }
 0x72c   : > { %v19891_v44 = vpop.f32.mrf.mxu0 }
 0x72e   : > { %v19897_v7 = vpop.f32.mrf.mxu0 }
 0x730   : > { %v19908_v20 = vpop.f32.mrf.mxu0 }
 0x731   : > { %v6638_v34 = vpop.f32.mrf.mxu1 }
 0x732   : > { %v6639_v10 = vadd.f32 %v6638_v34, %v6566_v21  ;;  %v6576_v34 = vadd.f32 %v6575_v6, %v19913_v43 }
 0x733   : > { %v6640_v15 = vpop.f32.mrf.mxu1 }
 0x734   : > { %v6641_v52 = vadd.f32 %v6640_v15, %v6568_v58  ;;  %v19928_v40 = vadd.f32 %v17449_v37, %v6639_v10  ;;  %v17455_v37 = vld [vmem:[#allocation2 + $0x40] sm:$0xff] }
 0x735   : > { %v6642_v62 = vpop.f32.mrf.mxu1 }
 0x736   : > { %v19924_v26 = vadd.f32 %v17448_v24, %v6641_v52  ;;  %23269 = vst [vmem:[#allocation29_spill] sm:$0xff] %v19928_v40  ;;  %v6643_v2 = vadd.f32 %v6642_v62, %v6570_v35  ;;  %v6582_v52 = vadd.f32 %v6581_v63, %v19906_v13  ;;  %v17453_v35 = vld [vmem:[#allocation2 + $0x78] sm:$0xff] }
 0x737   : > { %v6644_v41 = vpop.f32.mrf.mxu1 }
 0x738   : > { %23268 = vst [vmem:[#allocation28_spill] sm:$0xff] %v19924_v26  ;;  %v6645_v45 = vadd.f32 %v6644_v41, %v6572_v60  ;;  %v6833_v0 = vadd.f32 %v19924_v26, %v19928_v40  ;;  %v17452_v60 = vld [vmem:[#allocation2 + $0x48] sm:$0xff] }
 0x739   : > { %v6648_v33 = vpop.f32.mrf.mxu1  ;;  %v15767_v30 = vpop.f32.mrf.mxu0  ;;  %v19939_v6 = vadd.f32 %v17452_v60, %v6643_v2 }
 0x73a   : > { %v19931_v58 = vadd.f32 %v17450_v50, %v6645_v45  ;;  %v6649_v62 = vadd.f32 %v6648_v33, %v6576_v34  ;;  %v17454_v33 = vld [vmem:[#allocation2 + $0x28] sm:$0xff]  ;;  %v6586_v50 = vadd.f32 %v19873_v12, %v19913_v43 }
 0x73b   : > { %v6650_v54 = vpop.f32.mrf.mxu1  ;;  %v6776_v36 = vpop.f32.mrf.mxu0  ;;  %23272 = vst [vmem:[#allocation32_spill] sm:$0xff] %v19939_v6 }
 0x73c   : > { %v6651_v15 = vadd.f32 %v6650_v54, %v6578_v4  ;;  %23270 = vst [vmem:[#allocation30_spill] sm:$0xff] %v19931_v58  ;;  %v19952_v2 = vadd.f32 %v17455_v37, %v6649_v62 }
 0x73d   : > { %v19881_v59 = vpop.f32.mrf.mxu1  ;;  %v15768_v14 = vpop.f32.mrf.mxu0 }
 0x73e   : > { %v19944_v24 = vadd.f32 %v17453_v35, %v6651_v15  ;;  %23275 = vst [vmem:[#allocation35_spill] sm:$0xff] %v19952_v2  ;;  %v6590_v35 = vadd.f32 %v19877_v32, %v19913_v43 }
 0x73f   : > { %v19883_v42 = vpop.f32.mrf.mxu1 }
 0x740   : > { %23273 = vst [vmem:[#allocation33_spill] sm:$0xff] %v19944_v24 }
 0x741   : > { %v19887_v38 = vpop.f32.mrf.mxu1 }
 0x743   : > { %v19889_v5 = vpop.f32.mrf.mxu1 }
 0x745   : > { %v19893_v57 = vpop.f32.mrf.mxu1 }
 0x746   : > { %v6663_v32 = vadd.f32 %v19893_v57, %v6590_v35 }
 0x747   : > { %v19895_v22 = vpop.f32.mrf.mxu1 }
 0x749   : > { %v19899_v11 = vpop.f32.mrf.mxu1 }
 0x74b   : > { %v19903_v29 = vpop.f32.mrf.mxu1 }
 0x74d   : > { %v19910_v19 = vpop.f32.mrf.mxu1 }
 0x74f   : > { %v19915_v49 = vpop.f32.mrf.mxu1 }
 0x751   : > { %v15161_v23 = vpop.f32.mrf.mxu1 }
 0x753   : > { %v15162_v25 = vpop.f32.mrf.mxu1 }
 0x754   : > { %v15163_v9 = vadd.f32 %v15162_v25, %v15161_v23  ;;  %v17451_v23 = vld [vmem:[#allocation2 + $0x10] sm:$0xff] }
 0x755   : > { %v15164_v55 = vpop.f32.mrf.mxu1 }
 0x756   : > { %v6712_v51 = vadd.f32 %v15163_v9, %v19920_v16 }
 0x757   : > { %v15165_v17 = vpop.f32.mrf.mxu1 }
 0x758   : > { %v6777_v61 = vadd.f32 %v6776_v36, %v6712_v51  ;;  %v15166_v56 = vadd.f32 %v15165_v17, %v15164_v55  ;;  %v6779_v36 = vpop.f32.mrf.mxu0  ;;  %v6580_v55 = vadd.f32 %v19871_v8, %v19913_v43  ;;  %v6655_v51 = vadd.f32 %v19883_v42, %v6582_v52 }
 0x759   : > { %v15167_v31 = vpop.f32.mrf.mxu1  ;;  %v6837_v17 = vadd.f32 %v19931_v58, %v19939_v6  ;;  %v6588_v42 = vadd.f32 %v19875_v18, %v19906_v13  ;;  %v17457_v18 = vld [vmem:[#allocation2 + $0x88] sm:$0xff] }
 0x75a   : > { %v6715_v41 = vadd.f32 %v15166_v56, %v19920_v16  ;;  %v19934_v21 = vadd.f32 %v17451_v23, %v6777_v61  ;;  %v6653_v8 = vadd.f32 %v19881_v59, %v6580_v55  ;;  %v19955_v61 = vpop.f32.mrf.mxu0  ;;  %v6841_v23 = vadd.f32 %v19944_v24, %v19952_v2 }
 0x75b   : > { %v15168_v25 = vpop.f32.mrf.mxu1  ;;  %v6661_v59 = vadd.f32 %v19889_v5, %v6588_v42 }
 0x75c   : > { %23271 = vst [vmem:[#allocation31_spill] sm:$0xff] %v19934_v21  ;;  %v6780_v54 = vadd.f32 %v6779_v36, %v6715_v41  ;;  %v15169_v10 = vadd.f32 %v15168_v25, %v15167_v31  ;;  %v6834_v9 = vadd.f32 %v6833_v0, %v19934_v21  ;;  %v17456_v0 = vld [vmem:[#allocation2 + $0x18] sm:$0xff]  ;;  %v6592_v36 = vadd.f32 %v19879_v39, %v19906_v13  ;;  %v17458_v25 = vld [vmem:[#allocation2 + $0x90] sm:$0xff]  ;;  %v6792_v60 = vpop.f32.mrf.mxu0 }
 0x75d   : > { %v15170_v45 = vpop.f32.mrf.mxu1  ;;  %v19964_v52 = vadd.f32 %v17456_v0, %v6655_v51  ;;  %v19972_v12 = vadd.f32 %v17458_v25, %v6653_v8 }
 0x75e   : > { %v6720_v63 = vadd.f32 %v15169_v10, %v19920_v16  ;;  %6835 = vadd.xlane.f32.xlu0 %v6834_v9  ;;  %v19948_v4 = vadd.f32 %v17454_v33, %v6780_v54  ;;  %v6659_v10 = vadd.f32 %v19887_v38, %v6586_v50  ;;  %v15772_v8 = vpop.f32.mrf.mxu0  ;;  %v6596_v50 = vadd.f32 %v19885_v1, %v19913_v43 }
 0x75f   : > { %v15171_v56 = vpop.f32.mrf.mxu1  ;;  %23276 = vst [vmem:[#allocation36_spill] sm:$0xff] %v19964_v52  ;;  %23278 = vst [vmem:[#allocation38_spill] sm:$0xff] %v19972_v12  ;;  %v6845_v38 = vadd.f32 %v19964_v52, %v19972_v12 }
 0x760   : > { %23274 = vst [vmem:[#allocation34_spill] sm:$0xff] %v19948_v4  ;;  %v6785_v34 = vadd.f32 %v15767_v30, %v6720_v63  ;;  %v15172_v15 = vadd.f32 %v15171_v56, %v15170_v45  ;;  %v6838_v31 = vadd.f32 %v6837_v17, %v19948_v4  ;;  %v6665_v45 = vadd.f32 %v19895_v22, %v6592_v36  ;;  %v17459_v63 = vld [vmem:[#allocation2 + $0x50] sm:$0xff]  ;;  %v17460_v17 = vld [vmem:[#allocation2 + $0x98] sm:$0xff]  ;;  %v17464_v36 = vld [vmem:[#allocation2 + $0xa0] sm:$0xff] }
 0x761   : > { %v15173_v41 = vpop.f32.mrf.mxu1  ;;  %v19979_v33 = vadd.f32 %v17459_v63, %v6661_v59  ;;  %v17461_v56 = vld [vmem:[#allocation2 + $0x38] sm:$0xff]  ;;  %v17463_v59 = vld [vmem:[#allocation2 + $0x70] sm:$0xff]  ;;  %v20002_v25 = vadd.f32 %v17464_v36, %v6663_v32  ;;  %v6669_v1 = vadd.f32 %v19899_v11, %v6596_v50 }
 0x762   : > { %v6723_v62 = vadd.f32 %v15172_v15, %v19920_v16  ;;  %6839 = vadd.xlane.f32.xlu1 %v6838_v31  ;;  %v19968_v30 = vadd.f32 %v17457_v18, %v6785_v34  ;;  %v19989_v42 = vadd.f32 %v17461_v56, %v6659_v10  ;;  %v6602_v10 = vadd.f32 %v19908_v20, %v19906_v13  ;;  %v17468_v56 = vld [vmem:[#allocation2 + $0x20] sm:$0xff] }
 0x763   : > { %v15174_v54 = vpop.f32.mrf.mxu1  ;;  %23279 = vst [vmem:[#allocation39_spill] sm:$0xff] %v19979_v33  ;;  %23284 = vst [vmem:[#allocation44_spill] sm:$0xff] %v20002_v25  ;;  %v16302_v36 = vld [vmem:[%s18177_s26 + $0x2a4] ss:$48 sps:$4 sm:$0xff]  }
 0x764   : > { %23277 = vst [vmem:[#allocation37_spill] sm:$0xff] %v19968_v30  ;;  %v6788_v9 = vadd.f32 %v15768_v14, %v6723_v62  ;;  %v15175_v55 = vadd.f32 %v15174_v54, %v15173_v41  ;;  %v6842_v5 = vadd.f32 %v6841_v23, %v19968_v30  ;;  %v6598_v14 = vadd.f32 %v19891_v44, %v19906_v13  ;;  %v17462_v41 = vld [vmem:[#allocation2 + $0xa8] sm:$0xff] }
 0x765   : > { %v15176_v51 = vpop.f32.mrf.mxu1  ;;  %23281 = vst [vmem:[#allocation41_spill] sm:$0xff] %v19989_v42  ;;  %v19994_v23 = vadd.f32 %v17462_v41, %v6665_v45  ;;  %v6849_v18 = vadd.f32 %v19979_v33, %v19989_v42  ;;  %v6675_v11 = vadd.f32 %v19915_v49, %v6602_v10  ;;  %v17466_v13 = vld [vmem:[#allocation2 + $0x68] sm:$0xff]  ;;  %8885 = vmatprep.subr.bf16.mxu1 %v16302_v36  ;;  %v16326_v10 = vld [vmem:[%s18177_s26 + $0x8a4] ss:$48 sps:$4 sm:$0xff]  }
 0x766   : > { %v6728_v39 = vadd.f32 %v15175_v55, %v19920_v16  ;;  %6843 = vadd.xlane.f32.xlu0 %v6842_v5  ;;  %v19982_v37 = vadd.f32 %v17460_v17, %v6788_v9  ;;  %v6671_v44 = vadd.f32 %v19903_v29, %v6598_v14  ;;  %v6600_v5 = vadd.f32 %v19897_v7, %v19913_v43  ;;  %v17467_v17 = vld [vmem:[#allocation2 + $0x30] sm:$0xff] }
 0x767   : > { %v15177_v22 = vpop.f32.mrf.mxu1  ;;  %23282 = vst [vmem:[#allocation42_spill] sm:$0xff] %v19994_v23  ;;  %v6853_v45 = vadd.f32 %v19994_v23, %v20002_v25  ;;  %8958 = vmatprep.subr.bf16.mxu0 %v16326_v10 }
 0x768   : > { %23280 = vst [vmem:[#allocation40_spill] sm:$0xff] %v19982_v37  ;;  %v6793_v34 = vadd.f32 %v6792_v60, %v6728_v39  ;;  %v15178_v15 = vadd.f32 %v15177_v22, %v15176_v51  ;;  %v6846_v31 = vadd.f32 %v6845_v38, %v19982_v37  ;;  %v6795_v60 = vpop.f32.mrf.mxu0  ;;  %v17465_v51 = vld [vmem:[#allocation2 + $0x58] sm:$0xff]  ;;  %v20018_v38 = vadd.f32 %v17467_v17, %v6669_v1  ;;  %v16303_v1 = vld [vmem:[%s18177_s26 + $0x240] ss:$48 sps:$4 sm:$0xff]  }
 0x769   : > { %v15179_v0 = vpop.f32.mrf.mxu1  ;;  %v20012_v63 = vadd.f32 %v17465_v51, %v6671_v44  ;;  %v6673_v7 = vadd.f32 %v19910_v19, %v6600_v5  ;;  %v16314_v5 = vld [vmem:[%s18177_s26 + $0x124] ss:$48 sps:$4 sm:$0xff]   ;;  %v16315_v51 = vld [vmem:[%s18177_s26 + $0xc0] ss:$48 sps:$4 sm:$0xff]  }
 0x76a   : > { %v6731_v57 = vadd.f32 %v15178_v15, %v19920_v16  ;;  %6847 = vadd.xlane.f32.xlu1 %v6846_v31  ;;  %v19998_v62 = vadd.f32 %v17463_v59, %v6793_v34  ;;  %23287 = vst [vmem:[#allocation47_spill] sm:$0xff] %v20018_v38  ;;  %v20023_v34 = vadd.f32 %v17468_v56, %v6675_v11  ;;  %v17469_v15 = vld [vmem:[#allocation2 + $0x80] sm:$0xff] }
 0x76b   : > { %v15180_v54 = vpop.f32.mrf.mxu1  ;;  %23285 = vst [vmem:[#allocation45_spill] sm:$0xff] %v20012_v63  ;;  %v6857_v19 = vadd.f32 %v20012_v63, %v20018_v38  ;;  %v16320_v11 = vld [vmem:[%s18177_s26 + $0x64] ss:$48 sps:$4 sm:$0xff]   ;;  %v16321_v17 = vld [vmem:[%s18177_s26] ss:$48 sps:$4 sm:$0xff]  }
 0x76c   : > { %23283 = vst [vmem:[#allocation43_spill] sm:$0xff] %v19998_v62  ;;  %v6796_v29 = vadd.f32 %v6795_v60, %v6731_v57  ;;  %v15181_v9 = vadd.f32 %v15180_v54, %v15179_v0  ;;  %v6850_v55 = vadd.f32 %v6849_v18, %v19998_v62  ;;  %23288 = vst [vmem:[#allocation48_spill] sm:$0xff] %v20023_v34  ;;  %v16300_v18 = vld [vmem:[%s18177_s26 + $0x2a0] ss:$48 sps:$4 sm:$0xff]   ;;  %v16308_v60 = vld [vmem:[%s18177_s26 + $0x1e4] ss:$48 sps:$4 sm:$0xff]  }
 0x76d   : > { %v15182_v35 = vpop.f32.mrf.mxu1  ;;  %8886 = vmatpush1.bf16.msra.mxu1 %v16300_v18  ;;  %v16324_v54 = vld [vmem:[%s18177_s26 + $0x8a0] ss:$48 sps:$4 sm:$0xff]  }
 0x76e   : > { %v6736_v39 = vadd.f32 %v15181_v9, %v19920_v16  ;;  %6851 = vadd.xlane.f32.xlu0 %v6850_v55  ;;  %v20016_v20 = vadd.f32 %v17466_v13, %v6796_v29  ;;  %v16306_v29 = vld [vmem:[%s18177_s26 + $0x1e0] ss:$48 sps:$4 sm:$0xff]   ;;  %v16311_v9 = vld [vmem:[%s18177_s26 + $0x184] ss:$48 sps:$4 sm:$0xff]   ;;  %8959 = vmatpush1.bf16.msra.mxu0 %v16324_v54 }
 0x76f   : > { %v15183_v14 = vpop.f32.mrf.mxu1  ;;  %v16309_v55 = vld [vmem:[%s18177_s26 + $0x180] ss:$48 sps:$4 sm:$0xff]   ;;  %v16323_v13 = vld [vmem:[%s18177_s26 + $0x4] ss:$48 sps:$4 sm:$0xff]  }
 0x770   : > { %23286 = vst [vmem:[#allocation46_spill] sm:$0xff] %v20016_v20  ;;  %v6801_v43 = vadd.f32 %v19955_v61, %v6736_v39  ;;  %v15184_v32 = vadd.f32 %v15183_v14, %v15182_v35  ;;  %v6854_v22 = vadd.f32 %v6853_v45, %v20016_v20  ;;  %v17470_v61 = vld [vmem:[#allocation2 + $0xb8] sm:$0xff]  ;;  %v16312_v35 = vld [vmem:[%s18177_s26 + $0x120] ss:$48 sps:$4 sm:$0xff]   ;;  %v16317_v45 = vld [vmem:[%s18177_s26 + $0xc4] ss:$48 sps:$4 sm:$0xff]  }
 0x771   : > { %v20030_v50 = vadd.f32 %v17470_v61, %v6673_v7  ;;  %v16318_v39 = vld [vmem:[%s18177_s26 + $0x60] ss:$48 sps:$4 sm:$0xff]   ;;  %v16329_v14 = vld [vmem:[%s18177_s26 + $0x5a4] ss:$48 sps:$4 sm:$0xff]  }
 0x772   : > { %v6739_v49 = vadd.f32 %v15184_v32, %v19920_v16  ;;  %6855 = vadd.xlane.f32.xlu1 %v6854_v22  ;;  %v20026_v31 = vadd.f32 %v17469_v15, %v6801_v43  ;;  %v17471_v16 = vld [vmem:[#allocation2 + $0x8] sm:$0xff]  ;;  %v16327_v7 = vld [vmem:[%s18177_s26 + $0x5a0] ss:$48 sps:$4 sm:$0xff]  }
 0x773   : > { %23290 = vst [vmem:[#allocation50_spill] sm:$0xff] %v20030_v50  ;;  %v6861_v57 = vadd.f32 %v20023_v34, %v20030_v50 }
 0x774   : > { %23289 = vst [vmem:[#allocation49_spill] sm:$0xff] %v20026_v31  ;;  %v6804_v41 = vadd.f32 %v15772_v8, %v6739_v49  ;;  %v6858_v0 = vadd.f32 %v6857_v19, %v20026_v31  ;;  %v16305_v8 = vld [vmem:[%s18177_s26 + $0x244] ss:$48 sps:$4 sm:$0xff]  }
 0x775   : > { %8887 = vmatprep.subr.bf16.mxu1 %v16305_v8 }
 0x776   : > { %6859 = vadd.xlane.f32.xlu0 %v6858_v0  ;;  %v20033_v44 = vadd.f32 %v17471_v16, %v6804_v41  ;;  %8888 = vmatpush1.bf16.msra.mxu1 %v16303_v1 }
 0x777   : > { %8889 = vmatprep.subr.bf16.mxu1 %v16308_v60 }
 0x778   : > { %23291 = vst [vmem:[#allocation51_spill] sm:$0xff] %v20033_v44  ;;  %v6862_v59 = vadd.f32 %v6861_v57, %v20033_v44 }
 0x77a   : > { %6863 = vadd.xlane.f32.xlu1 %v6862_v59  ;;  %8890 = vmatpush1.bf16.msra.mxu1 %v16306_v29 }
 0x77b   : > { %8891 = vmatprep.subr.bf16.mxu1 %v16311_v9 }
 0x77e   : > { %8892 = vmatpush1.bf16.msra.mxu1 %v16309_v55 }
 0x77f   : > { %8893 = vmatprep.subr.bf16.mxu1 %v16314_v5 }
 0x782   : > { %8894 = vmatpush1.bf16.msra.mxu1 %v16312_v35 }
 0x783   : > { %8895 = vmatprep.subr.bf16.mxu1 %v16317_v45 }
 0x786   : > { %8896 = vmatpush1.bf16.msra.mxu1 %v16315_v51 }
 0x787   : > { %8897 = vmatprep.subr.bf16.mxu1 %v16320_v11 }
 0x78a   : > { %8898 = vmatpush1.bf16.msra.mxu1 %v16318_v39 }
 0x78b   : > { %8899 = vmatprep.subr.bf16.mxu1 %v16323_v13 }
 0x78e   : > { %8900 = vmatpush1.bf16.msra.mxu1 %v16321_v17 }
 0x78f   : > { %8901 = vmatprep.subr.bf16.mxu1 %v16329_v14 }
 0x792   : > { %8902 = vmatpush2.bf16.msra.mxu1 %v16327_v7 }
 0x7e7   : > { %v6836_v43 = vpop.xlane.xlu0 %6835 }
 0x7e8   : > { %v6865_v32 = vmul.f32 0.0026041667, %v6836_v43 }
 0x7ea   : > { %v20059_v22 = vsub.f32 %v19928_v40, %v6865_v32  ;;  %v20062_v56 = vsub.f32 %v19924_v26, %v6865_v32  ;;  %v20065_v49 = vsub.f32 %v19934_v21, %v6865_v32  ;;  %v16344_v21 = vld [vmem:[%s18177_s26 + $0x784] ss:$48 sps:$4 sm:$0xff]  }
 0x7eb   : > { %v6840_v15 = vpop.xlane.xlu1 %6839  ;;  %v16795_v40 = vld [vmem:[%s18182_s0 + $0xd8] ss:$12 sps:$4 sm:$0xff]  }
 0x7ec   : > { %v6866_v19 = vmul.f32 0.0026041667, %v6840_v15  ;;  %v6897_v61 = vmul.f32 %v20059_v22, %v20059_v22  ;;  %v6898_v41 = vmul.f32 %v20062_v56, %v20062_v56  ;;  %v6899_v0 = vmul.f32 %v20065_v49, %v20065_v49 }
 0x7ee   : > { %v20074_v16 = vsub.f32 %v19939_v6, %v6866_v19  ;;  %v20077_v57 = vsub.f32 %v19931_v58, %v6866_v19  ;;  %v20080_v59 = vsub.f32 %v19948_v4, %v6866_v19  ;;  %v6921_v18 = vadd.f32 %v6898_v41, %v6897_v61  ;;  %v16342_v4 = vld [vmem:[%s18177_s26 + $0x780] ss:$48 sps:$4 sm:$0xff]  }
 0x7ef   : > { %v6844_v36 = vpop.xlane.xlu0 %6843 }
 0x7f0   : > { %v6867_v8 = vmul.f32 0.0026041667, %v6844_v36  ;;  %v6922_v1 = vadd.f32 %v6921_v18, %v6899_v0  ;;  %v6900_v60 = vmul.f32 %v20074_v16, %v20074_v16  ;;  %v6901_v54 = vmul.f32 %v20077_v57, %v20077_v57 }
 0x7f1   : > { %v6902_v10 = vmul.f32 %v20080_v59, %v20080_v59 }
 0x7f2   : > { %v20089_v29 = vsub.f32 %v19952_v2, %v6867_v8  ;;  %v20092_v9 = vsub.f32 %v19944_v24, %v6867_v8  ;;  %v20095_v55 = vsub.f32 %v19968_v30, %v6867_v8  ;;  %6923 = vadd.xlane.f32.xlu0 %v6922_v1  ;;  %v6925_v5 = vadd.f32 %v6901_v54, %v6900_v60  ;;  %v16336_v30 = vld [vmem:[%s18177_s26 + $0x7e0] ss:$48 sps:$4 sm:$0xff]  }
 0x7f3   : > { %v6848_v35 = vpop.xlane.xlu1 %6847 }
 0x7f4   : > { %v6868_v45 = vmul.f32 0.0026041667, %v6848_v35  ;;  %v6926_v51 = vadd.f32 %v6925_v5, %v6902_v10  ;;  %v6903_v11 = vmul.f32 %v20089_v29, %v20089_v29  ;;  %v6904_v39 = vmul.f32 %v20092_v9, %v20092_v9 }
 0x7f5   : > { %v6905_v13 = vmul.f32 %v20095_v55, %v20095_v55 }
 0x7f6   : > { %v20104_v17 = vsub.f32 %v19972_v12, %v6868_v45  ;;  %v20107_v14 = vsub.f32 %v19964_v52, %v6868_v45  ;;  %v20110_v7 = vsub.f32 %v19982_v37, %v6868_v45  ;;  %6927 = vadd.xlane.f32.xlu1 %v6926_v51  ;;  %v6929_v43 = vadd.f32 %v6904_v39, %v6903_v11 }
 0x7f7   : > { %v6852_v32 = vpop.xlane.xlu0 %6851 }
 0x7f8   : > { %v6869_v15 = vmul.f32 0.0026041667, %v6852_v32  ;;  %v6930_v19 = vadd.f32 %v6929_v43, %v6905_v13  ;;  %v6906_v61 = vmul.f32 %v20104_v17, %v20104_v17  ;;  %v6907_v41 = vmul.f32 %v20107_v14, %v20107_v14 }
 0x7f9   : > { %v6908_v0 = vmul.f32 %v20110_v7, %v20110_v7 }
 0x7fa   : > { %v20119_v18 = vsub.f32 %v19989_v42, %v6869_v15  ;;  %v20122_v36 = vsub.f32 %v19979_v33, %v6869_v15  ;;  %v20125_v8 = vsub.f32 %v19998_v62, %v6869_v15  ;;  %6931 = vadd.xlane.f32.xlu0 %v6930_v19  ;;  %v6933_v1 = vadd.f32 %v6907_v41, %v6906_v61  ;;  %v16330_v41 = vld [vmem:[%s18177_s26 + $0x840] ss:$48 sps:$4 sm:$0xff]   ;;  %v16713_v42 = vld [vmem:[%s18182_s0 + $0xac] ss:$12 sps:$4 sm:$0xff]  }
 0x7fb   : > { %v6856_v60 = vpop.xlane.xlu1 %6855 }
 0x7fc   : > { %v6870_v54 = vmul.f32 0.0026041667, %v6856_v60  ;;  %v6934_v10 = vadd.f32 %v6933_v1, %v6908_v0  ;;  %v6909_v5 = vmul.f32 %v20119_v18, %v20119_v18  ;;  %v6910_v35 = vmul.f32 %v20122_v36, %v20122_v36  ;;  %v16332_v0 = vld [vmem:[%s18177_s26 + $0x844] ss:$48 sps:$4 sm:$0xff]   ;;  %v16333_v60 = vld [vmem:[%s18177_s26 + $0x540] ss:$48 sps:$4 sm:$0xff]  }
 0x7fd   : > { %v6911_v45 = vmul.f32 %v20125_v8, %v20125_v8  ;;  %8960 = vmatprep.subr.bf16.mxu0 %v16332_v0 }
 0x7fe   : > { %v20134_v51 = vsub.f32 %v20002_v25, %v6870_v54  ;;  %v20137_v11 = vsub.f32 %v19994_v23, %v6870_v54  ;;  %v20140_v39 = vsub.f32 %v20016_v20, %v6870_v54  ;;  %6935 = vadd.xlane.f32.xlu1 %v6934_v10  ;;  %v6937_v13 = vadd.f32 %v6910_v35, %v6909_v5  ;;  %v16335_v54 = vld [vmem:[%s18177_s26 + $0x544] ss:$48 sps:$4 sm:$0xff]  }
 0x7ff   : > { %v6860_v43 = vpop.xlane.xlu0 %6859  ;;  %8903 = vmatprep.subr.bf16.mxu1 %v16335_v54  ;;  %8961 = vmatpush1.bf16.msra.mxu0 %v16330_v41 }
 0x800   : > { %v6871_v32 = vmul.f32 0.0026041667, %v6860_v43  ;;  %v6938_v15 = vadd.f32 %v6937_v13, %v6911_v45  ;;  %v6912_v19 = vmul.f32 %v20134_v51, %v20134_v51  ;;  %v6913_v61 = vmul.f32 %v20137_v11, %v20137_v11  ;;  %8904 = vmatpush2.bf16.msra.mxu1 %v16333_v60 }
 0x801   : > { %v6914_v1 = vmul.f32 %v20140_v39, %v20140_v39 }
 0x802   : > { %v20153_v10 = vsub.f32 %v20018_v38, %v6871_v32  ;;  %v20156_v5 = vsub.f32 %v20012_v63, %v6871_v32  ;;  %v20159_v35 = vsub.f32 %v20026_v31, %v6871_v32  ;;  %6939 = vadd.xlane.f32.xlu0 %v6938_v15  ;;  %v6941_v45 = vadd.f32 %v6913_v61, %v6912_v19  ;;  %v16338_v32 = vld [vmem:[%s18177_s26 + $0x7e4] ss:$48 sps:$4 sm:$0xff]   ;;  %v16339_v19 = vld [vmem:[%s18177_s26 + $0x4e0] ss:$48 sps:$4 sm:$0xff]   ;;  %v16383_v63 = vld [vmem:[%s18177_s26 + $0x84c] ss:$48 sps:$4 sm:$0xff]  }
 0x803   : > { %v6864_v13 = vpop.xlane.xlu1 %6863  ;;  %v16341_v61 = vld [vmem:[%s18177_s26 + $0x4e4] ss:$48 sps:$4 sm:$0xff]   ;;  %8962 = vmatprep.subr.bf16.mxu0 %v16338_v32 }
 0x804   : > { %v6872_v43 = vmul.f32 0.0026041667, %v6864_v13  ;;  %v6942_v47 = vadd.f32 %v6941_v45, %v6914_v1  ;;  %v6915_v3 = vmul.f32 %v20153_v10, %v20153_v10  ;;  %v6916_v37 = vmul.f32 %v20156_v5, %v20156_v5  ;;  %8905 = vmatprep.subr.bf16.mxu1 %v16341_v61  ;;  %8963 = vmatpush1.bf16.msra.mxu0 %v16336_v30  ;;  %v16348_v30 = vld [vmem:[%s18177_s26 + $0x720] ss:$48 sps:$4 sm:$0xff]   ;;  %v16353_v61 = vld [vmem:[%s18177_s26 + $0x424] ss:$48 sps:$4 sm:$0xff]  }
 0x805   : > { %v6917_v15 = vmul.f32 %v20159_v35, %v20159_v35  ;;  %8906 = vmatpush2.bf16.msra.mxu1 %v16339_v19  ;;  %8964 = vmatprep.subr.bf16.mxu0 %v16344_v21  ;;  %v16351_v19 = vld [vmem:[%s18177_s26 + $0x420] ss:$48 sps:$4 sm:$0xff]   ;;  %v16356_v21 = vld [vmem:[%s18177_s26 + $0x6c4] ss:$48 sps:$4 sm:$0xff]  }
 0x806   : > { %v20172_v0 = vsub.f32 %v20030_v50, %v6872_v43  ;;  %v20175_v1 = vsub.f32 %v20023_v34, %v6872_v43  ;;  %v20178_v41 = vsub.f32 %v20033_v44, %v6872_v43  ;;  %6943 = vadd.xlane.f32.xlu1 %v6942_v47  ;;  %v6945_v60 = vadd.f32 %v6916_v37, %v6915_v3  ;;  %v16345_v43 = vld [vmem:[%s18177_s26 + $0x480] ss:$48 sps:$4 sm:$0xff]   ;;  %v16347_v47 = vld [vmem:[%s18177_s26 + $0x484] ss:$48 sps:$4 sm:$0xff]   ;;  %v16380_v34 = vld [vmem:[%s18177_s26 + $0x24c] ss:$48 sps:$4 sm:$0xff]  }
 0x807   : > { %8907 = vmatprep.subr.bf16.mxu1 %v16347_v47  ;;  %v16365_v47 = vld [vmem:[%s18177_s26 + $0x364] ss:$48 sps:$4 sm:$0xff]  }
 0x808   : > { %v6946_v54 = vadd.f32 %v6945_v60, %v6917_v15  ;;  %v6918_v45 = vmul.f32 %v20172_v0, %v20172_v0  ;;  %v6919_v13 = vmul.f32 %v20175_v1, %v20175_v1  ;;  %v6920_v3 = vmul.f32 %v20178_v41, %v20178_v41  ;;  %8965 = vmatpush1.bf16.msra.mxu0 %v16342_v4  ;;  %v16350_v15 = vld [vmem:[%s18177_s26 + $0x724] ss:$48 sps:$4 sm:$0xff]   ;;  %v16354_v60 = vld [vmem:[%s18177_s26 + $0x6c0] ss:$48 sps:$4 sm:$0xff]  }
 0x809   : > { %8908 = vmatpush2.bf16.msra.mxu1 %v16345_v43  ;;  %8966 = vmatprep.subr.bf16.mxu0 %v16350_v15  ;;  %v16359_v4 = vld [vmem:[%s18177_s26 + $0x3c4] ss:$48 sps:$4 sm:$0xff]   ;;  %v16363_v43 = vld [vmem:[%s18177_s26 + $0x360] ss:$48 sps:$4 sm:$0xff]   ;;  %v16374_v15 = vld [vmem:[%s18177_s26 + $0x2ac] ss:$48 sps:$4 sm:$0xff]  }
 0x80a   : > { %6947 = vadd.xlane.f32.xlu0 %v6946_v54  ;;  %v6949_v37 = vadd.f32 %v6919_v13, %v6918_v45  ;;  %8909 = vmatprep.subr.bf16.mxu1 %v16353_v61  ;;  %v16357_v54 = vld [vmem:[%s18177_s26 + $0x3c0] ss:$48 sps:$4 sm:$0xff]   ;;  %v16362_v13 = vld [vmem:[%s18177_s26 + $0x664] ss:$48 sps:$4 sm:$0xff]  }
 0x80b   : > { %v16360_v45 = vld [vmem:[%s18177_s26 + $0x660] ss:$48 sps:$4 sm:$0xff]  }
 0x80c   : > { %v6950_v32 = vadd.f32 %v6949_v37, %v6920_v3  ;;  %8967 = vmatpush1.bf16.msra.mxu0 %v16348_v30  ;;  %v16366_v3 = vld [vmem:[%s18177_s26 + $0x600] ss:$48 sps:$4 sm:$0xff]   ;;  %v16368_v37 = vld [vmem:[%s18177_s26 + $0x604] ss:$48 sps:$4 sm:$0xff]  }
 0x80d   : > { %8910 = vmatpush2.bf16.msra.mxu1 %v16351_v19  ;;  %8968 = vmatprep.subr.bf16.mxu0 %v16356_v21  ;;  %v16371_v30 = vld [vmem:[%s18177_s26 + $0x304] ss:$48 sps:$4 sm:$0xff]   ;;  %v16377_v19 = vld [vmem:[%s18177_s26 + $0x8ac] ss:$48 sps:$4 sm:$0xff]  }
 0x80e   : > { %6951 = vadd.xlane.f32.xlu1 %v6950_v32  ;;  %8911 = vmatprep.subr.bf16.mxu1 %v16359_v4  ;;  %v16369_v32 = vld [vmem:[%s18177_s26 + $0x300] ss:$48 sps:$4 sm:$0xff]  }
 0x810   : > { %8969 = vmatpush1.bf16.msra.mxu0 %v16354_v60 }
 0x811   : > { %8912 = vmatpush2.bf16.msra.mxu1 %v16357_v54  ;;  %8970 = vmatprep.subr.bf16.mxu0 %v16362_v13 }
 0x812   : > { %8913 = vmatprep.subr.bf16.mxu1 %v16365_v47 }
 0x814   : > { %8971 = vmatpush1.bf16.msra.mxu0 %v16360_v45 }
 0x815   : > { %8914 = vmatpush2.bf16.msra.mxu1 %v16363_v43  ;;  %8972 = vmatprep.subr.bf16.mxu0 %v16368_v37 }
 0x816   : > { %8915 = vmatprep.subr.bf16.mxu1 %v16371_v30  ;;  %v6831_v30 = vld [vmem:[%s23292_s15] sm:$0x7] }
 0x818   : > { %8973 = vmatpush1.bf16.msra.mxu0 %v16366_v3 }
 0x819   : > { %8916 = vmatpush2.bf16.msra.mxu1 %v16369_v32  ;;  %9031 = vmatprep.subr.bf16.mxu0 %v16374_v15 }
 0x81a   : > { %9104 = vmatprep.subr.bf16.mxu1 %v16377_v19 }
 0x87b   : > { %v6924_v61 = vpop.xlane.xlu0 %6923 }
 0x87c   : > { %v6953_v60 = vmul.f32 0.0026041667, %v6924_v61 }
 0x87e   : > { %v6961_v21 = vadd.f32 1e-05, %v6953_v60  ;;  %v20211_v60 = vrot.slane %v6831_v30, %v23265_v48 }
 0x87f   : > { %v6928_v54 = vpop.xlane.xlu1 %6927 }
 0x880   : > { %17228 = vrsqrt.f32 %v6961_v21  ;;  %v6954_v4 = vmul.f32 0.0026041667, %v6928_v54  ;;  %v20214_v21 = vrot.slane %v6831_v30, %v23267_v27 }
 0x882   : > { %v6962_v45 = vadd.f32 1e-05, %v6954_v4  ;;  %v6832_v4 = vld [vmem:[%s23293_s9] sm:$0x7] }
 0x883   : > { %v6932_v13 = vpop.xlane.xlu0 %6931  ;;  %v20226_v44 = vrot.slane %v6832_v4, %v23265_v48 }
 0x884   : > { %17230 = vrsqrt.f32 %v6962_v45  ;;  %v6955_v43 = vmul.f32 0.0026041667, %v6932_v13 }
 0x886   : > { %v6963_v47 = vadd.f32 1e-05, %v6955_v43 }
 0x887   : > { %v6936_v37 = vpop.xlane.xlu1 %6935 }
 0x888   : > { %17232 = vrsqrt.f32 %v6963_v47  ;;  %v6956_v3 = vmul.f32 0.0026041667, %v6936_v37  ;;  %v20222_v37 = vrot.slane %v6831_v30, %v23266_v53 }
 0x88a   : > { %v6964_v32 = vadd.f32 1e-05, %v6956_v3 }
 0x88b   : > { %v6940_v15 = vpop.xlane.xlu0 %6939 }
 0x88c   : > { %17234 = vrsqrt.f32 %v6964_v32  ;;  %v6957_v19 = vmul.f32 0.0026041667, %v6940_v15 }
 0x88d   : > { %v17229_v61 = vpop.eup %17228 }
 0x88e   : > { %v6965_v54 = vadd.f32 1e-05, %v6957_v19  ;;  %v6978_v45 = vmul.f32 %v17229_v61, %v20062_v56  ;;  %v6979_v13 = vmul.f32 %v17229_v61, %v20065_v49  ;;  %v6977_v47 = vmul.f32 %v17229_v61, %v20059_v22 }
 0x88f   : > { %v6944_v43 = vpop.xlane.xlu1 %6943  ;;  %v20230_v56 = vrot.slane %v6832_v4, %v23267_v27 }
 0x890   : > { %17236 = vrsqrt.f32 %v6965_v54  ;;  %v6958_v3 = vmul.f32 0.0026041667, %v6944_v43  ;;  %v7018_v15 = vmul.f32 %v20211_v60, %v6978_v45  ;;  %v7019_v19 = vmul.f32 %v20214_v21, %v6979_v13 }
 0x891   : > { %v17231_v32 = vpop.eup %17230  ;;  %v7017_v54 = vmul.f32 %v20222_v37, %v6977_v47  ;;  %v20237_v45 = vrot.slane %v6832_v4, %v23266_v53 }
 0x892   : > { %v6966_v49 = vadd.f32 1e-05, %v6958_v3  ;;  %v6981_v31 = vmul.f32 %v17231_v32, %v20077_v57  ;;  %v6982_v22 = vmul.f32 %v17231_v32, %v20080_v59  ;;  %v6980_v61 = vmul.f32 %v17231_v32, %v20074_v16 }
 0x893   : > { %v6948_v30 = vpop.xlane.xlu0 %6947  ;;  %v7058_v57 = vadd.f32 %v20226_v44, %v7018_v15  ;;  %v7059_v59 = vadd.f32 %v20230_v56, %v7019_v19 }
 0x894   : > { %17238 = vrsqrt.f32 %v6966_v49  ;;  %v6959_v43 = vmul.f32 0.0026041667, %v6948_v30  ;;  %v7021_v13 = vmul.f32 %v20211_v60, %v6981_v31  ;;  %v7022_v20 = vmul.f32 %v20214_v21, %v6982_v22  ;;  %v16372_v30 = vld [vmem:[%s18177_s26 + $0x2a8] ss:$48 sps:$4 sm:$0xff]  }
 0x895   : > { %v17233_v3 = vpop.eup %17232  ;;  %v7020_v16 = vmul.f32 %v20222_v37, %v6980_v61  ;;  %v7057_v22 = vadd.f32 %v20237_v45, %v7017_v54 }
 0x896   : > { %v6967_v32 = vadd.f32 1e-05, %v6959_v43  ;;  %v7061_v47 = vadd.f32 %v20226_v44, %v7021_v13  ;;  %v7062_v4 = vadd.f32 %v20230_v56, %v7022_v20  ;;  %v6984_v49 = vmul.f32 %v17233_v3, %v20092_v9  ;;  %v16375_v20 = vld [vmem:[%s18177_s26 + $0x8a8] ss:$48 sps:$4 sm:$0xff]  }
 0x897   : > { %v6952_v31 = vpop.xlane.xlu1 %6951  ;;  %v7060_v15 = vadd.f32 %v20237_v45, %v7020_v16  ;;  %v6985_v19 = vmul.f32 %v17233_v3, %v20095_v55  ;;  %v6983_v62 = vmul.f32 %v17233_v3, %v20089_v29 }
 0x898   : > { %17240 = vrsqrt.f32 %v6967_v32  ;;  %v6960_v61 = vmul.f32 0.0026041667, %v6952_v31  ;;  %v20252_v43 = vpack.c.bf16 %v7061_v47, %v7058_v57  ;;  %v20254_v13 = vpack.c.bf16 %v7062_v4, %v7059_v59  ;;  %v16378_v32 = vld [vmem:[%s18177_s26 + $0x248] ss:$48 sps:$4 sm:$0xff]   ;;  %v16386_v47 = vld [vmem:[%s18177_s26 + $0x1ec] ss:$48 sps:$4 sm:$0xff]  }
 0x899   : > { %v17235_v9 = vpop.eup %17234  ;;  %v20258_v50 = vpack.c.bf16 %v7060_v15, %v7057_v22  ;;  %v7024_v54 = vmul.f32 %v20211_v60, %v6984_v49  ;;  %v7025_v55 = vmul.f32 %v20214_v21, %v6985_v19  ;;  %v7023_v29 = vmul.f32 %v20222_v37, %v6983_v62  ;;  %v16381_v62 = vld [vmem:[%s18177_s26 + $0x848] ss:$48 sps:$4 sm:$0xff]  }
 0x89a   : > { %v6968_v3 = vadd.f32 1e-05, %v6960_v61  ;;  %8917 = vmatprep.mubr.bf16.mxu1 %v20252_v43  ;;  %8991 = vmatmul.mubr.bf16.vlgmr.msra.gmra.mxu0 %v20254_v13  ;;  %v6987_v57 = vmul.f32 %v17235_v9, %v20107_v14  ;;  %v6988_v59 = vmul.f32 %v17235_v9, %v20110_v7  ;;  %v6986_v16 = vmul.f32 %v17235_v9, %v20104_v17  ;;  %v16384_v61 = vld [vmem:[%s18177_s26 + $0x1e8] ss:$48 sps:$4 sm:$0xff]  }
 0x89b   : > { %9032 = vmatpush1.bf16.msra.mxu0 %v16372_v30  ;;  %8918 = vmatmul.mubr.bf16.vlgmr.msra.gmra.mxu1 %v20258_v50  ;;  %v7064_v17 = vadd.f32 %v20226_v44, %v7024_v54  ;;  %v7065_v31 = vadd.f32 %v20230_v56, %v7025_v55  ;;  %v16389_v30 = vld [vmem:[%s18177_s26 + $0x7ec] ss:$48 sps:$4 sm:$0xff]  }
 0x89c   : > { %17242 = vrsqrt.f32 %v6968_v3  ;;  %9105 = vmatpush1.bf16.msra.mxu1 %v16375_v20  ;;  %9033 = vmatprep.subr.bf16.mxu0 %v16380_v34  ;;  %v7027_v4 = vmul.f32 %v20211_v60, %v6987_v57  ;;  %v7028_v49 = vmul.f32 %v20214_v21, %v6988_v59  ;;  %v7026_v14 = vmul.f32 %v20222_v37, %v6986_v16  ;;  %v16392_v57 = vld [vmem:[%s18177_s26 + $0x18c] ss:$48 sps:$4 sm:$0xff]  }
 0x89d   : > { %v17237_v7 = vpop.eup %17236  ;;  %9106 = vmatprep.subr.bf16.mxu1 %v16383_v63  ;;  %9000 = vmatprep.mubr.bf16.mxu0 %v23263_v46  ;;  %v7063_v34 = vadd.f32 %v20237_v45, %v7023_v29  ;;  %v16387_v29 = vld [vmem:[%s18177_s26 + $0x7e8] ss:$48 sps:$4 sm:$0xff]  }
 0x89e   : > { %v7067_v22 = vadd.f32 %v20226_v44, %v7027_v4  ;;  %v7068_v15 = vadd.f32 %v20230_v56, %v7028_v49  ;;  %v7066_v19 = vadd.f32 %v20237_v45, %v7026_v14  ;;  %v6990_v63 = vmul.f32 %v17237_v7, %v20122_v36  ;;  %v16395_v36 = vld [vmem:[%s18177_s26 + $0x78c] ss:$48 sps:$4 sm:$0xff]   ;;  %v16390_v4 = vld [vmem:[%s18177_s26 + $0x188] ss:$48 sps:$4 sm:$0xff]  }
 0x89f   : > { %9034 = vmatpush1.bf16.msra.mxu0 %v16378_v32  ;;  %v6991_v20 = vmul.f32 %v17237_v7, %v20125_v8  ;;  %v6989_v9 = vmul.f32 %v17237_v7, %v20119_v18  ;;  %v16393_v49 = vld [vmem:[%s18177_s26 + $0x788] ss:$48 sps:$4 sm:$0xff]   ;;  %v16398_v14 = vld [vmem:[%s18177_s26 + $0x12c] ss:$48 sps:$4 sm:$0xff]  }
 0x8a0   : > { %9107 = vmatpush1.bf16.msra.mxu1 %v16381_v62  ;;  %9035 = vmatprep.subr.bf16.mxu0 %v16386_v47  ;;  %v20288_v54 = vpack.c.bf16 %v7067_v22, %v7064_v17  ;;  %v20290_v55 = vpack.c.bf16 %v7068_v15, %v7065_v31  ;;  %v20293_v3 = vpack.c.bf16 %v7066_v19, %v7063_v34 }
 0x8a1   : > { %v17239_v59 = vpop.eup %17238  ;;  %9108 = vmatprep.subr.bf16.mxu1 %v16389_v30  ;;  %v7030_v8 = vmul.f32 %v20211_v60, %v6990_v63  ;;  %v7031_v18 = vmul.f32 %v20214_v21, %v6991_v20  ;;  %v7029_v16 = vmul.f32 %v20222_v37, %v6989_v9  ;;  %v16401_v30 = vld [vmem:[%s18177_s26 + $0x72c] ss:$48 sps:$4 sm:$0xff]  }
 0x8a2   : > { %8927 = vmatprep.mubr.bf16.mxu1 %v20288_v54  ;;  %9001 = vmatmul.mubr.bf16.gmra.mxu0 %v20290_v55  ;;  %v6993_v32 = vmul.f32 %v17239_v59, %v20137_v11  ;;  %v6994_v62 = vmul.f32 %v17239_v59, %v20140_v39  ;;  %v6992_v47 = vmul.f32 %v17239_v59, %v20134_v51  ;;  %v16399_v59 = vld [vmem:[%s18177_s26 + $0x728] ss:$48 sps:$4 sm:$0xff]  }
 0x8a3   : > { %9036 = vmatpush1.bf16.msra.mxu0 %v16384_v61  ;;  %8928 = vmatmul.mubr.bf16.gmra.mxu1 %v20293_v3  ;;  %v7070_v51 = vadd.f32 %v20226_v44, %v7030_v8  ;;  %v7071_v39 = vadd.f32 %v20230_v56, %v7031_v18  ;;  %v7069_v34 = vadd.f32 %v20237_v45, %v7029_v16  ;;  %v16396_v61 = vld [vmem:[%s18177_s26 + $0x128] ss:$48 sps:$4 sm:$0xff]   ;;  %v16404_v8 = vld [vmem:[%s18177_s26 + $0xcc] ss:$48 sps:$4 sm:$0xff]  }
 0x8a4   : > { %9109 = vmatpush1.bf16.msra.mxu1 %v16387_v29  ;;  %9037 = vmatprep.subr.bf16.mxu0 %v16392_v57  ;;  %v7033_v7 = vmul.f32 %v20211_v60, %v6993_v32  ;;  %v7034_v17 = vmul.f32 %v20214_v21, %v6994_v62  ;;  %v7032_v11 = vmul.f32 %v20222_v37, %v6992_v47 }
 0x8a5   : > { %v17241_v31 = vpop.eup %17240  ;;  %9110 = vmatprep.subr.bf16.mxu1 %v16395_v36  ;;  %9010 = vmatprep.mubr.bf16.mxu0 %v23263_v46 }
 0x8a6   : > { %v7073_v22 = vadd.f32 %v20226_v44, %v7033_v7  ;;  %v7074_v15 = vadd.f32 %v20230_v56, %v7034_v17  ;;  %v7072_v19 = vadd.f32 %v20237_v45, %v7032_v11  ;;  %v6996_v63 = vmul.f32 %v17241_v31, %v20156_v5  ;;  %v16407_v5 = vld [vmem:[%s18177_s26 + $0x6cc] ss:$48 sps:$4 sm:$0xff]  }
 0x8a7   : > { %9038 = vmatpush1.bf16.msra.mxu0 %v16390_v4  ;;  %v6997_v20 = vmul.f32 %v17241_v31, %v20159_v35  ;;  %v6995_v9 = vmul.f32 %v17241_v31, %v20153_v10  ;;  %v16402_v4 = vld [vmem:[%s18177_s26 + $0xc8] ss:$48 sps:$4 sm:$0xff]   ;;  %v16413_v11 = vld [vmem:[%s18177_s26 + $0x66c] ss:$48 sps:$4 sm:$0xff]  }
 0x8a8   : > { %9111 = vmatpush1.bf16.msra.mxu1 %v16393_v49  ;;  %9039 = vmatprep.subr.bf16.mxu0 %v16398_v14  ;;  %v20324_v29 = vpack.c.bf16 %v7073_v22, %v7070_v51  ;;  %v20326_v57 = vpack.c.bf16 %v7074_v15, %v7071_v39  ;;  %v20329_v36 = vpack.c.bf16 %v7072_v19, %v7069_v34  ;;  %v16405_v49 = vld [vmem:[%s18177_s26 + $0x6c8] ss:$48 sps:$4 sm:$0xff]   ;;  %v16410_v14 = vld [vmem:[%s18177_s26 + $0x6c] ss:$48 sps:$4 sm:$0xff]  }
 0x8a9   : > { %v17243_v18 = vpop.eup %17242  ;;  %9112 = vmatprep.subr.bf16.mxu1 %v16401_v30  ;;  %v7036_v35 = vmul.f32 %v20211_v60, %v6996_v63  ;;  %v7037_v10 = vmul.f32 %v20214_v21, %v6997_v20  ;;  %v7035_v16 = vmul.f32 %v20222_v37, %v6995_v9  ;;  %v16411_v34 = vld [vmem:[%s18177_s26 + $0x668] ss:$48 sps:$4 sm:$0xff]   ;;  %v16419_v22 = vld [vmem:[%s18177_s26 + $0x60c] ss:$48 sps:$4 sm:$0xff]   ;;  %v16425_v63 = vld [vmem:[%s18177_s26 + $0x2b4] ss:$48 sps:$4 sm:$0xff]  }
 0x8aa   : > { %8937 = vmatprep.mubr.bf16.mxu1 %v20324_v29  ;;  %9011 = vmatmul.mubr.bf16.gmra.mxu0 %v20326_v57  ;;  %v6999_v32 = vmul.f32 %v17243_v18, %v20175_v1  ;;  %v7000_v62 = vmul.f32 %v17243_v18, %v20178_v41  ;;  %v6998_v47 = vmul.f32 %v17243_v18, %v20172_v0  ;;  %v16417_v15 = vld [vmem:[%s18177_s26 + $0x608] ss:$48 sps:$4 sm:$0xff]   ;;  %v16422_v19 = vld [vmem:[%s18177_s26 + $0x5ac] ss:$48 sps:$4 sm:$0xff]   ;;  %v16423_v20 = vld [vmem:[%s18177_s26 + $0x2b0] ss:$48 sps:$4 sm:$0xff]  }
 0x8ab   : > { %9040 = vmatpush1.bf16.msra.mxu0 %v16396_v61  ;;  %8938 = vmatmul.mubr.bf16.gmra.mxu1 %v20329_v36  ;;  %v7076_v0 = vadd.f32 %v20226_v44, %v7036_v35  ;;  %v7077_v41 = vadd.f32 %v20230_v56, %v7037_v10  ;;  %v16420_v61 = vld [vmem:[%s18177_s26 + $0x5a8] ss:$48 sps:$4 sm:$0xff]   ;;  %v16428_v9 = vld [vmem:[%s18177_s26 + $0x54c] ss:$48 sps:$4 sm:$0xff]   ;;  %v16429_v18 = vld [vmem:[%s18177_s26 + $0x250] ss:$48 sps:$4 sm:$0xff]  }
 0x8ac   : > { %9113 = vmatpush1.bf16.msra.mxu1 %v16399_v59  ;;  %9041 = vmatprep.subr.bf16.mxu0 %v16404_v8  ;;  %v7039_v7 = vmul.f32 %v20211_v60, %v6999_v32  ;;  %v7040_v17 = vmul.f32 %v20214_v21, %v7000_v62  ;;  %v7038_v1 = vmul.f32 %v20222_v37, %v6998_v47  ;;  %v16408_v37 = vld [vmem:[%s18177_s26 + $0x68] ss:$48 sps:$4 sm:$0xff]   ;;  %v16431_v59 = vld [vmem:[%s18177_s26 + $0x254] ss:$48 sps:$4 sm:$0xff]   ;;  %v16440_v32 = vld [vmem:[%s18177_s26 + $0x48c] ss:$48 sps:$4 sm:$0xff]  }
 0x8ad   : > { %9114 = vmatprep.subr.bf16.mxu1 %v16407_v5  ;;  %9020 = vmatprep.mubr.bf16.mxu0 %v23263_v46  ;;  %v7075_v60 = vadd.f32 %v20237_v45, %v7035_v16  ;;  %v16426_v8 = vld [vmem:[%s18177_s26 + $0x548] ss:$48 sps:$4 sm:$0xff]   ;;  %v16434_v5 = vld [vmem:[%s18177_s26 + $0x4ec] ss:$48 sps:$4 sm:$0xff]   ;;  %v16437_v35 = vld [vmem:[%s18177_s26 + $0x1f4] ss:$48 sps:$4 sm:$0xff]  }
 0x8ae   : > { %v7079_v31 = vadd.f32 %v20226_v44, %v7039_v7  ;;  %v7080_v51 = vadd.f32 %v20230_v56, %v7040_v17  ;;  %v7078_v21 = vadd.f32 %v20237_v45, %v7038_v1  ;;  %v16416_v56 = vld [vmem:[%s18177_s26 + $0xc] ss:$48 sps:$4 sm:$0xff]   ;;  %v16414_v45 = vld [vmem:[%s18177_s26 + $0x8] ss:$48 sps:$4 sm:$0xff]   ;;  %v16435_v16 = vld [vmem:[%s18177_s26 + $0x1f0] ss:$48 sps:$4 sm:$0xff]  }
 0x8af   : > { %9042 = vmatpush1.bf16.msra.mxu0 %v16402_v4  ;;  %v16432_v10 = vld [vmem:[%s18177_s26 + $0x4e8] ss:$48 sps:$4 sm:$0xff]   ;;  %v16443_v62 = vld [vmem:[%s18177_s26 + $0x194] ss:$48 sps:$4 sm:$0xff]   ;;  %v16441_v4 = vld [vmem:[%s18177_s26 + $0x190] ss:$48 sps:$4 sm:$0xff]  }
 0x8b0   : > { %9115 = vmatpush1.bf16.msra.mxu1 %v16405_v49  ;;  %9043 = vmatprep.subr.bf16.mxu0 %v16410_v14  ;;  %v20357_v39 = vpack.c.bf16 %v7079_v31, %v7076_v0  ;;  %v20359_v30 = vpack.c.bf16 %v7080_v51, %v7077_v41  ;;  %v20362_v44 = vpack.c.bf16 %v7078_v21, %v7075_v60  ;;  %v16438_v47 = vld [vmem:[%s18177_s26 + $0x488] ss:$48 sps:$4 sm:$0xff]   ;;  %v16446_v49 = vld [vmem:[%s18177_s26 + $0x42c] ss:$48 sps:$4 sm:$0xff]   ;;  %v16449_v14 = vld [vmem:[%s18177_s26 + $0x134] ss:$48 sps:$4 sm:$0xff]  }
 0x8b1   : > { %9116 = vmatprep.subr.bf16.mxu1 %v16413_v11  ;;  %v16444_v7 = vld [vmem:[%s18177_s26 + $0x428] ss:$48 sps:$4 sm:$0xff]   ;;  %v16447_v17 = vld [vmem:[%s18177_s26 + $0x130] ss:$48 sps:$4 sm:$0xff]   ;;  %v16452_v1 = vld [vmem:[%s18177_s26 + $0x3cc] ss:$48 sps:$4 sm:$0xff]  }
 0x8b2   : > { %8947 = vmatprep.mubr.bf16.mxu1 %v20357_v39  ;;  %9021 = vmatmul.mubr.bf16.gmra.mxu0 %v20359_v30  ;;  %v16455_v0 = vld [vmem:[%s18177_s26 + $0xd4] ss:$48 sps:$4 sm:$0xff]   ;;  %v16450_v41 = vld [vmem:[%s18177_s26 + $0x3c8] ss:$48 sps:$4 sm:$0xff]   ;;  %v16453_v11 = vld [vmem:[%s18177_s26 + $0xd0] ss:$48 sps:$4 sm:$0xff]  }
 0x8b3   : > { %9044 = vmatpush1.bf16.msra.mxu0 %v16408_v37  ;;  %8948 = vmatmul.mubr.bf16.gmra.mxu1 %v20362_v44  ;;  %v16458_v31 = vld [vmem:[%s18177_s26 + $0x36c] ss:$48 sps:$4 sm:$0xff]   ;;  %v16461_v51 = vld [vmem:[%s18177_s26 + $0x74] ss:$48 sps:$4 sm:$0xff]   ;;  %v16456_v60 = vld [vmem:[%s18177_s26 + $0x368] ss:$48 sps:$4 sm:$0xff]  }
 0x8b4   : > { %9063 = vmatprep.mubr.bf16.mxu0 %v20252_v43  ;;  %9117 = vmatpush1.bf16.msra.mxu1 %v16411_v34  ;;  %v16459_v21 = vld [vmem:[%s18177_s26 + $0x70] ss:$48 sps:$4 sm:$0xff]   ;;  %v16464_v37 = vld [vmem:[%s18177_s26 + $0x30c] ss:$48 sps:$4 sm:$0xff]   ;;  %v16467_v34 = vld [vmem:[%s18177_s26 + $0x14] ss:$48 sps:$4 sm:$0xff]  }
 0x8b5   : > { %9045 = vmatprep.subr.bf16.mxu0 %v16416_v56  ;;  %9118 = vmatprep.subr.bf16.mxu1 %v16419_v22  ;;  %v16462_v56 = vld [vmem:[%s18177_s26 + $0x308] ss:$48 sps:$4 sm:$0xff]   ;;  %v16465_v22 = vld [vmem:[%s18177_s26 + $0x10] ss:$48 sps:$4 sm:$0xff]  }
 0x8b6   : > { %9136 = vmatprep.mubr.bf16.mxu1 %v23263_v46 }
 0x8b7   : > { %9046 = vmatpush1.bf16.msra.mxu0 %v16414_v45  ;;  %v16470_v45 = vld [vmem:[%s18177_s26 + $0x8b4] ss:$48 sps:$4 sm:$0xff]  }
 0x8b8   : > { %9119 = vmatpush1.bf16.msra.mxu1 %v16417_v15  ;;  %9047 = vmatprep.subr.bf16.mxu0 %v16422_v19  ;;  %v16473_v15 = vld [vmem:[%s18177_s26 + $0x5b4] ss:$48 sps:$4 sm:$0xff]   ;;  %v16468_v19 = vld [vmem:[%s18177_s26 + $0x8b0] ss:$48 sps:$4 sm:$0xff]  }
 0x8b9   : > { %9177 = vmatprep.subr.bf16.mxu1 %v16425_v63  ;;  %v16471_v63 = vld [vmem:[%s18177_s26 + $0x5b0] ss:$48 sps:$4 sm:$0xff]  }
 0x8bb   : > { %9048 = vmatpush2.bf16.msra.mxu0 %v16420_v61  ;;  %9137 = vmatmul.mubr.bf16.vlgmr.msra.gmra.mxu1 %v20254_v13  ;;  %v16476_v61 = vld [vmem:[%s18177_s26 + $0x854] ss:$48 sps:$4 sm:$0xff]  }
 0x8bc   : > { %9178 = vmatpush1.bf16.msra.mxu1 %v16423_v20  ;;  %9049 = vmatprep.subr.bf16.mxu0 %v16428_v9  ;;  %v16479_v20 = vld [vmem:[%s18177_s26 + $0x554] ss:$48 sps:$4 sm:$0xff]   ;;  %v16474_v9 = vld [vmem:[%s18177_s26 + $0x850] ss:$48 sps:$4 sm:$0xff]  }
 0x8bd   : > { %9179 = vmatprep.subr.bf16.mxu1 %v16431_v59  ;;  %9146 = vmatprep.mubr.bf16.mxu1 %v23263_v46  ;;  %v16477_v59 = vld [vmem:[%s18177_s26 + $0x550] ss:$48 sps:$4 sm:$0xff]  }
 0x8bf   : > { %9050 = vmatpush2.bf16.msra.mxu0 %v16426_v8  ;;  %v16482_v8 = vld [vmem:[%s18177_s26 + $0x7f4] ss:$48 sps:$4 sm:$0xff]  }
 0x8c0   : > { %9180 = vmatpush1.bf16.msra.mxu1 %v16429_v18  ;;  %9051 = vmatprep.subr.bf16.mxu0 %v16434_v5  ;;  %v16485_v18 = vld [vmem:[%s18177_s26 + $0x4f4] ss:$48 sps:$4 sm:$0xff]   ;;  %v16480_v5 = vld [vmem:[%s18177_s26 + $0x7f0] ss:$48 sps:$4 sm:$0xff]  }
 0x8c1   : > { %9181 = vmatprep.subr.bf16.mxu1 %v16437_v35  ;;  %v16483_v35 = vld [vmem:[%s18177_s26 + $0x4f0] ss:$48 sps:$4 sm:$0xff]  }
 0x8c3   : > { %9052 = vmatpush2.bf16.msra.mxu0 %v16432_v10  ;;  %9147 = vmatmul.mubr.bf16.gmra.mxu1 %v20290_v55  ;;  %v16488_v10 = vld [vmem:[%s18177_s26 + $0x794] ss:$48 sps:$4 sm:$0xff]  }
 0x8c4   : > { %9182 = vmatpush1.bf16.msra.mxu1 %v16435_v16  ;;  %9053 = vmatprep.subr.bf16.mxu0 %v16440_v32  ;;  %v16491_v16 = vld [vmem:[%s18177_s26 + $0x494] ss:$48 sps:$4 sm:$0xff]   ;;  %v16486_v32 = vld [vmem:[%s18177_s26 + $0x790] ss:$48 sps:$4 sm:$0xff]  }
 0x8c5   : > { %9183 = vmatprep.subr.bf16.mxu1 %v16443_v62  ;;  %9156 = vmatprep.mubr.bf16.mxu1 %v23263_v46  ;;  %v16489_v62 = vld [vmem:[%s18177_s26 + $0x490] ss:$48 sps:$4 sm:$0xff]  }
 0x8c7   : > { %9054 = vmatpush2.bf16.msra.mxu0 %v16438_v47  ;;  %v16494_v47 = vld [vmem:[%s18177_s26 + $0x734] ss:$48 sps:$4 sm:$0xff]  }
 0x8c8   : > { %9184 = vmatpush1.bf16.msra.mxu1 %v16441_v4  ;;  %9055 = vmatprep.subr.bf16.mxu0 %v16446_v49  ;;  %v16497_v4 = vld [vmem:[%s18177_s26 + $0x434] ss:$48 sps:$4 sm:$0xff]   ;;  %v16492_v49 = vld [vmem:[%s18177_s26 + $0x730] ss:$48 sps:$4 sm:$0xff]  }
 0x8c9   : > { %9185 = vmatprep.subr.bf16.mxu1 %v16449_v14  ;;  %v16495_v14 = vld [vmem:[%s18177_s26 + $0x430] ss:$48 sps:$4 sm:$0xff]  }
 0x8cb   : > { %9056 = vmatpush2.bf16.msra.mxu0 %v16444_v7  ;;  %9157 = vmatmul.mubr.bf16.gmra.mxu1 %v20326_v57  ;;  %v16500_v7 = vld [vmem:[%s18177_s26 + $0x6d4] ss:$48 sps:$4 sm:$0xff]  }
 0x8cc   : > { %9186 = vmatpush1.bf16.msra.mxu1 %v16447_v17  ;;  %9057 = vmatprep.subr.bf16.mxu0 %v16452_v1  ;;  %v16503_v17 = vld [vmem:[%s18177_s26 + $0x3d4] ss:$48 sps:$4 sm:$0xff]   ;;  %v16498_v1 = vld [vmem:[%s18177_s26 + $0x6d0] ss:$48 sps:$4 sm:$0xff]  }
 0x8cd   : > { %9187 = vmatprep.subr.bf16.mxu1 %v16455_v0  ;;  %9166 = vmatprep.mubr.bf16.mxu1 %v23263_v46  ;;  %v16501_v0 = vld [vmem:[%s18177_s26 + $0x3d0] ss:$48 sps:$4 sm:$0xff]  }
 0x8cf   : > { %9058 = vmatpush2.bf16.msra.mxu0 %v16450_v41  ;;  %v16506_v41 = vld [vmem:[%s18177_s26 + $0x674] ss:$48 sps:$4 sm:$0xff]  }
 0x8d0   : > { %9188 = vmatpush1.bf16.msra.mxu1 %v16453_v11  ;;  %9059 = vmatprep.subr.bf16.mxu0 %v16458_v31  ;;  %v16509_v11 = vld [vmem:[%s18177_s26 + $0x374] ss:$48 sps:$4 sm:$0xff]   ;;  %v16504_v31 = vld [vmem:[%s18177_s26 + $0x670] ss:$48 sps:$4 sm:$0xff]  }
 0x8d1   : > { %9189 = vmatprep.subr.bf16.mxu1 %v16461_v51  ;;  %v16507_v51 = vld [vmem:[%s18177_s26 + $0x370] ss:$48 sps:$4 sm:$0xff]  }
 0x8d3   : > { %9060 = vmatpush2.bf16.msra.mxu0 %v16456_v60  ;;  %9167 = vmatmul.mubr.bf16.gmra.mxu1 %v20359_v30  ;;  %v16512_v60 = vld [vmem:[%s18177_s26 + $0x614] ss:$48 sps:$4 sm:$0xff]  }
 0x8d4   : > { %9190 = vmatpush1.bf16.msra.mxu1 %v16459_v21  ;;  %9209 = vmatprep.mubr.bf16.mxu1 %v20252_v43  ;;  %v16515_v21 = vld [vmem:[%s18177_s26 + $0x314] ss:$48 sps:$4 sm:$0xff]  }
 0x8d5   : > { %9061 = vmatprep.subr.bf16.mxu0 %v16464_v37  ;;  %9191 = vmatprep.subr.bf16.mxu1 %v16467_v34  ;;  %v16510_v37 = vld [vmem:[%s18177_s26 + $0x610] ss:$48 sps:$4 sm:$0xff]  }
 0x8d6   : > { %v16513_v34 = vld [vmem:[%s18177_s26 + $0x310] ss:$48 sps:$4 sm:$0xff]  }
 0x8d7   : > { %9062 = vmatpush2.bf16.msra.mxu0 %v16462_v56  ;;  %v16518_v56 = vld [vmem:[%s18177_s26 + $0x2bc] ss:$48 sps:$4 sm:$0xff]  }
 0x8d8   : > { %9192 = vmatpush1.bf16.msra.mxu1 %v16465_v22  ;;  %9250 = vmatprep.subr.bf16.mxu0 %v16470_v45  ;;  %v16521_v22 = vld [vmem:[%s18177_s26 + $0x8bc] ss:$48 sps:$4 sm:$0xff]   ;;  %v16516_v45 = vld [vmem:[%s18177_s26 + $0x2b8] ss:$48 sps:$4 sm:$0xff]  }
 0x8d9   : > { %9193 = vmatprep.subr.bf16.mxu1 %v16473_v15  ;;  %v16519_v15 = vld [vmem:[%s18177_s26 + $0x8b8] ss:$48 sps:$4 sm:$0xff]  }
 0x8da   : > { %9064 = vmatmul.mubr.bf16.vlgmr.msra.gmra.mxu0 %v20258_v50 }
 0x8db   : > { %9073 = vmatprep.mubr.bf16.mxu0 %v20288_v54  ;;  %9251 = vmatpush1.bf16.msra.mxu0 %v16468_v19  ;;  %v16524_v19 = vld [vmem:[%s18177_s26 + $0x25c] ss:$48 sps:$4 sm:$0xff]  }
 0x8dc   : > { %9194 = vmatpush2.bf16.msra.mxu1 %v16471_v63  ;;  %9252 = vmatprep.subr.bf16.mxu0 %v16476_v61  ;;  %v16527_v63 = vld [vmem:[%s18177_s26 + $0x85c] ss:$48 sps:$4 sm:$0xff]   ;;  %v16522_v61 = vld [vmem:[%s18177_s26 + $0x258] ss:$48 sps:$4 sm:$0xff]  }
 0x8dd   : > { %9195 = vmatprep.subr.bf16.mxu1 %v16479_v20  ;;  %v16525_v20 = vld [vmem:[%s18177_s26 + $0x858] ss:$48 sps:$4 sm:$0xff]  }
 0x8df   : > { %9253 = vmatpush1.bf16.msra.mxu0 %v16474_v9  ;;  %v16530_v9 = vld [vmem:[%s18177_s26 + $0x1fc] ss:$48 sps:$4 sm:$0xff]  }
 0x8e0   : > { %9196 = vmatpush2.bf16.msra.mxu1 %v16477_v59  ;;  %9254 = vmatprep.subr.bf16.mxu0 %v16482_v8  ;;  %v16533_v59 = vld [vmem:[%s18177_s26 + $0x7fc] ss:$48 sps:$4 sm:$0xff]   ;;  %v16528_v8 = vld [vmem:[%s18177_s26 + $0x1f8] ss:$48 sps:$4 sm:$0xff]  }
 0x8e1   : > { %9197 = vmatprep.subr.bf16.mxu1 %v16485_v18  ;;  %v16531_v18 = vld [vmem:[%s18177_s26 + $0x7f8] ss:$48 sps:$4 sm:$0xff]  }
 0x8e2   : > { %9074 = vmatmul.mubr.bf16.gmra.mxu0 %v20293_v3 }
 0x8e3   : > { %9083 = vmatprep.mubr.bf16.mxu0 %v20324_v29  ;;  %9255 = vmatpush1.bf16.msra.mxu0 %v16480_v5  ;;  %v16536_v5 = vld [vmem:[%s18177_s26 + $0x19c] ss:$48 sps:$4 sm:$0xff]  }
 0x8e4   : > { %9198 = vmatpush2.bf16.msra.mxu1 %v16483_v35  ;;  %9256 = vmatprep.subr.bf16.mxu0 %v16488_v10  ;;  %v16539_v35 = vld [vmem:[%s18177_s26 + $0x79c] ss:$48 sps:$4 sm:$0xff]   ;;  %v16534_v10 = vld [vmem:[%s18177_s26 + $0x198] ss:$48 sps:$4 sm:$0xff]  }
 0x8e5   : > { %9199 = vmatprep.subr.bf16.mxu1 %v16491_v16  ;;  %v16537_v16 = vld [vmem:[%s18177_s26 + $0x798] ss:$48 sps:$4 sm:$0xff]  }
 0x8e7   : > { %9257 = vmatpush1.bf16.msra.mxu0 %v16486_v32  ;;  %v16542_v32 = vld [vmem:[%s18177_s26 + $0x13c] ss:$48 sps:$4 sm:$0xff]  }
 0x8e8   : > { %9200 = vmatpush2.bf16.msra.mxu1 %v16489_v62  ;;  %9258 = vmatprep.subr.bf16.mxu0 %v16494_v47  ;;  %v16545_v62 = vld [vmem:[%s18177_s26 + $0x73c] ss:$48 sps:$4 sm:$0xff]   ;;  %v16540_v47 = vld [vmem:[%s18177_s26 + $0x138] ss:$48 sps:$4 sm:$0xff]  }
 0x8e9   : > { %9201 = vmatprep.subr.bf16.mxu1 %v16497_v4  ;;  %v16543_v4 = vld [vmem:[%s18177_s26 + $0x738] ss:$48 sps:$4 sm:$0xff]  }
 0x8ea   : > { %9084 = vmatmul.mubr.bf16.gmra.mxu0 %v20329_v36 }
 0x8eb   : > { %9093 = vmatprep.mubr.bf16.mxu0 %v20357_v39  ;;  %9259 = vmatpush1.bf16.msra.mxu0 %v16492_v49  ;;  %v16548_v49 = vld [vmem:[%s18177_s26 + $0xdc] ss:$48 sps:$4 sm:$0xff]  }
 0x8ec   : > { %9202 = vmatpush2.bf16.msra.mxu1 %v16495_v14  ;;  %9260 = vmatprep.subr.bf16.mxu0 %v16500_v7  ;;  %v16551_v14 = vld [vmem:[%s18177_s26 + $0x6dc] ss:$48 sps:$4 sm:$0xff]   ;;  %v16546_v7 = vld [vmem:[%s18177_s26 + $0xd8] ss:$48 sps:$4 sm:$0xff]  }
 0x8ed   : > { %9203 = vmatprep.subr.bf16.mxu1 %v16503_v17  ;;  %v16549_v17 = vld [vmem:[%s18177_s26 + $0x6d8] ss:$48 sps:$4 sm:$0xff]  }
 0x8ef   : > { %9261 = vmatpush1.bf16.msra.mxu0 %v16498_v1  ;;  %v16554_v1 = vld [vmem:[%s18177_s26 + $0x7c] ss:$48 sps:$4 sm:$0xff]  }
 0x8f0   : > { %9204 = vmatpush2.bf16.msra.mxu1 %v16501_v0  ;;  %9262 = vmatprep.subr.bf16.mxu0 %v16506_v41  ;;  %v16557_v0 = vld [vmem:[%s18177_s26 + $0x67c] ss:$48 sps:$4 sm:$0xff]   ;;  %v16552_v41 = vld [vmem:[%s18177_s26 + $0x78] ss:$48 sps:$4 sm:$0xff]  }
 0x8f1   : > { %9205 = vmatprep.subr.bf16.mxu1 %v16509_v11  ;;  %v16555_v11 = vld [vmem:[%s18177_s26 + $0x678] ss:$48 sps:$4 sm:$0xff]  }
 0x8f2   : > { %9094 = vmatmul.mubr.bf16.gmra.mxu0 %v20362_v44 }
 0x8f3   : > { %9263 = vmatpush1.bf16.msra.mxu0 %v16504_v31  ;;  %9282 = vmatprep.mubr.bf16.mxu0 %v23263_v46  ;;  %v16560_v31 = vld [vmem:[%s18177_s26 + $0x1c] ss:$48 sps:$4 sm:$0xff]  }
 0x8f4   : > { %9206 = vmatpush2.bf16.msra.mxu1 %v16507_v51  ;;  %9264 = vmatprep.subr.bf16.mxu0 %v16512_v60  ;;  %v16563_v51 = vld [vmem:[%s18177_s26 + $0x61c] ss:$48 sps:$4 sm:$0xff]   ;;  %v16558_v60 = vld [vmem:[%s18177_s26 + $0x18] ss:$48 sps:$4 sm:$0xff]  }
 0x8f5   : > { %9207 = vmatprep.subr.bf16.mxu1 %v16515_v21  ;;  %v16561_v21 = vld [vmem:[%s18177_s26 + $0x618] ss:$48 sps:$4 sm:$0xff]  }
 0x8f7   : > { %9265 = vmatpush1.bf16.msra.mxu0 %v16510_v37  ;;  %v16566_v37 = vld [vmem:[%s18177_s26 + $0x5bc] ss:$48 sps:$4 sm:$0xff]  }
 0x8f8   : > { %9208 = vmatpush2.bf16.msra.mxu1 %v16513_v34  ;;  %9323 = vmatprep.subr.bf16.mxu0 %v16518_v56  ;;  %v16569_v34 = vld [vmem:[%s18177_s26 + $0x2c4] ss:$48 sps:$4 sm:$0xff]   ;;  %v16564_v56 = vld [vmem:[%s18177_s26 + $0x5b8] ss:$48 sps:$4 sm:$0xff]  }
 0x8f9   : > { %9396 = vmatprep.subr.bf16.mxu1 %v16521_v22  ;;  %v16567_v22 = vld [vmem:[%s18177_s26 + $0x2c0] ss:$48 sps:$4 sm:$0xff]  }
 0x8fa   : > { %9283 = vmatmul.mubr.bf16.vlgmr.msra.gmra.mxu0 %v20254_v13 }
 0x8fb   : > { %9210 = vmatmul.mubr.bf16.vlgmr.msra.gmra.mxu1 %v20258_v50  ;;  %9324 = vmatpush1.bf16.msra.mxu0 %v16516_v45  ;;  %v16572_v45 = vld [vmem:[%s18177_s26 + $0x55c] ss:$48 sps:$4 sm:$0xff]  }
 0x8fc   : > { %9219 = vmatprep.mubr.bf16.mxu1 %v20288_v54  ;;  %9397 = vmatpush1.bf16.msra.mxu1 %v16519_v15  ;;  %v16575_v15 = vld [vmem:[%s18177_s26 + $0x264] ss:$48 sps:$4 sm:$0xff]  }
 0x8fd   : > { %9325 = vmatprep.subr.bf16.mxu0 %v16524_v19  ;;  %9398 = vmatprep.subr.bf16.mxu1 %v16527_v63  ;;  %v16570_v19 = vld [vmem:[%s18177_s26 + $0x558] ss:$48 sps:$4 sm:$0xff]   ;;  %v16573_v63 = vld [vmem:[%s18177_s26 + $0x260] ss:$48 sps:$4 sm:$0xff]  }
 0x8fe   : > { %9292 = vmatprep.mubr.bf16.mxu0 %v23263_v46 }
 0x8ff   : > { %9326 = vmatpush1.bf16.msra.mxu0 %v16522_v61  ;;  %v16578_v61 = vld [vmem:[%s18177_s26 + $0x4fc] ss:$48 sps:$4 sm:$0xff]  }
 0x900   : > { %9399 = vmatpush1.bf16.msra.mxu1 %v16525_v20  ;;  %9327 = vmatprep.subr.bf16.mxu0 %v16530_v9  ;;  %v16581_v20 = vld [vmem:[%s18177_s26 + $0x204] ss:$48 sps:$4 sm:$0xff]   ;;  %v16576_v9 = vld [vmem:[%s18177_s26 + $0x4f8] ss:$48 sps:$4 sm:$0xff]  }
 0x901   : > { %9400 = vmatprep.subr.bf16.mxu1 %v16533_v59  ;;  %v16579_v59 = vld [vmem:[%s18177_s26 + $0x200] ss:$48 sps:$4 sm:$0xff]  }
 0x902   : > { %9293 = vmatmul.mubr.bf16.gmra.mxu0 %v20290_v55 }
 0x903   : > { %9220 = vmatmul.mubr.bf16.gmra.mxu1 %v20293_v3  ;;  %9328 = vmatpush1.bf16.msra.mxu0 %v16528_v8  ;;  %v16584_v8 = vld [vmem:[%s18177_s26 + $0x49c] ss:$48 sps:$4 sm:$0xff]  }
 0x904   : > { %9229 = vmatprep.mubr.bf16.mxu1 %v20324_v29  ;;  %9401 = vmatpush1.bf16.msra.mxu1 %v16531_v18  ;;  %v16587_v18 = vld [vmem:[%s18177_s26 + $0x1a4] ss:$48 sps:$4 sm:$0xff]  }
 0x905   : > { %9329 = vmatprep.subr.bf16.mxu0 %v16536_v5  ;;  %9402 = vmatprep.subr.bf16.mxu1 %v16539_v35  ;;  %v16582_v5 = vld [vmem:[%s18177_s26 + $0x498] ss:$48 sps:$4 sm:$0xff]   ;;  %v16585_v35 = vld [vmem:[%s18177_s26 + $0x1a0] ss:$48 sps:$4 sm:$0xff]  }
 0x906   : > { %9302 = vmatprep.mubr.bf16.mxu0 %v23263_v46 }
 0x907   : > { %9330 = vmatpush1.bf16.msra.mxu0 %v16534_v10  ;;  %v16590_v10 = vld [vmem:[%s18177_s26 + $0x43c] ss:$48 sps:$4 sm:$0xff]  }
 0x908   : > { %9403 = vmatpush1.bf16.msra.mxu1 %v16537_v16  ;;  %9331 = vmatprep.subr.bf16.mxu0 %v16542_v32  ;;  %v16593_v16 = vld [vmem:[%s18177_s26 + $0x144] ss:$48 sps:$4 sm:$0xff]   ;;  %v16588_v32 = vld [vmem:[%s18177_s26 + $0x438] ss:$48 sps:$4 sm:$0xff]  }
 0x909   : > { %9404 = vmatprep.subr.bf16.mxu1 %v16545_v62  ;;  %v16591_v62 = vld [vmem:[%s18177_s26 + $0x140] ss:$48 sps:$4 sm:$0xff]  }
 0x90a   : > { %9303 = vmatmul.mubr.bf16.gmra.mxu0 %v20326_v57 }
 0x90b   : > { %9230 = vmatmul.mubr.bf16.gmra.mxu1 %v20329_v36  ;;  %9332 = vmatpush1.bf16.msra.mxu0 %v16540_v47  ;;  %v16596_v47 = vld [vmem:[%s18177_s26 + $0x3dc] ss:$48 sps:$4 sm:$0xff]  }
 0x90c   : > { %9239 = vmatprep.mubr.bf16.mxu1 %v20357_v39  ;;  %9405 = vmatpush1.bf16.msra.mxu1 %v16543_v4  ;;  %v16599_v4 = vld [vmem:[%s18177_s26 + $0xe4] ss:$48 sps:$4 sm:$0xff]  }
 0x90d   : > { %9333 = vmatprep.subr.bf16.mxu0 %v16548_v49  ;;  %9406 = vmatprep.subr.bf16.mxu1 %v16551_v14  ;;  %v16594_v49 = vld [vmem:[%s18177_s26 + $0x3d8] ss:$48 sps:$4 sm:$0xff]   ;;  %v16597_v14 = vld [vmem:[%s18177_s26 + $0xe0] ss:$48 sps:$4 sm:$0xff]  }
 0x90e   : > { %9312 = vmatprep.mubr.bf16.mxu0 %v23263_v46 }
 0x90f   : > { %9334 = vmatpush1.bf16.msra.mxu0 %v16546_v7  ;;  %v16602_v7 = vld [vmem:[%s18177_s26 + $0x37c] ss:$48 sps:$4 sm:$0xff]  }
 0x910   : > { %9407 = vmatpush1.bf16.msra.mxu1 %v16549_v17  ;;  %9335 = vmatprep.subr.bf16.mxu0 %v16554_v1  ;;  %v16605_v17 = vld [vmem:[%s18177_s26 + $0x84] ss:$48 sps:$4 sm:$0xff]   ;;  %v16600_v1 = vld [vmem:[%s18177_s26 + $0x378] ss:$48 sps:$4 sm:$0xff]  }
 0x911   : > { %9408 = vmatprep.subr.bf16.mxu1 %v16557_v0  ;;  %v16603_v0 = vld [vmem:[%s18177_s26 + $0x80] ss:$48 sps:$4 sm:$0xff]  }
 0x912   : > { %9313 = vmatmul.mubr.bf16.gmra.mxu0 %v20359_v30 }
 0x913   : > { %9240 = vmatmul.mubr.bf16.gmra.mxu1 %v20362_v44  ;;  %9336 = vmatpush1.bf16.msra.mxu0 %v16552_v41  ;;  %v16608_v41 = vld [vmem:[%s18177_s26 + $0x31c] ss:$48 sps:$4 sm:$0xff]  }
 0x914   : > { %9355 = vmatprep.mubr.bf16.mxu0 %v20252_v43  ;;  %9409 = vmatpush1.bf16.msra.mxu1 %v16555_v11  ;;  %v16611_v11 = vld [vmem:[%s18177_s26 + $0x24] ss:$48 sps:$4 sm:$0xff]  }
 0x915   : > { %9337 = vmatprep.subr.bf16.mxu0 %v16560_v31  ;;  %9410 = vmatprep.subr.bf16.mxu1 %v16563_v51  ;;  %v16606_v31 = vld [vmem:[%s18177_s26 + $0x318] ss:$48 sps:$4 sm:$0xff]   ;;  %v16609_v51 = vld [vmem:[%s18177_s26 + $0x20] ss:$48 sps:$4 sm:$0xff]  }
 0x916   : > { %9428 = vmatprep.mubr.bf16.mxu1 %v23263_v46 }
 0x917   : > { %9338 = vmatpush1.bf16.msra.mxu0 %v16558_v60  ;;  %v16614_v60 = vld [vmem:[%s18177_s26 + $0x8c4] ss:$48 sps:$4 sm:$0xff]  }
 0x918   : > { %9411 = vmatpush1.bf16.msra.mxu1 %v16561_v21  ;;  %9339 = vmatprep.subr.bf16.mxu0 %v16566_v37  ;;  %v16617_v21 = vld [vmem:[%s18177_s26 + $0x5c4] ss:$48 sps:$4 sm:$0xff]   ;;  %v16612_v37 = vld [vmem:[%s18177_s26 + $0x8c0] ss:$48 sps:$4 sm:$0xff]  }
 0x919   : > { %9469 = vmatprep.subr.bf16.mxu1 %v16569_v34  ;;  %v16615_v34 = vld [vmem:[%s18177_s26 + $0x5c0] ss:$48 sps:$4 sm:$0xff]  }
 0x91b   : > { %9340 = vmatpush2.bf16.msra.mxu0 %v16564_v56  ;;  %9429 = vmatmul.mubr.bf16.vlgmr.msra.gmra.mxu1 %v20254_v13  ;;  %v16620_v56 = vld [vmem:[%s18177_s26 + $0x864] ss:$48 sps:$4 sm:$0xff]  }
 0x91c   : > { %9470 = vmatpush1.bf16.msra.mxu1 %v16567_v22  ;;  %9341 = vmatprep.subr.bf16.mxu0 %v16572_v45  ;;  %v16623_v22 = vld [vmem:[%s18177_s26 + $0x564] ss:$48 sps:$4 sm:$0xff]   ;;  %v16618_v45 = vld [vmem:[%s18177_s26 + $0x860] ss:$48 sps:$4 sm:$0xff]  }
 0x91d   : > { %9471 = vmatprep.subr.bf16.mxu1 %v16575_v15  ;;  %9438 = vmatprep.mubr.bf16.mxu1 %v23263_v46  ;;  %v16621_v15 = vld [vmem:[%s18177_s26 + $0x560] ss:$48 sps:$4 sm:$0xff]  }
 0x91f   : > { %9342 = vmatpush2.bf16.msra.mxu0 %v16570_v19  ;;  %v16626_v19 = vld [vmem:[%s18177_s26 + $0x804] ss:$48 sps:$4 sm:$0xff]  }
 0x920   : > { %9472 = vmatpush1.bf16.msra.mxu1 %v16573_v63  ;;  %9343 = vmatprep.subr.bf16.mxu0 %v16578_v61  ;;  %v16629_v63 = vld [vmem:[%s18177_s26 + $0x504] ss:$48 sps:$4 sm:$0xff]   ;;  %v16624_v61 = vld [vmem:[%s18177_s26 + $0x800] ss:$48 sps:$4 sm:$0xff]  }
 0x921   : > { %9473 = vmatprep.subr.bf16.mxu1 %v16581_v20  ;;  %v16627_v20 = vld [vmem:[%s18177_s26 + $0x500] ss:$48 sps:$4 sm:$0xff]  }
 0x923   : > { %9344 = vmatpush2.bf16.msra.mxu0 %v16576_v9  ;;  %9439 = vmatmul.mubr.bf16.gmra.mxu1 %v20290_v55  ;;  %v16632_v9 = vld [vmem:[%s18177_s26 + $0x7a4] ss:$48 sps:$4 sm:$0xff]  }
 0x924   : > { %9474 = vmatpush1.bf16.msra.mxu1 %v16579_v59  ;;  %9345 = vmatprep.subr.bf16.mxu0 %v16584_v8  ;;  %v16635_v59 = vld [vmem:[%s18177_s26 + $0x4a4] ss:$48 sps:$4 sm:$0xff]   ;;  %v16630_v8 = vld [vmem:[%s18177_s26 + $0x7a0] ss:$48 sps:$4 sm:$0xff]  }
 0x925   : > { %9475 = vmatprep.subr.bf16.mxu1 %v16587_v18  ;;  %9448 = vmatprep.mubr.bf16.mxu1 %v23263_v46  ;;  %v16633_v18 = vld [vmem:[%s18177_s26 + $0x4a0] ss:$48 sps:$4 sm:$0xff]  }
 0x927   : > { %9346 = vmatpush2.bf16.msra.mxu0 %v16582_v5  ;;  %v16638_v5 = vld [vmem:[%s18177_s26 + $0x744] ss:$48 sps:$4 sm:$0xff]  }
 0x928   : > { %9476 = vmatpush1.bf16.msra.mxu1 %v16585_v35  ;;  %9347 = vmatprep.subr.bf16.mxu0 %v16590_v10  ;;  %v16641_v35 = vld [vmem:[%s18177_s26 + $0x444] ss:$48 sps:$4 sm:$0xff]   ;;  %v16636_v10 = vld [vmem:[%s18177_s26 + $0x740] ss:$48 sps:$4 sm:$0xff]  }
 0x929   : > { %9477 = vmatprep.subr.bf16.mxu1 %v16593_v16  ;;  %v16639_v16 = vld [vmem:[%s18177_s26 + $0x440] ss:$48 sps:$4 sm:$0xff]  }
 0x92b   : > { %9348 = vmatpush2.bf16.msra.mxu0 %v16588_v32  ;;  %9449 = vmatmul.mubr.bf16.gmra.mxu1 %v20326_v57  ;;  %v16644_v32 = vld [vmem:[%s18177_s26 + $0x6e4] ss:$48 sps:$4 sm:$0xff]  }
 0x92c   : > { %9478 = vmatpush1.bf16.msra.mxu1 %v16591_v62  ;;  %9349 = vmatprep.subr.bf16.mxu0 %v16596_v47  ;;  %v16647_v62 = vld [vmem:[%s18177_s26 + $0x3e4] ss:$48 sps:$4 sm:$0xff]   ;;  %v16642_v47 = vld [vmem:[%s18177_s26 + $0x6e0] ss:$48 sps:$4 sm:$0xff]  }
 0x92d   : > { %9479 = vmatprep.subr.bf16.mxu1 %v16599_v4  ;;  %9458 = vmatprep.mubr.bf16.mxu1 %v23263_v46  ;;  %v16645_v4 = vld [vmem:[%s18177_s26 + $0x3e0] ss:$48 sps:$4 sm:$0xff]  }
 0x92f   : > { %9350 = vmatpush2.bf16.msra.mxu0 %v16594_v49  ;;  %v16650_v49 = vld [vmem:[%s18177_s26 + $0x684] ss:$48 sps:$4 sm:$0xff]  }
 0x930   : > { %9480 = vmatpush1.bf16.msra.mxu1 %v16597_v14  ;;  %9351 = vmatprep.subr.bf16.mxu0 %v16602_v7  ;;  %v16653_v14 = vld [vmem:[%s18177_s26 + $0x384] ss:$48 sps:$4 sm:$0xff]   ;;  %v16648_v7 = vld [vmem:[%s18177_s26 + $0x680] ss:$48 sps:$4 sm:$0xff]  }
 0x931   : > { %9481 = vmatprep.subr.bf16.mxu1 %v16605_v17  ;;  %v16651_v17 = vld [vmem:[%s18177_s26 + $0x380] ss:$48 sps:$4 sm:$0xff]  }
 0x933   : > { %9352 = vmatpush2.bf16.msra.mxu0 %v16600_v1  ;;  %9459 = vmatmul.mubr.bf16.gmra.mxu1 %v20359_v30  ;;  %v16656_v1 = vld [vmem:[%s18177_s26 + $0x624] ss:$48 sps:$4 sm:$0xff]  }
 0x934   : > { %9482 = vmatpush1.bf16.msra.mxu1 %v16603_v0  ;;  %9501 = vmatprep.mubr.bf16.mxu1 %v20252_v43  ;;  %v16659_v0 = vld [vmem:[%s18177_s26 + $0x324] ss:$48 sps:$4 sm:$0xff]  }
 0x935   : > { %9353 = vmatprep.subr.bf16.mxu0 %v16608_v41  ;;  %9483 = vmatprep.subr.bf16.mxu1 %v16611_v11  ;;  %v16654_v41 = vld [vmem:[%s18177_s26 + $0x620] ss:$48 sps:$4 sm:$0xff]  }
 0x936   : > { %v16657_v11 = vld [vmem:[%s18177_s26 + $0x320] ss:$48 sps:$4 sm:$0xff]  }
 0x937   : > { %9354 = vmatpush2.bf16.msra.mxu0 %v16606_v31  ;;  %v16662_v31 = vld [vmem:[%s18177_s26 + $0x2cc] ss:$48 sps:$4 sm:$0xff]  }
 0x938   : > { %9484 = vmatpush1.bf16.msra.mxu1 %v16609_v51  ;;  %9542 = vmatprep.subr.bf16.mxu0 %v16614_v60  ;;  %v16665_v51 = vld [vmem:[%s18177_s26 + $0x8cc] ss:$48 sps:$4 sm:$0xff]   ;;  %v16660_v60 = vld [vmem:[%s18177_s26 + $0x2c8] ss:$48 sps:$4 sm:$0xff]  }
 0x939   : > { %9485 = vmatprep.subr.bf16.mxu1 %v16617_v21  ;;  %v16663_v21 = vld [vmem:[%s18177_s26 + $0x8c8] ss:$48 sps:$4 sm:$0xff]  }
 0x93a   : > { %9356 = vmatmul.mubr.bf16.vlgmr.msra.gmra.mxu0 %v20258_v50 }
 0x93b   : > { %9365 = vmatprep.mubr.bf16.mxu0 %v20288_v54  ;;  %9543 = vmatpush1.bf16.msra.mxu0 %v16612_v37  ;;  %v16668_v37 = vld [vmem:[%s18177_s26 + $0x26c] ss:$48 sps:$4 sm:$0xff]  }
 0x93c   : > { %9486 = vmatpush2.bf16.msra.mxu1 %v16615_v34  ;;  %9544 = vmatprep.subr.bf16.mxu0 %v16620_v56  ;;  %v16671_v34 = vld [vmem:[%s18177_s26 + $0x86c] ss:$48 sps:$4 sm:$0xff]  }
 0x93d   : > { %9487 = vmatprep.subr.bf16.mxu1 %v16623_v22  ;;  %v20592_v22 = vld [vmem:[%s18146_s23] sm:$0xff] }
 0x93f   : > { %9545 = vmatpush1.bf16.msra.mxu0 %v16618_v45 }
 0x940   : > { %9488 = vmatpush2.bf16.msra.mxu1 %v16621_v15  ;;  %9546 = vmatprep.subr.bf16.mxu0 %v16626_v19  ;;  %v16666_v15 = vld [vmem:[%s18177_s26 + $0x268] ss:$48 sps:$4 sm:$0xff]  }
 0x941   : > { %9489 = vmatprep.subr.bf16.mxu1 %v16629_v63  ;;  %v20600_v63 = vrot.slane %v20592_v22, %v23265_v48 }
 0x942   : > { %9366 = vmatmul.mubr.bf16.gmra.mxu0 %v20293_v3 }
 0x943   : > { %9375 = vmatprep.mubr.bf16.mxu0 %v20324_v29  ;;  %9547 = vmatpush1.bf16.msra.mxu0 %v16624_v61  ;;  %v16669_v61 = vld [vmem:[%s18177_s26 + $0x868] ss:$48 sps:$4 sm:$0xff]  }
 0x944   : > { %9490 = vmatpush2.bf16.msra.mxu1 %v16627_v20  ;;  %9548 = vmatprep.subr.bf16.mxu0 %v16632_v9  ;;  %v16674_v20 = vld [vmem:[%s18177_s26 + $0x20c] ss:$48 sps:$4 sm:$0xff]  }
 0x945   : > { %9491 = vmatprep.subr.bf16.mxu1 %v16635_v59  ;;  %v16677_v59 = vld [vmem:[%s18177_s26 + $0x80c] ss:$48 sps:$4 sm:$0xff]  }
 0x947   : > { %9549 = vmatpush1.bf16.msra.mxu0 %v16630_v8 }
 0x948   : > { %9492 = vmatpush2.bf16.msra.mxu1 %v16633_v18  ;;  %9550 = vmatprep.subr.bf16.mxu0 %v16638_v5  ;;  %v16672_v5 = vld [vmem:[%s18177_s26 + $0x208] ss:$48 sps:$4 sm:$0xff]  }
 0x949   : > { %9493 = vmatprep.subr.bf16.mxu1 %v16641_v35 }
 0x94a   : > { %9376 = vmatmul.mubr.bf16.gmra.mxu0 %v20329_v36 }
 0x94b   : > { %9385 = vmatprep.mubr.bf16.mxu0 %v20357_v39  ;;  %9551 = vmatpush1.bf16.msra.mxu0 %v16636_v10 }
 0x94c   : > { %9494 = vmatpush2.bf16.msra.mxu1 %v16639_v16  ;;  %9552 = vmatprep.subr.bf16.mxu0 %v16644_v32  ;;  %v16675_v16 = vld [vmem:[%s18177_s26 + $0x808] ss:$48 sps:$4 sm:$0xff]  }
 0x94d   : > { %9495 = vmatprep.subr.bf16.mxu1 %v16647_v62  ;;  %v16680_v62 = vld [vmem:[%s18177_s26 + $0x1ac] ss:$48 sps:$4 sm:$0xff]  }
 0x94f   : > { %9553 = vmatpush1.bf16.msra.mxu0 %v16642_v47  ;;  %v16683_v47 = vld [vmem:[%s18177_s26 + $0x7ac] ss:$48 sps:$4 sm:$0xff]  }
 0x950   : > { %9496 = vmatpush2.bf16.msra.mxu1 %v16645_v4  ;;  %9554 = vmatprep.subr.bf16.mxu0 %v16650_v49 }
 0x951   : > { %9497 = vmatprep.subr.bf16.mxu1 %v16653_v14 }
 0x952   : > { %9386 = vmatmul.mubr.bf16.gmra.mxu0 %v20362_v44 }
 0x953   : > { %9555 = vmatpush1.bf16.msra.mxu0 %v16648_v7  ;;  %9574 = vmatprep.mubr.bf16.mxu0 %v23263_v46  ;;  %v16678_v7 = vld [vmem:[%s18177_s26 + $0x1a8] ss:$48 sps:$4 sm:$0xff]  }
 0x954   : > { %9498 = vmatpush2.bf16.msra.mxu1 %v16651_v17  ;;  %9556 = vmatprep.subr.bf16.mxu0 %v16656_v1 }
 0x955   : > { %9499 = vmatprep.subr.bf16.mxu1 %v16659_v0  ;;  %v16681_v0 = vld [vmem:[%s18177_s26 + $0x7a8] ss:$48 sps:$4 sm:$0xff]  }
 0x957   : > { %9557 = vmatpush1.bf16.msra.mxu0 %v16654_v41  ;;  %v16686_v41 = vld [vmem:[%s18177_s26 + $0x14c] ss:$48 sps:$4 sm:$0xff]  }
 0x958   : > { %9500 = vmatpush2.bf16.msra.mxu1 %v16657_v11  ;;  %9615 = vmatprep.subr.bf16.mxu0 %v16662_v31 }
 0x959   : > { %9688 = vmatprep.subr.bf16.mxu1 %v16665_v51  ;;  %v16689_v51 = vld [vmem:[%s18177_s26 + $0x74c] ss:$48 sps:$4 sm:$0xff]  }
 0x95a   : > { %9575 = vmatmul.mubr.bf16.vlgmr.msra.gmra.mxu0 %v20254_v13  ;;  %v20588_v56 = vpop.f32.mrf.mxu0 }
 0x95b   : > { %9502 = vmatmul.mubr.bf16.vlgmr.msra.gmra.mxu1 %v20258_v50  ;;  %9616 = vmatpush1.bf16.msra.mxu0 %v16660_v60  ;;  %v20594_v45 = vpop.f32.mrf.mxu1 }
 0x95c   : > { %9511 = vmatprep.mubr.bf16.mxu1 %v20288_v54  ;;  %9689 = vmatpush1.bf16.msra.mxu1 %v16663_v21  ;;  %v8994_v19 = vpop.f32.mrf.mxu0  ;;  %v20636_v21 = vrot.slane %v20592_v22, %v23266_v53 }
 0x95d   : > { %v8921_v9 = vpop.f32.mrf.mxu1  ;;  %9617 = vmatprep.subr.bf16.mxu0 %v16668_v37  ;;  %9690 = vmatprep.subr.bf16.mxu1 %v16671_v34 }
 0x95e   : > { %v20605_v8 = vpop.f32.mrf.mxu0  ;;  %9584 = vmatprep.mubr.bf16.mxu0 %v23263_v46  ;;  %v8922_v35 = vadd.f32 %v8921_v9, %v20600_v63 }
 0x95f   : > { %9618 = vmatpush1.bf16.msra.mxu0 %v16666_v15  ;;  %v8923_v18 = vpop.f32.mrf.mxu1  ;;  %v16684_v15 = vld [vmem:[%s18177_s26 + $0x148] ss:$48 sps:$4 sm:$0xff]  }
 0x960   : > { %9691 = vmatpush1.bf16.msra.mxu1 %v16669_v61  ;;  %v8998_v10 = vpop.f32.mrf.mxu0  ;;  %9619 = vmatprep.subr.bf16.mxu0 %v16674_v20  ;;  %v20621_v17 = vadd.f32 %v8994_v19, %v8922_v35  ;;  %v16687_v20 = vld [vmem:[%s18177_s26 + $0x748] ss:$48 sps:$4 sm:$0xff]  }
 0x961   : > { %v8925_v32 = vpop.f32.mrf.mxu1  ;;  %9692 = vmatprep.subr.bf16.mxu1 %v16677_v59  ;;  %v16692_v59 = vld [vmem:[%s18177_s26 + $0xec] ss:$48 sps:$4 sm:$0xff]  }
 0x962   : > { %v8926_v4 = vadd.f32 %v8925_v32, %v20600_v63  ;;  %9585 = vmatmul.mubr.bf16.gmra.mxu0 %v20290_v55  ;;  %v20615_v49 = vpop.f32.mrf.mxu0  ;;  %v9858_v19 = vmul.f32 0.044715, %v20621_v17 }
 0x963   : > { %9512 = vmatmul.mubr.bf16.gmra.mxu1 %v20293_v3  ;;  %9620 = vmatpush1.bf16.msra.mxu0 %v16672_v5  ;;  %v20618_v14 = vpop.f32.mrf.mxu1  ;;  %v16695_v5 = vld [vmem:[%s18177_s26 + $0x6ec] ss:$48 sps:$4 sm:$0xff]  }
 0x964   : > { %9521 = vmatprep.mubr.bf16.mxu1 %v20324_v29  ;;  %9693 = vmatpush1.bf16.msra.mxu1 %v16675_v16  ;;  %v20624_v1 = vpop.f32.mrf.mxu0  ;;  %v20628_v11 = vadd.f32 %v8998_v10, %v8926_v4  ;;  %v8920_v16 = vadd.f32 %v20594_v45, %v20636_v21  ;;  %v8924_v4 = vadd.f32 %v8923_v18, %v20636_v21  ;;  %v16701_v45 = vld [vmem:[%s18177_s26 + $0x68c] ss:$48 sps:$4 sm:$0xff]  }
 0x965   : > { %v8931_v31 = vpop.f32.mrf.mxu1  ;;  %9621 = vmatprep.subr.bf16.mxu0 %v16680_v62  ;;  %9694 = vmatprep.subr.bf16.mxu1 %v16683_v47  ;;  %v16690_v62 = vld [vmem:[%s18177_s26 + $0xe8] ss:$48 sps:$4 sm:$0xff]   ;;  %v9954_v47 = vmul.f32 %v9858_v19, %v20621_v17 }
 0x966   : > { %v20631_v60 = vpop.f32.mrf.mxu0  ;;  %9594 = vmatprep.mubr.bf16.mxu0 %v23263_v46  ;;  %v9870_v37 = vmul.f32 0.044715, %v20628_v11  ;;  %v20665_v18 = vadd.f32 %v20588_v56, %v8920_v16  ;;  %v20673_v38 = vadd.f32 %v20605_v8, %v8924_v4  ;;  %v16704_v56 = vld [vmem:[%s18177_s26 + $0x2c] ss:$48 sps:$4 sm:$0xff]  }
 0x967   : > { %9622 = vmatpush1.bf16.msra.mxu0 %v16678_v7  ;;  %v8933_v34 = vpop.f32.mrf.mxu1  ;;  %v16707_v16 = vld [vmem:[%s18177_s26 + $0x62c] ss:$48 sps:$4 sm:$0xff]  }
 0x968   : > { %9695 = vmatpush1.bf16.msra.mxu1 %v16681_v0  ;;  %v20641_v61 = vpop.f32.mrf.mxu0  ;;  %9623 = vmatprep.subr.bf16.mxu0 %v16686_v41  ;;  %v9966_v35 = vmul.f32 %v9870_v37, %v20628_v11  ;;  %v16693_v0 = vld [vmem:[%s18177_s26 + $0x6e8] ss:$48 sps:$4 sm:$0xff]   ;;  %v16698_v41 = vld [vmem:[%s18177_s26 + $0x8c] ss:$48 sps:$4 sm:$0xff]   ;;  %v9857_v4 = vmul.f32 0.044715, %v20665_v18 }
 0x969   : > { %v8935_v9 = vpop.f32.mrf.mxu1  ;;  %9696 = vmatprep.subr.bf16.mxu1 %v16689_v51 }
 0x96a   : > { %9595 = vmatmul.mubr.bf16.gmra.mxu0 %v20326_v57  ;;  %v20648_v10 = vpop.f32.mrf.mxu0  ;;  %v10062_v37 = vmul.f32 %v9966_v35, %v20628_v11  ;;  %v8932_v35 = vadd.f32 %v8931_v31, %v20600_v63 }
 0x96b   : > { %9522 = vmatmul.mubr.bf16.gmra.mxu1 %v20329_v36  ;;  %9624 = vmatpush1.bf16.msra.mxu0 %v16684_v15  ;;  %v8939_v32 = vpop.f32.mrf.mxu1 }
 0x96c   : > { %9531 = vmatprep.mubr.bf16.mxu1 %v20357_v39  ;;  %9697 = vmatpush1.bf16.msra.mxu1 %v16687_v20  ;;  %v20657_v7 = vpop.f32.mrf.mxu0  ;;  %v16696_v20 = vld [vmem:[%s18177_s26 + $0x88] ss:$48 sps:$4 sm:$0xff]   ;;  %v10158_v8 = vadd.f32 %v10062_v37, %v20628_v11  ;;  %v16710_v37 = vld [vmem:[%s18177_s26 + $0x5cc] ss:$48 sps:$4 sm:$0xff]   ;;  %v20699_v33 = vadd.f32 %v20624_v1, %v8932_v35 }
 0x96d   : > { %v8941_v51 = vpop.f32.mrf.mxu1  ;;  %9625 = vmatprep.subr.bf16.mxu0 %v16692_v59  ;;  %9698 = vmatprep.subr.bf16.mxu1 %v16695_v5  ;;  %v16699_v59 = vld [vmem:[%s18177_s26 + $0x688] ss:$48 sps:$4 sm:$0xff]   ;;  %v10050_v5 = vmul.f32 %v9954_v47, %v20621_v17 }
 0x96e   : > { %9604 = vmatprep.mubr.bf16.mxu0 %v23263_v46  ;;  %v20667_v15 = vpop.f32.mrf.mxu0  ;;  %v16702_v47 = vld [vmem:[%s18177_s26 + $0x28] ss:$48 sps:$4 sm:$0xff]  }
 0x96f   : > { %9626 = vmatpush1.bf16.msra.mxu0 %v16690_v62  ;;  %v20669_v19 = vpop.f32.mrf.mxu1  ;;  %v8936_v62 = vadd.f32 %v8935_v9, %v20600_v63  ;;  %v16705_v9 = vld [vmem:[%s18177_s26 + $0x628] ss:$48 sps:$4 sm:$0xff]   ;;  %v10146_v25 = vadd.f32 %v10050_v5, %v20621_v17  ;;  %v9953_v5 = vmul.f32 %v9857_v4, %v20665_v18 }
 0x970   : > { %9699 = vmatpush1.bf16.msra.mxu1 %v16693_v0  ;;  %9627 = vmatprep.subr.bf16.mxu0 %v16698_v41  ;;  %v8934_v0 = vadd.f32 %v8933_v34, %v20636_v21  ;;  %v20685_v41 = vpop.f32.mrf.mxu0  ;;  %v8930_v34 = vadd.f32 %v20618_v14, %v20636_v21  ;;  %v8940_v14 = vadd.f32 %v8939_v32, %v20636_v21  ;;  %v9882_v32 = vmul.f32 0.044715, %v20699_v33 }
 0x971   : > { %v8945_v23 = vpop.f32.mrf.mxu1  ;;  %9700 = vmatprep.subr.bf16.mxu1 %v16701_v45  ;;  %v9869_v45 = vmul.f32 0.044715, %v20673_v38  ;;  %v10242_v4 = vmul.f32 0.7978846, %v10146_v25 }
 0x972   : > { %9605 = vmatmul.mubr.bf16.gmra.mxu0 %v20359_v30  ;;  %v20708_v52 = vadd.f32 %v20631_v60, %v8934_v0  ;;  %v20711_v1 = vpop.f32.mrf.mxu0  ;;  %v20719_v60 = vadd.f32 %v20615_v49, %v8930_v34  ;;  %v20728_v25 = vadd.f32 %v20648_v10, %v8940_v14  ;;  %v8944_v14 = vadd.f32 %v20669_v19, %v20636_v21 }
 0x973   : > { %9532 = vmatmul.mubr.bf16.gmra.mxu1 %v20362_v44  ;;  %9628 = vmatpush1.bf16.msra.mxu0 %v16696_v20  ;;  %v20688_v31 = vpop.f32.mrf.mxu1 }
 0x974   : > { %9647 = vmatprep.mubr.bf16.mxu0 %v20252_v43  ;;  %9701 = vmatpush1.bf16.msra.mxu1 %v16699_v59  ;;  %v20703_v43 = vadd.f32 %v20641_v61, %v8936_v62  ;;  %v10254_v59 = vmul.f32 0.7978846, %v10158_v8  ;;  %v8942_v61 = vadd.f32 %v8941_v51, %v20600_v63  ;;  %v16711_v62 = vld [vmem:[%s18182_s0 + $0xa8] ss:$12 sps:$4 sm:$0xff]   ;;  %v16716_v8 = vld [vmem:[%s18177_s26 + $0x56c] ss:$48 sps:$4 sm:$0xff]   ;;  %v8946_v51 = vadd.f32 %v8945_v23, %v20600_v63  ;;  %v9024_v49 = vpop.f32.mrf.mxu0 }
 0x975   : > { %v8951_v20 = vpop.f32.mrf.mxu1  ;;  %9629 = vmatprep.subr.bf16.mxu0 %v16704_v56  ;;  %9702 = vmatprep.subr.bf16.mxu1 %v16707_v16  ;;  %v16708_v56 = vld [vmem:[%s18177_s26 + $0x5c8] ss:$48 sps:$4 sm:$0xff]   ;;  %v9965_v16 = vmul.f32 %v9869_v45, %v20673_v38  ;;  %v16717_v23 = vld [vmem:[%s18182_s0 + $0x90] ss:$12 sps:$4 sm:$0xff]   ;;  %v9881_v10 = vmul.f32 0.044715, %v20719_v60 }
 0x976   : > { %9720 = vmatprep.mubr.bf16.mxu1 %v23263_v46  ;;  %v9894_v45 = vmul.f32 0.044715, %v20703_v43  ;;  %17244 = vtanh.f32 %v10254_v59  ;;  %v20734_v12 = vadd.f32 %v20657_v7, %v8942_v61  ;;  %v16722_v59 = vld [vmem:[%s18177_s26 + $0x50c] ss:$48 sps:$4 sm:$0xff]   ;;  %v8952_v19 = vadd.f32 %v8951_v20, %v20600_v63 }
 0x977   : > { %9630 = vmatpush1.bf16.msra.mxu0 %v16702_v47  ;;  %v8953_v35 = vpop.f32.mrf.mxu1  ;;  %v16719_v47 = vld [vmem:[%s18182_s0 + $0x94] ss:$12 sps:$4 sm:$0xff]   ;;  %v10061_v34 = vmul.f32 %v9965_v16, %v20673_v38  ;;  %17246 = vtanh.f32 %v10242_v4  ;;  %v16725_v7 = vld [vmem:[%s18182_s0 + $0x7c] ss:$12 sps:$4 sm:$0xff]   ;;  %v20748_v16 = vadd.f32 %v20685_v41, %v8946_v51  ;;  %v9026_v4 = vpop.f32.mrf.mxu0  ;;  %v16723_v41 = vld [vmem:[%s18182_s0 + $0x78] ss:$12 sps:$4 sm:$0xff]  }
 0x978   : > { %9703 = vmatpush1.bf16.msra.mxu1 %v16705_v9  ;;  %9631 = vmatprep.subr.bf16.mxu0 %v16710_v37  ;;  %v10049_v9 = vmul.f32 %v9953_v5, %v20665_v18  ;;  %v9893_v37 = vmul.f32 0.044715, %v20708_v52  ;;  %v9978_v5 = vmul.f32 %v9882_v32, %v20699_v33  ;;  %v16720_v32 = vld [vmem:[%s18177_s26 + $0x508] ss:$48 sps:$4 sm:$0xff]   ;;  %v9906_v24 = vmul.f32 0.044715, %v20734_v12 }
 0x979   : > { %v8955_v0 = vpop.f32.mrf.mxu1  ;;  %12610 = vmatprep.subr.bf16.mxu1 %v16713_v42  ;;  %v16714_v42 = vld [vmem:[%s18177_s26 + $0x568] ss:$48 sps:$4 sm:$0xff]   ;;  %v16728_v51 = vld [vmem:[%s18177_s26 + $0x4ac] ss:$48 sps:$4 sm:$0xff]   ;;  %v8954_v20 = vadd.f32 %v8953_v35, %v20636_v21 }
 0x97a   : > { %v10145_v61 = vadd.f32 %v10049_v9, %v20665_v18  ;;  %v9977_v9 = vmul.f32 %v9881_v10, %v20719_v60  ;;  %v10074_v2 = vmul.f32 %v9978_v5, %v20699_v33  ;;  %v20775_v10 = vadd.f32 %v9024_v49, %v8952_v19  ;;  %v16726_v5 = vld [vmem:[%s18177_s26 + $0x4a8] ss:$48 sps:$4 sm:$0xff]  }
 0x97b   : > { %9632 = vmatpush2.bf16.msra.mxu0 %v16708_v56  ;;  %9721 = vmatmul.mubr.bf16.vlgmr.msra.gmra.mxu1 %v20254_v13  ;;  %v20742_v13 = vpop.f32.mrf.mxu1  ;;  %v9990_v56 = vmul.f32 %v9894_v45, %v20703_v43  ;;  %v8956_v45 = vadd.f32 %v8955_v0, %v20600_v63  ;;  %v9918_v63 = vmul.f32 0.044715, %v20748_v16  ;;  %v8950_v0 = vadd.f32 %v20688_v31, %v20636_v21  ;;  %v16729_v31 = vld [vmem:[%s18182_s0 + $0x60] ss:$12 sps:$4 sm:$0xff]  }
 0x97c   : > { %12611 = vmatpush1.bf16.msra.mxu1 %v16711_v62  ;;  %9633 = vmatprep.subr.bf16.mxu0 %v16716_v8  ;;  %v9989_v62 = vmul.f32 %v9893_v37, %v20708_v52  ;;  %v9905_v8 = vmul.f32 0.044715, %v20728_v25  ;;  %v20762_v37 = vadd.f32 %v20667_v15, %v8944_v14  ;;  %v10241_v15 = vmul.f32 0.7978846, %v10145_v61  ;;  %v9028_v14 = vpop.f32.mrf.mxu0 }
 0x97d   : > { %12612 = vmatprep.subr.bf16.mxu1 %v16719_v47  ;;  %9730 = vmatprep.mubr.bf16.mxu1 %v23263_v46  ;;  %v10157_v47 = vadd.f32 %v10061_v34, %v20673_v38  ;;  %v16731_v34 = vld [vmem:[%s18182_s0 + $0x64] ss:$12 sps:$4 sm:$0xff]   ;;  %v10002_v58 = vmul.f32 %v9906_v24, %v20734_v12  ;;  %v20780_v21 = vadd.f32 %v9028_v14, %v8956_v45 }
 0x97e   : > { %v10001_v35 = vmul.f32 %v9905_v8, %v20728_v25  ;;  %v10073_v61 = vmul.f32 %v9977_v9, %v20719_v60  ;;  %v9917_v49 = vmul.f32 0.044715, %v20762_v37  ;;  %v10170_v24 = vadd.f32 %v10074_v2, %v20699_v33  ;;  %v16732_v9 = vld [vmem:[%s18177_s26 + $0x448] ss:$48 sps:$4 sm:$0xff]  }
 0x97f   : > { %9634 = vmatpush2.bf16.msra.mxu0 %v16714_v42  ;;  %v20765_v42 = vpop.f32.mrf.mxu1  ;;  %v10014_v19 = vmul.f32 %v9918_v63, %v20748_v16  ;;  %17248 = vtanh.f32 %v10241_v15  ;;  %v9942_v2 = vmul.f32 0.044715, %v20780_v21 }
 0x980   : > { %12613 = vmatpush1.bf16.msra.mxu1 %v16717_v23  ;;  %9635 = vmatprep.subr.bf16.mxu0 %v16722_v59  ;;  %v10086_v23 = vmul.f32 %v9990_v56, %v20703_v43  ;;  %v10085_v59 = vmul.f32 %v9989_v62, %v20708_v52  ;;  %v16734_v56 = vld [vmem:[%s18177_s26 + $0x44c] ss:$48 sps:$4 sm:$0xff]   ;;  %v20786_v62 = vadd.f32 %v9026_v4, %v8954_v20  ;;  %v10266_v14 = vmul.f32 0.7978846, %v10170_v24 }
 0x981   : > { %12614 = vmatprep.subr.bf16.mxu1 %v16725_v7  ;;  %v10253_v7 = vmul.f32 0.7978846, %v10157_v47  ;;  %v20788_v8 = vpop.f32.mrf.mxu1  ;;  %v16740_v20 = vld [vmem:[%s18177_s26 + $0x3ec] ss:$48 sps:$4 sm:$0xff]   ;;  %v10038_v24 = vmul.f32 %v9942_v2, %v20780_v21 }
 0x982   : > { %v10182_v47 = vadd.f32 %v10086_v23, %v20703_v43  ;;  %v10181_v4 = vadd.f32 %v10085_v59, %v20708_v52  ;;  %v10013_v23 = vmul.f32 %v9917_v49, %v20762_v37  ;;  %v9941_v15 = vmul.f32 0.044715, %v20786_v62  ;;  %v16738_v49 = vld [vmem:[%s18177_s26 + $0x3e8] ss:$48 sps:$4 sm:$0xff]  }
 0x983   : > { %9636 = vmatpush2.bf16.msra.mxu0 %v16720_v32  ;;  %9731 = vmatmul.mubr.bf16.gmra.mxu1 %v20290_v55  ;;  %v16737_v55 = vld [vmem:[%s18182_s0 + $0x4c] ss:$12 sps:$4 sm:$0xff]   ;;  %v20795_v32 = vadd.f32 %v20711_v1, %v8950_v0  ;;  %v17245_v45 = vpop.eup %17244  ;;  %17250 = vtanh.f32 %v10253_v7  ;;  %v16735_v1 = vld [vmem:[%s18182_s0 + $0x48] ss:$12 sps:$4 sm:$0xff]   ;;  %v10169_v0 = vadd.f32 %v10073_v61, %v20719_v60  ;;  %v20809_v59 = vpop.f32.mrf.mxu1 }
 0x984   : > { %12615 = vmatpush1.bf16.msra.mxu1 %v16723_v41  ;;  %9637 = vmatprep.subr.bf16.mxu0 %v16728_v51  ;;  %v10097_v41 = vmul.f32 %v10001_v35, %v20728_v25  ;;  %v9930_v51 = vmul.f32 0.044715, %v20775_v10  ;;  %v17247_v63 = vpop.eup %17246  ;;  %v16743_v35 = vld [vmem:[%s18182_s0 + $0x34] ss:$12 sps:$4 sm:$0xff]   ;;  %v10446_v7 = vadd.f32 1.0, %v17245_v45  ;;  %17252 = vtanh.f32 %v10266_v14 }
 0x985   : > { %12616 = vmatprep.subr.bf16.mxu1 %v16731_v34  ;;  %9740 = vmatprep.mubr.bf16.mxu1 %v23263_v46  ;;  %v10098_v34 = vmul.f32 %v10002_v58, %v20734_v12  ;;  %v10110_v58 = vmul.f32 %v10014_v19, %v20748_v16  ;;  %v10277_v6 = vmul.f32 0.7978846, %v10181_v4  ;;  %v16741_v45 = vld [vmem:[%s18182_s0 + $0x30] ss:$12 sps:$4 sm:$0xff]   ;;  %v9774_v19 = vmul.f32 0.5, %v20628_v11  ;;  %v20826_v26 = vpop.f32.mrf.mxu1 }
 0x986   : > { %v10026_v61 = vmul.f32 %v9930_v51, %v20775_v10  ;;  %v10265_v4 = vmul.f32 0.7978846, %v10169_v0 }
 0x987   : > { %9638 = vmatpush2.bf16.msra.mxu0 %v16726_v5  ;;  %v9929_v5 = vmul.f32 0.044715, %v20795_v32  ;;  %v10194_v51 = vadd.f32 %v10098_v34, %v20734_v12  ;;  %v10542_v11 = vmul.f32 %v10446_v7, %v9774_v19  ;;  %v16755_v7 = vld [vmem:[%s18182_s0 + $0x4] ss:$12 sps:$4 sm:$0xff]  }
 0x988   : > { %12617 = vmatpush1.bf16.msra.mxu1 %v16729_v31  ;;  %9639 = vmatprep.subr.bf16.mxu0 %v16734_v56  ;;  %v10278_v31 = vmul.f32 0.7978846, %v10182_v47  ;;  %v10193_v56 = vadd.f32 %v10097_v41, %v20728_v25  ;;  %v16746_v47 = vld [vmem:[%s18177_s26 + $0x38c] ss:$48 sps:$4 sm:$0xff]   ;;  %v10434_v41 = vadd.f32 1.0, %v17247_v63  ;;  %v10122_v63 = vmul.f32 %v10026_v61, %v20775_v10 }
 0x989   : > { %12618 = vmatprep.subr.bf16.mxu1 %v16737_v55  ;;  %v9762_v55 = vmul.f32 0.5, %v20621_v17  ;;  %v16749_v17 = vld [vmem:[%s18182_s0 + $0x1c] ss:$12 sps:$4 sm:$0xff]   ;;  %v10025_v2 = vmul.f32 %v9929_v5, %v20795_v32  ;;  %v10290_v0 = vmul.f32 0.7978846, %v10194_v51  ;;  %v20838_v5 = vpop.f32.mrf.mxu1 }
 0x98a   : > { %17254 = vtanh.f32 %v10278_v31  ;;  %v10289_v34 = vmul.f32 0.7978846, %v10193_v56  ;;  %v16750_v61 = vld [vmem:[%s18177_s26 + $0x328] ss:$48 sps:$4 sm:$0xff]  }
 0x98b   : > { %9640 = vmatpush2.bf16.msra.mxu0 %v16732_v9  ;;  %9741 = vmatmul.mubr.bf16.gmra.mxu1 %v20326_v57  ;;  %v10109_v9 = vmul.f32 %v10013_v23, %v20762_v37  ;;  %v10037_v57 = vmul.f32 %v9941_v15, %v20786_v62  ;;  %17256 = vtanh.f32 %v10277_v6  ;;  %v10530_v23 = vmul.f32 %v10434_v41, %v9762_v55  ;;  %v16752_v6 = vld [vmem:[%s18177_s26 + $0x32c] ss:$48 sps:$4 sm:$0xff]  }
 0x98c   : > { %12619 = vmatpush1.bf16.msra.mxu1 %v16735_v1  ;;  %9641 = vmatprep.subr.bf16.mxu0 %v16740_v20  ;;  %v10206_v1 = vadd.f32 %v10110_v58, %v20748_v16  ;;  %v16744_v20 = vld [vmem:[%s18177_s26 + $0x388] ss:$48 sps:$4 sm:$0xff]   ;;  %v10134_v15 = vmul.f32 %v10038_v24, %v20780_v21  ;;  %v10121_v31 = vmul.f32 %v10025_v2, %v20795_v32  ;;  %17258 = vtanh.f32 %v10265_v4  ;;  %v17249_v55 = vpop.eup %17248  ;;  %v16753_v24 = vld [vmem:[%s18182_s0] ss:$12 sps:$4 sm:$0xff]   ;;  %s23332_s26 = scalar_lea.vmem [#allocation13], %s18126_s28 }
 0x98d   : > { %12620 = vmatprep.subr.bf16.mxu1 %v16743_v35  ;;  %9750 = vmatprep.mubr.bf16.mxu1 %v23263_v46  ;;  %v16747_v46 = vld [vmem:[%s18182_s0 + $0x18] ss:$12 sps:$4 sm:$0xff]   ;;  %v10205_v35 = vadd.f32 %v10109_v9, %v20762_v37  ;;  %v10133_v14 = vmul.f32 %v10037_v57, %v20786_v62  ;;  %v20843_v58 = vpack.c.bf16 %v10542_v11, %v10530_v23  ;;  %17260 = vtanh.f32 %v10289_v34  ;;  %v16756_v4 = vld [vmem:[%s18182_s0 + $0x228] ss:$12 sps:$4 sm:$0xff]  }
 0x98e   : > { %v10302_v56 = vmul.f32 0.7978846, %v10206_v1  ;;  %17262 = vtanh.f32 %v10290_v0  ;;  %v16761_v51 = vld [vmem:[%s18182_s0 + $0x16c] ss:$12 sps:$4 sm:$0xff]   ;;  %v10217_v9 = vadd.f32 %v10121_v31, %v20795_v32  ;;  %v16759_v2 = vld [vmem:[%s18182_s0 + $0x168] ss:$12 sps:$4 sm:$0xff]  }
 0x98f   : > { %9642 = vmatpush2.bf16.msra.mxu0 %v16738_v49  ;;  %23294 = vst [vmem:[#allocation52_spill] sm:$0xff] %v20843_v58  ;;  %v10218_v49 = vadd.f32 %v10122_v63, %v20775_v10  ;;  %v10229_v41 = vadd.f32 %v10133_v14, %v20786_v62  ;;  %v10301_v57 = vmul.f32 0.7978846, %v10205_v35  ;;  %v23295_v11 = vld [vmem:[#allocation27_spill] sm:$0xff]  ;;  %v10433_v34 = vadd.f32 1.0, %v17249_v55 }
 0x990   : > { %12621 = vmatpush1.bf16.msra.mxu1 %v16741_v45  ;;  %9643 = vmatprep.subr.bf16.mxu0 %v16746_v47  ;;  %v16758_v45 = vld [vmem:[%s18182_s0 + $0x22c] ss:$12 sps:$4 sm:$0xff]   ;;  %v10230_v47 = vadd.f32 %v10134_v15, %v20780_v21  ;;  %v17251_v19 = vpop.eup %17250  ;;  %17264 = vtanh.f32 %v10302_v56  ;;  %v20865_v1 = vrot.slane %v20592_v22, %v23295_v11  ;;  %v23296_v23 = vsub.s32 4, %v18482_v28 }
 0x991   : > { %12622 = vmatprep.subr.bf16.mxu1 %v16749_v17  ;;  %v20859_v17 = vrot.slane %v20592_v22, %v23267_v27  ;;  %v10445_v63 = vadd.f32 1.0, %v17251_v19  ;;  %v9761_v35 = vmul.f32 0.5, %v20665_v18  ;;  %v9773_v14 = vmul.f32 0.5, %v20673_v38 }
 0x992   : > { %v20871_v0 = vrot.slane %v20592_v22, %v23296_v23  ;;  %v10326_v15 = vmul.f32 0.7978846, %v10230_v47  ;;  %v23297_v31 = vsub.s32 5, %v18482_v28  ;;  %v20886_v18 = vmul.f32 0.5, %v20719_v60 }
 0x993   : > { %9644 = vmatpush2.bf16.msra.mxu0 %v16744_v20  ;;  %9751 = vmatmul.mubr.bf16.gmra.mxu1 %v20359_v30  ;;  %v20853_v30 = vpop.f32.mrf.mxu1  ;;  %v10314_v20 = vmul.f32 0.7978846, %v10218_v49  ;;  %v17253_v49 = vpop.eup %17252  ;;  %17266 = vtanh.f32 %v10301_v57  ;;  %v10313_v38 = vmul.f32 0.7978846, %v10217_v9  ;;  %v9798_v19 = vmul.f32 0.5, %v20703_v43 }
 0x994   : > { %12623 = vmatpush1.bf16.msra.mxu1 %v16747_v46  ;;  %12642 = vmatprep.mubr.bf16.mxu1 %v20843_v58  ;;  %v16764_v46 = vld [vmem:[%s18182_s0 + $0x214] ss:$12 sps:$4 sm:$0xff]   ;;  %v20881_v56 = vrot.slane %v20592_v22, %v23297_v31  ;;  %v16762_v22 = vld [vmem:[%s18182_s0 + $0x210] ss:$12 sps:$4 sm:$0xff]   ;;  %v10529_v60 = vmul.f32 %v10433_v34, %v9761_v35  ;;  %v20896_v23 = vmul.f32 0.5, %v20734_v12  ;;  %v10458_v12 = vadd.f32 1.0, %v17253_v49 }
 0x995   : > { %9645 = vmatprep.subr.bf16.mxu0 %v16752_v6  ;;  %12624 = vmatprep.subr.bf16.mxu1 %v16755_v7  ;;  %v20875_v6 = vpop.f32.mrf.mxu1  ;;  %v16767_v7 = vld [vmem:[%s18182_s0 + $0x154] ss:$12 sps:$4 sm:$0xff]   ;;  %17268 = vtanh.f32 %v10314_v20  ;;  %v16765_v9 = vld [vmem:[%s18182_s0 + $0x150] ss:$12 sps:$4 sm:$0xff]   ;;  %v20906_v20 = vmul.f32 0.5, %v20748_v16 }
 0x996   : > { %v16770_v57 = vld [vmem:[%s18182_s0 + $0x1fc] ss:$12 sps:$4 sm:$0xff]   ;;  %17270 = vtanh.f32 %v10326_v15  ;;  %v16768_v34 = vld [vmem:[%s18182_s0 + $0x1f8] ss:$12 sps:$4 sm:$0xff]  }
 0x997   : > { %9646 = vmatpush2.bf16.msra.mxu0 %v16750_v61  ;;  %v10325_v61 = vmul.f32 0.7978846, %v10229_v41  ;;  %v10541_v41 = vmul.f32 %v10445_v63, %v9773_v14  ;;  %v16771_v16 = vld [vmem:[%s18182_s0 + $0x138] ss:$12 sps:$4 sm:$0xff]  }
 0x998   : > { %12625 = vmatpush1.bf16.msra.mxu1 %v16753_v24  ;;  %12683 = vmatprep.subr.bf16.mxu0 %v16758_v45  ;;  %v9786_v24 = vmul.f32 0.5, %v20699_v33  ;;  %v17255_v45 = vpop.eup %17254  ;;  %v16776_v49 = vld [vmem:[%s18182_s0 + $0x1e4] ss:$12 sps:$4 sm:$0xff]  }
 0x999   : > { %12626 = vmatprep.subr.bf16.mxu1 %v16761_v51  ;;  %v17257_v33 = vpop.eup %17256  ;;  %17272 = vtanh.f32 %v10325_v61  ;;  %v10470_v63 = vadd.f32 1.0, %v17255_v45  ;;  %v16800_v58 = vld [vmem:[%s18182_s0 + $0x184] ss:$12 sps:$4 sm:$0xff]  }
 0x99a   : > { %v9065_v55 = vpop.f32.mrf.mxu0  ;;  %9648 = vmatmul.mubr.bf16.vlgmr.msra.gmra.mxu0 %v20258_v50  ;;  %v9797_v50 = vmul.f32 0.5, %v20708_v52  ;;  %17274 = vtanh.f32 %v10313_v38  ;;  %v20925_v38 = vmul.f32 0.5, %v20775_v10 }
 0x99b   : > { %v9066_v47 = vadd.f32 %v9065_v55, %v20859_v17  ;;  %9657 = vmatprep.mubr.bf16.mxu0 %v20288_v54  ;;  %12684 = vmatpush1.bf16.msra.mxu0 %v16756_v4  ;;  %v20898_v54 = vpop.f32.mrf.mxu1  ;;  %v16773_v4 = vld [vmem:[%s18182_s0 + $0x13c] ss:$12 sps:$4 sm:$0xff]   ;;  %v20922_v55 = vmul.f32 0.5, %v20762_v37 }
 0x99c   : > { %v9067_v51 = vpop.f32.mrf.mxu0  ;;  %12627 = vmatpush2.bf16.msra.mxu1 %v16759_v2  ;;  %12685 = vmatprep.subr.bf16.mxu0 %v16764_v46  ;;  %v20910_v46 = vmul.f32 0.5, %v20728_v25  ;;  %v20919_v25 = vpack.c.bf16 %v10541_v41, %v10529_v60  ;;  %v16779_v60 = vld [vmem:[%s18182_s0 + $0x124] ss:$12 sps:$4 sm:$0xff]   ;;  %v10566_v41 = vmul.f32 %v10470_v63, %v9798_v19  ;;  %v16782_v63 = vld [vmem:[%s18182_s0 + $0x1cc] ss:$12 sps:$4 sm:$0xff]  }
 0x99d   : > { %v20901_v43 = vadd.f32 %v20742_v13, %v9066_v47  ;;  %v9068_v52 = vadd.f32 %v9067_v51, %v20865_v1  ;;  %12628 = vmatprep.subr.bf16.mxu1 %v16767_v7  ;;  %v17259_v13 = vpop.eup %17258  ;;  %v10469_v7 = vadd.f32 1.0, %v17257_v33  ;;  %v20930_v47 = vpop.f32.mrf.mxu1 }
 0x99e   : > { %v9069_v2 = vpop.f32.mrf.mxu0  ;;  %v17261_v31 = vpop.eup %17260  ;;  %23298 = vst [vmem:[#allocation53_spill] sm:$0xff] %v20919_v25 }
 0x99f   : > { %v9859_v15 = vmul.f32 0.044715, %v20901_v43  ;;  %v20914_v35 = vadd.f32 %v20765_v42, %v9068_v52  ;;  %v9070_v14 = vadd.f32 %v9069_v2, %v20859_v17  ;;  %12686 = vmatpush1.bf16.msra.mxu0 %v16762_v22  ;;  %v20928_v42 = vmul.f32 0.5, %v20780_v21  ;;  %v17263_v45 = vpop.eup %17262 }
 0x9a0   : > { %v9071_v61 = vpop.f32.mrf.mxu0  ;;  %12629 = vmatpush2.bf16.msra.mxu1 %v16765_v9  ;;  %12687 = vmatprep.subr.bf16.mxu0 %v16770_v57  ;;  %v10554_v21 = vmul.f32 %v10458_v12, %v9786_v24  ;;  %v10457_v9 = vadd.f32 1.0, %v17259_v13  ;;  %v20941_v57 = vmul.f32 0.5, %v20795_v32  ;;  %v17265_v52 = vpop.eup %17264  ;;  %v16777_v12 = vld [vmem:[%s18182_s0 + $0x120] ss:$12 sps:$4 sm:$0xff]   ;;  %v10482_v13 = vadd.f32 1.0, %v17263_v45 }
 0x9a1   : > { %v9955_v22 = vmul.f32 %v9859_v15, %v20901_v43  ;;  %v9860_v33 = vmul.f32 0.044715, %v20914_v35  ;;  %v20935_v51 = vadd.f32 %v20788_v8, %v9070_v14  ;;  %v9072_v37 = vadd.f32 %v9071_v61, %v20865_v1  ;;  %12630 = vmatprep.subr.bf16.mxu1 %v16773_v4  ;;  %v16774_v4 = vld [vmem:[%s18182_s0 + $0x1e0] ss:$12 sps:$4 sm:$0xff]   ;;  %v20954_v61 = vpop.f32.mrf.mxu1 }
 0x9a2   : > { %v9075_v10 = vpop.f32.mrf.mxu0  ;;  %9658 = vmatmul.mubr.bf16.gmra.mxu0 %v20293_v3  ;;  %v10565_v3 = vmul.f32 %v10469_v7, %v9797_v50  ;;  %v10481_v14 = vadd.f32 1.0, %v17261_v31  ;;  %v10553_v31 = vmul.f32 %v10457_v9, %v20886_v18  ;;  %v10494_v45 = vadd.f32 1.0, %v17265_v52  ;;  %v16783_v18 = vld [vmem:[%s18182_s0 + $0x108] ss:$12 sps:$4 sm:$0xff]  }
 0x9a3   : > { %v10051_v8 = vmul.f32 %v9955_v22, %v20901_v43  ;;  %v9956_v2 = vmul.f32 %v9860_v33, %v20914_v35  ;;  %v9871_v15 = vmul.f32 0.044715, %v20935_v51  ;;  %9667 = vmatprep.mubr.bf16.mxu0 %v20324_v29  ;;  %12688 = vmatpush1.bf16.msra.mxu0 %v16768_v34  ;;  %v20949_v24 = vadd.f32 %v20809_v59, %v9072_v37  ;;  %v16785_v59 = vld [vmem:[%s18182_s0 + $0x10c] ss:$12 sps:$4 sm:$0xff]   ;;  %v17267_v33 = vpop.eup %17266  ;;  %v16788_v9 = vld [vmem:[%s18182_s0 + $0x1b4] ss:$12 sps:$4 sm:$0xff]  }
 0x9a4   : > { %v9076_v19 = vadd.f32 %v9075_v10, %v20859_v17  ;;  %v9077_v32 = vpop.f32.mrf.mxu0  ;;  %12631 = vmatpush2.bf16.msra.mxu1 %v16771_v16  ;;  %12689 = vmatprep.subr.bf16.mxu0 %v16776_v49  ;;  %v20962_v22 = vpack.c.bf16 %v10566_v41, %v10554_v21  ;;  %v17269_v21 = vpop.eup %17268  ;;  %v20977_v52 = vpack.c.bf16 %v10565_v3, %v10553_v31 }
 0x9a5   : > { %v10147_v29 = vadd.f32 %v10051_v8, %v20901_v43  ;;  %v9967_v34 = vmul.f32 %v9871_v15, %v20935_v51  ;;  %v9078_v50 = vadd.f32 %v9077_v32, %v20865_v1  ;;  %12632 = vmatprep.subr.bf16.mxu1 %v16779_v60  ;;  %v10052_v7 = vmul.f32 %v9956_v2, %v20914_v35  ;;  %v16780_v2 = vld [vmem:[%s18182_s0 + $0x1c8] ss:$12 sps:$4 sm:$0xff]   ;;  %v20983_v32 = vpop.f32.mrf.mxu1 }
 0x9a6   : > { %v9872_v16 = vmul.f32 0.044715, %v20949_v24  ;;  %v9079_v49 = vpop.f32.mrf.mxu0  ;;  %23299 = vst [vmem:[#allocation54_spill] sm:$0xff] %v20962_v22  ;;  %v20967_v10 = vadd.f32 %v20826_v26, %v9076_v19  ;;  %23300 = vst [vmem:[#allocation55_spill] sm:$0xff] %v20977_v52  ;;  %v17271_v19 = vpop.eup %17270  ;;  %v20991_v3 = vmul.f32 %v10481_v14, %v20910_v46  ;;  %v10493_v14 = vadd.f32 1.0, %v17267_v33 }
 0x9a7   : > { %v10063_v37 = vmul.f32 %v9967_v34, %v20935_v51  ;;  %v20970_v60 = vadd.f32 %v20838_v5, %v9078_v50  ;;  %v9080_v8 = vadd.f32 %v9079_v49, %v20859_v17  ;;  %12690 = vmatpush1.bf16.msra.mxu0 %v16774_v4  ;;  %v10148_v26 = vadd.f32 %v10052_v7, %v20914_v35  ;;  %v16791_v50 = vld [vmem:[%s18182_s0 + $0xf4] ss:$12 sps:$4 sm:$0xff]  }
 0x9a8   : > { %v9968_v41 = vmul.f32 %v9872_v16, %v20949_v24  ;;  %v9081_v15 = vpop.f32.mrf.mxu0  ;;  %12633 = vmatpush2.bf16.msra.mxu1 %v16777_v12  ;;  %12691 = vmatprep.subr.bf16.mxu0 %v16782_v63  ;;  %v20981_v5 = vmul.f32 0.5, %v20786_v62  ;;  %v10243_v4 = vmul.f32 0.7978846, %v10147_v29  ;;  %v20988_v12 = vmul.f32 %v10482_v13, %v20896_v23  ;;  %v17273_v63 = vpop.eup %17272 }
 0x9a9   : > { %v9884_v34 = vmul.f32 0.044715, %v20970_v60  ;;  %12634 = vmatprep.subr.bf16.mxu1 %v16785_v59  ;;  %v20994_v7 = vadd.f32 %v20853_v30, %v9080_v8  ;;  %v9082_v62 = vadd.f32 %v9081_v15, %v20865_v1  ;;  %v10244_v59 = vmul.f32 0.7978846, %v10148_v26  ;;  %v17275_v49 = vpop.eup %17274  ;;  %v16786_v30 = vld [vmem:[%s18182_s0 + $0x1b0] ss:$12 sps:$4 sm:$0xff]  }
 0x9aa   : > { %v9085_v16 = vpop.f32.mrf.mxu0  ;;  %9668 = vmatmul.mubr.bf16.gmra.mxu0 %v20329_v36  ;;  %v10064_v29 = vmul.f32 %v9968_v41, %v20949_v24  ;;  %v10159_v23 = vadd.f32 %v10063_v37, %v20935_v51  ;;  %v9883_v46 = vmul.f32 0.044715, %v20967_v10  ;;  %v10590_v13 = vmul.f32 %v10494_v45, %v20906_v20  ;;  %v16789_v41 = vld [vmem:[%s18182_s0 + $0xf0] ss:$12 sps:$4 sm:$0xff]  }
 0x9ab   : > { %9677 = vmatprep.mubr.bf16.mxu0 %v20357_v39  ;;  %12692 = vmatpush1.bf16.msra.mxu0 %v16780_v2  ;;  %v9980_v36 = vmul.f32 %v9884_v34, %v20970_v60  ;;  %v21006_v31 = vadd.f32 %v20875_v6, %v9082_v62  ;;  %v16794_v37 = vld [vmem:[%s18182_s0 + $0x19c] ss:$12 sps:$4 sm:$0xff]   ;;  %17276 = vtanh.f32 %v10244_v59  ;;  %v21011_v39 = vpop.f32.mrf.mxu1  ;;  %v9086_v20 = vadd.f32 %v9085_v16, %v20859_v17 }
 0x9ac   : > { %v9087_v8 = vpop.f32.mrf.mxu0  ;;  %12635 = vmatpush2.bf16.msra.mxu1 %v16783_v18  ;;  %12693 = vmatprep.subr.bf16.mxu0 %v16788_v9  ;;  %v10160_v15 = vadd.f32 %v10064_v29, %v20949_v24  ;;  %17278 = vtanh.f32 %v10243_v4  ;;  %v16797_v45 = vld [vmem:[%s18182_s0 + $0xdc] ss:$12 sps:$4 sm:$0xff]   ;;  %v10518_v33 = vadd.f32 1.0, %v17271_v19  ;;  %v10517_v2 = vadd.f32 1.0, %v17273_v63  ;;  %v16792_v4 = vld [vmem:[%s18182_s0 + $0x198] ss:$12 sps:$4 sm:$0xff]  }
 0x9ad   : > { %12636 = vmatprep.subr.bf16.mxu1 %v16791_v50  ;;  %v9895_v6 = vmul.f32 0.044715, %v20994_v7  ;;  %v9896_v18 = vmul.f32 0.044715, %v21006_v31  ;;  %v9088_v9 = vadd.f32 %v9087_v8, %v20865_v1  ;;  %v9979_v62 = vmul.f32 %v9883_v46, %v20967_v10  ;;  %v21025_v46 = vpop.f32.mrf.mxu1 }
 0x9ae   : > { %v9089_v26 = vpop.f32.mrf.mxu0  ;;  %v10256_v34 = vmul.f32 0.7978846, %v10160_v15  ;;  %v10589_v16 = vmul.f32 %v10493_v14, %v20922_v55  ;;  %v10506_v50 = vadd.f32 1.0, %v17269_v21  ;;  %v10505_v19 = vadd.f32 1.0, %v17275_v49  ;;  %v16803_v21 = vld [vmem:[%s18182_s0 + $0xc4] ss:$12 sps:$4 sm:$0xff]  }
 0x9af   : > { %12694 = vmatpush1.bf16.msra.mxu0 %v16786_v30  ;;  %v10255_v63 = vmul.f32 0.7978846, %v10159_v23  ;;  %v9992_v29 = vmul.f32 %v9896_v18, %v21006_v31  ;;  %v10076_v8 = vmul.f32 %v9980_v36, %v20970_v60  ;;  %v21028_v30 = vadd.f32 %v20898_v54, %v9086_v20 }
 0x9b0   : > { %v9091_v59 = vpop.f32.mrf.mxu0  ;;  %12637 = vmatpush2.bf16.msra.mxu1 %v16789_v41  ;;  %12695 = vmatprep.subr.bf16.mxu0 %v16794_v37  ;;  %17280 = vtanh.f32 %v10256_v34  ;;  %v9090_v55 = vadd.f32 %v9089_v26, %v20859_v17  ;;  %v10614_v49 = vmul.f32 %v10518_v33, %v20928_v42  ;;  %v10613_v23 = vmul.f32 %v10517_v2, %v20981_v5  ;;  %v16798_v42 = vld [vmem:[%s18182_s0 + $0x180] ss:$12 sps:$4 sm:$0xff]   ;;  %v16804_v34 = vld [vmem:[%s18182_s0 + $0x2e8] ss:$12 sps:$4 sm:$0xff]  }
 0x9b1   : > { %12638 = vmatprep.subr.bf16.mxu1 %v16797_v45  ;;  %v9991_v14 = vmul.f32 %v9895_v6, %v20994_v7  ;;  %v21036_v41 = vadd.f32 %v20930_v47, %v9088_v9  ;;  %v9092_v36 = vadd.f32 %v9091_v59, %v20865_v1  ;;  %v10088_v54 = vmul.f32 %v9992_v29, %v21006_v31  ;;  %v16801_v2 = vld [vmem:[%s18182_s0 + $0xc0] ss:$12 sps:$4 sm:$0xff]  }
 0x9b2   : > { %v9095_v37 = vpop.f32.mrf.mxu0  ;;  %9678 = vmatmul.mubr.bf16.gmra.mxu0 %v20362_v44  ;;  %v10075_v15 = vmul.f32 %v9979_v62, %v20967_v10  ;;  %v21044_v5 = vpack.c.bf16 %v10590_v13, %v20988_v12  ;;  %v10602_v47 = vmul.f32 %v10506_v50, %v20925_v38  ;;  %v10601_v20 = vmul.f32 %v10505_v19, %v20941_v57  ;;  %v16806_v6 = vld [vmem:[%s18182_s0 + $0x2ec] ss:$12 sps:$4 sm:$0xff]   ;;  %v21055_v13 = vpop.f32.mrf.mxu1  ;;  %v16807_v62 = vld [vmem:[%s18182_s0 + $0x3a8] ss:$12 sps:$4 sm:$0xff]  }
 0x9b3   : > { %12696 = vmatpush1.bf16.msra.mxu0 %v16792_v4  ;;  %17282 = vtanh.f32 %v10255_v63  ;;  %v21049_v45 = vadd.f32 %v20983_v32, %v9092_v36  ;;  %v9096_v44 = vadd.f32 %v9095_v37, %v20859_v17  ;;  %v10172_v12 = vadd.f32 %v10076_v8, %v20970_v60  ;;  %v16809_v32 = vld [vmem:[%s18182_s0 + $0x3ac] ss:$12 sps:$4 sm:$0xff]   ;;  %v16812_v19 = vld [vmem:[%s18182_s0 + $0x2d4] ss:$12 sps:$4 sm:$0xff]  }
 0x9b4   : > { %23301 = vst [vmem:[#allocation56_spill] sm:$0xff] %v21044_v5  ;;  %v9097_v33 = vpop.f32.mrf.mxu0  ;;  %12639 = vmatpush2.bf16.msra.mxu1 %v16795_v40  ;;  %12697 = vmatprep.subr.bf16.mxu0 %v16800_v58  ;;  %v9907_v38 = vmul.f32 0.044715, %v21028_v30  ;;  %v21059_v57 = vadd.f32 %v20954_v61, %v9090_v55  ;;  %v21063_v18 = vpack.c.bf16 %v10589_v16, %v20991_v3  ;;  %v9908_v9 = vmul.f32 0.044715, %v21036_v41 }
 0x9b5   : > { %12640 = vmatprep.subr.bf16.mxu1 %v16803_v21  ;;  %v10184_v40 = vadd.f32 %v10088_v54, %v21006_v31  ;;  %v10087_v58 = vmul.f32 %v9991_v14, %v20994_v7  ;;  %v21070_v4 = vpack.c.bf16 %v10614_v49, %v10602_v47  ;;  %v21072_v61 = vpack.c.bf16 %v10613_v23, %v10601_v20  ;;  %v21095_v23 = vpop.f32.mrf.mxu1 }
 0x9b6   : > { %23302 = vst [vmem:[#allocation57_spill] sm:$0xff] %v21063_v18  ;;  %v9099_v26 = vpop.f32.mrf.mxu0  ;;  %v21075_v50 = vmul.f32 0.5, %v20901_v43  ;;  %v10171_v3 = vadd.f32 %v10075_v15, %v20967_v10  ;;  %v9920_v16 = vmul.f32 0.044715, %v21049_v45  ;;  %v21081_v63 = vmul.f32 0.5, %v20914_v35 }
 0x9b7   : > { %23303 = vst [vmem:[#allocation58_spill] sm:$0xff] %v21070_v4  ;;  %12698 = vmatpush1.bf16.msra.mxu0 %v16798_v42  ;;  %v21084_v29 = vmul.f32 0.5, %v20935_v51  ;;  %v21087_v59 = vadd.f32 %v21011_v39, %v9096_v44  ;;  %v16815_v43 = vld [vmem:[%s18182_s0 + $0x394] ss:$12 sps:$4 sm:$0xff]   ;;  %v21093_v55 = vmul.f32 0.5, %v20949_v24  ;;  %v10003_v35 = vmul.f32 %v9907_v38, %v21028_v30 }
 0x9b8   : > { %v21089_v8 = vpop.f32.mrf.mxu0  ;;  %12641 = vmatpush2.bf16.msra.mxu1 %v16801_v2  ;;  %12699 = vmatprep.subr.bf16.mxu0 %v16806_v6  ;;  %v10268_v21 = vmul.f32 0.7978846, %v10172_v12  ;;  %v17277_v49 = vpop.eup %17276  ;;  %v9919_v51 = vmul.f32 0.044715, %v21059_v57  ;;  %v10280_v39 = vmul.f32 0.7978846, %v10184_v40  ;;  %v10183_v37 = vadd.f32 %v10087_v58, %v20994_v7 }
 0x9b9   : > { %12756 = vmatprep.subr.bf16.mxu1 %v16809_v32  ;;  %v21100_v14 = vmul.f32 0.5, %v20967_v10  ;;  %v17279_v36 = vpop.eup %17278  ;;  %v10004_v24 = vmul.f32 %v9908_v9, %v21036_v41  ;;  %v21105_v15 = vmul.f32 0.5, %v20970_v60  ;;  %v21108_v42 = vmul.f32 0.5, %v21006_v31  ;;  %v16810_v2 = vld [vmem:[%s18182_s0 + $0x2d0] ss:$12 sps:$4 sm:$0xff]  }
 0x9ba   : > { %v9284_v54 = vpop.f32.mrf.mxu0  ;;  %v10016_v47 = vmul.f32 %v9920_v16, %v21049_v45  ;;  %v9098_v20 = vadd.f32 %v9097_v33, %v20865_v1  ;;  %v9100_v10 = vadd.f32 %v9099_v26, %v20859_v17  ;;  %v16813_v6 = vld [vmem:[%s18182_s0 + $0x390] ss:$12 sps:$4 sm:$0xff]   ;;  %v10267_v12 = vmul.f32 0.7978846, %v10171_v3 }
 0x9bb   : > { %v9211_v44 = vpop.f32.mrf.mxu1  ;;  %12643 = vmatmul.mubr.bf16.vlgmr.msra.gmra.mxu1 %v20919_v25  ;;  %12700 = vmatpush2.bf16.msra.mxu0 %v16804_v34  ;;  %v9931_v60 = vmul.f32 0.044715, %v21087_v59  ;;  %v16818_v33 = vld [vmem:[%s18182_s0 + $0x2bc] ss:$12 sps:$4 sm:$0xff]   ;;  %v10436_v32 = vadd.f32 1.0, %v17277_v49  ;;  %17284 = vtanh.f32 %v10268_v21  ;;  %v10099_v40 = vmul.f32 %v10003_v35, %v21028_v30 }
 0x9bc   : > { %v9212_v38 = vadd.f32 %v9211_v44, %v20871_v0  ;;  %v21118_v31 = vpop.f32.mrf.mxu0  ;;  %12652 = vmatprep.mubr.bf16.mxu1 %v20962_v22  ;;  %12757 = vmatpush1.bf16.msra.mxu1 %v16807_v62  ;;  %v10015_v58 = vmul.f32 %v9919_v51, %v21059_v57  ;;  %v16821_v26 = vld [vmem:[%s18182_s0 + $0x37c] ss:$12 sps:$4 sm:$0xff]   ;;  %17286 = vtanh.f32 %v10280_v39  ;;  %v21126_v34 = vmul.f32 0.5, %v20994_v7 }
 0x9bd   : > { %v17281_v17 = vpop.eup %17280  ;;  %v9213_v9 = vpop.f32.mrf.mxu1  ;;  %12701 = vmatprep.subr.bf16.mxu0 %v16812_v19  ;;  %12758 = vmatprep.subr.bf16.mxu1 %v16815_v43  ;;  %v10435_v3 = vadd.f32 1.0, %v17279_v36  ;;  %v10279_v21 = vmul.f32 0.7978846, %v10183_v37  ;;  %v10100_v49 = vmul.f32 %v10004_v24, %v21036_v41  ;;  %v21132_v35 = vadd.f32 %v21025_v46, %v9098_v20  ;;  %v16816_v43 = vld [vmem:[%s18182_s0 + $0x2b8] ss:$12 sps:$4 sm:$0xff]  }
 0x9be   : > { %v21128_v16 = vadd.f32 %v9284_v54, %v9212_v38  ;;  %v9288_v62 = vpop.f32.mrf.mxu0  ;;  %v21135_v51 = vadd.f32 %v21055_v13, %v9100_v10  ;;  %v10448_v39 = vadd.f32 1.0, %v17281_v17  ;;  %v10112_v7 = vmul.f32 %v10016_v47, %v21049_v45  ;;  %v16819_v24 = vld [vmem:[%s18182_s0 + $0x378] ss:$12 sps:$4 sm:$0xff]  }
 0x9bf   : > { %v9215_v19 = vpop.f32.mrf.mxu1  ;;  %12702 = vmatpush2.bf16.msra.mxu0 %v16810_v2  ;;  %v10027_v36 = vmul.f32 %v9931_v60, %v21087_v59  ;;  %v10532_v46 = vmul.f32 %v10436_v32, %v21081_v63  ;;  %17288 = vtanh.f32 %v10267_v12  ;;  %v9214_v20 = vadd.f32 %v9213_v9, %v20881_v56  ;;  %v16824_v2 = vld [vmem:[%s18182_s0 + $0x2a4] ss:$12 sps:$4 sm:$0xff]  }
 0x9c0   : > { %v9861_v54 = vmul.f32 0.044715, %v21128_v16  ;;  %v9290_v37 = vpop.f32.mrf.mxu0  ;;  %12759 = vmatpush1.bf16.msra.mxu1 %v16813_v6  ;;  %12703 = vmatprep.subr.bf16.mxu0 %v16818_v33  ;;  %v17283_v13 = vpop.eup %17282  ;;  %v9216_v10 = vadd.f32 %v9215_v19, %v20871_v0  ;;  %v10544_v47 = vmul.f32 %v10448_v39, %v21093_v55  ;;  %v10208_v60 = vadd.f32 %v10112_v7, %v21049_v45  ;;  %v16827_v12 = vld [vmem:[%s18182_s0 + $0x364] ss:$12 sps:$4 sm:$0xff]   ;;  %v16830_v7 = vld [vmem:[%s18182_s0 + $0x28c] ss:$12 sps:$4 sm:$0xff]  }
 0x9c1   : > { %v9217_v44 = vpop.f32.mrf.mxu1  ;;  %12760 = vmatprep.subr.bf16.mxu1 %v16821_v26  ;;  %v9102_v6 = vadd.f32 %v21089_v8, %v20865_v1  ;;  %17290 = vtanh.f32 %v10279_v21  ;;  %v10196_v33 = vadd.f32 %v10100_v49, %v21036_v41  ;;  %v9943_v32 = vmul.f32 0.044715, %v21135_v51  ;;  %v16822_v8 = vld [vmem:[%s18182_s0 + $0x2a0] ss:$12 sps:$4 sm:$0xff]  }
 0x9c2   : > { %v9218_v63 = vadd.f32 %v9217_v44, %v20881_v56  ;;  %v9294_v38 = vpop.f32.mrf.mxu0  ;;  %v9957_v55 = vmul.f32 %v9861_v54, %v21128_v16  ;;  %v21155_v17 = vadd.f32 %v9288_v62, %v9216_v10  ;;  %v21158_v1 = vpack.c.bf16 %v10544_v47, %v10532_v46  ;;  %v16825_v62 = vld [vmem:[%s18182_s0 + $0x360] ss:$12 sps:$4 sm:$0xff]  }
 0x9c3   : > { %v9221_v9 = vpop.f32.mrf.mxu1  ;;  %12653 = vmatmul.mubr.bf16.gmra.mxu1 %v20977_v52  ;;  %12704 = vmatpush2.bf16.msra.mxu0 %v16816_v43  ;;  %v10447_v26 = vadd.f32 1.0, %v17283_v13  ;;  %v21162_v21 = vadd.f32 %v10099_v40, %v21028_v30  ;;  %v10111_v49 = vmul.f32 %v10015_v58, %v21059_v57  ;;  %v21172_v43 = vadd.f32 %v21118_v31, %v9214_v20  ;;  %v16833_v58 = vld [vmem:[%s18182_s0 + $0x34c] ss:$12 sps:$4 sm:$0xff]  }
 0x9c4   : > { %23304 = vst [vmem:[#allocation59_spill] sm:$0xff] %v21158_v1  ;;  %v9222_v19 = vadd.f32 %v9221_v9, %v20871_v0  ;;  %v21166_v39 = vpop.f32.mrf.mxu0  ;;  %12662 = vmatprep.mubr.bf16.mxu1 %v21044_v5  ;;  %12761 = vmatpush1.bf16.msra.mxu1 %v16819_v24  ;;  %v9873_v54 = vmul.f32 0.044715, %v21155_v17  ;;  %v21175_v46 = vadd.f32 %v9290_v37, %v9218_v63  ;;  %v10304_v13 = vmul.f32 0.7978846, %v10208_v60 }
 0x9c5   : > { %12715 = vmatprep.mubr.bf16.mxu0 %v21158_v1  ;;  %v9223_v40 = vpop.f32.mrf.mxu1  ;;  %12705 = vmatprep.subr.bf16.mxu0 %v16824_v2  ;;  %v10531_v10 = vmul.f32 %v10435_v3, %v21075_v50  ;;  %v10123_v24 = vmul.f32 %v10027_v36, %v21087_v59  ;;  %v9932_v44 = vmul.f32 0.044715, %v21132_v35  ;;  %v21183_v31 = vadd.f32 %v21095_v23, %v9102_v6  ;;  %v16828_v60 = vld [vmem:[%s18182_s0 + $0x288] ss:$12 sps:$4 sm:$0xff]  }
 0x9c6   : > { %v9298_v20 = vpop.f32.mrf.mxu0  ;;  %12762 = vmatprep.subr.bf16.mxu1 %v16827_v12  ;;  %v10039_v37 = vmul.f32 %v9943_v32, %v21135_v51  ;;  %v10053_v47 = vmul.f32 %v9957_v55, %v21128_v16  ;;  %v21187_v63 = vadd.f32 %v9294_v38, %v9222_v19  ;;  %v10292_v50 = vmul.f32 0.7978846, %v10196_v33  ;;  %v16831_v12 = vld [vmem:[%s18182_s0 + $0x348] ss:$12 sps:$4 sm:$0xff]  }
 0x9c7   : > { %v9225_v2 = vpop.f32.mrf.mxu1  ;;  %12706 = vmatpush2.bf16.msra.mxu0 %v16822_v8  ;;  %v10543_v3 = vmul.f32 %v10447_v26, %v21084_v29  ;;  %v21192_v36 = vadd.f32 %v10111_v49, %v21059_v57  ;;  %v9969_v23 = vmul.f32 %v9873_v54, %v21155_v17  ;;  %v21199_v38 = vmul.f32 0.5, %v21036_v41  ;;  %v16836_v8 = vld [vmem:[%s18182_s0 + $0x274] ss:$12 sps:$4 sm:$0xff]  }
 0x9c8   : > { %v21195_v6 = vpop.f32.mrf.mxu0  ;;  %12763 = vmatpush1.bf16.msra.mxu1 %v16825_v62  ;;  %12707 = vmatprep.subr.bf16.mxu0 %v16830_v7  ;;  %v17285_v32 = vpop.eup %17284  ;;  %v9862_v55 = vmul.f32 0.044715, %v21172_v43  ;;  %v9874_v33 = vmul.f32 0.044715, %v21175_v46  ;;  %v9226_v29 = vadd.f32 %v9225_v2, %v20871_v0  ;;  %17292 = vtanh.f32 %v10304_v13  ;;  %v16839_v54 = vld [vmem:[%s18182_s0 + $0x334] ss:$12 sps:$4 sm:$0xff]  }
 0x9c9   : > { %v9227_v9 = vpop.f32.mrf.mxu1  ;;  %12764 = vmatprep.subr.bf16.mxu1 %v16833_v58  ;;  %v17287_v26 = vpop.eup %17286  ;;  %v21206_v49 = vadd.f32 %v10123_v24, %v21087_v59  ;;  %v21209_v19 = vmul.f32 %v9932_v44, %v21132_v35  ;;  %v9944_v41 = vmul.f32 0.044715, %v21183_v31  ;;  %v9224_v62 = vadd.f32 %v9223_v40, %v20881_v56  ;;  %v16834_v24 = vld [vmem:[%s18182_s0 + $0x270] ss:$12 sps:$4 sm:$0xff]  }
 0x9ca   : > { %v9304_v7 = vpop.f32.mrf.mxu0  ;;  %v10135_v2 = vmul.f32 %v10039_v37, %v21135_v51  ;;  %v10149_v58 = vadd.f32 %v10053_v47, %v21128_v16  ;;  %v9885_v13 = vmul.f32 0.044715, %v21187_v63  ;;  %17294 = vtanh.f32 %v10292_v50  ;;  %v16842_v37 = vld [vmem:[%s18182_s0 + $0x25c] ss:$12 sps:$4 sm:$0xff]  }
 0x9cb   : > { %v9231_v1 = vpop.f32.mrf.mxu1  ;;  %12663 = vmatmul.mubr.bf16.gmra.mxu1 %v21063_v18  ;;  %12708 = vmatpush2.bf16.msra.mxu0 %v16828_v60  ;;  %v10065_v44 = vmul.f32 %v9969_v23, %v21155_v17  ;;  %v21220_v5 = vadd.f32 %v9298_v20, %v9226_v29  ;;  %v21228_v47 = vmul.f32 0.5, %v21049_v45  ;;  %v9958_v60 = vmul.f32 %v9862_v55, %v21172_v43  ;;  %v16837_v20 = vld [vmem:[%s18182_s0 + $0x330] ss:$12 sps:$4 sm:$0xff]  }
 0x9cc   : > { %v9232_v40 = vadd.f32 %v9231_v1, %v20871_v0  ;;  %v21223_v52 = vpop.f32.mrf.mxu0  ;;  %12672 = vmatprep.mubr.bf16.mxu1 %v21070_v4  ;;  %v17289_v18 = vpop.eup %17288  ;;  %v9970_v50 = vmul.f32 %v9874_v33, %v21175_v46  ;;  %12765 = vmatpush1.bf16.msra.mxu1 %v16831_v12  ;;  %v21233_v29 = vpack.c.bf16 %v10543_v3, %v10531_v10  ;;  %v10472_v1 = vadd.f32 1.0, %v17287_v26  ;;  %v16845_v55 = vld [vmem:[%s18182_s0 + $0x31c] ss:$12 sps:$4 sm:$0xff]  }
 0x9cd   : > { %v9233_v23 = vpop.f32.mrf.mxu1  ;;  %12709 = vmatprep.subr.bf16.mxu0 %v16836_v8  ;;  %v21236_v4 = vmul.f32 %v9944_v41, %v21183_v31  ;;  %v21239_v22 = vadd.f32 %v21166_v39, %v9224_v62  ;;  %v9228_v45 = vadd.f32 %v9227_v9, %v20881_v56  ;;  %12766 = vmatprep.subr.bf16.mxu1 %v16839_v54  ;;  %v10460_v12 = vadd.f32 1.0, %v17285_v32  ;;  %v16840_v41 = vld [vmem:[%s18182_s0 + $0x258] ss:$12 sps:$4 sm:$0xff]  }
 0x9ce   : > { %23305 = vst [vmem:[#allocation60_spill] sm:$0xff] %v21233_v29  ;;  %v9308_v25 = vpop.f32.mrf.mxu0  ;;  %v17291_v33 = vpop.eup %17290  ;;  %v21244_v8 = vadd.f32 %v10135_v2, %v21135_v51  ;;  %v21247_v10 = vmul.f32 0.5, %v21128_v16  ;;  %v10245_v3 = vmul.f32 0.7978846, %v10149_v58  ;;  %v9981_v26 = vmul.f32 %v9885_v13, %v21187_v63  ;;  %v16848_v2 = vld [vmem:[%s18182_s0 + $0x244] ss:$12 sps:$4 sm:$0xff]  }
 0x9cf   : > { %v9235_v39 = vpop.f32.mrf.mxu1  ;;  %12710 = vmatpush2.bf16.msra.mxu0 %v16834_v24  ;;  %v10161_v9 = vadd.f32 %v10065_v44, %v21155_v17  ;;  %v9897_v62 = vmul.f32 0.044715, %v21220_v5  ;;  %v21253_v32 = vadd.f32 %v9304_v7, %v9232_v40  ;;  %v9234_v16 = vadd.f32 %v9233_v23, %v20881_v56  ;;  %v16843_v13 = vld [vmem:[%s18182_s0 + $0x318] ss:$12 sps:$4 sm:$0xff]  }
 0x9d0   : > { %v9236_v54 = vadd.f32 %v9235_v39, %v20871_v0  ;;  %12711 = vmatprep.subr.bf16.mxu0 %v16842_v37  ;;  %v21258_v11 = vpop.f32.mrf.mxu0  ;;  %12767 = vmatpush1.bf16.msra.mxu1 %v16837_v20  ;;  %v10568_v24 = vmul.f32 %v10472_v1, %v21108_v42  ;;  %v10054_v44 = vmul.f32 %v9958_v60, %v21172_v43  ;;  %v9886_v7 = vmul.f32 0.044715, %v21239_v22  ;;  %v16851_v37 = vld [vmem:[%s18182_s0 + $0x304] ss:$12 sps:$4 sm:$0xff]   ;;  %v16846_v42 = vld [vmem:[%s18182_s0 + $0x240] ss:$12 sps:$4 sm:$0xff]  }
 0x9d1   : > { %v9237_v58 = vpop.f32.mrf.mxu1  ;;  %v10066_v27 = vmul.f32 %v9970_v50, %v21175_v46  ;;  %v21266_v40 = vadd.f32 %v21195_v6, %v9228_v45  ;;  %12768 = vmatprep.subr.bf16.mxu1 %v16845_v55  ;;  %v10556_v23 = vmul.f32 %v10460_v12, %v21105_v15  ;;  %v10471_v20 = vadd.f32 1.0, %v17291_v33 }
 0x9d2   : > { %v21270_v39 = vadd.f32 %v9308_v25, %v9236_v54  ;;  %v10459_v60 = vadd.f32 1.0, %v17289_v18  ;;  %v10150_v50 = vadd.f32 %v10054_v44, %v21172_v43  ;;  %v10257_v1 = vmul.f32 0.7978846, %v10161_v9  ;;  %v16863_v25 = vld [vmem:[%s18182_s0 + $0x52c] ss:$12 sps:$4 sm:$0xff]   ;;  %v9314_v33 = vpop.f32.mrf.mxu0 }
 0x9d3   : > { %v9241_v48 = vpop.f32.mrf.mxu1  ;;  %12673 = vmatmul.mubr.bf16.gmra.mxu1 %v21072_v61  ;;  %12712 = vmatpush2.bf16.msra.mxu0 %v16840_v41  ;;  %v10162_v6 = vadd.f32 %v10066_v27, %v21175_v46  ;;  %v10077_v45 = vmul.f32 %v9981_v26, %v21187_v63  ;;  %v9993_v55 = vmul.f32 %v9897_v62, %v21220_v5  ;;  %v9909_v15 = vmul.f32 0.044715, %v21253_v32  ;;  %v16849_v41 = vld [vmem:[%s18182_s0 + $0x300] ss:$12 sps:$4 sm:$0xff]  }
 0x9d4   : > { %12713 = vmatprep.subr.bf16.mxu0 %v16848_v2  ;;  %17296 = vtanh.f32 %v10245_v3  ;;  %v21281_v12 = vadd.f32 %v21223_v52, %v9234_v16  ;;  %12769 = vmatpush1.bf16.msra.mxu1 %v16843_v13  ;;  %v21284_v27 = vpack.c.bf16 %v10568_v24, %v10556_v23  ;;  %v10246_v9 = vmul.f32 0.7978846, %v10150_v50  ;;  %v16854_v52 = vld [vmem:[%s18182_s0 + $0x46c] ss:$12 sps:$4 sm:$0xff]  }
 0x9d5   : > { %v9243_v18 = vpop.f32.mrf.mxu1  ;;  %v17293_v26 = vpop.eup %17292  ;;  %v21287_v62 = vmul.f32 %v9886_v7, %v21239_v22  ;;  %v9898_v54 = vmul.f32 0.044715, %v21266_v40  ;;  %v9238_v2 = vadd.f32 %v9237_v58, %v20881_v56  ;;  %12770 = vmatprep.subr.bf16.mxu1 %v16851_v37  ;;  %v10567_v3 = vmul.f32 %v10471_v20, %v21126_v34  ;;  %v16861_v7 = vld [vmem:[%s18182_s0 + $0x528] ss:$12 sps:$4 sm:$0xff]  }
 0x9d6   : > { %23306 = vst [vmem:[#allocation61_spill] sm:$0xff] %v21284_v27  ;;  %v9921_v16 = vmul.f32 0.044715, %v21270_v39  ;;  %v10555_v24 = vmul.f32 %v10459_v60, %v21100_v14  ;;  %v10258_v44 = vmul.f32 0.7978846, %v10162_v6  ;;  %17298 = vtanh.f32 %v10246_v9 }
 0x9d7   : > { %v9245_v13 = vpop.f32.mrf.mxu1  ;;  %12714 = vmatpush2.bf16.msra.mxu0 %v16846_v42  ;;  %v17295_v23 = vpop.eup %17294  ;;  %17300 = vtanh.f32 %v10257_v1  ;;  %v21297_v50 = vadd.f32 %v10077_v45, %v21187_v63  ;;  %v10089_v58 = vmul.f32 %v9993_v55, %v21220_v5  ;;  %v10005_v34 = vmul.f32 %v9909_v15, %v21253_v32  ;;  %v16869_v37 = vld [vmem:[%s18182_s0 + $0x514] ss:$12 sps:$4 sm:$0xff]  }
 0x9d8   : > { %12829 = vmatprep.subr.bf16.mxu0 %v16863_v25  ;;  %v9910_v20 = vmul.f32 0.044715, %v21281_v12  ;;  %v9242_v14 = vadd.f32 %v9241_v48, %v20871_v0  ;;  %v9316_v42 = vpop.f32.mrf.mxu0  ;;  %12771 = vmatpush1.bf16.msra.mxu1 %v16849_v41  ;;  %v16852_v6 = vld [vmem:[%s18182_s0 + $0x468] ss:$12 sps:$4 sm:$0xff]   ;;  %v10496_v1 = vadd.f32 1.0, %v17293_v26  ;;  %17302 = vtanh.f32 %v10258_v44 }
 0x9d9   : > { %v9247_v60 = vpop.f32.mrf.mxu1  ;;  %v21306_v45 = vmul.f32 %v9898_v54, %v21266_v40  ;;  %v21309_v55 = vadd.f32 %v21258_v11, %v9238_v2  ;;  %12772 = vmatprep.subr.bf16.mxu1 %v16854_v52  ;;  %v16857_v15 = vld [vmem:[%s18182_s0 + $0x454] ss:$12 sps:$4 sm:$0xff]   ;;  %v21313_v25 = vpack.c.bf16 %v10567_v3, %v10555_v24  ;;  %v21316_v48 = vmul.f32 0.5, %v21172_v43  ;;  %v16867_v54 = vld [vmem:[%s18182_s0 + $0x510] ss:$12 sps:$4 sm:$0xff]  }
 0x9da   : > { %12716 = vmatmul.mubr.bf16.vlgmr.msra.gmra.mxu0 %v21233_v29  ;;  %v10017_v41 = vmul.f32 %v9921_v16, %v21270_v39  ;;  %v9244_v9 = vadd.f32 %v9243_v18, %v20881_v56  ;;  %v10484_v26 = vadd.f32 1.0, %v17295_v23  ;;  %v21322_v11 = vmul.f32 0.5, %v21175_v46  ;;  %v16875_v18 = vld [vmem:[%s18182_s0 + $0x4fc] ss:$12 sps:$4 sm:$0xff]   ;;  %v9318_v44 = vpop.f32.mrf.mxu0 }
 0x9db   : > { %23307 = vst [vmem:[#allocation62_spill] sm:$0xff] %v21313_v25  ;;  %12725 = vmatprep.mubr.bf16.mxu0 %v21284_v27  ;;  %12830 = vmatpush1.bf16.msra.mxu0 %v16861_v7  ;;  %v10101_v2 = vmul.f32 %v10005_v34, %v21253_v32  ;;  %v9246_v52 = vadd.f32 %v9245_v13, %v20871_v0  ;;  %v10291_v43 = vmul.f32 0.7978846, %v21162_v21  ;;  %v10303_v3 = vmul.f32 0.7978846, %v21192_v36  ;;  %v21338_v7 = vpop.f32.mrf.mxu1 }
 0x9dc   : > { %12831 = vmatprep.subr.bf16.mxu0 %v16869_v37  ;;  %v21331_v16 = vadd.f32 %v10089_v58, %v21220_v5  ;;  %v21334_v24 = vmul.f32 %v9910_v20, %v21281_v12  ;;  %v21336_v46 = vadd.f32 %v9314_v33, %v9242_v14  ;;  %12773 = vmatpush2.bf16.msra.mxu1 %v16852_v6  ;;  %v16855_v0 = vld [vmem:[%s18182_s0 + $0x450] ss:$12 sps:$4 sm:$0xff]   ;;  %v9922_v36 = vmul.f32 0.044715, %v21309_v55  ;;  %v16858_v14 = vld [vmem:[%s18182_s0 + $0x438] ss:$12 sps:$4 sm:$0xff]  }
 0x9dd   : > { %v10592_v21 = vmul.f32 %v10496_v1, %v21228_v47  ;;  %v9248_v13 = vadd.f32 %v9247_v60, %v20881_v56  ;;  %12774 = vmatprep.subr.bf16.mxu1 %v16857_v15  ;;  %v16860_v23 = vld [vmem:[%s18182_s0 + $0x43c] ss:$12 sps:$4 sm:$0xff]   ;;  %17304 = vtanh.f32 %v10291_v43  ;;  %v10124_v33 = vmul.f32 %v21209_v19, %v21132_v35  ;;  %v16873_v47 = vld [vmem:[%s18182_s0 + $0x4f8] ss:$12 sps:$4 sm:$0xff]   ;;  %v21363_v1 = vpop.f32.mrf.mxu1  ;;  %v16979_v27 = vld [vmem:[%s18182_s0 + $0x814] ss:$12 sps:$4 sm:$0xff]  }
 0x9de   : > { %v10113_v58 = vmul.f32 %v10017_v41, %v21270_v39  ;;  %v21348_v34 = vadd.f32 %v9316_v42, %v9244_v9  ;;  %v10580_v37 = vmul.f32 %v10484_v26, %v21199_v38  ;;  %17306 = vtanh.f32 %v10303_v3  ;;  %v16881_v42 = vld [vmem:[%s18182_s0 + $0x4e4] ss:$12 sps:$4 sm:$0xff]   ;;  %v9320_v38 = vpop.f32.mrf.mxu0 }
 0x9df   : > { %12832 = vmatpush1.bf16.msra.mxu0 %v16867_v54  ;;  %v21353_v20 = vadd.f32 %v10101_v2, %v21253_v32  ;;  %v21355_v56 = vadd.f32 %v9318_v44, %v9246_v52  ;;  %v10136_v60 = vmul.f32 %v21236_v4, %v21183_v31  ;;  %v10220_v19 = vadd.f32 %v10124_v33, %v21132_v35  ;;  %v16866_v2 = vld [vmem:[%s18182_s0 + $0x424] ss:$12 sps:$4 sm:$0xff]  }
 0x9e0   : > { %12833 = vmatprep.subr.bf16.mxu0 %v16875_v18  ;;  %v9933_v6 = vmul.f32 0.044715, %v21336_v46  ;;  %12775 = vmatpush2.bf16.msra.mxu1 %v16855_v0  ;;  %v21365_v15 = vpack.c.bf16 %v10592_v21, %v10580_v37  ;;  %v10315_v41 = vmul.f32 0.7978846, %v21206_v49  ;;  %v10327_v9 = vmul.f32 0.7978846, %v21244_v8 }
 0x9e1   : > { %v21369_v26 = vpop.eup %17296  ;;  %v10018_v4 = vmul.f32 %v9922_v36, %v21309_v55  ;;  %v21372_v54 = vadd.f32 %v9320_v38, %v9248_v13  ;;  %12776 = vmatprep.subr.bf16.mxu1 %v16860_v23  ;;  %v10232_v52 = vadd.f32 %v10136_v60, %v21183_v31  ;;  %v10316_v43 = vmul.f32 0.7978846, %v10220_v19  ;;  %v16879_v8 = vld [vmem:[%s18182_s0 + $0x4e0] ss:$12 sps:$4 sm:$0xff]   ;;  %v16885_v38 = vld [vmem:[%s18182_s0 + $0x4c8] ss:$12 sps:$4 sm:$0xff]  }
 0x9e2   : > { %23308 = vst [vmem:[#allocation63_spill] sm:$0xff] %v21365_v15  ;;  %12726 = vmatmul.mubr.bf16.gmra.mxu0 %v21313_v25  ;;  %v21378_v3 = vadd.f32 %v10113_v58, %v21270_v39  ;;  %v9934_v49 = vmul.f32 0.044715, %v21348_v34  ;;  %17308 = vtanh.f32 %v10315_v41  ;;  %v10078_v18 = vmul.f32 %v21287_v62, %v21239_v22  ;;  %v16887_v36 = vld [vmem:[%s18182_s0 + $0x4cc] ss:$12 sps:$4 sm:$0xff]   ;;  %v21392_v58 = vpop.f32.mrf.mxu1 }
 0x9e3   : > { %12735 = vmatprep.mubr.bf16.mxu0 %v21365_v15  ;;  %12834 = vmatpush1.bf16.msra.mxu0 %v16873_v47  ;;  %v17299_v44 = vpop.eup %17298  ;;  %v9945_v0 = vmul.f32 0.044715, %v21355_v56  ;;  %v10328_v21 = vmul.f32 0.7978846, %v10232_v52  ;;  %17310 = vtanh.f32 %v10316_v43  ;;  %v10090_v13 = vmul.f32 %v21306_v45, %v21266_v40  ;;  %v16864_v62 = vld [vmem:[%s18182_s0 + $0x420] ss:$12 sps:$4 sm:$0xff]  }
 0x9e4   : > { %12835 = vmatprep.subr.bf16.mxu0 %v16881_v42  ;;  %v21389_v23 = vpop.eup %17300  ;;  %v10029_v33 = vmul.f32 %v9933_v6, %v21336_v46  ;;  %12777 = vmatpush2.bf16.msra.mxu1 %v16858_v14  ;;  %v10438_v37 = vadd.f32 1.0, %v17299_v44  ;;  %v16872_v47 = vld [vmem:[%s18182_s0 + $0x40c] ss:$12 sps:$4 sm:$0xff]   ;;  %17312 = vtanh.f32 %v10327_v9  ;;  %v10174_v60 = vadd.f32 %v10078_v18, %v21239_v22  ;;  %v16893_v18 = vld [vmem:[%s18182_s0 + $0x4b4] ss:$12 sps:$4 sm:$0xff]  }
 0x9e5   : > { %v17303_v19 = vpop.eup %17302  ;;  %v9946_v42 = vmul.f32 0.044715, %v21372_v54  ;;  %12778 = vmatprep.subr.bf16.mxu1 %v16866_v2  ;;  %v9811_v45 = vmul.f32 0.5, %v21028_v30  ;;  %17314 = vtanh.f32 %v10328_v21  ;;  %v10186_v6 = vadd.f32 %v10090_v13, %v21266_v40  ;;  %v21408_v21 = vpop.f32.mrf.mxu1 }
 0x9e6   : > { %v10030_v14 = vmul.f32 %v9934_v49, %v21348_v34  ;;  %v10450_v41 = vadd.f32 1.0, %v17303_v19  ;;  %v10270_v52 = vmul.f32 0.7978846, %v10174_v60  ;;  %v10281_v9 = vmul.f32 0.7978846, %v21331_v16 }
 0x9e7   : > { %12836 = vmatpush1.bf16.msra.mxu0 %v16879_v8  ;;  %v10041_v43 = vmul.f32 %v9945_v0, %v21355_v56  ;;  %v10282_v2 = vmul.f32 0.7978846, %v10186_v6  ;;  %v10269_v30 = vmul.f32 0.7978846, %v21297_v50  ;;  %v10102_v44 = vmul.f32 %v21334_v24, %v21281_v12  ;;  %v16870_v16 = vld [vmem:[%s18182_s0 + $0x408] ss:$12 sps:$4 sm:$0xff]   ;;  %v21425_v6 = vpop.f32.mrf.mxu1 }
 0x9e8   : > { %12837 = vmatprep.subr.bf16.mxu0 %v16887_v36  ;;  %v10534_v49 = vmul.f32 %v10438_v37, %v21316_v48  ;;  %v10546_v8 = vmul.f32 %v10450_v41, %v21322_v11  ;;  %12779 = vmatpush2.bf16.msra.mxu1 %v16864_v62  ;;  %17316 = vtanh.f32 %v10270_v52  ;;  %v10114_v0 = vmul.f32 %v10018_v4, %v21309_v55  ;;  %v16878_v50 = vld [vmem:[%s18182_s0 + $0x3f4] ss:$12 sps:$4 sm:$0xff]   ;;  %v16891_v11 = vld [vmem:[%s18182_s0 + $0x4b0] ss:$12 sps:$4 sm:$0xff]  }
 0x9e9   : > { %v10042_v36 = vmul.f32 %v9946_v42, %v21372_v54  ;;  %12780 = vmatprep.subr.bf16.mxu1 %v16872_v47  ;;  %17318 = vtanh.f32 %v10282_v2  ;;  %v10198_v24 = vadd.f32 %v10102_v44, %v21281_v12  ;;  %v10293_v13 = vmul.f32 0.7978846, %v21353_v20  ;;  %v16896_v42 = vld [vmem:[%s18182_s0 + $0x49c] ss:$12 sps:$4 sm:$0xff]  }
 0x9ea   : > { %v17305_v60 = vpop.eup %17304  ;;  %v10125_v48 = vmul.f32 %v10029_v33, %v21336_v46  ;;  %v21419_v37 = vpack.c.bf16 %v10546_v8, %v10534_v49  ;;  %17320 = vtanh.f32 %v10281_v9  ;;  %v10210_v4 = vadd.f32 %v10114_v0, %v21309_v55  ;;  %v16876_v41 = vld [vmem:[%s18182_s0 + $0x3f0] ss:$12 sps:$4 sm:$0xff]   ;;  %v16882_v49 = vld [vmem:[%s18182_s0 + $0x3d8] ss:$12 sps:$4 sm:$0xff]  }
 0x9eb   : > { %12838 = vmatpush1.bf16.msra.mxu0 %v16885_v38  ;;  %v17307_v62 = vpop.eup %17306  ;;  %v10137_v47 = vmul.f32 %v10041_v43, %v21355_v56  ;;  %v10483_v19 = vadd.f32 1.0, %v17305_v60  ;;  %17322 = vtanh.f32 %v10269_v30  ;;  %v10294_v20 = vmul.f32 0.7978846, %v10198_v24  ;;  %v16884_v9 = vld [vmem:[%s18182_s0 + $0x3dc] ss:$12 sps:$4 sm:$0xff]   ;;  %v21444_v60 = vpop.f32.mrf.mxu1 }
 0x9ec   : > { %12839 = vmatprep.subr.bf16.mxu0 %v16893_v18  ;;  %12788 = vmatprep.mubr.bf16.mxu1 %v21419_v37  ;;  %v9823_v33 = vmul.f32 0.5, %v21059_v57  ;;  %v10495_v38 = vadd.f32 1.0, %v17307_v62  ;;  %v10306_v52 = vmul.f32 0.7978846, %v10210_v4  ;;  %17324 = vtanh.f32 %v10293_v13  ;;  %v16894_v24 = vld [vmem:[%s18182_s0 + $0x498] ss:$12 sps:$4 sm:$0xff]  }
 0x9ed   : > { %12781 = vmatpush2.bf16.msra.mxu1 %v16870_v16  ;;  %17326 = vtanh.f32 %v10294_v20  ;;  %v10305_v43 = vmul.f32 0.7978846, %v21378_v3  ;;  %v10126_v18 = vmul.f32 %v10030_v14, %v21348_v34  ;;  %v10138_v2 = vmul.f32 %v10042_v36, %v21372_v54 }
 0x9ee   : > { %12782 = vmatprep.subr.bf16.mxu1 %v16878_v50  ;;  %v10221_v30 = vadd.f32 %v10125_v48, %v21336_v46  ;;  %v10579_v44 = vmul.f32 %v10483_v19, %v9811_v45  ;;  %v10591_v57 = vmul.f32 %v10495_v38, %v9823_v33  ;;  %17328 = vtanh.f32 %v10306_v52  ;;  %v16890_v50 = vld [vmem:[%s18182_s0 + $0x3c4] ss:$12 sps:$4 sm:$0xff]  }
 0x9ef   : > { %12840 = vmatpush1.bf16.msra.mxu0 %v16891_v11  ;;  %v17309_v8 = vpop.eup %17308  ;;  %v9777_v16 = vmul.f32 0.5, %v21155_v17  ;;  %v10233_v0 = vadd.f32 %v10137_v47, %v21355_v56  ;;  %v10222_v3 = vadd.f32 %v10126_v18, %v21348_v34  ;;  %v10234_v14 = vadd.f32 %v10138_v2, %v21372_v54  ;;  %v16899_v11 = vld [vmem:[%s18182_s0 + $0x484] ss:$12 sps:$4 sm:$0xff]   ;;  %v16888_v2 = vld [vmem:[%s18182_s0 + $0x3c0] ss:$12 sps:$4 sm:$0xff]  }
 0x9f0   : > { %12841 = vmatprep.subr.bf16.mxu0 %v16896_v42  ;;  %v17311_v36 = vpop.eup %17310  ;;  %v10437_v45 = vadd.f32 1.0, %v21369_v26  ;;  %v10449_v13 = vadd.f32 1.0, %v21389_v23  ;;  %v21446_v48 = vpack.c.bf16 %v10591_v57, %v10579_v44  ;;  %v9836_v17 = vmul.f32 0.5, %v21132_v35 }
 0x9f1   : > { %12783 = vmatpush2.bf16.msra.mxu1 %v16876_v41  ;;  %v17313_v4 = vpop.eup %17312  ;;  %v10508_v62 = vadd.f32 1.0, %v17311_v36  ;;  %17330 = vtanh.f32 %v10305_v43  ;;  %v10318_v47 = vmul.f32 0.7978846, %v10222_v3  ;;  %v10330_v19 = vmul.f32 0.7978846, %v10234_v14 }
 0x9f2   : > { %23309 = vst [vmem:[#allocation64_spill] sm:$0xff] %v21446_v48  ;;  %12784 = vmatprep.subr.bf16.mxu1 %v16884_v9  ;;  %v17315_v42 = vpop.eup %17314  ;;  %12736 = vmatmul.mubr.bf16.gmra.mxu0 %v21446_v48  ;;  %v9847_v26 = vmul.f32 0.5, %v21135_v51  ;;  %v10507_v23 = vadd.f32 1.0, %v17309_v8  ;;  %v10519_v20 = vadd.f32 1.0, %v17313_v4  ;;  %v10317_v35 = vmul.f32 0.7978846, %v10221_v30  ;;  %v21454_v9 = vpop.f32.mrf.mxu1 }
 0x9f3   : > { %v9848_v33 = vmul.f32 0.5, %v21183_v31  ;;  %v10520_v38 = vadd.f32 1.0, %v17315_v42  ;;  %12842 = vmatpush1.bf16.msra.mxu0 %v16894_v24  ;;  %v16897_v41 = vld [vmem:[%s18182_s0 + $0x480] ss:$12 sps:$4 sm:$0xff]   ;;  %17332 = vtanh.f32 %v10318_v47  ;;  %v10329_v52 = vmul.f32 0.7978846, %v10233_v0 }
 0x9f4   : > { %v9835_v43 = vmul.f32 0.5, %v21087_v59  ;;  %v10615_v18 = vmul.f32 %v10519_v20, %v9847_v26  ;;  %v17472_v51 = vld [vmem:[%s18146_s23] sm:$0xff]  ;;  %v23310_v44 = vsub.s32 6, %v18482_v28  ;;  %12843 = vmatprep.subr.bf16.mxu0 %v16899_v11  ;;  %17334 = vtanh.f32 %v10330_v19 }
 0x9f5   : > { %12785 = vmatpush2.bf16.msra.mxu1 %v16882_v49  ;;  %v16902_v31 = vld [vmem:[%s18182_s0 + $0x5ec] ss:$12 sps:$4 sm:$0xff]   ;;  %v17317_v30 = vpop.eup %17316  ;;  %v10533_v8 = vmul.f32 %v10437_v45, %v21247_v10  ;;  %v10545_v0 = vmul.f32 %v10449_v13, %v9777_v16  ;;  %v10604_v24 = vmul.f32 %v10508_v62, %v9836_v17  ;;  %v10616_v3 = vmul.f32 %v10520_v38, %v9848_v33  ;;  %v16900_v16 = vld [vmem:[%s18182_s0 + $0x5e8] ss:$12 sps:$4 sm:$0xff]  }
 0x9f6   : > { %v21461_v57 = vrot.slane %v17472_v51, %v23310_v44  ;;  %12786 = vmatprep.subr.bf16.mxu1 %v16890_v50  ;;  %v16905_v59 = vld [vmem:[%s18182_s0 + $0x6ac] ss:$12 sps:$4 sm:$0xff]   ;;  %v17319_v14 = vpop.eup %17318  ;;  %v10603_v49 = vmul.f32 %v10507_v23, %v9835_v43  ;;  %v9790_v36 = vmul.f32 0.5, %v21239_v22  ;;  %v10462_v4 = vadd.f32 1.0, %v17317_v30  ;;  %v21471_v50 = vpop.f32.mrf.mxu1  ;;  %v16903_v62 = vld [vmem:[%s18182_s0 + $0x6a8] ss:$12 sps:$4 sm:$0xff]  }
 0x9f7   : > { %17336 = vtanh.f32 %v10317_v35  ;;  %v17321_v11 = vpop.eup %17320  ;;  %v21467_v47 = vpack.c.bf16 %v10616_v3, %v10604_v24  ;;  %v9802_v19 = vmul.f32 0.5, %v21266_v40  ;;  %v10474_v10 = vadd.f32 1.0, %v17319_v14  ;;  %12844 = vmatpush1.bf16.msra.mxu0 %v16897_v41  ;;  %v16908_v42 = vld [vmem:[%s18182_s0 + $0x5d4] ss:$12 sps:$4 sm:$0xff]   ;;  %v16906_v30 = vld [vmem:[%s18182_s0 + $0x5d0] ss:$12 sps:$4 sm:$0xff]  }
 0x9f8   : > { %17338 = vtanh.f32 %v10329_v52  ;;  %v17323_v45 = vpop.eup %17322  ;;  %v21473_v13 = vpack.c.bf16 %v10615_v18, %v10603_v49  ;;  %v23313_v22 = vsub.s32 7, %v18482_v28  ;;  %12845 = vmatprep.subr.bf16.mxu0 %v16902_v31  ;;  %v21482_v23 = vpack.c.bf16 %v10545_v0, %v10533_v8  ;;  %v16911_v38 = vld [vmem:[%s18182_s0 + $0x694] ss:$12 sps:$4 sm:$0xff]   ;;  %v21493_v8 = vpop.f32.mrf.mxu1  ;;  %v16914_v14 = vld [vmem:[%s18182_s0 + $0x5bc] ss:$12 sps:$4 sm:$0xff]  }
 0x9f9   : > { %23311 = vst [vmem:[#allocation65_spill] sm:$0xff] %v21467_v47  ;;  %12787 = vmatpush2.bf16.msra.mxu1 %v16888_v2  ;;  %v17325_v26 = vpop.eup %17324  ;;  %12745 = vmatprep.mubr.bf16.mxu0 %v21467_v47  ;;  %v10558_v20 = vmul.f32 %v10462_v4, %v9790_v36  ;;  %v10570_v35 = vmul.f32 %v10474_v10, %v9802_v19  ;;  %v10473_v33 = vadd.f32 1.0, %v17321_v11  ;;  %v9789_v52 = vmul.f32 0.5, %v21187_v63  ;;  %v16917_v11 = vld [vmem:[%s18182_s0 + $0x67c] ss:$12 sps:$4 sm:$0xff]  }
 0x9fa   : > { %23312 = vst [vmem:[#allocation66_spill] sm:$0xff] %v21473_v13  ;;  %v21477_v17 = vrot.slane %v17472_v51, %v23313_v22  ;;  %v9357_v40 = vpop.f32.mrf.mxu0  ;;  %12902 = vmatprep.subr.bf16.mxu1 %v16905_v59  ;;  %v17327_v41 = vpop.eup %17326  ;;  %12746 = vmatmul.mubr.bf16.gmra.mxu0 %v21473_v13  ;;  %v9801_v51 = vmul.f32 0.5, %v21220_v5  ;;  %v10461_v44 = vadd.f32 1.0, %v17323_v45  ;;  %v9814_v24 = vmul.f32 0.5, %v21281_v12  ;;  %v16909_v59 = vld [vmem:[%s18182_s0 + $0x690] ss:$12 sps:$4 sm:$0xff]  }
 0x9fb   : > { %v9358_v28 = vadd.f32 %v9357_v40, %v21461_v57  ;;  %v17329_v43 = vpop.eup %17328  ;;  %v21489_v2 = vpack.c.bf16 %v10570_v35, %v10558_v20  ;;  %v10486_v31 = vadd.f32 1.0, %v17327_v41  ;;  %12846 = vmatpush2.bf16.msra.mxu0 %v16900_v16  ;;  %v9826_v36 = vmul.f32 0.5, %v21309_v55  ;;  %v21514_v20 = vpop.f32.mrf.mxu1  ;;  %v16920_v41 = vld [vmem:[%s18182_s0 + $0x5a4] ss:$12 sps:$4 sm:$0xff]  }
 0x9fc   : > { %12789 = vmatmul.mubr.bf16.vlgmr.msra.gmra.mxu1 %v21482_v23  ;;  %v9359_v18 = vpop.f32.mrf.mxu0  ;;  %v10498_v3 = vadd.f32 1.0, %v17329_v43  ;;  %12847 = vmatprep.subr.bf16.mxu0 %v16908_v42  ;;  %v10569_v49 = vmul.f32 %v10473_v33, %v9801_v51  ;;  %v9825_v4 = vmul.f32 0.5, %v21270_v39  ;;  %v10485_v45 = vadd.f32 1.0, %v17325_v26  ;;  %v16912_v39 = vld [vmem:[%s18182_s0 + $0x5b8] ss:$12 sps:$4 sm:$0xff]  }
 0x9fd   : > { %v21496_v0 = vadd.f32 %v21338_v7, %v9358_v28  ;;  %v9360_v63 = vadd.f32 %v9359_v18, %v21477_v17  ;;  %12903 = vmatpush1.bf16.msra.mxu1 %v16903_v62  ;;  %12798 = vmatprep.mubr.bf16.mxu1 %v21489_v2  ;;  %v9813_v7 = vmul.f32 0.5, %v21253_v32  ;;  %v10557_v55 = vmul.f32 %v10461_v44, %v9789_v52  ;;  %v16923_v51 = vld [vmem:[%s18182_s0 + $0x664] ss:$12 sps:$4 sm:$0xff]  }
 0x9fe   : > { %v9361_v5 = vpop.f32.mrf.mxu0  ;;  %12904 = vmatprep.subr.bf16.mxu1 %v16911_v38  ;;  %v17331_v19 = vpop.eup %17330  ;;  %v10582_v62 = vmul.f32 %v10486_v31, %v9814_v24  ;;  %v10594_v42 = vmul.f32 %v10498_v3, %v9826_v36  ;;  %v9838_v32 = vmul.f32 0.5, %v21348_v34  ;;  %v9850_v33 = vmul.f32 0.5, %v21372_v54  ;;  %v16915_v38 = vld [vmem:[%s18182_s0 + $0x678] ss:$12 sps:$4 sm:$0xff]  }
 0x9ff   : > { %v9863_v12 = vmul.f32 0.044715, %v21496_v0  ;;  %v21509_v10 = vadd.f32 %v21363_v1, %v9360_v63  ;;  %v9362_v16 = vadd.f32 %v9361_v5, %v21461_v57  ;;  %12848 = vmatpush2.bf16.msra.mxu0 %v16906_v30  ;;  %v21525_v43 = vpack.c.bf16 %v10569_v49, %v10557_v55  ;;  %v16918_v5 = vld [vmem:[%s18182_s0 + $0x5a0] ss:$12 sps:$4 sm:$0xff]   ;;  %v21541_v36 = vpop.f32.mrf.mxu1 }
 0xa00   : > { %v9363_v22 = vpop.f32.mrf.mxu0  ;;  %v17333_v40 = vpop.eup %17332  ;;  %12849 = vmatprep.subr.bf16.mxu0 %v16914_v14  ;;  %v10497_v18 = vadd.f32 1.0, %v17331_v19  ;;  %v21533_v31 = vpack.c.bf16 %v10594_v42, %v10582_v62  ;;  %v10581_v30 = vmul.f32 %v10485_v45, %v9813_v7  ;;  %v16921_v19 = vld [vmem:[%s18182_s0 + $0x660] ss:$12 sps:$4 sm:$0xff]  }
 0xa01   : > { %v9959_v1 = vmul.f32 %v9863_v12, %v21496_v0  ;;  %v21518_v35 = vadd.f32 %v21392_v58, %v9362_v16  ;;  %v9364_v26 = vadd.f32 %v9363_v22, %v21477_v17  ;;  %12905 = vmatpush1.bf16.msra.mxu1 %v16909_v59  ;;  %v17335_v28 = vpop.eup %17334  ;;  %v9864_v34 = vmul.f32 0.044715, %v21509_v10  ;;  %23314 = vst [vmem:[#allocation67_spill] sm:$0xff] %v21525_v43  ;;  %v16926_v16 = vld [vmem:[%s18182_s0 + $0x58c] ss:$12 sps:$4 sm:$0xff]  }
 0xa02   : > { %v9367_v52 = vpop.f32.mrf.mxu0  ;;  %12906 = vmatprep.subr.bf16.mxu1 %v16917_v11  ;;  %v21529_v58 = vmul.f32 0.5, %v21336_v46  ;;  %23315 = vst [vmem:[#allocation68_spill] sm:$0xff] %v21533_v31  ;;  %v10510_v46 = vadd.f32 1.0, %v17333_v40  ;;  %v10522_v14 = vadd.f32 1.0, %v17335_v28  ;;  %v9849_v12 = vmul.f32 0.5, %v21355_v56 }
 0xa03   : > { %v10055_v44 = vmul.f32 %v9959_v1, %v21496_v0  ;;  %v9875_v54 = vmul.f32 0.044715, %v21518_v35  ;;  %v21536_v24 = vadd.f32 %v21408_v21, %v9364_v26  ;;  %v9368_v3 = vadd.f32 %v9367_v52, %v21461_v57  ;;  %12850 = vmatpush2.bf16.msra.mxu0 %v16912_v39  ;;  %v16929_v39 = vld [vmem:[%s18182_s0 + $0x64c] ss:$12 sps:$4 sm:$0xff]   ;;  %v21563_v52 = vpop.f32.mrf.mxu1 }
 0xa04   : > { %v17337_v63 = vpop.eup %17336  ;;  %12799 = vmatmul.mubr.bf16.gmra.mxu1 %v21525_v43  ;;  %v9369_v59 = vpop.f32.mrf.mxu0  ;;  %v9960_v45 = vmul.f32 %v9864_v34, %v21509_v10  ;;  %v10593_v42 = vmul.f32 %v10497_v18, %v9825_v4  ;;  %12851 = vmatprep.subr.bf16.mxu0 %v16920_v41  ;;  %v10618_v26 = vmul.f32 %v10522_v14, %v9850_v33  ;;  %v16924_v41 = vld [vmem:[%s18182_s0 + $0x588] ss:$12 sps:$4 sm:$0xff]  }
 0xa05   : > { %v17339_v49 = vpop.eup %17338  ;;  %v10151_v7 = vadd.f32 %v10055_v44, %v21496_v0  ;;  %v9971_v11 = vmul.f32 %v9875_v54, %v21518_v35  ;;  %v9370_v21 = vadd.f32 %v9369_v59, %v21477_v17  ;;  %12808 = vmatprep.mubr.bf16.mxu1 %v21533_v31  ;;  %12907 = vmatpush1.bf16.msra.mxu1 %v16915_v38  ;;  %v9876_v22 = vmul.f32 0.044715, %v21536_v24  ;;  %v16927_v33 = vld [vmem:[%s18182_s0 + $0x648] ss:$12 sps:$4 sm:$0xff]  }
 0xa06   : > { %v21553_v55 = vadd.f32 %v21425_v6, %v9368_v3  ;;  %v9371_v62 = vpop.f32.mrf.mxu0  ;;  %12908 = vmatprep.subr.bf16.mxu1 %v16923_v51  ;;  %v10606_v6 = vmul.f32 %v10510_v46, %v9838_v32  ;;  %v10509_v34 = vadd.f32 1.0, %v17337_v63  ;;  %v10521_v4 = vadd.f32 1.0, %v17339_v49  ;;  %v16932_v59 = vld [vmem:[%s18182_s0 + $0x574] ss:$12 sps:$4 sm:$0xff]  }
 0xa07   : > { %v10067_v40 = vmul.f32 %v9971_v11, %v21518_v35  ;;  %v21558_v1 = vadd.f32 %v21444_v60, %v9370_v21  ;;  %v9372_v56 = vadd.f32 %v9371_v62, %v21461_v57  ;;  %v9972_v38 = vmul.f32 %v9876_v22, %v21536_v24  ;;  %12852 = vmatpush2.bf16.msra.mxu0 %v16918_v5  ;;  %v16935_v46 = vld [vmem:[%s18182_s0 + $0x634] ss:$12 sps:$4 sm:$0xff]   ;;  %v16930_v21 = vld [vmem:[%s18182_s0 + $0x570] ss:$12 sps:$4 sm:$0xff]  }
 0xa08   : > { %v9373_v28 = vpop.f32.mrf.mxu0  ;;  %v10247_v18 = vmul.f32 0.7978846, %v10151_v7  ;;  %v9887_v51 = vmul.f32 0.044715, %v21553_v55  ;;  %12853 = vmatprep.subr.bf16.mxu0 %v16926_v16  ;;  %v21573_v3 = vpack.c.bf16 %v10593_v42, %v10581_v30  ;;  %v10056_v14 = vmul.f32 %v9960_v45, %v21509_v10  ;;  %v21588_v16 = vpop.f32.mrf.mxu1  ;;  %v16938_v42 = vld [vmem:[%s18182_s0 + $0x55c] ss:$12 sps:$4 sm:$0xff]  }
 0xa09   : > { %v10163_v60 = vadd.f32 %v10067_v40, %v21518_v35  ;;  %v21568_v44 = vadd.f32 %v21454_v9, %v9372_v56  ;;  %12909 = vmatpush1.bf16.msra.mxu1 %v16921_v19  ;;  %v9888_v32 = vmul.f32 0.044715, %v21558_v1  ;;  %v9374_v54 = vadd.f32 %v9373_v28, %v21477_v17 }
 0xa0a   : > { %v9377_v63 = vpop.f32.mrf.mxu0  ;;  %23316 = vst [vmem:[#allocation69_spill] sm:$0xff] %v21573_v3  ;;  %12910 = vmatprep.subr.bf16.mxu1 %v16929_v39  ;;  %v21580_v7 = vpack.c.bf16 %v10618_v26, %v10606_v6  ;;  %v10068_v19 = vmul.f32 %v9972_v38, %v21536_v24  ;;  %17340 = vtanh.f32 %v10247_v18  ;;  %v9983_v45 = vmul.f32 %v9887_v51, %v21553_v55  ;;  %v16941_v26 = vld [vmem:[%s18182_s0 + $0x61c] ss:$12 sps:$4 sm:$0xff]   ;;  %v16936_v18 = vld [vmem:[%s18182_s0 + $0x558] ss:$12 sps:$4 sm:$0xff]  }
 0xa0b   : > { %v10259_v5 = vmul.f32 0.7978846, %v10163_v60  ;;  %v9899_v9 = vmul.f32 0.044715, %v21568_v44  ;;  %v9378_v49 = vadd.f32 %v9377_v63, %v21461_v57  ;;  %v21583_v11 = vadd.f32 %v21471_v50, %v9374_v54  ;;  %12854 = vmatpush2.bf16.msra.mxu0 %v16924_v41  ;;  %v16933_v50 = vld [vmem:[%s18182_s0 + $0x630] ss:$12 sps:$4 sm:$0xff]  }
 0xa0c   : > { %23317 = vst [vmem:[#allocation70_spill] sm:$0xff] %v21580_v7  ;;  %12809 = vmatmul.mubr.bf16.gmra.mxu1 %v21573_v3  ;;  %v9379_v30 = vpop.f32.mrf.mxu0  ;;  %v10605_v22 = vmul.f32 %v10509_v34, %v21529_v58  ;;  %v10617_v62 = vmul.f32 %v10521_v4, %v9849_v12  ;;  %v9984_v39 = vmul.f32 %v9888_v32, %v21558_v1  ;;  %v21708_v15 = vmul.f32 0.5, %v21553_v55 }
 0xa0d   : > { %12818 = vmatprep.mubr.bf16.mxu1 %v21580_v7  ;;  %12911 = vmatpush1.bf16.msra.mxu1 %v16927_v33  ;;  %v9900_v40 = vmul.f32 0.044715, %v21583_v11  ;;  %v10152_v38 = vadd.f32 %v10056_v14, %v21509_v10  ;;  %v10164_v28 = vadd.f32 %v10068_v19, %v21536_v24  ;;  %17342 = vtanh.f32 %v10259_v5  ;;  %v21608_v33 = vpop.f32.mrf.mxu1  ;;  %v21625_v19 = vld [vmem:[%s18146_s23 + $0x8] sm:$0xf] }
 0xa0e   : > { %v9381_v56 = vpop.f32.mrf.mxu0  ;;  %12855 = vmatprep.subr.bf16.mxu0 %v16932_v59  ;;  %12912 = vmatprep.subr.bf16.mxu1 %v16935_v46  ;;  %v9995_v58 = vmul.f32 %v9899_v9, %v21568_v44  ;;  %v21602_v12 = vadd.f32 %v21493_v8, %v9378_v49  ;;  %v9380_v6 = vadd.f32 %v9379_v30, %v21477_v17  ;;  %v16939_v8 = vld [vmem:[%s18182_s0 + $0x618] ss:$12 sps:$4 sm:$0xff]  }
 0xa0f   : > { %v9996_v34 = vmul.f32 %v9900_v40, %v21583_v11  ;;  %v9382_v4 = vadd.f32 %v9381_v56, %v21461_v57  ;;  %12856 = vmatpush2.bf16.msra.mxu0 %v16930_v21  ;;  %v10248_v60 = vmul.f32 0.7978846, %v10152_v38  ;;  %v10260_v51 = vmul.f32 0.7978846, %v10164_v28  ;;  %v16944_v59 = vld [vmem:[%s18182_s0 + $0x544] ss:$12 sps:$4 sm:$0xff]  }
 0xa10   : > { %v9383_v41 = vpop.f32.mrf.mxu0  ;;  %v21610_v32 = vpack.c.bf16 %v10617_v62, %v10605_v22  ;;  %12857 = vmatprep.subr.bf16.mxu0 %v16938_v42  ;;  %v10079_v54 = vmul.f32 %v9983_v45, %v21553_v55  ;;  %v16947_v46 = vld [vmem:[%s18182_s0 + $0x604] ss:$12 sps:$4 sm:$0xff]   ;;  %v10080_v14 = vmul.f32 %v9984_v39, %v21558_v1  ;;  %v10091_v9 = vmul.f32 %v9995_v58, %v21568_v44  ;;  %v16942_v62 = vld [vmem:[%s18182_s0 + $0x540] ss:$12 sps:$4 sm:$0xff]  }
 0xa11   : > { %12913 = vmatpush1.bf16.msra.mxu1 %v16933_v50  ;;  %17344 = vtanh.f32 %v10248_v60  ;;  %v10092_v5 = vmul.f32 %v9996_v34, %v21583_v11  ;;  %v9911_v49 = vmul.f32 0.044715, %v21602_v12  ;;  %v21621_v30 = vadd.f32 %v21514_v20, %v9380_v6  ;;  %v9464_v20 = vpop.f32.mrf.mxu1  ;;  %v16945_v39 = vld [vmem:[%s18182_s0 + $0x600] ss:$12 sps:$4 sm:$0xff]  }
 0xa12   : > { %23318 = vst [vmem:[#allocation71_spill] sm:$0xff] %v21610_v32  ;;  %v9387_v63 = vpop.f32.mrf.mxu0  ;;  %12914 = vmatprep.subr.bf16.mxu1 %v16941_v26  ;;  %v21628_v45 = vadd.f32 %v21541_v36, %v9382_v4  ;;  %17346 = vtanh.f32 %v10260_v51  ;;  %v10176_v50 = vadd.f32 %v10080_v14, %v21558_v1  ;;  %v16974_v40 = vld [vmem:[%s18182_s0 + $0x82c] ss:$12 sps:$4 sm:$0xff]   ;;  %v9384_v56 = vadd.f32 %v9383_v41, %v21477_v17  ;;  %v16948_v14 = vld [vmem:[%s18182_s0 + $0x768] ss:$12 sps:$4 sm:$0xff]  }
 0xa13   : > { %v9388_v21 = vadd.f32 %v9387_v63, %v21461_v57  ;;  %12858 = vmatpush2.bf16.msra.mxu0 %v16936_v18  ;;  %v10188_v42 = vadd.f32 %v10092_v5, %v21583_v11  ;;  %v21639_v36 = vrot.slane %v21625_v19, %v23266_v53  ;;  %v16950_v38 = vld [vmem:[%s18182_s0 + $0x76c] ss:$12 sps:$4 sm:$0xff]   ;;  %v10175_v6 = vadd.f32 %v10079_v54, %v21553_v55  ;;  %v9466_v63 = vpop.f32.mrf.mxu1 }
 0xa14   : > { %12819 = vmatmul.mubr.bf16.gmra.mxu1 %v21610_v32  ;;  %v9389_v22 = vpop.f32.mrf.mxu0  ;;  %12859 = vmatprep.subr.bf16.mxu0 %v16944_v59  ;;  %v10272_v28 = vmul.f32 0.7978846, %v10176_v50  ;;  %v10007_v34 = vmul.f32 %v9911_v49, %v21602_v12  ;;  %v9912_v4 = vmul.f32 0.044715, %v21621_v30  ;;  %v10187_v41 = vadd.f32 %v10091_v9, %v21568_v44 }
 0xa15   : > { %12915 = vmatpush1.bf16.msra.mxu1 %v16939_v8  ;;  %v10284_v58 = vmul.f32 0.7978846, %v10188_v42  ;;  %v21646_v18 = vadd.f32 %v21588_v16, %v9388_v21  ;;  %v9923_v60 = vmul.f32 0.044715, %v21628_v45  ;;  %v21652_v54 = vmul.f32 0.5, %v21496_v0 }
 0xa16   : > { %v9391_v26 = vpop.f32.mrf.mxu0  ;;  %12916 = vmatprep.subr.bf16.mxu1 %v16947_v46  ;;  %17348 = vtanh.f32 %v10272_v28  ;;  %v9390_v59 = vadd.f32 %v9389_v22, %v21477_v17  ;;  %v23319_v46 = vld [vmem:[#allocation24_spill] sm:$0xff]  ;;  %v21662_v9 = vadd.f32 %v21563_v52, %v9384_v56  ;;  %v9768_v21 = vmul.f32 0.5, %v21509_v10 }
 0xa17   : > { %v9392_v51 = vadd.f32 %v9391_v26, %v21461_v57  ;;  %12860 = vmatpush2.bf16.msra.mxu0 %v16942_v62  ;;  %v21657_v16 = vrot.slane %v21625_v19, %v23319_v46  ;;  %v17341_v5 = vpop.eup %17340  ;;  %v9779_v57 = vmul.f32 0.5, %v21518_v35  ;;  %v16953_v0 = vld [vmem:[%s18182_s0 + $0x754] ss:$12 sps:$4 sm:$0xff]   ;;  %17350 = vtanh.f32 %v10284_v58 }
 0xa18   : > { %v9393_v8 = vpop.f32.mrf.mxu0  ;;  %12975 = vmatprep.subr.bf16.mxu0 %v16974_v40  ;;  %v10103_v22 = vmul.f32 %v10007_v34, %v21602_v12  ;;  %v10008_v62 = vmul.f32 %v9912_v4, %v21621_v30  ;;  %v9935_v50 = vmul.f32 0.044715, %v21646_v18  ;;  %v10019_v35 = vmul.f32 %v9923_v60, %v21628_v45 }
 0xa19   : > { %12917 = vmatpush1.bf16.msra.mxu1 %v16945_v39  ;;  %v10271_v39 = vmul.f32 0.7978846, %v10175_v6  ;;  %v21670_v52 = vadd.f32 %v9464_v20, %v9392_v51  ;;  %v10283_v26 = vmul.f32 0.7978846, %v10187_v41  ;;  %v9394_v28 = vadd.f32 %v9393_v8, %v21477_v17  ;;  %v16951_v6 = vld [vmem:[%s18182_s0 + $0x750] ss:$12 sps:$4 sm:$0xff]  }
 0xa1a   : > { %v9576_v49 = vpop.f32.mrf.mxu0  ;;  %12918 = vmatprep.subr.bf16.mxu1 %v16950_v38  ;;  %v17343_v40 = vpop.eup %17342  ;;  %v21676_v38 = vadd.f32 %v21608_v33, %v9390_v59  ;;  %v9780_v34 = vmul.f32 0.5, %v21536_v24  ;;  %v9924_v20 = vmul.f32 0.044715, %v21662_v9  ;;  %v21685_v51 = vmul.f32 0.5, %v21558_v1  ;;  %v16956_v41 = vld [vmem:[%s18182_s0 + $0x73c] ss:$12 sps:$4 sm:$0xff]  }
 0xa1b   : > { %v9503_v42 = vpop.f32.mrf.mxu1  ;;  %17352 = vtanh.f32 %v10271_v39  ;;  %v21688_v33 = vmul.f32 0.5, %v21583_v11  ;;  %v10439_v8 = vadd.f32 1.0, %v17341_v5  ;;  %v10451_v59 = vadd.f32 1.0, %v17343_v40 }
 0xa1c   : > { %v9504_v56 = vadd.f32 %v9503_v42, %v21639_v36  ;;  %v21673_v10 = vpop.f32.mrf.mxu0  ;;  %v10031_v24 = vmul.f32 %v9935_v50, %v21646_v18  ;;  %17354 = vtanh.f32 %v10283_v26  ;;  %v9947_v1 = vmul.f32 0.044715, %v21670_v52 }
 0xa1d   : > { %v9505_v58 = vpop.f32.mrf.mxu1  ;;  %12919 = vmatpush2.bf16.msra.mxu1 %v16948_v14  ;;  %v10104_v11 = vmul.f32 %v10008_v62, %v21621_v30  ;;  %v9936_v5 = vmul.f32 0.044715, %v21676_v38  ;;  %v21701_v40 = vadd.f32 %v9466_v63, %v9394_v28  ;;  %v16959_v62 = vld [vmem:[%s18182_s0 + $0x724] ss:$12 sps:$4 sm:$0xff]   ;;  %v10535_v63 = vmul.f32 %v10439_v8, %v21652_v54 }
 0xa1e   : > { %v21682_v4 = vadd.f32 %v9576_v49, %v9504_v56  ;;  %v9580_v60 = vpop.f32.mrf.mxu0  ;;  %12920 = vmatprep.subr.bf16.mxu1 %v16953_v0  ;;  %v17345_v17 = vpop.eup %17344  ;;  %v21693_v49 = vadd.f32 %v10103_v22, %v21602_v12  ;;  %v10115_v0 = vmul.f32 %v10019_v35, %v21628_v45  ;;  %v16954_v22 = vld [vmem:[%s18182_s0 + $0x738] ss:$12 sps:$4 sm:$0xff]   ;;  %v10020_v35 = vmul.f32 %v9924_v20, %v21662_v9 }
 0xa1f   : > { %v9507_v14 = vpop.f32.mrf.mxu1  ;;  %v17347_v39 = vpop.eup %17346  ;;  %v10440_v26 = vadd.f32 1.0, %v17345_v17  ;;  %v10547_v28 = vmul.f32 %v10451_v59, %v9779_v57  ;;  %v10043_v20 = vmul.f32 %v9947_v1, %v21670_v52  ;;  %v9506_v32 = vadd.f32 %v9505_v58, %v21657_v16  ;;  %v16962_v1 = vld [vmem:[%s18182_s0 + $0x70c] ss:$12 sps:$4 sm:$0xff]  }
 0xa20   : > { %v21697_v42 = vpop.f32.mrf.mxu0  ;;  %v9508_v50 = vadd.f32 %v9507_v14, %v21639_v36  ;;  %v9865_v13 = vmul.f32 0.044715, %v21682_v4  ;;  %v10452_v48 = vadd.f32 1.0, %v17347_v39  ;;  %v10127_v14 = vmul.f32 %v10031_v24, %v21646_v18 }
 0xa21   : > { %v9509_v56 = vpop.f32.mrf.mxu1  ;;  %12921 = vmatpush2.bf16.msra.mxu1 %v16951_v6  ;;  %v10536_v25 = vmul.f32 %v10440_v26, %v9768_v21  ;;  %v21720_v54 = vadd.f32 %v10115_v0, %v21628_v45  ;;  %v21723_v57 = vmul.f32 %v9936_v5, %v21676_v38  ;;  %v21727_v59 = vmul.f32 0.5, %v21568_v44  ;;  %v16972_v5 = vld [vmem:[%s18182_s0 + $0x828] ss:$12 sps:$4 sm:$0xff]  }
 0xa22   : > { %v9586_v47 = vpop.f32.mrf.mxu0  ;;  %12922 = vmatprep.subr.bf16.mxu1 %v16956_v41  ;;  %v21713_v17 = vadd.f32 %v9580_v60, %v9508_v50  ;;  %v10548_v39 = vmul.f32 %v10452_v48, %v9780_v34  ;;  %v9948_v60 = vmul.f32 0.044715, %v21701_v40  ;;  %v16957_v48 = vld [vmem:[%s18182_s0 + $0x720] ss:$12 sps:$4 sm:$0xff]   ;;  %v9961_v21 = vmul.f32 %v9865_v13, %v21682_v4 }
 0xa23   : > { %v9513_v6 = vpop.f32.mrf.mxu1  ;;  %v17349_v41 = vpop.eup %17348  ;;  %v21738_v26 = vadd.f32 %v10127_v14, %v21646_v18  ;;  %v21740_v44 = vpack.c.bf16 %v10547_v28, %v10535_v63  ;;  %v10116_v13 = vmul.f32 %v10020_v35, %v21662_v9  ;;  %v21755_v63 = vmul.f32 0.5, %v21621_v30 }
 0xa24   : > { %v21717_v55 = vpop.f32.mrf.mxu0  ;;  %v9877_v58 = vmul.f32 0.044715, %v21713_v17  ;;  %v9514_v34 = vadd.f32 %v9513_v6, %v21639_v36  ;;  %v21733_v24 = vpack.c.bf16 %v10548_v39, %v10536_v25  ;;  %v17351_v50 = vpop.eup %17350  ;;  %v10464_v7 = vadd.f32 1.0, %v17349_v41  ;;  %v16960_v39 = vld [vmem:[%s18182_s0 + $0x708] ss:$12 sps:$4 sm:$0xff]  }
 0xa25   : > { %v9515_v8 = vpop.f32.mrf.mxu1  ;;  %12923 = vmatpush2.bf16.msra.mxu1 %v16954_v22  ;;  %23321 = vst [vmem:[#allocation73_spill] sm:$0xff] %v21740_v44  ;;  %v21745_v6 = vmul.f32 %v10043_v20, %v21670_v52  ;;  %v21748_v25 = vadd.f32 %v21673_v10, %v9506_v32  ;;  %v21758_v28 = vmul.f32 %v9948_v60, %v21701_v40  ;;  %v10476_v10 = vadd.f32 1.0, %v17351_v50  ;;  %v16977_v50 = vld [vmem:[%s18182_s0 + $0x810] ss:$12 sps:$4 sm:$0xff]  }
 0xa26   : > { %23320 = vst [vmem:[#allocation72_spill] sm:$0xff] %v21733_v24  ;;  %v9590_v0 = vpop.f32.mrf.mxu0  ;;  %12924 = vmatprep.subr.bf16.mxu1 %v16959_v62  ;;  %12861 = vmatprep.mubr.bf16.mxu0 %v21733_v24  ;;  %v9510_v35 = vadd.f32 %v9509_v56, %v21657_v16  ;;  %v10200_v20 = vadd.f32 %v10104_v11, %v21621_v30  ;;  %v21769_v56 = vmul.f32 0.5, %v21662_v9 }
 0xa27   : > { %v9517_v22 = vpop.f32.mrf.mxu1  ;;  %12862 = vmatmul.mubr.bf16.vlgmr.msra.gmra.mxu0 %v21740_v44  ;;  %v9973_v24 = vmul.f32 %v9877_v58, %v21713_v17  ;;  %v21766_v3 = vadd.f32 %v9586_v47, %v9514_v34  ;;  %v16965_v44 = vld [vmem:[%s18182_s0 + $0x6f4] ss:$12 sps:$4 sm:$0xff]   ;;  %v10560_v30 = vmul.f32 %v10464_v7, %v21685_v51  ;;  %v10572_v11 = vmul.f32 %v10476_v10, %v21688_v33  ;;  %v16984_v47 = vld [vmem:[%s18182_s0 + $0x7fc] ss:$12 sps:$4 sm:$0xff]  }
 0xa28   : > { %v9518_v62 = vadd.f32 %v9517_v22, %v21639_v36  ;;  %v21752_v14 = vpop.f32.mrf.mxu0  ;;  %v17353_v41 = vpop.eup %17352  ;;  %v10057_v22 = vmul.f32 %v9961_v21, %v21682_v4  ;;  %12976 = vmatpush1.bf16.msra.mxu0 %v16972_v5  ;;  %v10212_v21 = vadd.f32 %v10116_v13, %v21662_v9  ;;  %v9866_v34 = vmul.f32 0.044715, %v21748_v25  ;;  %v16963_v13 = vld [vmem:[%s18182_s0 + $0x6f0] ss:$12 sps:$4 sm:$0xff]  }
 0xa29   : > { %v9519_v32 = vpop.f32.mrf.mxu1  ;;  %12925 = vmatpush2.bf16.msra.mxu1 %v16957_v48  ;;  %v10463_v29 = vadd.f32 1.0, %v17353_v41  ;;  %12977 = vmatprep.subr.bf16.mxu0 %v16979_v27  ;;  %v17355_v58 = vpop.eup %17354  ;;  %v9516_v31 = vadd.f32 %v9515_v8, %v21657_v16  ;;  %v21783_v7 = vadd.f32 %v21697_v42, %v9510_v35  ;;  %v21785_v51 = vpack.c.bf16 %v10572_v11, %v10560_v30  ;;  %v16968_v42 = vld [vmem:[%s18182_s0 + $0x6dc] ss:$12 sps:$4 sm:$0xff]  }
 0xa2a   : > { %v9596_v60 = vpop.f32.mrf.mxu0  ;;  %12926 = vmatprep.subr.bf16.mxu1 %v16962_v1  ;;  %v21779_v1 = vadd.f32 %v9590_v0, %v9518_v62  ;;  %v10475_v33 = vadd.f32 1.0, %v17355_v58  ;;  %v10296_v27 = vmul.f32 0.7978846, %v10200_v20  ;;  %v10153_v10 = vadd.f32 %v10057_v22, %v21682_v4 }
 0xa2b   : > { %v9523_v48 = vpop.f32.mrf.mxu1  ;;  %v10069_v8 = vmul.f32 %v9973_v24, %v21713_v17  ;;  %v9889_v0 = vmul.f32 0.044715, %v21766_v3  ;;  %v9520_v62 = vadd.f32 %v9519_v32, %v21657_v16  ;;  %12871 = vmatprep.mubr.bf16.mxu0 %v21785_v51  ;;  %v10559_v20 = vmul.f32 %v10463_v29, %v21708_v15 }
 0xa2c   : > { %v9524_v5 = vadd.f32 %v9523_v48, %v21639_v36  ;;  %v9598_v43 = vpop.f32.mrf.mxu0  ;;  %12978 = vmatpush1.bf16.msra.mxu0 %v16977_v50  ;;  %v10308_v22 = vmul.f32 0.7978846, %v10212_v21  ;;  %v21799_v32 = vadd.f32 %v21717_v55, %v9516_v31  ;;  %v16982_v48 = vld [vmem:[%s18182_s0 + $0x7f8] ss:$12 sps:$4 sm:$0xff]   ;;  %v21807_v29 = vadd.f32 %v21745_v6, %v21670_v52 }
 0xa2d   : > { %v9525_v9 = vpop.f32.mrf.mxu1  ;;  %12927 = vmatpush2.bf16.msra.mxu1 %v16960_v39  ;;  %v10571_v39 = vmul.f32 %v10475_v33, %v21727_v59  ;;  %12979 = vmatprep.subr.bf16.mxu0 %v16984_v47  ;;  %v21810_v15 = vmul.f32 %v9866_v34, %v21748_v25  ;;  %17356 = vtanh.f32 %v10296_v27  ;;  %v16966_v31 = vld [vmem:[%s18182_s0 + $0x6d8] ss:$12 sps:$4 sm:$0xff]   ;;  %v10165_v11 = vadd.f32 %v10069_v8, %v21713_v17 }
 0xa2e   : > { %v9600_v41 = vpop.f32.mrf.mxu0  ;;  %12928 = vmatprep.subr.bf16.mxu1 %v16965_v44  ;;  %v21793_v35 = vadd.f32 %v9596_v60, %v9524_v5  ;;  %v9901_v44 = vmul.f32 0.044715, %v21779_v1  ;;  %v9526_v50 = vadd.f32 %v9525_v9, %v21657_v16  ;;  %v16989_v55 = vld [vmem:[%s18182_s0 + $0x7e4] ss:$12 sps:$4 sm:$0xff]   ;;  %v9985_v21 = vmul.f32 %v9889_v0, %v21766_v3 }
 0xa2f   : > { %v9527_v24 = vpop.f32.mrf.mxu1  ;;  %v21812_v59 = vpack.c.bf16 %v10571_v39, %v10559_v20  ;;  %v21819_v47 = vadd.f32 %v21752_v14, %v9520_v62  ;;  %v16971_v34 = vld [vmem:[%s18182_s0 + $0x6c4] ss:$12 sps:$4 sm:$0xff]   ;;  %v9878_v5 = vmul.f32 0.044715, %v21783_v7  ;;  %17358 = vtanh.f32 %v10308_v22  ;;  %v16987_v62 = vld [vmem:[%s18182_s0 + $0x7e0] ss:$12 sps:$4 sm:$0xff]  }
 0xa30   : > { %v9528_v60 = vadd.f32 %v9527_v24, %v21639_v36  ;;  %v9602_v58 = vpop.f32.mrf.mxu0  ;;  %v9913_v33 = vmul.f32 0.044715, %v21793_v35  ;;  %v10295_v27 = vmul.f32 0.7978846, %v21693_v49  ;;  %v9890_v14 = vmul.f32 0.044715, %v21799_v32  ;;  %12980 = vmatpush1.bf16.msra.mxu0 %v16982_v48 }
 0xa31   : > { %v9529_v30 = vpop.f32.mrf.mxu1  ;;  %12929 = vmatpush2.bf16.msra.mxu1 %v16963_v13  ;;  %12872 = vmatmul.mubr.bf16.gmra.mxu0 %v21812_v59  ;;  %v10249_v13 = vmul.f32 0.7978846, %v10153_v10  ;;  %v9997_v8 = vmul.f32 %v9901_v44, %v21779_v1  ;;  %v21830_v0 = vadd.f32 %v9598_v43, %v9526_v50  ;;  %v10307_v20 = vmul.f32 0.7978846, %v21720_v54  ;;  %v16969_v49 = vld [vmem:[%s18182_s0 + $0x6c0] ss:$12 sps:$4 sm:$0xff]  }
 0xa32   : > { %v21821_v6 = vadd.f32 %v9600_v41, %v9528_v60  ;;  %12930 = vmatprep.subr.bf16.mxu1 %v16968_v42  ;;  %v9530_v42 = vadd.f32 %v9529_v30, %v21657_v16  ;;  %17360 = vtanh.f32 %v10295_v27  ;;  %12981 = vmatprep.subr.bf16.mxu0 %v16989_v55  ;;  %v10261_v10 = vmul.f32 0.7978846, %v10165_v11  ;;  %v9606_v22 = vpop.f32.mrf.mxu0  ;;  %v16975_v50 = vld [vmem:[%s18182_s0 + $0x170] ss:$12 sps:$4 sm:$0xff]   ;;  %v16999_v27 = vld [vmem:[%s18182_s0 + $0x7b4] ss:$12 sps:$4 sm:$0xff]  }
 0xa33   : > { %v9533_v9 = vpop.f32.mrf.mxu1  ;;  %v10081_v24 = vmul.f32 %v9985_v21, %v21766_v3  ;;  %v9902_v43 = vmul.f32 0.044715, %v21819_v47  ;;  %v21842_v60 = vmul.f32 %v9878_v5, %v21783_v7  ;;  %v10009_v54 = vmul.f32 %v9913_v33, %v21793_v35 }
 0xa34   : > { %v9925_v41 = vmul.f32 0.044715, %v21821_v6  ;;  %v9534_v44 = vadd.f32 %v9533_v9, %v21639_v36  ;;  %17362 = vtanh.f32 %v10307_v20  ;;  %v10128_v30 = vmul.f32 %v21723_v57, %v21676_v38  ;;  %12982 = vmatpush1.bf16.msra.mxu0 %v16987_v62  ;;  %v9608_v62 = vpop.f32.mrf.mxu0 }
 0xa35   : > { %v9535_v39 = vpop.f32.mrf.mxu1  ;;  %12931 = vmatpush2.bf16.msra.mxu1 %v16966_v31  ;;  %v16994_v31 = vld [vmem:[%s18182_s0 + $0x7cc] ss:$12 sps:$4 sm:$0xff]   ;;  %17364 = vtanh.f32 %v10249_v13  ;;  %v21849_v55 = vmul.f32 %v9890_v14, %v21799_v32  ;;  %v10093_v11 = vmul.f32 %v9997_v8, %v21779_v1  ;;  %v9914_v21 = vmul.f32 0.044715, %v21830_v0 }
 0xa36   : > { %12932 = vmatprep.subr.bf16.mxu1 %v16971_v34  ;;  %v16992_v34 = vld [vmem:[%s18182_s0 + $0x7c8] ss:$12 sps:$4 sm:$0xff]   ;;  %v10021_v5 = vmul.f32 %v9925_v41, %v21821_v6  ;;  %v21855_v33 = vadd.f32 %v9602_v58, %v9530_v42  ;;  %v10140_v9 = vmul.f32 %v21758_v28, %v21701_v40  ;;  %v10224_v57 = vadd.f32 %v10128_v30, %v21676_v38 }
 0xa37   : > { %v9537_v48 = vpop.f32.mrf.mxu1  ;;  %17366 = vtanh.f32 %v10261_v10  ;;  %v21862_v13 = vadd.f32 %v10081_v24, %v21766_v3  ;;  %v21865_v14 = vmul.f32 %v9902_v43, %v21819_v47  ;;  %v21867_v8 = vadd.f32 %v9606_v22, %v9534_v44  ;;  %12983 = vmatprep.subr.bf16.mxu0 %v16994_v31  ;;  %v17004_v30 = vld [vmem:[%s18182_s0 + $0x79c] ss:$12 sps:$4 sm:$0xff]  }
 0xa38   : > { %v10105_v58 = vmul.f32 %v10009_v54, %v21793_v35  ;;  %v21871_v28 = vmul.f32 0.5, %v21602_v12  ;;  %v10236_v42 = vadd.f32 %v10140_v9, %v21701_v40  ;;  %v10320_v20 = vmul.f32 0.7978846, %v10224_v57  ;;  %12984 = vmatpush1.bf16.msra.mxu0 %v16992_v34  ;;  %v16997_v12 = vld [vmem:[%s18182_s0 + $0x7b0] ss:$12 sps:$4 sm:$0xff]  }
 0xa39   : > { %12933 = vmatpush2.bf16.msra.mxu1 %v16969_v49  ;;  %v9539_v41 = vpop.f32.mrf.mxu1  ;;  %v21875_v49 = vadd.f32 %v10093_v11, %v21779_v1  ;;  %v21878_v10 = vmul.f32 %v9914_v21, %v21830_v0  ;;  %v21881_v24 = vmul.f32 0.5, %v21628_v45  ;;  %v9538_v43 = vadd.f32 %v9537_v48, %v21639_v36  ;;  %12985 = vmatprep.subr.bf16.mxu0 %v16999_v27  ;;  %v9610_v21 = vpop.f32.mrf.mxu0 }
 0xa3a   : > { %15197 = vmatprep.subr.bf16.mxu1 %v16975_v50  ;;  %v10117_v22 = vmul.f32 %v10021_v5, %v21821_v6  ;;  %v9926_v44 = vmul.f32 0.044715, %v21855_v33  ;;  %v9536_v50 = vadd.f32 %v9535_v39, %v21657_v16  ;;  %v10332_v54 = vmul.f32 0.7978846, %v10236_v42  ;;  %v17357_v31 = vpop.eup %17356 }
 0xa3b   : > { %v9937_v11 = vmul.f32 0.044715, %v21867_v8  ;;  %v21891_v45 = vmul.f32 0.5, %v21676_v38  ;;  %17368 = vtanh.f32 %v10320_v20  ;;  %v10319_v36 = vmul.f32 0.7978846, %v21738_v26  ;;  %v21898_v5 = vpop.f32.mrf.mxu1 }
 0xa3c   : > { %v21895_v48 = vadd.f32 %v10105_v58, %v21793_v35  ;;  %v10488_v34 = vadd.f32 1.0, %v17357_v31  ;;  %v9540_v39 = vadd.f32 %v9539_v41, %v21657_v16  ;;  %17370 = vtanh.f32 %v10332_v54  ;;  %v17359_v9 = vpop.eup %17358  ;;  %12986 = vmatpush1.bf16.msra.mxu0 %v16997_v12  ;;  %v17002_v26 = vld [vmem:[%s18182_s0 + $0x798] ss:$12 sps:$4 sm:$0xff]  }
 0xa3d   : > { %v21900_v57 = vadd.f32 %v9610_v21, %v9538_v43  ;;  %v21903_v27 = vmul.f32 0.5, %v21701_v40  ;;  %v10331_v38 = vmul.f32 0.7978846, %v21807_v29  ;;  %17372 = vtanh.f32 %v10319_v36  ;;  %12987 = vmatprep.subr.bf16.mxu0 %v17004_v30  ;;  %v17009_v20 = vld [vmem:[%s18182_s0 + $0x784] ss:$12 sps:$4 sm:$0xff]   ;;  %v9612_v40 = vpop.f32.mrf.mxu0  ;;  %v21923_v30 = vpop.f32.mrf.mxu1 }
 0xa3e   : > { %v21908_v58 = vadd.f32 %v10117_v22, %v21821_v6  ;;  %v10022_v42 = vmul.f32 %v9926_v44, %v21855_v33  ;;  %v10500_v16 = vadd.f32 1.0, %v17359_v9  ;;  %v21911_v41 = vadd.f32 %v9608_v62, %v9536_v50 }
 0xa3f   : > { %v17361_v43 = vpop.eup %17360  ;;  %v10033_v54 = vmul.f32 %v9937_v11, %v21867_v8  ;;  %17374 = vtanh.f32 %v10331_v38  ;;  %v10058_v29 = vmul.f32 %v21810_v15, %v21748_v25  ;;  %v10070_v12 = vmul.f32 %v21842_v60, %v21783_v7  ;;  %v17014_v38 = vld [vmem:[%s18182_s0 + $0x8ec] ss:$12 sps:$4 sm:$0xff]  }
 0xa40   : > { %v10584_v22 = vmul.f32 %v10488_v34, %v21755_v63  ;;  %v10596_v44 = vmul.f32 %v10500_v16, %v21769_v56  ;;  %v10487_v62 = vadd.f32 1.0, %v17361_v43  ;;  %v21921_v50 = vadd.f32 %v9612_v40, %v9540_v39  ;;  %12988 = vmatpush1.bf16.msra.mxu0 %v17002_v26  ;;  %v17007_v63 = vld [vmem:[%s18182_s0 + $0x780] ss:$12 sps:$4 sm:$0xff]  }
 0xa41   : > { %v17363_v31 = vpop.eup %17362  ;;  %v9949_v11 = vmul.f32 0.044715, %v21900_v57  ;;  %v10154_v21 = vadd.f32 %v10058_v29, %v21748_v25  ;;  %v10166_v15 = vadd.f32 %v10070_v12, %v21783_v7  ;;  %v10082_v60 = vmul.f32 %v21849_v55, %v21799_v32  ;;  %12989 = vmatprep.subr.bf16.mxu0 %v17009_v20  ;;  %v21947_v20 = vpop.f32.mrf.mxu1 }
 0xa42   : > { %v21931_v36 = vpop.eup %17364  ;;  %v21933_v56 = vpack.c.bf16 %v10596_v44, %v10584_v22  ;;  %v10499_v34 = vadd.f32 1.0, %v17363_v31  ;;  %v9938_v39 = vmul.f32 0.044715, %v21911_v41  ;;  %v10094_v9 = vmul.f32 %v21865_v14, %v21819_v47 }
 0xa43   : > { %v10129_v16 = vmul.f32 %v10033_v54, %v21867_v8  ;;  %v10250_v43 = vmul.f32 0.7978846, %v10154_v21  ;;  %v10262_v40 = vmul.f32 0.7978846, %v10166_v15  ;;  %v10178_v55 = vadd.f32 %v10082_v60, %v21799_v32  ;;  %v17012_v21 = vld [vmem:[%s18182_s0 + $0x8e8] ss:$12 sps:$4 sm:$0xff]  }
 0xa44   : > { %v21941_v26 = vpop.eup %17366  ;;  %12881 = vmatprep.mubr.bf16.mxu0 %v21933_v56  ;;  %v10583_v29 = vmul.f32 %v10487_v62, %v21871_v28  ;;  %v10595_v12 = vmul.f32 %v10499_v34, %v21881_v24  ;;  %v9950_v14 = vmul.f32 0.044715, %v21921_v50  ;;  %v10190_v54 = vadd.f32 %v10094_v9, %v21819_v47  ;;  %12990 = vmatpush1.bf16.msra.mxu0 %v17007_v63  ;;  %v17019_v62 = vld [vmem:[%s18182_s0 + $0x8d4] ss:$12 sps:$4 sm:$0xff]  }
 0xa45   : > { %v10045_v22 = vmul.f32 %v9949_v11, %v21900_v57  ;;  %17376 = vtanh.f32 %v10250_v43  ;;  %v10274_v44 = vmul.f32 0.7978846, %v10178_v55  ;;  %v10273_v31 = vmul.f32 0.7978846, %v21862_v13  ;;  %12991 = vmatprep.subr.bf16.mxu0 %v17014_v38  ;;  %v21964_v43 = vpop.f32.mrf.mxu1 }
 0xa46   : > { %v21953_v15 = vpack.c.bf16 %v10595_v12, %v10583_v29  ;;  %17378 = vtanh.f32 %v10262_v40  ;;  %v10286_v28 = vmul.f32 0.7978846, %v10190_v54  ;;  %v10285_v24 = vmul.f32 0.7978846, %v21875_v49  ;;  %v17017_v40 = vld [vmem:[%s18182_s0 + $0x8d0] ss:$12 sps:$4 sm:$0xff]  }
 0xa47   : > { %v9839_v60 = vmul.f32 0.5, %v21646_v18  ;;  %17380 = vtanh.f32 %v10274_v44  ;;  %v10106_v11 = vmul.f32 %v21878_v10, %v21830_v0  ;;  %v10118_v34 = vmul.f32 %v10022_v42, %v21855_v33 }
 0xa48   : > { %v17369_v13 = vpop.eup %17368  ;;  %12882 = vmatmul.mubr.bf16.gmra.mxu0 %v21953_v15  ;;  %v10034_v63 = vmul.f32 %v9938_v39, %v21911_v41  ;;  %v10046_v9 = vmul.f32 %v9950_v14, %v21921_v50  ;;  %17382 = vtanh.f32 %v10286_v28  ;;  %v10297_v18 = vmul.f32 0.7978846, %v21895_v48  ;;  %v17024_v14 = vld [vmem:[%s18182_s0 + $0x8bc] ss:$12 sps:$4 sm:$0xff]  }
 0xa49   : > { %v17371_v49 = vpop.eup %17370  ;;  %v10512_v38 = vadd.f32 1.0, %v17369_v13  ;;  %17384 = vtanh.f32 %v10273_v31  ;;  %v10202_v10 = vadd.f32 %v10106_v11, %v21830_v0  ;;  %v10214_v42 = vadd.f32 %v10118_v34, %v21855_v33  ;;  %12992 = vmatpush2.bf16.msra.mxu0 %v17012_v21  ;;  %v21975_v21 = vpop.f32.mrf.mxu1 }
 0xa4a   : > { %v17373_v55 = vpop.eup %17372  ;;  %v10141_v39 = vmul.f32 %v10045_v22, %v21900_v57  ;;  %v10524_v29 = vadd.f32 1.0, %v17371_v49  ;;  %17386 = vtanh.f32 %v10285_v24  ;;  %v10309_v12 = vmul.f32 0.7978846, %v21908_v58  ;;  %12993 = vmatprep.subr.bf16.mxu0 %v17019_v62 }
 0xa4b   : > { %v10608_v48 = vmul.f32 %v10512_v38, %v21891_v45  ;;  %v10511_v54 = vadd.f32 1.0, %v17373_v55  ;;  %v10298_v44 = vmul.f32 0.7978846, %v10202_v10  ;;  %v10310_v31 = vmul.f32 0.7978846, %v10214_v42 }
 0xa4c   : > { %v17375_v28 = vpop.eup %17374  ;;  %v10620_v11 = vmul.f32 %v10524_v29, %v21903_v27  ;;  %17388 = vtanh.f32 %v10297_v18  ;;  %v10130_v22 = vmul.f32 %v10034_v63, %v21911_v41  ;;  %v10142_v24 = vmul.f32 %v10046_v9, %v21921_v50  ;;  %v17022_v45 = vld [vmem:[%s18182_s0 + $0x8b8] ss:$12 sps:$4 sm:$0xff]   ;;  %v17027_v29 = vld [vmem:[%s18182_s0 + $0x8a0] ss:$12 sps:$4 sm:$0xff]  }
 0xa4d   : > { %v10225_v58 = vadd.f32 %v10129_v16, %v21867_v8  ;;  %v9851_v62 = vmul.f32 0.5, %v21670_v52  ;;  %v10523_v34 = vadd.f32 1.0, %v17375_v28  ;;  %17390 = vtanh.f32 %v10298_v44  ;;  %12994 = vmatpush2.bf16.msra.mxu0 %v17017_v40  ;;  %v17029_v63 = vld [vmem:[%s18182_s0 + $0x8a4] ss:$12 sps:$4 sm:$0xff]   ;;  %v21989_v52 = vpop.f32.mrf.mxu1 }
 0xa4e   : > { %v21982_v13 = vpack.c.bf16 %v10620_v11, %v10608_v48  ;;  %17392 = vtanh.f32 %v10310_v31  ;;  %v10226_v27 = vadd.f32 %v10130_v22, %v21911_v41  ;;  %v10238_v18 = vadd.f32 %v10142_v24, %v21921_v50  ;;  %12995 = vmatprep.subr.bf16.mxu0 %v17024_v14 }
 0xa4f   : > { %v10237_v9 = vadd.f32 %v10141_v39, %v21900_v57  ;;  %v10607_v49 = vmul.f32 %v10511_v54, %v9839_v60  ;;  %v10619_v16 = vmul.f32 %v10523_v34, %v9851_v62  ;;  %17394 = vtanh.f32 %v10309_v12  ;;  %v23323_v60 = vld [vmem:[#allocation25_spill] sm:$0xff] }
 0xa50   : > { %12891 = vmatprep.mubr.bf16.mxu0 %v21982_v13  ;;  %v10322_v38 = vmul.f32 0.7978846, %v10226_v27  ;;  %v10334_v10 = vmul.f32 0.7978846, %v10238_v18  ;;  %v10453_v42 = vadd.f32 1.0, %v21941_v26  ;;  %v9781_v39 = vmul.f32 0.5, %v21713_v17 }
 0xa51   : > { %v21992_v40 = vpack.c.bf16 %v10619_v16, %v10607_v49  ;;  %v10321_v55 = vmul.f32 0.7978846, %v10225_v58  ;;  %12996 = vmatpush2.bf16.msra.mxu0 %v17022_v45  ;;  %v21998_v48 = vrot.slane %v21625_v19, %v23323_v60  ;;  %v17034_v12 = vld [vmem:[%s18182_s0 + $0x88c] ss:$12 sps:$4 sm:$0xff]   ;;  %v10441_v44 = vadd.f32 1.0, %v21931_v36  ;;  %v22006_v58 = vpop.f32.mrf.mxu1 }
 0xa52   : > { %v17377_v14 = vpop.eup %17376  ;;  %17396 = vtanh.f32 %v10322_v38  ;;  %12997 = vmatprep.subr.bf16.mxu0 %v17029_v63  ;;  %v10333_v31 = vmul.f32 0.7978846, %v10237_v9  ;;  %v9769_v11 = vmul.f32 0.5, %v21682_v4  ;;  %v9770_v17 = vmul.f32 0.5, %v21748_v25  ;;  %v17032_v27 = vld [vmem:[%s18182_s0 + $0x888] ss:$12 sps:$4 sm:$0xff]  }
 0xa53   : > { %23322 = vst [vmem:[#allocation74_spill] sm:$0xff] %v21992_v40  ;;  %v17379_v54 = vpop.eup %17378  ;;  %12892 = vmatmul.mubr.bf16.gmra.mxu0 %v21992_v40  ;;  %v10442_v26 = vadd.f32 1.0, %v17377_v14  ;;  %17398 = vtanh.f32 %v10334_v10  ;;  %v9782_v22 = vmul.f32 0.5, %v21783_v7  ;;  %v10549_v34 = vmul.f32 %v10453_v42, %v9781_v39  ;;  %v17039_v7 = vld [vmem:[%s18182_s0 + $0x874] ss:$12 sps:$4 sm:$0xff]   ;;  %v23324_v10 = vld [vmem:[#allocation27_spill] sm:$0xff] }
 0xa54   : > { %v17381_v28 = vpop.eup %17380  ;;  %v10454_v24 = vadd.f32 1.0, %v17379_v54  ;;  %v9794_v36 = vmul.f32 0.5, %v21799_v32  ;;  %17400 = vtanh.f32 %v10321_v55  ;;  %v9806_v25 = vmul.f32 0.5, %v21819_v47  ;;  %v16976_v55 = vld [vmem:[%s18182_s0 + $0xb0] ss:$12 sps:$4 sm:$0xff]  }
 0xa55   : > { %v17383_v62 = vpop.eup %17382  ;;  %v10466_v45 = vadd.f32 1.0, %v17381_v28  ;;  %12998 = vmatpush2.bf16.msra.mxu0 %v17027_v29  ;;  %v10538_v63 = vmul.f32 %v10442_v26, %v9770_v17  ;;  %v10537_v16 = vmul.f32 %v10441_v44, %v9769_v11  ;;  %v22014_v32 = vrot.slane %v21625_v19, %v23324_v10  ;;  %v22019_v29 = vpop.f32.mrf.mxu1  ;;  %v16980_v44 = vld [vmem:[%s18182_s0 + $0x158] ss:$12 sps:$4 sm:$0xff]   ;;  %v17037_v19 = vld [vmem:[%s18182_s0 + $0x870] ss:$12 sps:$4 sm:$0xff]  }
 0xa56   : > { %v17385_v18 = vpop.eup %17384  ;;  %v10550_v4 = vmul.f32 %v10454_v24, %v9782_v22  ;;  %v10478_v9 = vadd.f32 1.0, %v17383_v62  ;;  %12999 = vmatprep.subr.bf16.mxu0 %v17034_v12  ;;  %17402 = vtanh.f32 %v10333_v31  ;;  %v17044_v22 = vld [vmem:[%s18182_s0 + $0x85c] ss:$12 sps:$4 sm:$0xff]   ;;  %v16981_v62 = vld [vmem:[%s18182_s0 + $0x98] ss:$12 sps:$4 sm:$0xff]  }
 0xa57   : > { %v17387_v49 = vpop.eup %17386  ;;  %v10562_v47 = vmul.f32 %v10466_v45, %v9794_v36  ;;  %v22022_v54 = vpack.c.bf16 %v10549_v34, %v10537_v16  ;;  %v9805_v34 = vmul.f32 0.5, %v21779_v1  ;;  %v10465_v36 = vadd.f32 1.0, %v17385_v18  ;;  %v23328_v40 = vld [vmem:[#allocation55_spill] sm:$0xff] }
 0xa58   : > { %v22016_v42 = vpack.c.bf16 %v10550_v4, %v10538_v63  ;;  %v10574_v14 = vmul.f32 %v10478_v9, %v9806_v25  ;;  %v10477_v26 = vadd.f32 1.0, %v17387_v49  ;;  %v22037_v25 = vpop.f32.mrf.mxu1  ;;  %v16985_v9 = vld [vmem:[%s18182_s0 + $0x140] ss:$12 sps:$4 sm:$0xff]   ;;  %v9830_v1 = vmul.f32 0.5, %v21855_v33 }
 0xa59   : > { %v17389_v12 = vpop.eup %17388  ;;  %13000 = vmatpush2.bf16.msra.mxu0 %v17032_v27 }
 0xa5a   : > { %v9649_v38 = vpop.f32.mrf.mxu0  ;;  %v17391_v31 = vpop.eup %17390  ;;  %12934 = vmatprep.mubr.bf16.mxu1 %v22016_v42  ;;  %v22027_v11 = vpack.c.bf16 %v10574_v14, %v10562_v47  ;;  %13001 = vmatprep.subr.bf16.mxu0 %v17039_v7  ;;  %v9818_v7 = vmul.f32 0.5, %v21830_v0  ;;  %v10573_v49 = vmul.f32 %v10477_v26, %v9805_v34  ;;  %v10489_v16 = vadd.f32 1.0, %v17389_v12  ;;  %v17042_v47 = vld [vmem:[%s18182_s0 + $0x858] ss:$12 sps:$4 sm:$0xff]   ;;  %v16986_v34 = vld [vmem:[%s18182_s0 + $0x80] ss:$12 sps:$4 sm:$0xff]  }
 0xa5b   : > { %v9650_v39 = vadd.f32 %v9649_v38, %v21998_v48  ;;  %v17393_v24 = vpop.eup %17392  ;;  %12935 = vmatmul.mubr.bf16.vlgmr.msra.gmra.mxu1 %v22022_v54  ;;  %v10490_v45 = vadd.f32 1.0, %v17391_v31  ;;  %v9817_v26 = vmul.f32 0.5, %v21793_v35 }
 0xa5c   : > { %v9651_v28 = vpop.f32.mrf.mxu0  ;;  %v17395_v4 = vpop.eup %17394  ;;  %15198 = vmatpush3.bf16.msra.mxu1 %v16976_v55  ;;  %12944 = vmatprep.mubr.bf16.mxu1 %v22027_v11  ;;  %v10502_v18 = vadd.f32 1.0, %v17393_v24 }
 0xa5d   : > { %v22030_v17 = vadd.f32 %v21898_v5, %v9650_v39  ;;  %v9652_v27 = vadd.f32 %v9651_v28, %v22014_v32  ;;  %v9793_v5 = vmul.f32 0.5, %v21766_v3  ;;  %15199 = vmatprep.subr.bf16.mxu1 %v16980_v44  ;;  %13002 = vmatpush2.bf16.msra.mxu0 %v17037_v19  ;;  %v10586_v3 = vmul.f32 %v10490_v45, %v9818_v7  ;;  %v17049_v39 = vld [vmem:[%s18182_s0 + $0x844] ss:$12 sps:$4 sm:$0xff]   ;;  %v22054_v24 = vpop.f32.mrf.mxu1  ;;  %v16990_v45 = vld [vmem:[%s18182_s0 + $0x128] ss:$12 sps:$4 sm:$0xff]  }
 0xa5e   : > { %v9653_v63 = vpop.f32.mrf.mxu0  ;;  %v10598_v14 = vmul.f32 %v10502_v18, %v9830_v1  ;;  %13003 = vmatprep.subr.bf16.mxu0 %v17044_v22  ;;  %v10501_v28 = vadd.f32 1.0, %v17395_v4  ;;  %v9829_v22 = vmul.f32 0.5, %v21821_v6  ;;  %v17047_v1 = vld [vmem:[%s18182_s0 + $0x840] ss:$12 sps:$4 sm:$0xff]   ;;  %v10585_v18 = vmul.f32 %v10489_v16, %v9817_v26  ;;  %v16991_v16 = vld [vmem:[%s18182_s0 + $0x68] ss:$12 sps:$4 sm:$0xff]  }
 0xa5f   : > { %v9867_v38 = vmul.f32 0.044715, %v22030_v17  ;;  %v22046_v10 = vadd.f32 %v21923_v30, %v9652_v27  ;;  %v9654_v0 = vadd.f32 %v9653_v63, %v21998_v48  ;;  %v17397_v44 = vpop.eup %17396  ;;  %v10561_v12 = vmul.f32 %v10465_v36, %v9793_v5 }
 0xa60   : > { %v9655_v55 = vpop.f32.mrf.mxu0  ;;  %v17399_v19 = vpop.eup %17398  ;;  %15200 = vmatpush3.bf16.msra.mxu1 %v16981_v62  ;;  %v22058_v27 = vpack.c.bf16 %v10598_v14, %v10586_v3 }
 0xa61   : > { %v9656_v33 = vadd.f32 %v9655_v55, %v22014_v32  ;;  %v9963_v30 = vmul.f32 %v9867_v38, %v22030_v17  ;;  %v22062_v36 = vadd.f32 %v21947_v20, %v9654_v0  ;;  %v22067_v63 = vpack.c.bf16 %v10573_v49, %v10561_v12  ;;  %15201 = vmatprep.subr.bf16.mxu1 %v16985_v9  ;;  %v17401_v6 = vpop.eup %17400  ;;  %v22078_v0 = vpop.f32.mrf.mxu1  ;;  %v16995_v12 = vld [vmem:[%s18182_s0 + $0x110] ss:$12 sps:$4 sm:$0xff]  }
 0xa62   : > { %v9659_v31 = vpop.f32.mrf.mxu0  ;;  %v9868_v4 = vmul.f32 0.044715, %v22046_v10  ;;  %v10526_v5 = vadd.f32 1.0, %v17399_v19  ;;  %13004 = vmatpush2.bf16.msra.mxu0 %v17042_v47  ;;  %v9854_v20 = vmul.f32 0.5, %v21921_v50  ;;  %v10514_v38 = vadd.f32 1.0, %v17397_v44 }
 0xa63   : > { %v22065_v35 = vadd.f32 %v21964_v43, %v9656_v33  ;;  %v10059_v62 = vmul.f32 %v9963_v30, %v22030_v17  ;;  %13005 = vmatprep.subr.bf16.mxu0 %v17049_v39  ;;  %v17052_v43 = vld [vmem:[%s18182_s0 + $0x2f0] ss:$12 sps:$4 sm:$0xff]   ;;  %12945 = vmatmul.mubr.bf16.gmra.mxu1 %v22067_v63  ;;  %v10597_v9 = vmul.f32 %v10501_v28, %v9829_v22  ;;  %v9879_v55 = vmul.f32 0.044715, %v22062_v36  ;;  %v17403_v14 = vpop.eup %17402 }
 0xa64   : > { %v9661_v7 = vpop.f32.mrf.mxu0  ;;  %15202 = vmatpush3.bf16.msra.mxu1 %v16986_v34  ;;  %12954 = vmatprep.mubr.bf16.mxu1 %v22058_v27  ;;  %v9842_v50 = vmul.f32 0.5, %v21911_v41  ;;  %v10622_v33 = vmul.f32 %v10526_v5, %v9854_v20  ;;  %v9660_v39 = vadd.f32 %v9659_v31, %v21998_v48  ;;  %v9964_v26 = vmul.f32 %v9868_v4, %v22046_v10  ;;  %v16996_v20 = vld [vmem:[%s18182_s0 + $0x50] ss:$12 sps:$4 sm:$0xff]  }
 0xa65   : > { %v10155_v49 = vadd.f32 %v10059_v62, %v22030_v17  ;;  %v9880_v3 = vmul.f32 0.044715, %v22065_v35  ;;  %v9662_v44 = vadd.f32 %v9661_v7, %v22014_v32  ;;  %15203 = vmatprep.subr.bf16.mxu1 %v16990_v45  ;;  %v10513_v28 = vadd.f32 1.0, %v17401_v6 }
 0xa66   : > { %v9663_v47 = vpop.f32.mrf.mxu0  ;;  %v9975_v30 = vmul.f32 %v9879_v55, %v22062_v36  ;;  %13006 = vmatpush2.bf16.msra.mxu0 %v17047_v1  ;;  %v10610_v22 = vmul.f32 %v10514_v38, %v9842_v50  ;;  %v22090_v41 = vadd.f32 %v21975_v21, %v9660_v39  ;;  %v22096_v62 = vpack.c.bf16 %v10597_v9, %v10585_v18  ;;  %v9748_v1 = vpop.f32.mrf.mxu1  ;;  %v17000_v18 = vld [vmem:[%s18182_s0 + $0xf8] ss:$12 sps:$4 sm:$0xff]  }
 0xa67   : > { %v9976_v19 = vmul.f32 %v9880_v3, %v22065_v35  ;;  %v22093_v31 = vadd.f32 %v21989_v52, %v9662_v44  ;;  %v9664_v45 = vadd.f32 %v9663_v47, %v21998_v48  ;;  %15237 = vmatprep.subr.bf16.mxu0 %v17052_v43  ;;  %v10525_v4 = vadd.f32 1.0, %v17403_v14 }
 0xa68   : > { %v9665_v34 = vpop.f32.mrf.mxu0  ;;  %v10071_v5 = vmul.f32 %v9975_v30, %v22062_v36  ;;  %15204 = vmatpush3.bf16.msra.mxu1 %v16991_v16  ;;  %v10251_v21 = vmul.f32 0.7978846, %v10155_v49  ;;  %v22101_v38 = vpack.c.bf16 %v10622_v33, %v10610_v22  ;;  %v10060_v47 = vmul.f32 %v9964_v26, %v22046_v10  ;;  %v17001_v26 = vld [vmem:[%s18182_s0 + $0x38] ss:$12 sps:$4 sm:$0xff]  }
 0xa69   : > { %v9666_v7 = vadd.f32 %v9665_v34, %v22014_v32  ;;  %v22104_v52 = vadd.f32 %v22006_v58, %v9664_v45  ;;  %15205 = vmatprep.subr.bf16.mxu1 %v16995_v12  ;;  %v10072_v49 = vmul.f32 %v9976_v19, %v22065_v35  ;;  %v9841_v14 = vmul.f32 0.5, %v21867_v8  ;;  %v9752_v12 = vpop.f32.mrf.mxu1  ;;  %v17005_v34 = vld [vmem:[%s18182_s0 + $0xe0] ss:$12 sps:$4 sm:$0xff]  }
 0xa6a   : > { %v9669_v6 = vpop.f32.mrf.mxu0  ;;  %v10167_v43 = vadd.f32 %v10071_v5, %v22062_v36  ;;  %v9891_v58 = vmul.f32 0.044715, %v22090_v41  ;;  %v9892_v16 = vmul.f32 0.044715, %v22093_v31  ;;  %v9853_v50 = vmul.f32 0.5, %v21900_v57 }
 0xa6b   : > { %v9670_v55 = vadd.f32 %v9669_v6, %v21998_v48  ;;  %v22110_v9 = vadd.f32 %v22019_v29, %v9666_v7  ;;  %12955 = vmatmul.mubr.bf16.gmra.mxu1 %v22096_v62  ;;  %v9903_v29 = vmul.f32 0.044715, %v22104_v52  ;;  %v10156_v44 = vadd.f32 %v10060_v47, %v22046_v10  ;;  %v17006_v47 = vld [vmem:[%s18182_s0 + $0x20] ss:$12 sps:$4 sm:$0xff]  }
 0xa6c   : > { %v9671_v3 = vpop.f32.mrf.mxu0  ;;  %v10263_v33 = vmul.f32 0.7978846, %v10167_v43  ;;  %15206 = vmatpush3.bf16.msra.mxu1 %v16996_v20  ;;  %17404 = vtanh.f32 %v10251_v21  ;;  %12964 = vmatprep.mubr.bf16.mxu1 %v22101_v38  ;;  %v10609_v8 = vmul.f32 %v10513_v28, %v9841_v14  ;;  %v10621_v57 = vmul.f32 %v10525_v4, %v9853_v50  ;;  %v9754_v43 = vpop.f32.mrf.mxu1 }
 0xa6d   : > { %v22124_v30 = vadd.f32 %v22037_v25, %v9670_v55  ;;  %15207 = vmatprep.subr.bf16.mxu1 %v17000_v18  ;;  %v9904_v22 = vmul.f32 0.044715, %v22110_v9  ;;  %v10168_v5 = vadd.f32 %v10072_v49, %v22065_v35  ;;  %v9987_v7 = vmul.f32 %v9891_v58, %v22090_v41 }
 0xa6e   : > { %v9673_v39 = vpop.f32.mrf.mxu0  ;;  %17406 = vtanh.f32 %v10263_v33  ;;  %v9988_v6 = vmul.f32 %v9892_v16, %v22093_v31  ;;  %v9672_v25 = vadd.f32 %v9671_v3, %v22014_v32  ;;  %v9999_v4 = vmul.f32 %v9903_v29, %v22104_v52 }
 0xa6f   : > { %v9674_v19 = vadd.f32 %v9673_v39, %v21998_v48  ;;  %v10252_v55 = vmul.f32 0.7978846, %v10156_v44  ;;  %v10264_v18 = vmul.f32 0.7978846, %v10168_v5  ;;  %v9915_v49 = vmul.f32 0.044715, %v22124_v30 }
 0xa70   : > { %v9675_v45 = vpop.f32.mrf.mxu0  ;;  %15208 = vmatpush3.bf16.msra.mxu1 %v17001_v26  ;;  %v22142_v3 = vpack.c.bf16 %v10621_v57, %v10609_v8  ;;  %v10000_v16 = vmul.f32 %v9904_v22, %v22110_v9  ;;  %v10083_v33 = vmul.f32 %v9987_v7, %v22090_v41  ;;  %v22148_v29 = vadd.f32 %v22054_v24, %v9672_v25  ;;  %v23325_v22 = vld [vmem:[#allocation52_spill] sm:$0xff]  ;;  %v17011_v24 = vld [vmem:[%s18182_s0 + $0x8] ss:$12 sps:$4 sm:$0xff]   ;;  %v17015_v5 = vld [vmem:[%s18182_s0 + $0x470] ss:$12 sps:$4 sm:$0xff]  }
 0xa71   : > { %v22134_v28 = vadd.f32 %v22078_v0, %v9674_v19  ;;  %v9676_v20 = vadd.f32 %v9675_v45, %v22014_v32  ;;  %15209 = vmatprep.subr.bf16.mxu1 %v17005_v34  ;;  %v17010_v0 = vld [vmem:[%s18182_s0 + $0xc8] ss:$12 sps:$4 sm:$0xff]   ;;  %17408 = vtanh.f32 %v10252_v55  ;;  %v10095_v26 = vmul.f32 %v9999_v4, %v22104_v52  ;;  %v9756_v34 = vpop.f32.mrf.mxu1 }
 0xa72   : > { %v9679_v21 = vpop.f32.mrf.mxu0  ;;  %17410 = vtanh.f32 %v10264_v18  ;;  %v10084_v57 = vmul.f32 %v9988_v6, %v22093_v31  ;;  %v10096_v4 = vmul.f32 %v10000_v16, %v22110_v9  ;;  %v17016_v16 = vld [vmem:[%s18182_s0 + $0x3b0] ss:$12 sps:$4 sm:$0xff]  }
 0xa73   : > { %v9927_v14 = vmul.f32 0.044715, %v22134_v28  ;;  %v9680_v58 = vadd.f32 %v9679_v21, %v21998_v48  ;;  %v22150_v39 = vadd.f32 %v9748_v1, %v9676_v20  ;;  %12965 = vmatmul.mubr.bf16.gmra.mxu1 %v22142_v3  ;;  %v10011_v1 = vmul.f32 %v9915_v49, %v22124_v30 }
 0xa74   : > { %v9681_v50 = vpop.f32.mrf.mxu0  ;;  %15210 = vmatpush3.bf16.msra.mxu1 %v17006_v47  ;;  %13080 = vmatprep.mubr.bf16.mxu1 %v23325_v22  ;;  %v10180_v6 = vadd.f32 %v10084_v57, %v22093_v31  ;;  %v10179_v20 = vadd.f32 %v10083_v33, %v22090_v41  ;;  %v9916_v21 = vmul.f32 0.044715, %v22148_v29  ;;  %v10192_v49 = vadd.f32 %v10096_v4, %v22110_v9 }
 0xa75   : > { %v22152_v44 = vadd.f32 %v9752_v12, %v9680_v58  ;;  %v9682_v8 = vadd.f32 %v9681_v50, %v22014_v32  ;;  %v10023_v12 = vmul.f32 %v9927_v14, %v22134_v28  ;;  %15211 = vmatprep.subr.bf16.mxu1 %v17010_v0  ;;  %v9928_v55 = vmul.f32 0.044715, %v22150_v39  ;;  %v9758_v58 = vpop.f32.mrf.mxu1 }
 0xa76   : > { %v9683_v19 = vpop.f32.mrf.mxu0  ;;  %v10276_v14 = vmul.f32 0.7978846, %v10180_v6  ;;  %v10191_v0 = vadd.f32 %v10095_v26, %v22104_v52  ;;  %v10107_v50 = vmul.f32 %v10011_v1, %v22124_v30  ;;  %v10012_v26 = vmul.f32 %v9916_v21, %v22148_v29  ;;  %v23327_v6 = vld [vmem:[#allocation54_spill] sm:$0xff] }
 0xa77   : > { %v9684_v45 = vadd.f32 %v9683_v19, %v21998_v48  ;;  %v9939_v7 = vmul.f32 0.044715, %v22152_v44  ;;  %v22172_v48 = vadd.f32 %v9754_v43, %v9682_v8  ;;  %v10119_v33 = vmul.f32 %v10023_v12, %v22134_v28  ;;  %v17020_v43 = vld [vmem:[%s18182_s0 + $0x458] ss:$12 sps:$4 sm:$0xff]  }
 0xa78   : > { %v9685_v25 = vpop.f32.mrf.mxu0  ;;  %15212 = vmatpush3.bf16.msra.mxu1 %v17011_v24  ;;  %17412 = vtanh.f32 %v10276_v14  ;;  %v10024_v24 = vmul.f32 %v9928_v55, %v22150_v39  ;;  %v10275_v12 = vmul.f32 0.7978846, %v10179_v20  ;;  %v10203_v21 = vadd.f32 %v10107_v50, %v22124_v30  ;;  %v17021_v55 = vld [vmem:[%s18182_s0 + $0x398] ss:$12 sps:$4 sm:$0xff]  }
 0xa79   : > { %v22170_v18 = vadd.f32 %v9756_v34, %v9684_v45  ;;  %v9686_v47 = vadd.f32 %v9685_v25, %v22014_v32  ;;  %v17405_v57 = vpop.eup %17404  ;;  %15277 = vmatprep.subr.bf16.mxu1 %v17015_v5  ;;  %v10035_v8 = vmul.f32 %v9939_v7, %v22152_v44  ;;  %v10288_v34 = vmul.f32 0.7978846, %v10192_v49  ;;  %v23326_v25 = vld [vmem:[#allocation53_spill] sm:$0xff] }
 0xa7a   : > { %v9771_v45 = vmul.f32 0.5, %v22030_v17  ;;  %v9783_v5 = vmul.f32 0.5, %v22062_v36  ;;  %v9940_v7 = vmul.f32 0.044715, %v22172_v48  ;;  %v17025_v36 = vld [vmem:[%s18182_s0 + $0x440] ss:$12 sps:$4 sm:$0xff]   ;;  %v10215_v49 = vadd.f32 %v10119_v33, %v22134_v28 }
 0xa7b   : > { %v9951_v19 = vmul.f32 0.044715, %v22170_v18  ;;  %v22183_v32 = vadd.f32 %v9758_v58, %v9686_v47  ;;  %v17407_v22 = vpop.eup %17406  ;;  %13081 = vmatmul.mubr.bf16.vlgmr.msra.gmra.mxu1 %v23326_v25  ;;  %v22192_v4 = vpop.f32.mrf.mxu1  ;;  %17414 = vtanh.f32 %v10288_v34  ;;  %v10287_v47 = vmul.f32 0.7978846, %v10191_v0 }
 0xa7c   : > { %13088 = vmatprep.mubr.bf16.mxu1 %v23327_v6  ;;  %15278 = vmatpush3.bf16.msra.mxu1 %v17016_v16  ;;  %17416 = vtanh.f32 %v10275_v12  ;;  %v10455_v17 = vadd.f32 1.0, %v17407_v22  ;;  %v10131_v14 = vmul.f32 %v10035_v8, %v22152_v44  ;;  %v9772_v58 = vmul.f32 0.5, %v22046_v10  ;;  %v17026_v10 = vld [vmem:[%s18182_s0 + $0x380] ss:$12 sps:$4 sm:$0xff]  }
 0xa7d   : > { %v10047_v1 = vmul.f32 %v9951_v19, %v22170_v18  ;;  %v9952_v20 = vmul.f32 0.044715, %v22183_v32  ;;  %15279 = vmatprep.subr.bf16.mxu1 %v17020_v43  ;;  %17418 = vtanh.f32 %v10287_v47  ;;  %v10108_v50 = vmul.f32 %v10012_v26, %v22148_v29  ;;  %v22206_v22 = vpop.f32.mrf.mxu1 }
 0xa7e   : > { %v17409_v19 = vpop.eup %17408  ;;  %v10120_v0 = vmul.f32 %v10024_v24, %v22150_v39  ;;  %v10443_v34 = vadd.f32 1.0, %v17405_v57  ;;  %v10036_v43 = vmul.f32 %v9940_v7, %v22172_v48  ;;  %v9784_v33 = vmul.f32 0.5, %v22065_v35  ;;  %v17030_v57 = vld [vmem:[%s18182_s0 + $0x428] ss:$12 sps:$4 sm:$0xff]  }
 0xa7f   : > { %v10143_v16 = vmul.f32 %v10047_v1, %v22170_v18  ;;  %v10444_v12 = vadd.f32 1.0, %v17409_v19  ;;  %v17411_v8 = vpop.eup %17410  ;;  %v10048_v25 = vmul.f32 %v9952_v20, %v22183_v32  ;;  %v10204_v1 = vadd.f32 %v10108_v50, %v22148_v29  ;;  %v22217_v50 = vpop.f32.mrf.mxu1 }
 0xa80   : > { %15280 = vmatpush3.bf16.msra.mxu1 %v17021_v55  ;;  %v10216_v26 = vadd.f32 %v10120_v0, %v22150_v39  ;;  %v10299_v6 = vmul.f32 0.7978846, %v10203_v21  ;;  %v10551_v47 = vmul.f32 %v10455_v17, %v9783_v5  ;;  %v10227_v24 = vadd.f32 %v10131_v14, %v22152_v44  ;;  %v23329_v17 = vld [vmem:[#allocation56_spill] sm:$0xff] }
 0xa81   : > { %15281 = vmatprep.subr.bf16.mxu1 %v17025_v36  ;;  %v10456_v7 = vadd.f32 1.0, %v17411_v8  ;;  %v10311_v60 = vmul.f32 0.7978846, %v10215_v49  ;;  %v10239_v35 = vadd.f32 %v10143_v16, %v22170_v18  ;;  %v10300_v19 = vmul.f32 0.7978846, %v10204_v1 }
 0xa82   : > { %v10312_v55 = vmul.f32 0.7978846, %v10216_v26  ;;  %17420 = vtanh.f32 %v10299_v6  ;;  %v10539_v20 = vmul.f32 %v10443_v34, %v9771_v45  ;;  %v10540_v5 = vmul.f32 %v10444_v12, %v9772_v58  ;;  %v17031_v36 = vld [vmem:[%s18182_s0 + $0x368] ss:$12 sps:$4 sm:$0xff]   ;;  %v17035_v45 = vld [vmem:[%s18182_s0 + $0x410] ss:$12 sps:$4 sm:$0xff]  }
 0xa83   : > { %13089 = vmatmul.mubr.bf16.gmra.mxu1 %v23328_v40  ;;  %v10552_v21 = vmul.f32 %v10456_v7, %v9784_v33  ;;  %17422 = vtanh.f32 %v10311_v60  ;;  %v10132_v49 = vmul.f32 %v10036_v43, %v22172_v48  ;;  %v10144_v14 = vmul.f32 %v10048_v25, %v22183_v32  ;;  %v17053_v58 = vld [vmem:[%s18182_s0 + $0x230] ss:$12 sps:$4 sm:$0xff]   ;;  %v17056_v0 = vld [vmem:[%s18182_s0 + $0x2d8] ss:$12 sps:$4 sm:$0xff]  }
 0xa84   : > { %13096 = vmatprep.mubr.bf16.mxu1 %v23329_v17  ;;  %15282 = vmatpush3.bf16.msra.mxu1 %v17026_v10  ;;  %17424 = vtanh.f32 %v10300_v19  ;;  %v22226_v40 = vpack.c.bf16 %v10551_v47, %v10539_v20  ;;  %v10323_v12 = vmul.f32 0.7978846, %v10227_v24  ;;  %v10335_v43 = vmul.f32 0.7978846, %v10239_v35  ;;  %v17036_v8 = vld [vmem:[%s18182_s0 + $0x350] ss:$12 sps:$4 sm:$0xff]   ;;  %v22233_v10 = vpop.f32.mrf.mxu1 }
 0xa85   : > { %15283 = vmatprep.subr.bf16.mxu1 %v17030_v57  ;;  %v22224_v16 = vpack.c.bf16 %v10552_v21, %v10540_v5  ;;  %17426 = vtanh.f32 %v10312_v55  ;;  %v17413_v60 = vpop.eup %17412  ;;  %v10228_v34 = vadd.f32 %v10132_v49, %v22172_v48  ;;  %v10240_v33 = vadd.f32 %v10144_v14, %v22183_v32  ;;  %v17040_v26 = vld [vmem:[%s18182_s0 + $0x3f8] ss:$12 sps:$4 sm:$0xff]   ;;  %v17060_v20 = vld [vmem:[%s18182_s0 + $0x2c0] ss:$12 sps:$4 sm:$0xff]  }
 0xa86   : > { %v10468_v25 = vadd.f32 1.0, %v17413_v60  ;;  %17428 = vtanh.f32 %v10323_v12  ;;  %v17057_v24 = vld [vmem:[%s18182_s0 + $0x218] ss:$12 sps:$4 sm:$0xff]   ;;  %v9796_v7 = vmul.f32 0.5, %v22093_v31  ;;  %v9808_v35 = vmul.f32 0.5, %v22110_v9  ;;  %v23330_v21 = vld [vmem:[#allocation57_spill] sm:$0xff]  ;;  %v22243_v17 = vpop.f32.mrf.mxu1 }
 0xa87   : > { %13007 = vmatprep.mubr.bf16.mxu0 %v22224_v16  ;;  %v10324_v6 = vmul.f32 0.7978846, %v10228_v34  ;;  %v10336_v47 = vmul.f32 0.7978846, %v10240_v33  ;;  %17430 = vtanh.f32 %v10335_v43  ;;  %v23331_v31 = vld [vmem:[#allocation58_spill] sm:$0xff]  ;;  %v9795_v14 = vmul.f32 0.5, %v22090_v41 }
 0xa88   : > { %v17415_v1 = vpop.eup %17414  ;;  %15284 = vmatpush3.bf16.msra.mxu1 %v17031_v36  ;;  %13008 = vmatmul.mubr.bf16.vlgmr.msra.gmra.mxu0 %v22226_v40  ;;  %v10564_v36 = vmul.f32 %v10468_v25, %v9796_v7  ;;  %v17041_v9 = vld [vmem:[%s18182_s0 + $0x338] ss:$12 sps:$4 sm:$0xff]   ;;  %v17045_v60 = vld [vmem:[%s18182_s0 + $0x3e0] ss:$12 sps:$4 sm:$0xff]   ;;  %v17064_v43 = vld [vmem:[%s18182_s0 + $0x2a8] ss:$12 sps:$4 sm:$0xff]   ;;  %v22258_v41 = vpop.f32.mrf.mxu1 }
 0xa89   : > { %v17417_v57 = vpop.eup %17416  ;;  %15285 = vmatprep.subr.bf16.mxu1 %v17035_v45  ;;  %15238 = vmatpush3.bf16.msra.mxu0 %v17053_v58  ;;  %v10480_v19 = vadd.f32 1.0, %v17415_v1  ;;  %17432 = vtanh.f32 %v10324_v6  ;;  %v9807_v45 = vmul.f32 0.5, %v22104_v52  ;;  %v17061_v34 = vld [vmem:[%s18182_s0 + $0x200] ss:$12 sps:$4 sm:$0xff]   ;;  %v22256_v25 = vld [vmem:[%s23332_s26] sm:$0x7] }
 0xa8a   : > { %15239 = vmatprep.subr.bf16.mxu0 %v17056_v0  ;;  %v10467_v55 = vadd.f32 1.0, %v17417_v57  ;;  %v17419_v5 = vpop.eup %17418  ;;  %17434 = vtanh.f32 %v10336_v47  ;;  %v17046_v1 = vld [vmem:[%s18182_s0 + $0x320] ss:$12 sps:$4 sm:$0xff]   ;;  %v17050_v47 = vld [vmem:[%s18182_s0 + $0x3c8] ss:$12 sps:$4 sm:$0xff]  }
 0xa8b   : > { %13097 = vmatmul.mubr.bf16.gmra.mxu1 %v23330_v21  ;;  %v10576_v49 = vmul.f32 %v10480_v19, %v9808_v35  ;;  %v10479_v58 = vadd.f32 1.0, %v17419_v5  ;;  %v17065_v57 = vld [vmem:[%s18182_s0 + $0x1e8] ss:$12 sps:$4 sm:$0xff]   ;;  %v22268_v35 = vrot.slane %v22256_v25, %v23266_v53  ;;  %v17068_v5 = vld [vmem:[%s18182_s0 + $0x290] ss:$12 sps:$4 sm:$0xff]   ;;  %v22275_v21 = vrot.slane %v22256_v25, %v23319_v46 }
 0xa8c   : > { %13104 = vmatprep.mubr.bf16.mxu1 %v23331_v31  ;;  %15286 = vmatpush3.bf16.msra.mxu1 %v17036_v8  ;;  %v10563_v33 = vmul.f32 %v10467_v55, %v9795_v14  ;;  %v9831_v55 = vmul.f32 0.5, %v22134_v28  ;;  %v9820_v53 = vmul.f32 0.5, %v22148_v29  ;;  %v17051_v28 = vld [vmem:[%s18182_s0 + $0x308] ss:$12 sps:$4 sm:$0xff]   ;;  %v17054_v46 = vld [vmem:[%s18182_s0 + $0x770] ss:$12 sps:$4 sm:$0xff]  }
 0xa8d   : > { %15287 = vmatprep.subr.bf16.mxu1 %v17040_v26  ;;  %15240 = vmatpush3.bf16.msra.mxu0 %v17057_v24  ;;  %v22250_v0 = vpack.c.bf16 %v10576_v49, %v10564_v36  ;;  %v10575_v12 = vmul.f32 %v10479_v58, %v9807_v45  ;;  %v22278_v36 = vpop.f32.mrf.mxu1  ;;  %v9832_v49 = vmul.f32 0.5, %v22150_v39  ;;  %v12645_v39 = vadd.f32 %v22192_v4, %v22268_v35 }
 0xa8e   : > { %15241 = vmatprep.subr.bf16.mxu0 %v17060_v20 }
 0xa8f   : > { %v17421_v8 = vpop.eup %17420  ;;  %13017 = vmatprep.mubr.bf16.mxu0 %v22250_v0  ;;  %v22262_v26 = vpack.c.bf16 %v10575_v12, %v10563_v33  ;;  %v17069_v12 = vld [vmem:[%s18182_s0 + $0x1d0] ss:$12 sps:$4 sm:$0xff]  }
 0xa90   : > { %v17423_v52 = vpop.eup %17422  ;;  %15288 = vmatpush3.bf16.msra.mxu1 %v17041_v9  ;;  %v10491_v20 = vadd.f32 1.0, %v17421_v8  ;;  %v9819_v9 = vmul.f32 0.5, %v22124_v30  ;;  %v12647_v30 = vadd.f32 %v22206_v22, %v22275_v21  ;;  %v17072_v22 = vld [vmem:[%s18182_s0 + $0x278] ss:$12 sps:$4 sm:$0xff]  }
 0xa91   : > { %v17425_v6 = vpop.eup %17424  ;;  %15289 = vmatprep.subr.bf16.mxu1 %v17045_v60  ;;  %15242 = vmatpush3.bf16.msra.mxu0 %v17061_v34  ;;  %v10503_v24 = vadd.f32 1.0, %v17423_v52  ;;  %v22290_v34 = vpop.f32.mrf.mxu1  ;;  %v17055_v52 = vld [vmem:[%s18182_s0 + $0x6b0] ss:$12 sps:$4 sm:$0xff]  }
 0xa92   : > { %v17427_v7 = vpop.eup %17426  ;;  %13018 = vmatmul.mubr.bf16.gmra.mxu0 %v22262_v26  ;;  %15243 = vmatprep.subr.bf16.mxu0 %v17064_v43  ;;  %v10492_v19 = vadd.f32 1.0, %v17425_v6  ;;  %v10587_v60 = vmul.f32 %v10491_v20, %v9819_v9  ;;  %v12649_v20 = vadd.f32 %v22217_v50, %v22268_v35  ;;  %v12651_v50 = vadd.f32 %v22233_v10, %v22275_v21 }
 0xa93   : > { %13105 = vmatmul.mubr.bf16.gmra.mxu1 %v21072_v61  ;;  %v10504_v31 = vadd.f32 1.0, %v17427_v7  ;;  %v10599_v14 = vmul.f32 %v10503_v24, %v9831_v55  ;;  %v17429_v45 = vpop.eup %17428  ;;  %v9844_v24 = vmul.f32 0.5, %v22172_v48  ;;  %v9856_v7 = vmul.f32 0.5, %v22183_v32  ;;  %v22312_v48 = vpop.f32.mrf.mxu1  ;;  %v17073_v32 = vld [vmem:[%s18182_s0 + $0x1b8] ss:$12 sps:$4 sm:$0xff]  }
 0xa94   : > { %15290 = vmatpush3.bf16.msra.mxu1 %v17046_v1  ;;  %13210 = vmatprep.mubr.bf16.mxu1 %v21419_v37  ;;  %v10588_v61 = vmul.f32 %v10492_v19, %v9820_v53  ;;  %v17431_v29 = vpop.eup %17430  ;;  %v17058_v1 = vld [vmem:[%s18182_s0 + $0x758] ss:$12 sps:$4 sm:$0xff]   ;;  %v9855_v53 = vmul.f32 0.5, %v22170_v18  ;;  %v9843_v18 = vmul.f32 0.5, %v22152_v44  ;;  %v17077_v44 = vld [vmem:[%s18182_s0 + $0x1a0] ss:$12 sps:$4 sm:$0xff]  }
 0xa95   : > { %15291 = vmatprep.subr.bf16.mxu1 %v17050_v47  ;;  %15244 = vmatpush3.bf16.msra.mxu0 %v17065_v57  ;;  %v10600_v58 = vmul.f32 %v10504_v31, %v9832_v49  ;;  %v22297_v6 = vpack.c.bf16 %v10599_v14, %v10587_v60  ;;  %v10527_v57 = vadd.f32 1.0, %v17431_v29  ;;  %v10515_v49 = vadd.f32 1.0, %v17429_v45  ;;  %v17059_v14 = vld [vmem:[%s18182_s0 + $0x698] ss:$12 sps:$4 sm:$0xff]   ;;  %v12666_v60 = vpop.f32.mrf.mxu1 }
 0xa96   : > { %15245 = vmatprep.subr.bf16.mxu0 %v17068_v5  ;;  %v17433_v37 = vpop.eup %17432 }
 0xa97   : > { %v22292_v33 = vpack.c.bf16 %v10600_v58, %v10588_v61  ;;  %v17435_v8 = vpop.eup %17434  ;;  %v10516_v47 = vadd.f32 1.0, %v17433_v37  ;;  %v10623_v45 = vmul.f32 %v10527_v57, %v9855_v53  ;;  %v17062_v61 = vld [vmem:[%s18182_s0 + $0x740] ss:$12 sps:$4 sm:$0xff]   ;;  %v10611_v10 = vmul.f32 %v10515_v49, %v9843_v18  ;;  %v23333_v57 = vld [vmem:[#allocation67_spill] sm:$0xff] }
 0xa98   : > { %15292 = vmatpush3.bf16.msra.mxu1 %v17051_v28  ;;  %v10528_v19 = vadd.f32 1.0, %v17435_v8  ;;  %v17066_v8 = vld [vmem:[%s18182_s0 + $0x728] ss:$12 sps:$4 sm:$0xff]   ;;  %v17070_v49 = vld [vmem:[%s18182_s0 + $0x710] ss:$12 sps:$4 sm:$0xff]   ;;  %v23336_v18 = vld [vmem:[#allocation60_spill] sm:$0xff] }
 0xa99   : > { %15357 = vmatprep.subr.bf16.mxu1 %v17054_v46  ;;  %13027 = vmatprep.mubr.bf16.mxu0 %v22292_v33  ;;  %v10612_v31 = vmul.f32 %v10516_v47, %v9844_v24  ;;  %v17081_v24 = vld [vmem:[%s18182_s0 + $0x188] ss:$12 sps:$4 sm:$0xff]  }
 0xa9a   : > { %v12717_v43 = vpop.f32.mrf.mxu0  ;;  %13028 = vmatmul.mubr.bf16.gmra.mxu0 %v22297_v6  ;;  %v10624_v28 = vmul.f32 %v10528_v19, %v9856_v7  ;;  %v12661_v19 = vadd.f32 %v22290_v34, %v22275_v21 }
 0xa9b   : > { %v22299_v4 = vadd.f32 %v12717_v43, %v12645_v39  ;;  %13211 = vmatmul.mubr.bf16.vlgmr.msra.gmra.mxu1 %v21482_v23  ;;  %15246 = vmatpush3.bf16.msra.mxu0 %v17069_v12  ;;  %v17076_v23 = vld [vmem:[%s18182_s0 + $0x260] ss:$12 sps:$4 sm:$0xff]   ;;  %v22335_v43 = vpack.c.bf16 %v10623_v45, %v10611_v10  ;;  %v17088_v45 = vld [vmem:[%s18182_s0 + $0x5d8] ss:$12 sps:$4 sm:$0xff]  }
 0xa9c   : > { %v12719_v55 = vpop.f32.mrf.mxu0  ;;  %13218 = vmatprep.mubr.bf16.mxu1 %v21489_v2  ;;  %15358 = vmatpush3.bf16.msra.mxu1 %v17055_v52  ;;  %v22324_v58 = vpack.c.bf16 %v10624_v28, %v10612_v31  ;;  %v12655_v2 = vadd.f32 %v22243_v17, %v22268_v35  ;;  %v17063_v12 = vld [vmem:[%s18182_s0 + $0x680] ss:$12 sps:$4 sm:$0xff]   ;;  %v17075_v10 = vld [vmem:[%s18182_s0 + $0x638] ss:$12 sps:$4 sm:$0xff]  }
 0xa9d   : > { %v22308_v5 = vadd.f32 %v12719_v55, %v12647_v30  ;;  %15359 = vmatprep.subr.bf16.mxu1 %v17058_v1  ;;  %15247 = vmatprep.subr.bf16.mxu0 %v17072_v22  ;;  %v12657_v30 = vadd.f32 %v22258_v41, %v22275_v21  ;;  %v12659_v1 = vadd.f32 %v22278_v36, %v22268_v35  ;;  %v17080_v41 = vld [vmem:[%s18182_s0 + $0x248] ss:$12 sps:$4 sm:$0xff]   ;;  %v12668_v22 = vpop.f32.mrf.mxu1  ;;  %v23334_v55 = vld [vmem:[#allocation68_spill] sm:$0xff] }
 0xa9e   : > { %v12721_v9 = vpop.f32.mrf.mxu0  ;;  %13037 = vmatprep.mubr.bf16.mxu0 %v22324_v58  ;;  %v17067_v36 = vld [vmem:[%s18182_s0 + $0x668] ss:$12 sps:$4 sm:$0xff]  }
 0xa9f   : > { %v22321_v46 = vadd.f32 %v12721_v9, %v12649_v20  ;;  %15248 = vmatpush3.bf16.msra.mxu0 %v17073_v32  ;;  %v17084_v20 = vld [vmem:[%s18182_s0 + $0x5f0] ss:$12 sps:$4 sm:$0xff]   ;;  %v12670_v34 = vpop.f32.mrf.mxu1 }
 0xaa0   : > { %v12723_v29 = vpop.f32.mrf.mxu0  ;;  %15360 = vmatpush3.bf16.msra.mxu1 %v17059_v14  ;;  %15249 = vmatprep.subr.bf16.mxu0 %v17076_v23  ;;  %v23335_v32 = vld [vmem:[#allocation59_spill] sm:$0xff] }
 0xaa1   : > { %v22328_v39 = vadd.f32 %v12723_v29, %v12651_v50  ;;  %15361 = vmatprep.subr.bf16.mxu1 %v17062_v61  ;;  %v17071_v9 = vld [vmem:[%s18182_s0 + $0x650] ss:$12 sps:$4 sm:$0xff]   ;;  %v17074_v50 = vld [vmem:[%s18182_s0 + $0x6f8] ss:$12 sps:$4 sm:$0xff]   ;;  %v12674_v23 = vpop.f32.mrf.mxu1  ;;  %v23337_v61 = vld [vmem:[#allocation69_spill] sm:$0xff] }
 0xaa2   : > { %v12727_v37 = vpop.f32.mrf.mxu0  ;;  %13038 = vmatmul.mubr.bf16.gmra.mxu0 %v22335_v43  ;;  %v17085_v14 = vld [vmem:[%s18182_s0 + $0x530] ss:$12 sps:$4 sm:$0xff]   ;;  %v23338_v29 = vld [vmem:[#allocation61_spill] sm:$0xff] }
 0xaa3   : > { %v22337_v17 = vadd.f32 %v12727_v37, %v12655_v2  ;;  %13219 = vmatmul.mubr.bf16.gmra.mxu1 %v23333_v57  ;;  %15250 = vmatpush3.bf16.msra.mxu0 %v17077_v44  ;;  %v23339_v2 = vld [vmem:[#allocation70_spill] sm:$0xff]  ;;  %v17078_v44 = vld [vmem:[%s18182_s0 + $0x6e0] ss:$12 sps:$4 sm:$0xff]   ;;  %v17089_v37 = vld [vmem:[%s18182_s0 + $0x518] ss:$12 sps:$4 sm:$0xff]  }
 0xaa4   : > { %v12729_v52 = vpop.f32.mrf.mxu0  ;;  %13226 = vmatprep.mubr.bf16.mxu1 %v23334_v55  ;;  %15362 = vmatpush3.bf16.msra.mxu1 %v17063_v12  ;;  %v12665_v12 = vadd.f32 %v22312_v48, %v22268_v35  ;;  %v17082_v57 = vld [vmem:[%s18182_s0 + $0x6c8] ss:$12 sps:$4 sm:$0xff]  }
 0xaa5   : > { %v22344_v47 = vadd.f32 %v12729_v52, %v12657_v30  ;;  %15363 = vmatprep.subr.bf16.mxu1 %v17066_v8  ;;  %13145 = vmatprep.mubr.bf16.mxu0 %v23335_v32  ;;  %v17092_v30 = vld [vmem:[%s18182_s0 + $0x5c0] ss:$12 sps:$4 sm:$0xff]   ;;  %v12676_v8 = vpop.f32.mrf.mxu1  ;;  %v23340_v55 = vld [vmem:[#allocation62_spill] sm:$0xff]  ;;  %v23342_v32 = vld [vmem:[#allocation63_spill] sm:$0xff] }
 0xaa6   : > { %v12731_v7 = vpop.f32.mrf.mxu0  ;;  %15251 = vmatprep.subr.bf16.mxu0 %v17080_v41  ;;  %v17079_v52 = vld [vmem:[%s18182_s0 + $0x620] ss:$12 sps:$4 sm:$0xff]   ;;  %v12667_v41 = vadd.f32 %v12666_v60, %v22275_v21  ;;  %v17096_v48 = vld [vmem:[%s18182_s0 + $0x5a8] ss:$12 sps:$4 sm:$0xff]  }
 0xaa7   : > { %v22353_v53 = vadd.f32 %v12731_v7, %v12659_v1  ;;  %15252 = vmatpush3.bf16.msra.mxu0 %v17081_v24  ;;  %v17093_v7 = vld [vmem:[%s18182_s0 + $0x500] ss:$12 sps:$4 sm:$0xff]  }
 0xaa8   : > { %v12733_v31 = vpop.f32.mrf.mxu0  ;;  %15364 = vmatpush3.bf16.msra.mxu1 %v17067_v36  ;;  %15317 = vmatprep.subr.bf16.mxu0 %v17084_v20  ;;  %v12669_v36 = vadd.f32 %v12668_v22, %v22268_v35  ;;  %v12678_v20 = vpop.f32.mrf.mxu1 }
 0xaa9   : > { %v22357_v28 = vadd.f32 %v12733_v31, %v12661_v19  ;;  %15365 = vmatprep.subr.bf16.mxu1 %v17070_v49  ;;  %v23341_v49 = vld [vmem:[#allocation71_spill] sm:$0xff]  ;;  %v17083_v31 = vld [vmem:[%s18182_s0 + $0x608] ss:$12 sps:$4 sm:$0xff]  }
 0xaaa   : > { %13146 = vmatmul.mubr.bf16.vlgmr.msra.gmra.mxu0 %v23336_v18  ;;  %v17097_v18 = vld [vmem:[%s18182_s0 + $0x4e8] ss:$12 sps:$4 sm:$0xff]  }
 0xaab   : > { %13227 = vmatmul.mubr.bf16.gmra.mxu1 %v23337_v61  ;;  %13153 = vmatprep.mubr.bf16.mxu0 %v23338_v29  ;;  %v17100_v61 = vld [vmem:[%s18182_s0 + $0x590] ss:$12 sps:$4 sm:$0xff]   ;;  %v12675_v29 = vadd.f32 %v12674_v23, %v22268_v35 }
 0xaac   : > { %13234 = vmatprep.mubr.bf16.mxu1 %v23339_v2  ;;  %15366 = vmatpush3.bf16.msra.mxu1 %v17071_v9 }
 0xaad   : > { %15367 = vmatprep.subr.bf16.mxu1 %v17074_v50  ;;  %15318 = vmatpush3.bf16.msra.mxu0 %v17085_v14  ;;  %v12671_v50 = vadd.f32 %v12670_v34, %v22275_v21  ;;  %v22390_v14 = vld [vmem:[%s18182_s0 + $0x8f0] ss:$12 sps:$4 sm:$0xff]  }
 0xaae   : > { %15319 = vmatprep.subr.bf16.mxu0 %v17088_v45  ;;  %v22400_v34 = vld [vmem:[%s18182_s0 + $0x830] ss:$12 sps:$4 sm:$0xff]  }
 0xab0   : > { %15368 = vmatpush3.bf16.msra.mxu1 %v17075_v10 }
 0xab1   : > { %15369 = vmatprep.subr.bf16.mxu1 %v17078_v44  ;;  %15320 = vmatpush3.bf16.msra.mxu0 %v17089_v37  ;;  %v12677_v44 = vadd.f32 %v12676_v8, %v22275_v21  ;;  %v22405_v37 = vld [vmem:[%s18182_s0 + $0x8d8] ss:$12 sps:$4 sm:$0xff]   ;;  %v12679_v8 = vadd.f32 %v12678_v20, %v22268_v35 }
 0xab2   : > { %v12737_v1 = vpop.f32.mrf.mxu0  ;;  %13154 = vmatmul.mubr.bf16.gmra.mxu0 %v23340_v55  ;;  %15321 = vmatprep.subr.bf16.mxu0 %v17092_v30 }
 0xab3   : > { %v22376_v24 = vadd.f32 %v12737_v1, %v12665_v12  ;;  %13235 = vmatmul.mubr.bf16.gmra.mxu1 %v23341_v49  ;;  %13161 = vmatprep.mubr.bf16.mxu0 %v23342_v32  ;;  %v17101_v12 = vld [vmem:[%s18182_s0 + $0x4d0] ss:$12 sps:$4 sm:$0xff]   ;;  %v23343_v1 = vld [vmem:[#allocation64_spill] sm:$0xff] }
 0xab4   : > { %v12739_v19 = vpop.f32.mrf.mxu0  ;;  %15370 = vmatpush3.bf16.msra.mxu1 %v17079_v52  ;;  %13340 = vmatprep.mubr.bf16.mxu1 %v22016_v42  ;;  %v12680_v42 = vpop.f32.mrf.mxu1 }
 0xab5   : > { %v22383_v60 = vadd.f32 %v12739_v19, %v12667_v41  ;;  %15371 = vmatprep.subr.bf16.mxu1 %v17082_v57  ;;  %15322 = vmatpush3.bf16.msra.mxu0 %v17093_v7  ;;  %v17104_v41 = vld [vmem:[%s18182_s0 + $0x578] ss:$12 sps:$4 sm:$0xff]   ;;  %v23344_v19 = vld [vmem:[#allocation65_spill] sm:$0xff]  ;;  %v12681_v35 = vadd.f32 %v12680_v42, %v22275_v21 }
 0xab6   : > { %v12741_v9 = vpop.f32.mrf.mxu0  ;;  %15323 = vmatprep.subr.bf16.mxu0 %v17096_v48  ;;  %v22423_v48 = vld [vmem:[%s18182_s0 + $0x818] ss:$12 sps:$4 sm:$0xff]   ;;  %v17112_v42 = vld [vmem:[%s18182_s0 + $0x548] ss:$12 sps:$4 sm:$0xff]  }
 0xab7   : > { %v22392_v22 = vadd.f32 %v12741_v9, %v12669_v36 }
 0xab8   : > { %v12743_v45 = vpop.f32.mrf.mxu0  ;;  %15372 = vmatpush3.bf16.msra.mxu1 %v17083_v31  ;;  %v17108_v31 = vld [vmem:[%s18182_s0 + $0x560] ss:$12 sps:$4 sm:$0xff]  }
 0xab9   : > { %v22397_v2 = vadd.f32 %v12743_v45, %v12671_v50  ;;  %15773 = vmatprep.subr.bf16.mxu1 %v22390_v14  ;;  %15324 = vmatpush3.bf16.msra.mxu0 %v17097_v18  ;;  %v22444_v50 = vld [vmem:[%s18182_s0 + $0x800] ss:$12 sps:$4 sm:$0xff]   ;;  %v22451_v45 = vld [vmem:[%s18182_s0 + $0x8a8] ss:$12 sps:$4 sm:$0xff]  }
 0xaba   : > { %v12747_v10 = vpop.f32.mrf.mxu0  ;;  %13162 = vmatmul.mubr.bf16.gmra.mxu0 %v23343_v1  ;;  %15325 = vmatprep.subr.bf16.mxu0 %v17100_v61  ;;  %v17109_v61 = vld [vmem:[%s18182_s0 + $0x4a0] ss:$12 sps:$4 sm:$0xff]  }
 0xabb   : > { %v22407_v30 = vadd.f32 %v12747_v10, %v12675_v29  ;;  %13341 = vmatmul.mubr.bf16.vlgmr.msra.gmra.mxu1 %v22022_v54  ;;  %13169 = vmatprep.mubr.bf16.mxu0 %v23344_v19  ;;  %v22431_v54 = vld [vmem:[%s18182_s0 + $0x8c0] ss:$12 sps:$4 sm:$0xff]   ;;  %v23345_v29 = vld [vmem:[#allocation66_spill] sm:$0xff] }
 0xabc   : > { %v12790_v23 = vpop.f32.mrf.mxu1  ;;  %v12749_v52 = vpop.f32.mrf.mxu0  ;;  %13348 = vmatprep.mubr.bf16.mxu1 %v22027_v11  ;;  %15781 = vmatpush3.bf16.msra.mxu1 %v22400_v34  ;;  %v17105_v11 = vld [vmem:[%s18182_s0 + $0x4b8] ss:$12 sps:$4 sm:$0xff]  }
 0xabd   : > { %v22413_v57 = vadd.f32 %v12790_v23, %v22299_v4  ;;  %v22417_v7 = vadd.f32 %v12749_v52, %v12677_v44  ;;  %15774 = vmatprep.subr.bf16.mxu1 %v22405_v37  ;;  %15326 = vmatpush3.bf16.msra.mxu0 %v17101_v12  ;;  %v17099_v12 = vld [vmem:[%s18182_s0 + $0x7e8] ss:$12 sps:$4 sm:$0xff]   ;;  %v17102_v52 = vld [vmem:[%s18182_s0 + $0x890] ss:$12 sps:$4 sm:$0xff]  }
 0xabe   : > { %v12792_v55 = vpop.f32.mrf.mxu1  ;;  %v12751_v36 = vpop.f32.mrf.mxu0  ;;  %15327 = vmatprep.subr.bf16.mxu0 %v17104_v41 }
 0xabf   : > { %v22426_v4 = vadd.f32 %v12792_v55, %v22308_v5  ;;  %v22433_v20 = vadd.f32 %v12751_v36, %v12679_v8  ;;  %v17107_v36 = vld [vmem:[%s18182_s0 + $0x7b8] ss:$12 sps:$4 sm:$0xff]  }
 0xac0   : > { %v12794_v49 = vpop.f32.mrf.mxu1  ;;  %v12753_v32 = vpop.f32.mrf.mxu0  ;;  %15782 = vmatpush3.bf16.msra.mxu1 %v22423_v48 }
 0xac1   : > { %v22438_v5 = vadd.f32 %v12794_v49, %v22321_v46  ;;  %v22440_v9 = vadd.f32 %v12753_v32, %v12681_v35  ;;  %15775 = vmatprep.subr.bf16.mxu1 %v22431_v54  ;;  %15328 = vmatpush3.bf16.msra.mxu0 %v17105_v11  ;;  %v17110_v35 = vld [vmem:[%s18182_s0 + $0x860] ss:$12 sps:$4 sm:$0xff]   ;;  %v17114_v49 = vld [vmem:[%s18182_s0 + $0x848] ss:$12 sps:$4 sm:$0xff]  }
 0xac2   : > { %v12796_v21 = vpop.f32.mrf.mxu1  ;;  %13170 = vmatmul.mubr.bf16.gmra.mxu0 %v23345_v29  ;;  %15329 = vmatprep.subr.bf16.mxu0 %v17108_v31  ;;  %v23347_v11 = vld [vmem:[#allocation73_spill] sm:$0xff] }
 0xac3   : > { %v22447_v18 = vadd.f32 %v12796_v21, %v22328_v39  ;;  %13349 = vmatmul.mubr.bf16.gmra.mxu1 %v22067_v63  ;;  %v23346_v39 = vld [vmem:[#allocation72_spill] sm:$0xff] }
 0xac4   : > { %v12800_v46 = vpop.f32.mrf.mxu1  ;;  %13275 = vmatprep.mubr.bf16.mxu0 %v23346_v39  ;;  %13356 = vmatprep.mubr.bf16.mxu1 %v22058_v27  ;;  %v17103_v27 = vld [vmem:[%s18182_s0 + $0x7d0] ss:$12 sps:$4 sm:$0xff]  }
 0xac5   : > { %v22457_v10 = vadd.f32 %v12800_v46, %v22337_v17  ;;  %15783 = vmatpush3.bf16.msra.mxu1 %v22444_v50  ;;  %15330 = vmatpush3.bf16.msra.mxu0 %v17109_v61  ;;  %v17113_v17 = vld [vmem:[%s18182_s0 + $0x488] ss:$12 sps:$4 sm:$0xff]  }
 0xac6   : > { %v12802_v44 = vpop.f32.mrf.mxu1  ;;  %15776 = vmatprep.subr.bf16.mxu1 %v22451_v45  ;;  %15331 = vmatprep.subr.bf16.mxu0 %v17112_v42 }
 0xac7   : > { %v22465_v23 = vadd.f32 %v12802_v44, %v22344_v47  ;;  %v17106_v47 = vld [vmem:[%s18182_s0 + $0x878] ss:$12 sps:$4 sm:$0xff]  }
 0xac8   : > { %v12804_v1 = vpop.f32.mrf.mxu1 }
 0xac9   : > { %v22471_v63 = vadd.f32 %v12804_v1, %v22353_v53  ;;  %15784 = vmatpush3.bf16.msra.mxu1 %v17099_v12  ;;  %15332 = vmatpush3.bf16.msra.mxu0 %v17113_v17 }
 0xaca   : > { %v12806_v41 = vpop.f32.mrf.mxu1  ;;  %15777 = vmatprep.subr.bf16.mxu1 %v17102_v52  ;;  %15397 = vmatprep.subr.bf16.mxu0 %v22390_v14 }
 0xacb   : > { %v22475_v8 = vadd.f32 %v12806_v41, %v22357_v28  ;;  %13357 = vmatmul.mubr.bf16.gmra.mxu1 %v22096_v62 }
 0xacc   : > { %v12810_v19 = vpop.f32.mrf.mxu1  ;;  %13364 = vmatprep.mubr.bf16.mxu1 %v22101_v38  ;;  %13276 = vmatmul.mubr.bf16.vlgmr.msra.gmra.mxu0 %v23347_v11 }
 0xacd   : > { %v22480_v55 = vadd.f32 %v12810_v19, %v22376_v24  ;;  %15785 = vmatpush3.bf16.msra.mxu1 %v17103_v27  ;;  %13283 = vmatprep.mubr.bf16.mxu0 %v21785_v51  ;;  %v17111_v24 = vld [vmem:[%s18182_s0 + $0x7a0] ss:$12 sps:$4 sm:$0xff]  }
 0xace   : > { %v12812_v53 = vpop.f32.mrf.mxu1  ;;  %15778 = vmatprep.subr.bf16.mxu1 %v17106_v47  ;;  %15398 = vmatpush3.bf16.msra.mxu0 %v22400_v34  ;;  %v17115_v34 = vld [vmem:[%s18182_s0 + $0x788] ss:$12 sps:$4 sm:$0xff]  }
 0xacf   : > { %v22486_v28 = vadd.f32 %v12812_v53, %v22383_v60  ;;  %15399 = vmatprep.subr.bf16.mxu0 %v22405_v37 }
 0xad0   : > { %v12814_v14 = vpop.f32.mrf.mxu1 }
 0xad1   : > { %v22493_v62 = vadd.f32 %v12814_v14, %v22392_v22  ;;  %15786 = vmatpush3.bf16.msra.mxu1 %v17107_v36 }
 0xad2   : > { %v12816_v38 = vpop.f32.mrf.mxu1  ;;  %15779 = vmatprep.subr.bf16.mxu1 %v17110_v35  ;;  %15400 = vmatpush3.bf16.msra.mxu0 %v22423_v48 }
 0xad3   : > { %v22498_v60 = vadd.f32 %v12816_v38, %v22397_v2  ;;  %13365 = vmatmul.mubr.bf16.gmra.mxu1 %v22142_v3  ;;  %15401 = vmatprep.subr.bf16.mxu0 %v22431_v54 }
 0xad4   : > { %v12820_v32 = vpop.f32.mrf.mxu1  ;;  %13421 = vmatprep.mubr.bf16.mxu1 %v22292_v33  ;;  %13284 = vmatmul.mubr.bf16.gmra.mxu0 %v21812_v59  ;;  %v23348_v59 = vld [vmem:[#allocation74_spill] sm:$0xff] }
 0xad5   : > { %v12821_v51 = vadd.f32 %v12820_v32, %v22407_v30  ;;  %15787 = vmatpush3.bf16.msra.mxu1 %v17111_v24  ;;  %13291 = vmatprep.mubr.bf16.mxu0 %v21933_v56 }
 0xad6   : > { %v12822_v22 = vpop.f32.mrf.mxu1  ;;  %15780 = vmatprep.subr.bf16.mxu1 %v17114_v49  ;;  %15402 = vmatpush3.bf16.msra.mxu0 %v22444_v50 }
 0xad7   : > { %v12823_v37 = vadd.f32 %v12822_v22, %v22417_v7  ;;  %15403 = vmatprep.subr.bf16.mxu0 %v22451_v45 }
 0xad8   : > { %v12824_v2 = vpop.f32.mrf.mxu1 }
 0xad9   : > { %v12825_v30 = vadd.f32 %v12824_v2, %v22433_v20  ;;  %15788 = vmatpush3.bf16.msra.mxu1 %v17115_v34 }
 0xada   : > { %15404 = vmatpush3.bf16.msra.mxu0 %v17099_v12 }
 0xadb   : > { %15405 = vmatprep.subr.bf16.mxu0 %v17102_v52 }
 0xadc   : > { %13422 = vmatmul.mubr.bf16.vlgmr.msra.gmra.mxu1 %v22297_v6  ;;  %13292 = vmatmul.mubr.bf16.gmra.mxu0 %v21953_v15 }
 0xadd   : > { %13429 = vmatprep.mubr.bf16.mxu1 %v22324_v58  ;;  %13299 = vmatprep.mubr.bf16.mxu0 %v21982_v13 }
 0xade   : > { %15406 = vmatpush3.bf16.msra.mxu0 %v17103_v27 }
 0xadf   : > { %15407 = vmatprep.subr.bf16.mxu0 %v17106_v47 }
 0xae2   : > { %15408 = vmatpush3.bf16.msra.mxu0 %v17107_v36 }
 0xae3   : > { %15409 = vmatprep.subr.bf16.mxu0 %v17110_v35 }
 0xae4   : > { %13430 = vmatmul.mubr.bf16.gmra.mxu1 %v22335_v43  ;;  %13300 = vmatmul.mubr.bf16.gmra.mxu0 %v23348_v59 }
 0xae5   : > { %13405 = vmatprep.mubr.bf16.mxu0 %v22224_v16 }
 0xae6   : > { %15410 = vmatpush3.bf16.msra.mxu0 %v17111_v24 }
 0xae7   : > { %v12863_v56 = vpop.f32.mrf.mxu0  ;;  %15411 = vmatprep.subr.bf16.mxu0 %v17114_v49 }
 0xae8   : > { %v12864_v3 = vadd.f32 %v12863_v56, %v22413_v57 }
 0xae9   : > { %v12865_v33 = vpop.f32.mrf.mxu0 }
 0xaea   : > { %v12866_v15 = vadd.f32 %v12865_v33, %v22426_v4  ;;  %15412 = vmatpush3.bf16.msra.mxu0 %v17115_v34 }
 0xaeb   : > { %v12867_v13 = vpop.f32.mrf.mxu0 }
 0xaec   : > { %v12868_v6 = vadd.f32 %v12867_v13, %v22438_v5 }
 0xaed   : > { %v12869_v58 = vpop.f32.mrf.mxu0  ;;  %13406 = vmatmul.mubr.bf16.vlgmr.msra.gmra.mxu0 %v22226_v40 }
 0xaee   : > { %v12870_v43 = vadd.f32 %v12869_v58, %v22447_v18  ;;  %13413 = vmatprep.mubr.bf16.mxu0 %v22250_v0 }
 0xaf1   : > { %v12873_v7 = vpop.f32.mrf.mxu0 }
 0xaf2   : > { %v12874_v16 = vadd.f32 %v12873_v7, %v22457_v10 }
 0xaf3   : > { %v12875_v48 = vpop.f32.mrf.mxu0 }
 0xaf4   : > { %v12876_v57 = vadd.f32 %v12875_v48, %v22465_v23 }
 0xaf5   : > { %v12877_v54 = vpop.f32.mrf.mxu0  ;;  %13414 = vmatmul.mubr.bf16.gmra.mxu0 %v22262_v26  ;;  %v12826_v26 = vpop.f32.mrf.mxu1 }
 0xaf6   : > { %v12878_v4 = vadd.f32 %v12877_v54, %v22471_v63  ;;  %v12827_v44 = vadd.f32 %v12826_v26, %v22440_v9 }
 0xaf7   : > { %v12879_v20 = vpop.f32.mrf.mxu0 }
 0xaf8   : > { %v12880_v31 = vadd.f32 %v12879_v20, %v22475_v8 }
 0xb08   : > { %v12883_v5 = vpop.f32.mrf.mxu0 }
 0xb09   : > { %v12884_v40 = vadd.f32 %v12883_v5, %v22480_v55 }
 0xb0a   : > { %v12885_v21 = vpop.f32.mrf.mxu0 }
 0xb0b   : > { %v12886_v0 = vadd.f32 %v12885_v21, %v22486_v28 }
 0xb0c   : > { %v12887_v50 = vpop.f32.mrf.mxu0 }
 0xb0d   : > { %v12888_v18 = vadd.f32 %v12887_v50, %v22493_v62 }
 0xb0e   : > { %v12889_v45 = vpop.f32.mrf.mxu0 }
 0xb0f   : > { %v12890_v61 = vadd.f32 %v12889_v45, %v22498_v60 }
 0xb13   : > { %v12893_v46 = vpop.f32.mrf.mxu0 }
 0xb14   : > { %v12894_v29 = vadd.f32 %v12893_v46, %v12821_v51  ;;  %v23351_v46 = vld [vmem:[#allocation28_spill] sm:$0xff] }
 0xb15   : > { %v12895_v42 = vpop.f32.mrf.mxu0 }
 0xb16   : > { %v12896_v10 = vadd.f32 %v12895_v42, %v12823_v37 }
 0xb17   : > { %v12897_v39 = vpop.f32.mrf.mxu0 }
 0xb18   : > { %v12898_v12 = vadd.f32 %v12897_v39, %v12825_v30 }
 0xb19   : > { %v12899_v23 = vpop.f32.mrf.mxu0 }
 0xb1a   : > { %v12900_v52 = vadd.f32 %v12899_v23, %v12827_v44  ;;  %v23353_v44 = vld [vmem:[#allocation32_spill] sm:$0xff] }
 0xb1b   : > { %v12936_v17 = vpop.f32.mrf.mxu1 }
 0xb1c   : > { %v12937_v1 = vadd.f32 %v12936_v17, %v12864_v3  ;;  %v23355_v17 = vld [vmem:[#allocation30_spill] sm:$0xff] }
 0xb1d   : > { %v12938_v63 = vpop.f32.mrf.mxu1 }
 0xb1e   : > { %v12939_v41 = vadd.f32 %v12938_v63, %v12866_v15 }
 0xb1f   : > { %v12940_v27 = vpop.f32.mrf.mxu1 }
 0xb20   : > { %v12941_v8 = vadd.f32 %v12940_v27, %v12868_v6 }
 0xb21   : > { %v12942_v47 = vpop.f32.mrf.mxu1 }
 0xb22   : > { %v12943_v19 = vadd.f32 %v12942_v47, %v12870_v43 }
 0xb23   : > { %v12946_v55 = vpop.f32.mrf.mxu1 }
 0xb24   : > { %v12947_v53 = vadd.f32 %v12946_v55, %v12874_v16 }
 0xb25   : > { %v12948_v36 = vpop.f32.mrf.mxu1 }
 0xb26   : > { %v12949_v28 = vadd.f32 %v12948_v36, %v12876_v57 }
 0xb27   : > { %v12950_v35 = vpop.f32.mrf.mxu1 }
 0xb28   : > { %v12951_v11 = vadd.f32 %v12950_v35, %v12878_v4 }
 0xb29   : > { %v12952_v14 = vpop.f32.mrf.mxu1 }
 0xb2a   : > { %v12953_v62 = vadd.f32 %v12952_v14, %v12880_v31 }
 0xb2b   : > { %v12956_v9 = vpop.f32.mrf.mxu1 }
 0xb2c   : > { %v22536_v38 = vadd.f32 %v12956_v9, %v12884_v40 }
 0xb2d   : > { %v12958_v24 = vpop.f32.mrf.mxu1 }
 0xb2e   : > { %v22538_v60 = vadd.f32 %v12958_v24, %v12886_v0  ;;  %v23349_v0 = vld [vmem:[#allocation29_spill] sm:$0xff] }
 0xb2f   : > { %v12960_v49 = vpop.f32.mrf.mxu1 }
 0xb30   : > { %v22540_v32 = vadd.f32 %v12960_v49, %v12888_v18 }
 0xb31   : > { %v12962_v51 = vpop.f32.mrf.mxu1 }
 0xb32   : > { %v22542_v22 = vadd.f32 %v12962_v51, %v12890_v61 }
 0xb33   : > { %v12966_v34 = vpop.f32.mrf.mxu1 }
 0xb34   : > { %v22544_v37 = vadd.f32 %v12966_v34, %v12894_v29 }
 0xb35   : > { %v12968_v2 = vpop.f32.mrf.mxu1 }
 0xb36   : > { %v22546_v30 = vadd.f32 %v12968_v2, %v12896_v10 }
 0xb37   : > { %v12970_v59 = vpop.f32.mrf.mxu1 }
 0xb38   : > { %v22548_v56 = vadd.f32 %v12970_v59, %v12898_v12 }
 0xb39   : > { %v12972_v3 = vpop.f32.mrf.mxu1 }
 0xb3a   : > { %v22550_v33 = vadd.f32 %v12972_v3, %v12900_v52  ;;  %v23361_v3 = vld [vmem:[#allocation38_spill] sm:$0xff] }
 0xb3b   : > { %v15213_v15 = vpop.f32.mrf.mxu1 }
 0xb3d   : > { %v15214_v13 = vpop.f32.mrf.mxu1 }
 0xb3e   : > { %v22552_v6 = vadd.f32 %v15214_v13, %v15213_v15 }
 0xb3f   : > { %v15216_v58 = vpop.f32.mrf.mxu1 }
 0xb41   : > { %v15217_v43 = vpop.f32.mrf.mxu1 }
 0xb42   : > { %v22554_v7 = vadd.f32 %v15217_v43, %v15216_v58 }
 0xb43   : > { %v15219_v16 = vpop.f32.mrf.mxu1 }
 0xb45   : > { %v15220_v48 = vpop.f32.mrf.mxu1 }
 0xb46   : > { %v22556_v57 = vadd.f32 %v15220_v48, %v15219_v16  ;;  %v23363_v16 = vld [vmem:[#allocation36_spill] sm:$0xff] }
 0xb47   : > { %v15222_v54 = vpop.f32.mrf.mxu1 }
 0xb48   : > { %v13009_v4 = vpop.f32.mrf.mxu0 }
 0xb49   : > { %v15223_v20 = vpop.f32.mrf.mxu1  ;;  %v13010_v31 = vadd.f32 %v13009_v4, %v12937_v1 }
 0xb4a   : > { %v22558_v5 = vadd.f32 %v15223_v20, %v15222_v54  ;;  %v13011_v40 = vpop.f32.mrf.mxu0  ;;  %v23365_v20 = vld [vmem:[#allocation41_spill] sm:$0xff] }
 0xb4b   : > { %v15225_v21 = vpop.f32.mrf.mxu1  ;;  %v22561_v50 = vadd.f32 %v13010_v31, %v23349_v0  ;;  %v13012_v18 = vadd.f32 %v13011_v40, %v12939_v41 }
 0xb4c   : > { %v13013_v45 = vpop.f32.mrf.mxu0 }
 0xb4d   : > { %23350 = vst [vmem:[#allocation27_spill] sm:$0xff] %v22561_v50  ;;  %v15226_v61 = vpop.f32.mrf.mxu1  ;;  %v22564_v29 = vadd.f32 %v13012_v18, %v23351_v46  ;;  %v13014_v26 = vadd.f32 %v13013_v45, %v12941_v8  ;;  %v23357_v8 = vld [vmem:[#allocation35_spill] sm:$0xff] }
 0xb4e   : > { %v22566_v42 = vadd.f32 %v15226_v61, %v15225_v21  ;;  %v13015_v10 = vpop.f32.mrf.mxu0 }
 0xb4f   : > { %23352 = vst [vmem:[#allocation52_spill] sm:$0xff] %v22564_v29  ;;  %v15228_v39 = vpop.f32.mrf.mxu1  ;;  %v22569_v12 = vadd.f32 %v13014_v26, %v23353_v44  ;;  %v13016_v23 = vadd.f32 %v13015_v10, %v12943_v19  ;;  %v23359_v19 = vld [vmem:[#allocation33_spill] sm:$0xff]  ;;  %v23369_v26 = vld [vmem:[#allocation44_spill] sm:$0xff] }
 0xb51   : > { %23354 = vst [vmem:[#allocation53_spill] sm:$0xff] %v22569_v12  ;;  %v15229_v52 = vpop.f32.mrf.mxu1  ;;  %v22572_v1 = vadd.f32 %v13016_v23, %v23355_v17 }
 0xb52   : > { %v22574_v63 = vadd.f32 %v15229_v52, %v15228_v39  ;;  %v13019_v41 = vpop.f32.mrf.mxu0  ;;  %v23371_v52 = vld [vmem:[#allocation42_spill] sm:$0xff] }
 0xb53   : > { %23356 = vst [vmem:[#allocation54_spill] sm:$0xff] %v22572_v1  ;;  %v15231_v27 = vpop.f32.mrf.mxu1  ;;  %v13020_v47 = vadd.f32 %v13019_v41, %v12947_v53 }
 0xb54   : > { %v13021_v55 = vpop.f32.mrf.mxu0 }
 0xb55   : > { %v15232_v36 = vpop.f32.mrf.mxu1  ;;  %v22577_v35 = vadd.f32 %v13020_v47, %v23357_v8  ;;  %v13022_v14 = vadd.f32 %v13021_v55, %v12949_v28  ;;  %v23373_v47 = vld [vmem:[#allocation47_spill] sm:$0xff] }
 0xb56   : > { %v22579_v9 = vadd.f32 %v15232_v36, %v15231_v27  ;;  %v13023_v24 = vpop.f32.mrf.mxu0 }
 0xb57   : > { %23358 = vst [vmem:[#allocation55_spill] sm:$0xff] %v22577_v35  ;;  %v15234_v49 = vpop.f32.mrf.mxu1  ;;  %v22582_v51 = vadd.f32 %v13022_v14, %v23359_v19  ;;  %v13024_v34 = vadd.f32 %v13023_v24, %v12951_v11  ;;  %v23375_v14 = vld [vmem:[#allocation45_spill] sm:$0xff] }
 0xb58   : > { %v13025_v2 = vpop.f32.mrf.mxu0  ;;  %v23377_v19 = vld [vmem:[#allocation25_spill] sm:$0xff] }
 0xb59   : > { %23360 = vst [vmem:[#allocation56_spill] sm:$0xff] %v22582_v51  ;;  %v15235_v59 = vpop.f32.mrf.mxu1  ;;  %v22585_v15 = vadd.f32 %v13024_v34, %v23361_v3  ;;  %v13026_v53 = vadd.f32 %v13025_v2, %v12953_v62  ;;  %v23367_v62 = vld [vmem:[#allocation39_spill] sm:$0xff]  ;;  %v22621_v34 = vrot.slane %v22256_v25, %v23377_v19  ;;  %v23378_v2 = vld [vmem:[#allocation50_spill] sm:$0xff] }
 0xb5a   : > { %v22587_v13 = vadd.f32 %v15235_v59, %v15234_v49  ;;  %v13029_v58 = vpop.f32.mrf.mxu0 }
 0xb5b   : > { %23362 = vst [vmem:[#allocation57_spill] sm:$0xff] %v22585_v15  ;;  %v15293_v43 = vpop.f32.mrf.mxu1  ;;  %v22590_v28 = vadd.f32 %v13026_v53, %v23363_v16  ;;  %v13030_v48 = vadd.f32 %v13029_v58, %v22536_v38  ;;  %v23380_v58 = vld [vmem:[#allocation48_spill] sm:$0xff]  ;;  %v13102_v1 = vadd.f32 %v22574_v63, %v22621_v34 }
 0xb5c   : > { %v13031_v54 = vpop.f32.mrf.mxu0 }
 0xb5d   : > { %23364 = vst [vmem:[#allocation58_spill] sm:$0xff] %v22590_v28  ;;  %v15294_v4 = vpop.f32.mrf.mxu1  ;;  %v22594_v31 = vadd.f32 %v13030_v48, %v23365_v20  ;;  %v13032_v11 = vadd.f32 %v13031_v54, %v22538_v60 }
 0xb5e   : > { %v15295_v40 = vadd.f32 %v15294_v4, %v15293_v43  ;;  %v13033_v21 = vpop.f32.mrf.mxu0 }
 0xb5f   : > { %23366 = vst [vmem:[#allocation67_spill] sm:$0xff] %v22594_v31  ;;  %v15296_v0 = vpop.f32.mrf.mxu1  ;;  %v22598_v18 = vadd.f32 %v13032_v11, %v23367_v62  ;;  %v13034_v45 = vadd.f32 %v13033_v21, %v22540_v32 }
 0xb60   : > { %v13035_v61 = vpop.f32.mrf.mxu0 }
 0xb61   : > { %23368 = vst [vmem:[#allocation68_spill] sm:$0xff] %v22598_v18  ;;  %v15297_v46 = vpop.f32.mrf.mxu1  ;;  %v22602_v10 = vadd.f32 %v13034_v45, %v23369_v26  ;;  %v13036_v38 = vadd.f32 %v13035_v61, %v22542_v22  ;;  %v13091_v26 = vadd.f32 %v22556_v57, %v22621_v34 }
 0xb62   : > { %v15298_v39 = vadd.f32 %v15297_v46, %v15296_v0  ;;  %v13039_v44 = vpop.f32.mrf.mxu0 }
 0xb63   : > { %23370 = vst [vmem:[#allocation59_spill] sm:$0xff] %v22602_v10  ;;  %v15299_v23 = vpop.f32.mrf.mxu1  ;;  %v22606_v60 = vadd.f32 %v13036_v38, %v23371_v52  ;;  %v13040_v17 = vadd.f32 %v13039_v44, %v22544_v37  ;;  %v13099_v10 = vadd.f32 %v22566_v42, %v22621_v34  ;;  %v13107_v42 = vadd.f32 %v22579_v9, %v22621_v34 }
 0xb64   : > { %v13041_v41 = vpop.f32.mrf.mxu0 }
 0xb65   : > { %23372 = vst [vmem:[#allocation60_spill] sm:$0xff] %v22606_v60  ;;  %v15300_v27 = vpop.f32.mrf.mxu1  ;;  %v22610_v55 = vadd.f32 %v13040_v17, %v23373_v47  ;;  %v13042_v32 = vadd.f32 %v13041_v41, %v22546_v30 }
 0xb66   : > { %v13043_v36 = vpop.f32.mrf.mxu0 }
 0xb67   : > { %23374 = vst [vmem:[#allocation69_spill] sm:$0xff] %v22610_v55  ;;  %v22613_v8 = vpop.f32.mrf.mxu1  ;;  %v22616_v22 = vadd.f32 %v13042_v32, %v23375_v14  ;;  %v13044_v24 = vadd.f32 %v13043_v36, %v22548_v56  ;;  %v13083_v56 = vadd.f32 %v22552_v6, %v22621_v34 }
 0xb68   : > { %v13045_v49 = vpop.f32.mrf.mxu0 }
 0xb69   : > { %23376 = vst [vmem:[#allocation61_spill] sm:$0xff] %v22616_v22  ;;  %v22623_v37 = vpop.f32.mrf.mxu1  ;;  %v22626_v59 = vadd.f32 %v13044_v24, %v23378_v2  ;;  %v13046_v30 = vadd.f32 %v13045_v49, %v22550_v33  ;;  %v13086_v33 = vadd.f32 %v22554_v7, %v22621_v34  ;;  %v15301_v7 = vadd.f32 %v15300_v27, %v15299_v23 }
 0xb6a   : > { %v15253_v3 = vpop.f32.mrf.mxu0 }
 0xb6b   : > { %23379 = vst [vmem:[#allocation70_spill] sm:$0xff] %v22626_v59  ;;  %v22629_v53 = vpop.f32.mrf.mxu1  ;;  %v22632_v43 = vadd.f32 %v13046_v30, %v23380_v58 }
 0xb6c   : > { %v15254_v16 = vpop.f32.mrf.mxu0 }
 0xb6d   : > { %23381 = vst [vmem:[#allocation62_spill] sm:$0xff] %v22632_v43  ;;  %v22636_v48 = vpop.f32.mrf.mxu1  ;;  %v15255_v25 = vadd.f32 %v15254_v16, %v15253_v3 }
 0xb6e   : > { %v15256_v54 = vpop.f32.mrf.mxu0 }
 0xb6f   : > { %v22638_v4 = vpop.f32.mrf.mxu1  ;;  %v13148_v20 = vadd.f32 %v15255_v25, %v13083_v56 }
 0xb70   : > { %v15257_v11 = vpop.f32.mrf.mxu0 }
 0xb71   : > { %v22642_v21 = vpop.f32.mrf.mxu1  ;;  %v15258_v0 = vadd.f32 %v15257_v11, %v15256_v54  ;;  %v22644_v62 = vadd.f32 %v15295_v40, %v13148_v20 }
 0xb72   : > { %v15259_v45 = vpop.f32.mrf.mxu0 }
 0xb73   : > { %v22646_v61 = vpop.f32.mrf.mxu1  ;;  %v13151_v6 = vadd.f32 %v15258_v0, %v13086_v33 }
 0xb74   : > { %v15260_v46 = vpop.f32.mrf.mxu0 }
 0xb75   : > { %v22650_v38 = vpop.f32.mrf.mxu1  ;;  %v15261_v44 = vadd.f32 %v15260_v46, %v15259_v45  ;;  %v22652_v52 = vadd.f32 %v15298_v39, %v13151_v6 }
 0xb76   : > { %v22654_v17 = vpop.f32.mrf.mxu0 }
 0xb77   : > { %v22656_v41 = vpop.f32.mrf.mxu1  ;;  %v13156_v40 = vadd.f32 %v15261_v44, %v13091_v26 }
 0xb78   : > { %v22658_v47 = vpop.f32.mrf.mxu0 }
 0xb79   : > { %v22660_v32 = vpop.f32.mrf.mxu1  ;;  %v22662_v36 = vadd.f32 %v15301_v7, %v13156_v40 }
 0xb7a   : > { %v15265_v14 = vpop.f32.mrf.mxu0 }
 0xb7b   : > { %v22664_v24 = vpop.f32.mrf.mxu1 }
 0xb7c   : > { %v15266_v57 = vpop.f32.mrf.mxu0 }
 0xb7d   : > { %v22666_v49 = vpop.f32.mrf.mxu1  ;;  %v15267_v22 = vadd.f32 %v15266_v57, %v15265_v14  ;;  %v15307_v14 = vadd.f32 %v22636_v48, %v22629_v53 }
 0xb7e   : > { %v15268_v39 = vpop.f32.mrf.mxu0 }
 0xb7f   : > { %v22668_v19 = vpop.f32.mrf.mxu1  ;;  %v13164_v28 = vadd.f32 %v15267_v22, %v13099_v10  ;;  %v15310_v22 = vadd.f32 %v22642_v21, %v22638_v4 }
 0xb80   : > { %v15269_v2 = vpop.f32.mrf.mxu0 }
 0xb81   : > { %v22670_v23 = vpop.f32.mrf.mxu1  ;;  %v15270_v15 = vadd.f32 %v15269_v2, %v15268_v39 }
 0xb82   : > { %v15271_v27 = vpop.f32.mrf.mxu0 }
 0xb83   : > { %v22672_v30 = vpop.f32.mrf.mxu1  ;;  %v13167_v50 = vadd.f32 %v15270_v15, %v13102_v1 }
 0xb84   : > { %23382 = vst [vmem:[#allocation71_spill] sm:$0xff] %v22672_v30  ;;  %v15272_v3 = vpop.f32.mrf.mxu0 }
 0xb85   : > { %v22674_v58 = vpop.f32.mrf.mxu1  ;;  %v15273_v57 = vadd.f32 %v15272_v3, %v15271_v27  ;;  %v13232_v3 = vadd.f32 %v15310_v22, %v13167_v50 }
 0xb86   : > { %23383 = vst [vmem:[#allocation63_spill] sm:$0xff] %v22674_v58  ;;  %v15274_v16 = vpop.f32.mrf.mxu0 }
 0xb87   : > { %v22676_v56 = vpop.f32.mrf.mxu1  ;;  %v13172_v63 = vadd.f32 %v15273_v57, %v13107_v42 }
 0xb88   : > { %23384 = vst [vmem:[#allocation64_spill] sm:$0xff] %v22676_v56  ;;  %v15275_v54 = vpop.f32.mrf.mxu0 }
 0xb89   : > { %v22678_v25 = vpop.f32.mrf.mxu1  ;;  %v15276_v30 = vadd.f32 %v15275_v54, %v15274_v16 }
 0xb8a   : > { %23385 = vst [vmem:[#allocation65_spill] sm:$0xff] %v22678_v25  ;;  %v13229_v25 = vadd.f32 %v15307_v14, %v13164_v28 }
 0xb8b   : > { %v15385_v20 = vpop.f32.mrf.mxu1 }
 0xb8c   : > { %v15333_v33 = vpop.f32.mrf.mxu0 }
 0xb8d   : > { %v15386_v11 = vpop.f32.mrf.mxu1 }
 0xb8e   : > { %v15334_v45 = vpop.f32.mrf.mxu0  ;;  %v15387_v39 = vadd.f32 %v15386_v11, %v15385_v20 }
 0xb8f   : > { %v15388_v0 = vpop.f32.mrf.mxu1 }
 0xb90   : > { %v15336_v46 = vpop.f32.mrf.mxu0 }
 0xb91   : > { %v15389_v6 = vpop.f32.mrf.mxu1 }
 0xb92   : > { %v15337_v44 = vpop.f32.mrf.mxu0  ;;  %v15390_v28 = vadd.f32 %v15389_v6, %v15388_v0 }
 0xb93   : > { %v15391_v26 = vpop.f32.mrf.mxu1 }
 0xb94   : > { %v22680_v40 = vpop.f32.mrf.mxu0 }
 0xb95   : > { %v15392_v7 = vpop.f32.mrf.mxu1 }
 0xb96   : > { %v22684_v59 = vpop.f32.mrf.mxu0 }
 0xb97   : > { %v22682_v43 = vpop.f32.mrf.mxu1 }
 0xb98   : > { %v22688_v60 = vpop.f32.mrf.mxu0 }
 0xb99   : > { %v22686_v55 = vpop.f32.mrf.mxu1 }
 0xb9a   : > { %v22692_v31 = vpop.f32.mrf.mxu0 }
 0xb9b   : > { %23386 = vst [vmem:[#allocation66_spill] sm:$0xff] %v22692_v31 }
 0xb9c   : > { %v15425_v18 = vpop.f32.mrf.mxu1  ;;  %v15345_v35 = vpop.f32.mrf.mxu0 }
 0xb9e   : > { %v15426_v51 = vpop.f32.mrf.mxu1  ;;  %v15346_v29 = vpop.f32.mrf.mxu0 }
 0xb9f   : > { %v15347_v56 = vadd.f32 %v15346_v29, %v15345_v35  ;;  %v15427_v48 = vadd.f32 %v15426_v51, %v15425_v18  ;;  %v13110_v29 = vadd.f32 %v22587_v13, %v22621_v34  ;;  %v15313_v35 = vadd.f32 %v22650_v38, %v22646_v61  ;;  %v23387_v51 = vld [vmem:[#allocation43_spill] sm:$0xff] }
 0xba0   : > { %v15428_v12 = vpop.f32.mrf.mxu1  ;;  %v15348_v10 = vpop.f32.mrf.mxu0  ;;  %v15316_v13 = vadd.f32 %v22660_v32, %v22656_v41  ;;  %v15393_v38 = vadd.f32 %v15392_v7, %v15391_v26  ;;  %v15264_v26 = vadd.f32 %v22658_v47, %v22654_v17 }
 0xba1   : > { %v13294_v2 = vadd.f32 %v15347_v56, %v13229_v25  ;;  %v13175_v56 = vadd.f32 %v15276_v30, %v13110_v29  ;;  %v15335_v25 = vadd.f32 %v15334_v45, %v15333_v33  ;;  %v13237_v16 = vadd.f32 %v15313_v35, %v13172_v63  ;;  %v23391_v35 = vld [vmem:[#allocation51_spill] sm:$0xff] }
 0xba2   : > { %v15429_v58 = vpop.f32.mrf.mxu1  ;;  %v15349_v53 = vpop.f32.mrf.mxu0  ;;  %v15338_v30 = vadd.f32 %v15337_v44, %v15336_v46 }
 0xba3   : > { %v13359_v27 = vadd.f32 %v15387_v39, %v13294_v2  ;;  %v15350_v1 = vadd.f32 %v15349_v53, %v15348_v10  ;;  %v15430_v20 = vadd.f32 %v15429_v58, %v15428_v12  ;;  %v13278_v6 = vadd.f32 %v15335_v25, %v22644_v62  ;;  %v23388_v12 = vld [vmem:[#allocation46_spill] sm:$0xff]  ;;  %v23389_v53 = vld [vmem:[#allocation49_spill] sm:$0xff] }
 0xba4   : > { %v15431_v31 = vpop.f32.mrf.mxu1  ;;  %v15351_v15 = vpop.f32.mrf.mxu0  ;;  %v13240_v33 = vadd.f32 %v15316_v13, %v13175_v56  ;;  %v15375_v39 = vadd.f32 %v22666_v49, %v22664_v24  ;;  %v15396_v62 = vadd.f32 %v22686_v55, %v22682_v43  ;;  %v13281_v7 = vadd.f32 %v15338_v30, %v22652_v52 }
 0xba5   : > { %v13424_v4 = vadd.f32 %v15427_v48, %v13359_v27  ;;  %v13297_v21 = vadd.f32 %v15350_v1, %v13232_v3  ;;  %v15341_v2 = vadd.f32 %v22684_v59, %v22680_v40  ;;  %v15378_v55 = vadd.f32 %v22670_v23, %v22668_v19  ;;  %v23390_v1 = vld [vmem:[#allocation66_spill] sm:$0xff] }
 0xba6   : > { %v15432_v9 = vpop.f32.mrf.mxu1  ;;  %v15352_v54 = vpop.f32.mrf.mxu0  ;;  %v13343_v63 = vadd.f32 %v15375_v39, %v13278_v6  ;;  %v15344_v29 = vadd.f32 %v23390_v1, %v22688_v60 }
 0xba7   : > { %v22707_v18 = vadd.f32 %v13424_v4, %v23387_v51  ;;  %v13362_v50 = vadd.f32 %v15390_v28, %v13297_v21  ;;  %v15353_v11 = vadd.f32 %v15352_v54, %v15351_v15  ;;  %v15433_v42 = vadd.f32 %v15432_v9, %v15431_v31  ;;  %v23392_v15 = vld [vmem:[#allocation31_spill] sm:$0xff] }
 0xba8   : > { %v15434_v14 = vpop.f32.mrf.mxu1  ;;  %v15354_v61 = vpop.f32.mrf.mxu0  ;;  %v13094_v31 = vadd.f32 %v22558_v5, %v22621_v34  ;;  %v15304_v34 = vadd.f32 %v22623_v37, %v22613_v8  ;;  %v13286_v59 = vadd.f32 %v15341_v2, %v22662_v36  ;;  %v13346_v52 = vadd.f32 %v15378_v55, %v13281_v7  ;;  %v23393_v4 = vld [vmem:[#allocation71_spill] sm:$0xff] }
 0xba9   : > { %v13427_v57 = vadd.f32 %v15430_v20, %v13362_v50  ;;  %v13302_v0 = vadd.f32 %v15353_v11, %v13237_v16  ;;  %v23394_v21 = vld [vmem:[#allocation63_spill] sm:$0xff]  ;;  %v23395_v16 = vld [vmem:[#allocation34_spill] sm:$0xff]  ;;  %v23396_v50 = vld [vmem:[#allocation64_spill] sm:$0xff] }
 0xbaa   : > { %v15355_v45 = vpop.f32.mrf.mxu0  ;;  %v15435_v41 = vpop.f32.mrf.mxu1  ;;  %v13159_v27 = vadd.f32 %v15264_v26, %v13094_v31  ;;  %v15381_v56 = vadd.f32 %v23394_v21, %v23393_v4  ;;  %v23397_v11 = vld [vmem:[#allocation65_spill] sm:$0xff] }
 0xbab   : > { %v22713_v58 = vadd.f32 %v13427_v57, %v23388_v12  ;;  %v13367_v10 = vadd.f32 %v15393_v38, %v13302_v0  ;;  %v15356_v22 = vadd.f32 %v15355_v45, %v15354_v61  ;;  %v15436_v49 = vadd.f32 %v15435_v41, %v15434_v14  ;;  %v23398_v38 = vld [vmem:[#allocation37_spill] sm:$0xff] }
 0xbac   : > { %v13224_v25 = vadd.f32 %v15304_v34, %v13159_v27  ;;  %v13351_v20 = vadd.f32 %v15381_v56, %v13286_v59  ;;  %v15384_v13 = vadd.f32 %v23397_v11, %v23396_v50 }
 0xbad   : > { %v15413_v32 = vpop.f32.mrf.mxu0  ;;  %v13432_v46 = vadd.f32 %v15433_v42, %v13367_v10  ;;  %v13305_v44 = vadd.f32 %v15356_v22, %v13240_v33  ;;  %v23399_v33 = vld [vmem:[#allocation40_spill] sm:$0xff] }
 0xbae   : > { %v13289_v36 = vadd.f32 %v15344_v29, %v13224_v25 }
 0xbaf   : > { %v15414_v24 = vpop.f32.mrf.mxu0  ;;  %v22727_v48 = vadd.f32 %v13432_v46, %v23389_v53  ;;  %v13370_v17 = vadd.f32 %v15396_v62, %v13305_v44 }
 0xbb0   : > { %v15415_v47 = vadd.f32 %v15414_v24, %v15413_v32  ;;  %v13354_v0 = vadd.f32 %v15384_v13, %v13289_v36 }
 0xbb1   : > { %v15416_v43 = vpop.f32.mrf.mxu0  ;;  %v13435_v3 = vadd.f32 %v15436_v49, %v13370_v17 }
 0xbb2   : > { %v13408_v5 = vadd.f32 %v15415_v47, %v13343_v63 }
 0xbb3   : > { %v15417_v40 = vpop.f32.mrf.mxu0  ;;  %v22737_v9 = vadd.f32 %v13435_v3, %v23391_v35 }
 0xbb4   : > { %v22740_v28 = vadd.f32 %v13408_v5, %v23392_v15  ;;  %v15418_v19 = vadd.f32 %v15417_v40, %v15416_v43 }
 0xbb5   : > { %v15419_v23 = vpop.f32.mrf.mxu0 }
 0xbb6   : > { %v13411_v8 = vadd.f32 %v15418_v19, %v13346_v52 }
 0xbb7   : > { %v15420_v37 = vpop.f32.mrf.mxu0 }
 0xbb8   : > { %v22745_v54 = vadd.f32 %v13411_v8, %v23395_v16  ;;  %v15421_v60 = vadd.f32 %v15420_v37, %v15419_v23 }
 0xbb9   : > { %v15422_v51 = vpop.f32.mrf.mxu0 }
 0xbba   : > { %v13416_v14 = vadd.f32 %v15421_v60, %v13351_v20 }
 0xbbb   : > { %v15423_v61 = vpop.f32.mrf.mxu0 }
 0xbbc   : > { %v22750_v57 = vadd.f32 %v13416_v14, %v23398_v38  ;;  %v15424_v6 = vadd.f32 %v15423_v61, %v15422_v51  ;;  %13465 = sbr.rel (%p14953_p6) target bundleno = 3022 (0xbce), region = 128 }
 0xbbe   : > { %v13419_v30 = vadd.f32 %v15424_v6, %v13354_v0 }
 0xbc0   : > { %v22753_v45 = vadd.f32 %v13419_v30, %v23399_v33 }
 0xbc1   : > { %v23400_v42 = vld [vmem:[#allocation27_spill] sm:$0xff]  ;;  %v23401_v12 = vld [vmem:[#allocation52_spill] sm:$0xff]  ;;  %13468 = vst [vmem:[#allocation2 + $0x10] sm:$0xff] %v22740_v28  ;;  %v23402_v10 = vld [vmem:[#allocation53_spill] sm:$0xff] }
 0xbc2   : > { %13466 = vst [vmem:[#allocation2 + $0xb0] sm:$0xff] %v23400_v42  ;;  %13467 = vst [vmem:[#allocation2] sm:$0xff] %v23401_v12  ;;  %v23403_v22 = vld [vmem:[#allocation54_spill] sm:$0xff]  ;;  %v23404_v39 = vld [vmem:[#allocation55_spill] sm:$0xff] }
 0xbc3   : > { %13469 = vst [vmem:[#allocation2 + $0x48] sm:$0xff] %v23402_v10  ;;  %13470 = vst [vmem:[#allocation2 + $0x60] sm:$0xff] %v23403_v22  ;;  %v23405_v41 = vld [vmem:[#allocation56_spill] sm:$0xff]  ;;  %v23406_v32 = vld [vmem:[#allocation57_spill] sm:$0xff] }
 0xbc4   : > { %13471 = vst [vmem:[#allocation2 + $0x28] sm:$0xff] %v22745_v54  ;;  %13472 = vst [vmem:[#allocation2 + $0x40] sm:$0xff] %v23404_v39  ;;  %v23407_v26 = vld [vmem:[#allocation58_spill] sm:$0xff]  ;;  %v23408_v62 = vld [vmem:[#allocation67_spill] sm:$0xff] }
 0xbc5   : > { %13473 = vst [vmem:[#allocation2 + $0x78] sm:$0xff] %v23405_v41  ;;  %13474 = vst [vmem:[#allocation2 + $0x88] sm:$0xff] %v22750_v57  ;;  %v23409_v46 = vld [vmem:[#allocation68_spill] sm:$0xff]  ;;  %v23410_v44 = vld [vmem:[#allocation59_spill] sm:$0xff] }
 0xbc6   : > { %13475 = vst [vmem:[#allocation2 + $0x90] sm:$0xff] %v23406_v32  ;;  %13476 = vst [vmem:[#allocation2 + $0x18] sm:$0xff] %v23407_v26  ;;  %v23411_v31 = vld [vmem:[#allocation60_spill] sm:$0xff]  ;;  %v23412_v7 = vld [vmem:[#allocation69_spill] sm:$0xff] }
 0xbc7   : > { %13477 = vst [vmem:[#allocation2 + $0x98] sm:$0xff] %v22753_v45  ;;  %13478 = vst [vmem:[#allocation2 + $0x38] sm:$0xff] %v23408_v62  ;;  %v23413_v2 = vld [vmem:[#allocation61_spill] sm:$0xff]  ;;  %v23414_v63 = vld [vmem:[#allocation70_spill] sm:$0xff] }
 0xbc8   : > { %13479 = vst [vmem:[#allocation2 + $0x50] sm:$0xff] %v23409_v46  ;;  %13480 = vst [vmem:[#allocation2 + $0x70] sm:$0xff] %v22707_v18  ;;  %v23415_v24 = vld [vmem:[#allocation62_spill] sm:$0xff] }
 0xbc9   : > { %13481 = vst [vmem:[#allocation2 + $0xa0] sm:$0xff] %v23410_v44  ;;  %13482 = vst [vmem:[#allocation2 + $0xa8] sm:$0xff] %v23411_v31 }
 0xbca   : > { %13483 = vst [vmem:[#allocation2 + $0x68] sm:$0xff] %v22713_v58  ;;  %13484 = vst [vmem:[#allocation2 + $0x30] sm:$0xff] %v23412_v7 }
 0xbcb   : > { %13485 = vst [vmem:[#allocation2 + $0x58] sm:$0xff] %v23413_v2  ;;  %13486 = vst [vmem:[#allocation2 + $0x80] sm:$0xff] %v22727_v48 }
 0xbcc   : > { %13487 = vst [vmem:[#allocation2 + $0xb8] sm:$0xff] %v23414_v63  ;;  %13488 = vst [vmem:[#allocation2 + $0x20] sm:$0xff] %v23415_v24 }
 0xbcd   : > { %13489 = vst [vmem:[#allocation2 + $0x8] sm:$0xff] %v22737_v9 }
 0xbce PF: > { %p14954_p9 = scmp.ne.s32.totalorder %s17974_s30, 1 }
 0xbcf   : > { %s23432_s0 = sld [smem:[#allocation84_spill]] (!%p14954_p9) }
 0xbd0   : > { %13493 = sbr.rel (%p14954_p9) target bundleno = 3364 (0xd24), region = 132  ;;  %s23436_s22 = sld [smem:[#allocation85_spill]] (!%p14954_p9) }
 0xbd5   : > { %v23416_v49 = vld [vmem:[#allocation27_spill] sm:$0xff]  ;;  %v23417_v53 = vld [vmem:[#allocation52_spill] sm:$0xff]  ;;  %v23420_v27 = vld [vmem:[#allocation53_spill] sm:$0xff] }
 0xbd6   : > { %v13496_v17 = vadd.f32 %v23417_v53, %v23416_v49  ;;  %v23418_v47 = vld [vmem:[#allocation55_spill] sm:$0xff]  ;;  %v23419_v55 = vld [vmem:[#allocation56_spill] sm:$0xff]  ;;  %v23421_v3 = vld [vmem:[#allocation54_spill] sm:$0xff] }
 0xbd7   : > { %v13504_v43 = vadd.f32 %v23419_v55, %v23418_v47  ;;  %v13500_v5 = vadd.f32 %v23421_v3, %v23420_v27  ;;  %v23422_v34 = vld [vmem:[#allocation57_spill] sm:$0xff]  ;;  %v23423_v59 = vld [vmem:[#allocation58_spill] sm:$0xff]  ;;  %v23424_v29 = vld [vmem:[#allocation67_spill] sm:$0xff] }
 0xbd8   : > { %v13508_v52 = vadd.f32 %v23423_v59, %v23422_v34  ;;  %v13497_v40 = vadd.f32 %v13496_v17, %v22740_v28  ;;  %v23425_v35 = vld [vmem:[#allocation68_spill] sm:$0xff]  ;;  %v23426_v4 = vld [vmem:[#allocation59_spill] sm:$0xff]  ;;  %v23428_v25 = vld [vmem:[#allocation69_spill] sm:$0xff] }
 0xbd9   : > { %v13505_v1 = vadd.f32 %v13504_v43, %v22750_v57  ;;  %v13512_v15 = vadd.f32 %v23425_v35, %v23424_v29  ;;  %v13501_v19 = vadd.f32 %v13500_v5, %v22745_v54  ;;  %v23427_v21 = vld [vmem:[#allocation60_spill] sm:$0xff]  ;;  %v23429_v8 = vld [vmem:[#allocation61_spill] sm:$0xff]  ;;  %v23430_v20 = vld [vmem:[#allocation70_spill] sm:$0xff] }
 0xbda   : > { %13498 = vadd.xlane.f32.xlu0 %v13497_v40  ;;  %v13509_v23 = vadd.f32 %v13508_v52, %v22753_v45  ;;  %v13516_v56 = vadd.f32 %v23427_v21, %v23426_v4  ;;  %v13520_v37 = vadd.f32 %v23429_v8, %v23428_v25  ;;  %v23431_v60 = vld [vmem:[#allocation62_spill] sm:$0xff] }
 0xbdb   : > { %13506 = vadd.xlane.f32.xlu1 %v13505_v1  ;;  %v13513_v36 = vadd.f32 %v13512_v15, %v22707_v18  ;;  %v13524_v51 = vadd.f32 %v23431_v60, %v23430_v20 }
 0xbdc   : > { %v13517_v16 = vadd.f32 %v13516_v56, %v22713_v58  ;;  %v13521_v50 = vadd.f32 %v13520_v37, %v22727_v48 }
 0xbdd   : > { %v13525_v11 = vadd.f32 %v13524_v51, %v22737_v9 }
 0xbde   : > { %13502 = vadd.xlane.f32.xlu0 %v13501_v19 }
 0xbdf   : > { %13510 = vadd.xlane.f32.xlu1 %v13509_v23 }
 0xbe2   : > { %13514 = vadd.xlane.f32.xlu0 %v13513_v36 }
 0xbe3   : > { %13518 = vadd.xlane.f32.xlu1 %v13517_v16 }
 0xbe6   : > { %13522 = vadd.xlane.f32.xlu0 %v13521_v50 }
 0xbe7   : > { %13526 = vadd.xlane.f32.xlu1 %v13525_v11 }
 0xc63   : > { %v13499_v13 = vpop.xlane.xlu0 %13498 }
 0xc64   : > { %v13507_v14 = vpop.xlane.xlu1 %13506  ;;  %v13528_v61 = vmul.f32 0.0026041667, %v13499_v13 }
 0xc65   : > { %v13530_v38 = vmul.f32 0.0026041667, %v13507_v14 }
 0xc66   : > { %v22806_v0 = vsub.f32 %v23416_v49, %v13528_v61  ;;  %v22809_v6 = vsub.f32 %v23417_v53, %v13528_v61  ;;  %v22812_v30 = vsub.f32 %v22740_v28, %v13528_v61 }
 0xc67   : > { %v22815_v33 = vsub.f32 %v23418_v47, %v13530_v38  ;;  %v22818_v42 = vsub.f32 %v23419_v55, %v13530_v38  ;;  %v22821_v12 = vsub.f32 %v22750_v57, %v13530_v38  ;;  %v13503_v10 = vpop.xlane.xlu0 %13502 }
 0xc68   : > { %v13511_v22 = vpop.xlane.xlu1 %13510  ;;  %v13529_v39 = vmul.f32 0.0026041667, %v13503_v10  ;;  %v13560_v32 = vmul.f32 %v22806_v0, %v22806_v0  ;;  %v13561_v28 = vmul.f32 %v22809_v6, %v22809_v6  ;;  %v13562_v26 = vmul.f32 %v22812_v30, %v22812_v30 }
 0xc69   : > { %v13531_v41 = vmul.f32 0.0026041667, %v13511_v22  ;;  %v13566_v62 = vmul.f32 %v22815_v33, %v22815_v33  ;;  %v13567_v57 = vmul.f32 %v22818_v42, %v22818_v42  ;;  %v13568_v46 = vmul.f32 %v22821_v12, %v22821_v12 }
 0xc6a   : > { %v22836_v44 = vsub.f32 %v23420_v27, %v13529_v39  ;;  %v22839_v31 = vsub.f32 %v23421_v3, %v13529_v39  ;;  %v22842_v7 = vsub.f32 %v22745_v54, %v13529_v39  ;;  %v13584_v17 = vadd.f32 %v13561_v28, %v13560_v32 }
 0xc6b   : > { %v22845_v2 = vsub.f32 %v23422_v34, %v13531_v41  ;;  %v22848_v63 = vsub.f32 %v23423_v59, %v13531_v41  ;;  %v22851_v24 = vsub.f32 %v22753_v45, %v13531_v41  ;;  %v13515_v49 = vpop.xlane.xlu0 %13514  ;;  %v13592_v47 = vadd.f32 %v13567_v57, %v13566_v62 }
 0xc6c   : > { %v13519_v53 = vpop.xlane.xlu1 %13518  ;;  %v13532_v55 = vmul.f32 0.0026041667, %v13515_v49  ;;  %v13563_v27 = vmul.f32 %v22836_v44, %v22836_v44  ;;  %v13564_v54 = vmul.f32 %v22839_v31, %v22839_v31  ;;  %v13585_v3 = vadd.f32 %v13584_v17, %v13562_v26 }
 0xc6d   : > { %v13533_v43 = vmul.f32 0.0026041667, %v13519_v53  ;;  %v13593_v5 = vadd.f32 %v13592_v47, %v13568_v46  ;;  %v13565_v34 = vmul.f32 %v22842_v7, %v22842_v7  ;;  %v13569_v45 = vmul.f32 %v22845_v2, %v22845_v2 }
 0xc6e   : > { %v22862_v59 = vsub.f32 %v23424_v29, %v13532_v55  ;;  %v22865_v52 = vsub.f32 %v23425_v35, %v13532_v55  ;;  %v22868_v40 = vsub.f32 %v22707_v18, %v13532_v55  ;;  %13586 = vadd.xlane.f32.xlu0 %v13585_v3  ;;  %v13588_v29 = vadd.f32 %v13564_v54, %v13563_v27 }
 0xc6f   : > { %v22871_v1 = vsub.f32 %v23426_v4, %v13533_v43  ;;  %v22874_v15 = vsub.f32 %v23427_v21, %v13533_v43  ;;  %v22877_v19 = vsub.f32 %v22713_v58, %v13533_v43  ;;  %v13523_v23 = vpop.xlane.xlu0 %13522  ;;  %v13570_v35 = vmul.f32 %v22848_v63, %v22848_v63 }
 0xc70   : > { %v13527_v56 = vpop.xlane.xlu1 %13526  ;;  %v13534_v37 = vmul.f32 0.0026041667, %v13523_v23  ;;  %v13571_v18 = vmul.f32 %v22851_v24, %v22851_v24  ;;  %v13572_v4 = vmul.f32 %v22862_v59, %v22862_v59  ;;  %v13589_v21 = vadd.f32 %v13588_v29, %v13565_v34 }
 0xc71   : > { %v13535_v36 = vmul.f32 0.0026041667, %v13527_v56  ;;  %v13596_v16 = vadd.f32 %v13570_v35, %v13569_v45  ;;  %v13573_v58 = vmul.f32 %v22865_v52, %v22865_v52  ;;  %v13574_v51 = vmul.f32 %v22868_v40, %v22868_v40 }
 0xc72   : > { %v22890_v50 = vsub.f32 %v23428_v25, %v13534_v37  ;;  %v22893_v11 = vsub.f32 %v23429_v8, %v13534_v37  ;;  %v22896_v13 = vsub.f32 %v22727_v48, %v13534_v37  ;;  %13594 = vadd.xlane.f32.xlu0 %v13593_v5  ;;  %13590 = vadd.xlane.f32.xlu1 %v13589_v21 }
 0xc73   : > { %v22899_v14 = vsub.f32 %v23430_v20, %v13535_v36  ;;  %v22902_v61 = vsub.f32 %v23431_v60, %v13535_v36  ;;  %v22905_v38 = vsub.f32 %v22737_v9, %v13535_v36  ;;  %v13597_v10 = vadd.f32 %v13596_v16, %v13571_v18  ;;  %v13494_v18 = vld [vmem:[%s23432_s0] sm:$0x7] }
 0xc74   : > { %v13600_v25 = vadd.f32 %v13573_v58, %v13572_v4  ;;  %v13575_v8 = vmul.f32 %v22871_v1, %v22871_v1  ;;  %v13576_v48 = vmul.f32 %v22874_v15, %v22874_v15  ;;  %v13577_v20 = vmul.f32 %v22877_v19, %v22877_v19  ;;  %v13495_v58 = vld [vmem:[#allocation14] sm:$0x7] }
 0xc75   : > { %v13578_v60 = vmul.f32 %v22890_v50, %v22890_v50  ;;  %v13579_v9 = vmul.f32 %v22893_v11, %v22893_v11  ;;  %v13580_v22 = vmul.f32 %v22896_v13, %v22896_v13  ;;  %v13581_v39 = vmul.f32 %v22899_v14, %v22899_v14 }
 0xc76   : > { %v13601_v41 = vadd.f32 %v13600_v25, %v13574_v51  ;;  %v13604_v32 = vadd.f32 %v13576_v48, %v13575_v8  ;;  %v13582_v28 = vmul.f32 %v22902_v61, %v22902_v61  ;;  %13598 = vadd.xlane.f32.xlu1 %v13597_v10  ;;  %v13583_v46 = vmul.f32 %v22905_v38, %v22905_v38  ;;  %v23433_v10 = vld [vmem:[#allocation26_spill] sm:$0xff] }
 0xc77   : > { %v13608_v26 = vadd.f32 %v13579_v9, %v13578_v60  ;;  %v22929_v25 = vrot.slane %v13494_v18, %v23433_v10  ;;  %v23435_v9 = vld [vmem:[#allocation25_spill] sm:$0xff] }
 0xc78   : > { %13602 = vadd.xlane.f32.xlu0 %v13601_v41  ;;  %v13605_v62 = vadd.f32 %v13604_v32, %v13577_v20  ;;  %v13612_v49 = vadd.f32 %v13582_v28, %v13581_v39  ;;  %v23434_v20 = vld [vmem:[#allocation24_spill] sm:$0xff]  ;;  %v22938_v32 = vrot.slane %v13495_v58, %v23433_v10 }
 0xc79   : > { %v13609_v57 = vadd.f32 %v13608_v26, %v13580_v22  ;;  %v22932_v60 = vrot.slane %v13494_v18, %v23434_v20  ;;  %v22935_v22 = vrot.slane %v13494_v18, %v23435_v9  ;;  %v22941_v28 = vrot.slane %v13495_v58, %v23434_v20 }
 0xc7a   : > { %13606 = vadd.xlane.f32.xlu1 %v13605_v62  ;;  %v13613_v53 = vadd.f32 %v13612_v49, %v13583_v46  ;;  %v22944_v26 = vrot.slane %v13495_v58, %v23435_v9 }
 0xc7c   : > { %13610 = vadd.xlane.f32.xlu0 %v13609_v57 }
 0xc7e   : > { %13614 = vadd.xlane.f32.xlu1 %v13613_v53 }
 0xcf7   : > { %v13587_v17 = vpop.xlane.xlu0 %13586 }
 0xcf8   : > { %v13616_v47 = vmul.f32 0.0026041667, %v13587_v17 }
 0xcfa   : > { %v13624_v55 = vadd.f32 1e-05, %v13616_v47 }
 0xcfb   : > { %v13591_v43 = vpop.xlane.xlu1 %13590  ;;  %v13595_v27 = vpop.xlane.xlu0 %13594 }
 0xcfc   : > { %17473 = vrsqrt.f32 %v13624_v55  ;;  %v13617_v54 = vmul.f32 0.0026041667, %v13591_v43  ;;  %v13618_v3 = vmul.f32 0.0026041667, %v13595_v27 }
 0xcfe   : > { %v13625_v5 = vadd.f32 1e-05, %v13617_v54  ;;  %v13626_v34 = vadd.f32 1e-05, %v13618_v3 }
 0xcff   : > { %v13599_v45 = vpop.xlane.xlu1 %13598 }
 0xd00   : > { %17475 = vrsqrt.f32 %v13625_v5  ;;  %v13619_v23 = vmul.f32 0.0026041667, %v13599_v45 }
 0xd01   : > { %v13603_v56 = vpop.xlane.xlu0 %13602  ;;  %17477 = vrsqrt.f32 %v13626_v34 }
 0xd02   : > { %v13620_v29 = vmul.f32 0.0026041667, %v13603_v56  ;;  %v13627_v35 = vadd.f32 1e-05, %v13619_v23 }
 0xd03   : > { %v13607_v36 = vpop.xlane.xlu1 %13606 }
 0xd04   : > { %v13628_v37 = vadd.f32 1e-05, %v13620_v29  ;;  %17479 = vrsqrt.f32 %v13627_v35  ;;  %v13621_v4 = vmul.f32 0.0026041667, %v13607_v36 }
 0xd05   : > { %v13611_v21 = vpop.xlane.xlu0 %13610 }
 0xd06   : > { %17481 = vrsqrt.f32 %v13628_v37  ;;  %v13622_v16 = vmul.f32 0.0026041667, %v13611_v21  ;;  %v13629_v51 = vadd.f32 1e-05, %v13621_v4 }
 0xd07   : > { %v13615_v48 = vpop.xlane.xlu1 %13614 }
 0xd08   : > { %v13630_v8 = vadd.f32 1e-05, %v13622_v16  ;;  %17483 = vrsqrt.f32 %v13629_v51  ;;  %v13623_v39 = vmul.f32 0.0026041667, %v13615_v48 }
 0xd09   : > { %v17474_v41 = vpop.eup %17473 }
 0xd0a   : > { %17485 = vrsqrt.f32 %v13630_v8  ;;  %v13640_v62 = vmul.f32 %v17474_v41, %v22806_v0  ;;  %v13641_v57 = vmul.f32 %v17474_v41, %v22809_v6  ;;  %v13642_v46 = vmul.f32 %v17474_v41, %v22812_v30 }
 0xd0b   : > { %v13631_v49 = vadd.f32 1e-05, %v13623_v39 }
 0xd0c   : > { %v13680_v53 = vmul.f32 %v22929_v25, %v13640_v62  ;;  %v13681_v17 = vmul.f32 %v22932_v60, %v13641_v57  ;;  %v13682_v47 = vmul.f32 %v22935_v22, %v13642_v46 }
 0xd0d   : > { %17487 = vrsqrt.f32 %v13631_v49  ;;  %v17476_v55 = vpop.eup %17475 }
 0xd0e   : > { %v17478_v43 = vpop.eup %17477  ;;  %v13720_v27 = vadd.f32 %v22938_v32, %v13680_v53  ;;  %v13721_v54 = vadd.f32 %v22941_v28, %v13681_v17  ;;  %v13722_v0 = vadd.f32 %v22944_v26, %v13682_v47  ;;  %v13643_v6 = vmul.f32 %v17476_v55, %v22836_v44 }
 0xd0f   : > { %v13644_v30 = vmul.f32 %v17476_v55, %v22839_v31  ;;  %v13645_v3 = vmul.f32 %v17476_v55, %v22842_v7  ;;  %v13646_v5 = vmul.f32 %v17478_v43, %v22815_v33  ;;  %v13647_v34 = vmul.f32 %v17478_v43, %v22818_v42 }
 0xd10   : > { %13744 = vst [vmem:[%s23436_s22] sm:$0xff] %v13720_v27  ;;  %13745 = vst [vmem:[%s23436_s22 + $0x8] sm:$0xff] %v13721_v54  ;;  %v13683_v44 = vmul.f32 %v22929_v25, %v13643_v6  ;;  %v13648_v31 = vmul.f32 %v17478_v43, %v22821_v12 }
 0xd11   : > { %13746 = vst [vmem:[%s23436_s22 + $0x10] sm:$0xff] %v13722_v0  ;;  %v17480_v7 = vpop.eup %17479  ;;  %v13684_v33 = vmul.f32 %v22932_v60, %v13644_v30  ;;  %v13685_v42 = vmul.f32 %v22935_v22, %v13645_v3  ;;  %v13686_v45 = vmul.f32 %v22929_v25, %v13646_v5  ;;  %v13687_v23 = vmul.f32 %v22932_v60, %v13647_v34 }
 0xd12   : > { %v13723_v29 = vadd.f32 %v22938_v32, %v13683_v44  ;;  %v13688_v35 = vmul.f32 %v22935_v22, %v13648_v31  ;;  %v13649_v37 = vmul.f32 %v17480_v7, %v22845_v2  ;;  %v13650_v36 = vmul.f32 %v17480_v7, %v22848_v63 }
 0xd13   : > { %v17482_v56 = vpop.eup %17481  ;;  %v13724_v12 = vadd.f32 %v22941_v28, %v13684_v33  ;;  %v13725_v18 = vadd.f32 %v22944_v26, %v13685_v42  ;;  %v13726_v4 = vadd.f32 %v22938_v32, %v13686_v45  ;;  %v13727_v21 = vadd.f32 %v22941_v28, %v13687_v23 }
 0xd14   : > { %13747 = vst [vmem:[%s23436_s22 + $0x18] sm:$0xff] %v13723_v29  ;;  %v13728_v16 = vadd.f32 %v22944_v26, %v13688_v35  ;;  %v13651_v58 = vmul.f32 %v17480_v7, %v22851_v24  ;;  %v13689_v2 = vmul.f32 %v22929_v25, %v13649_v37  ;;  %v13690_v63 = vmul.f32 %v22932_v60, %v13650_v36 }
 0xd15   : > { %v17484_v51 = vpop.eup %17483  ;;  %13748 = vst [vmem:[%s23436_s22 + $0x20] sm:$0xff] %v13724_v12  ;;  %13749 = vst [vmem:[%s23436_s22 + $0x28] sm:$0xff] %v13725_v18  ;;  %v13652_v24 = vmul.f32 %v17482_v56, %v22862_v59  ;;  %v13653_v10 = vmul.f32 %v17482_v56, %v22865_v52  ;;  %v13654_v8 = vmul.f32 %v17482_v56, %v22868_v40 }
 0xd16   : > { %13750 = vst [vmem:[%s23436_s22 + $0x30] sm:$0xff] %v13726_v4  ;;  %13751 = vst [vmem:[%s23436_s22 + $0x38] sm:$0xff] %v13727_v21  ;;  %v13691_v20 = vmul.f32 %v22935_v22, %v13651_v58  ;;  %v13729_v9 = vadd.f32 %v22938_v32, %v13689_v2  ;;  %v13730_v39 = vadd.f32 %v22941_v28, %v13690_v63 }
 0xd17   : > { %v17486_v48 = vpop.eup %17485  ;;  %13752 = vst [vmem:[%s23436_s22 + $0x40] sm:$0xff] %v13728_v16  ;;  %v13655_v41 = vmul.f32 %v17484_v51, %v22871_v1  ;;  %v13692_v62 = vmul.f32 %v22929_v25, %v13652_v24  ;;  %v13693_v59 = vmul.f32 %v22932_v60, %v13653_v10  ;;  %v13694_v52 = vmul.f32 %v22935_v22, %v13654_v8 }
 0xd18   : > { %v13656_v40 = vmul.f32 %v17484_v51, %v22874_v15  ;;  %v13731_v57 = vadd.f32 %v22944_v26, %v13691_v20  ;;  %13753 = vst [vmem:[%s23436_s22 + $0x48] sm:$0xff] %v13729_v9  ;;  %13754 = vst [vmem:[%s23436_s22 + $0x50] sm:$0xff] %v13730_v39  ;;  %v13657_v1 = vmul.f32 %v17484_v51, %v22877_v19 }
 0xd19   : > { %v13695_v46 = vmul.f32 %v22929_v25, %v13655_v41  ;;  %v13658_v49 = vmul.f32 %v17486_v48, %v22890_v50  ;;  %v13732_v17 = vadd.f32 %v22938_v32, %v13692_v62  ;;  %v13733_v15 = vadd.f32 %v22941_v28, %v13693_v59 }
 0xd1a   : > { %v17488_v53 = vpop.eup %17487  ;;  %v13734_v47 = vadd.f32 %v22944_v26, %v13694_v52  ;;  %v13696_v55 = vmul.f32 %v22932_v60, %v13656_v40  ;;  %13755 = vst [vmem:[%s23436_s22 + $0x58] sm:$0xff] %v13731_v57  ;;  %v13697_v43 = vmul.f32 %v22935_v22, %v13657_v1  ;;  %v13659_v27 = vmul.f32 %v17486_v48, %v22893_v11 }
 0xd1b   : > { %v13735_v19 = vadd.f32 %v22938_v32, %v13695_v46  ;;  %v13660_v50 = vmul.f32 %v17486_v48, %v22896_v13  ;;  %13756 = vst [vmem:[%s23436_s22 + $0x60] sm:$0xff] %v13732_v17  ;;  %13757 = vst [vmem:[%s23436_s22 + $0x68] sm:$0xff] %v13733_v15  ;;  %v13698_v0 = vmul.f32 %v22929_v25, %v13658_v49 }
 0xd1c   : > { %13758 = vst [vmem:[%s23436_s22 + $0x70] sm:$0xff] %v13734_v47  ;;  %v13736_v54 = vadd.f32 %v22941_v28, %v13696_v55  ;;  %v13661_v11 = vmul.f32 %v17488_v53, %v22899_v14  ;;  %v13662_v13 = vmul.f32 %v17488_v53, %v22902_v61  ;;  %v13737_v6 = vadd.f32 %v22944_v26, %v13697_v43 }
 0xd1d   : > { %13759 = vst [vmem:[%s23436_s22 + $0x78] sm:$0xff] %v13735_v19  ;;  %v13699_v30 = vmul.f32 %v22932_v60, %v13659_v27  ;;  %v13700_v3 = vmul.f32 %v22935_v22, %v13660_v50  ;;  %v13663_v5 = vmul.f32 %v17488_v53, %v22905_v38  ;;  %v13738_v14 = vadd.f32 %v22938_v32, %v13698_v0 }
 0xd1e   : > { %13760 = vst [vmem:[%s23436_s22 + $0x80] sm:$0xff] %v13736_v54  ;;  %v13701_v61 = vmul.f32 %v22929_v25, %v13661_v11  ;;  %v13702_v34 = vmul.f32 %v22932_v60, %v13662_v13  ;;  %13761 = vst [vmem:[%s23436_s22 + $0x88] sm:$0xff] %v13737_v6 }
 0xd1f   : > { %v13739_v44 = vadd.f32 %v22941_v28, %v13699_v30  ;;  %v13740_v31 = vadd.f32 %v22944_v26, %v13700_v3  ;;  %v13703_v38 = vmul.f32 %v22935_v22, %v13663_v5  ;;  %13762 = vst [vmem:[%s23436_s22 + $0x90] sm:$0xff] %v13738_v14 }
 0xd20   : > { %v13741_v7 = vadd.f32 %v22938_v32, %v13701_v61  ;;  %v13742_v25 = vadd.f32 %v22941_v28, %v13702_v34 }
 0xd21   : > { %13763 = vst [vmem:[%s23436_s22 + $0x98] sm:$0xff] %v13739_v44  ;;  %13764 = vst [vmem:[%s23436_s22 + $0xa0] sm:$0xff] %v13740_v31  ;;  %v13743_v60 = vadd.f32 %v22944_v26, %v13703_v38 }
 0xd22   : > { %13765 = vst [vmem:[%s23436_s22 + $0xa8] sm:$0xff] %v13741_v7  ;;  %13766 = vst [vmem:[%s23436_s22 + $0xb0] sm:$0xff] %v13742_v25 }
 0xd23   : > { %13767 = vst [vmem:[%s23436_s22 + $0xb8] sm:$0xff] %v13743_v60 }
 0xd24 PF: > { %s23437_s27 = sld [smem:[#allocation22_spill]]  ;;  %s23440_s24 = smov %s17753_s25 }
 0xd25   : > { %s23438_s4 = sld [smem:[#allocation21_spill]] }
 0xd26   : > { %s23439_s26 = sld [smem:[#allocation23_spill]] }
 0xd2a   : > { %p37_p8 = scmp.ge.s32.totalorder %s23437_s27, 4  }
 0xd2b   : > { %s23441_s25 = smov %s23438_s4 }
 0xd2c   :  { %39 = sbr.rel (!%p37_p8) target bundleno = 22 (0x16), region = 227 }
 0xd31   :  { %13779 = vsyncpa [#allocation4], 1 }
 0xd32   :  { %13781 = vsyncpa [#allocation4 + $0x1], 1 }
 0xd33   :  { %13782 = vsyncpa [#allocation6], 1 }
 0xd34   :  { %13784 = vsyncpa [#allocation6 + $0x1], 1 }
 0xd35   :  { %13785 = vsyncpa [#allocation9], 1 }
 0xd36   :  { %13787 = vsyncpa [#allocation9 + $0x1], 1 }
 0xd37   :  { %13788 = vsyncpa [#allocation12], 1 }
 0xd38   :  { %13790 = vsyncpa [#allocation12 + $0x1], 1 }
 0xd39   :  { %13791 = vsyncpa [#allocation15], 1 }

</bundles_post_ra>
